<compile_context>
chip_gen: v5e
topology: v5e:2x2
jax: 0.10.0
libtpu: 0.0.40
codegen_flags: <defaults>
</compile_context>

<pallas_src>
import functools

import jax
import jax.numpy as jnp
from jax.experimental import pallas as pl
from jax.experimental.pallas import tpu as pltpu


# ------------------------------------------------------------------ fused layer kernel

def _fused_conv_kernel(*refs, n_phase, n_img, ohw, has_norm, relu, has_res, tanh, eps):
    """One conv layer = one transposed GEMM + fused CBN / ReLU / residual / tanh.

    refs (in order):
      patches : [K, M]             bf16   M = n_img * ohw (lane-dense)
      weights : [n_phase*Cout, K]  bf16   (n_phase=4 for sub-pixel decomposed convT)
      gamma   : [Cout, n_img] f32, beta : [Cout, n_img] f32        (if has_norm)
      residual: [Cout, M] f32                                      (if has_res)
      out     : [n_phase, Cout, M] f32
    """
    p_ref, w_ref = refs[0], refs[1]
    idx = 2
    if has_norm:
        g_ref, b_ref = refs[idx], refs[idx + 1]
        idx += 2
    if has_res:
        r_ref = refs[idx]
        idx += 1
    o_ref = refs[idx]

    cout = w_ref.shape[0] // n_phase
    m = p_ref.shape[1]

    # One batched GEMM over the whole layer (all images, all kernel taps, all phases):
    # bf16 inputs, f32 accumulation on the MXU, output lane-dense [n_phase*Cout, M].
    acc = jnp.dot(w_ref[...], p_ref[...], preferred_element_type=jnp.float32)

    if has_norm:
        # Streamed batch-norm statistics straight off the in-register accumulator
        # (single pass: no scratch write + reload of the [*, M] slab).
        s = jnp.sum(acc, axis=1, keepdims=True)            # [n_phase*cout, 1]
        q = jnp.sum(acc * acc, axis=1, keepdims=True)
        s_c, q_c = s[0:cout], q[0:cout]
        for ph in range(1, n_phase):                       # pool sub-pixel phases (<=4)
            s_c = s_c + s[ph * cout:(ph + 1) * cout]
            q_c = q_c + q[ph * cout:(ph + 1) * cout]
        inv_cnt = 1.0 / float(n_phase * m)
        mu = s_c * inv_cnt                                 # [cout, 1]
        var = jnp.maximum(q_c * inv_cnt - mu * mu, 0.0)
        inv = jax.lax.rsqrt(var + eps)                     # [cout, 1]

        # Fold normalisation + per-sample (conditional) affine into one scale/shift.
        g_all = g_ref[...]                                 # [cout, n_img]
        b_all = b_ref[...]
        sc_n = inv * g_all                                 # [cout, n_img]
        sh_n = b_all - mu * sc_n
        # Per-sample broadcast along the lane axis via iota-select (no HBM repeat).
        lane = jax.lax.broadcasted_iota(jnp.int32, (1, m), 1)
        scale = jnp.broadcast_to(sc_n[:, 0:1], (cout, m))
        shift = jnp.broadcast_to(sh_n[:, 0:1], (cout, m))
        for n in range(1, n_img):                          # tiny static loop (batch)
            sel = lane >= n * ohw
            scale = jnp.where(sel, sc_n[:, n:n + 1], scale)
            shift = jnp.where(sel, sh_n[:, n:n + 1], shift)

        for ph in range(n_phase):                          # <=4 aligned sublane slices
            yb = acc[ph * cout:(ph + 1) * cout, :] * scale + shift
            if relu:
                yb = jnp.maximum(yb, 0.0)
            if has_res:
                yb = yb + r_ref[...]
            o_ref[ph] = yb.astype(o_ref.dtype)             # single store per output block
    else:
        yb = acc
        if relu:
            yb = jnp.maximum(yb, 0.0)
        if has_res:
            yb = yb + r_ref[...]
        if tanh:
            yb = jnp.tanh(yb)
        o_ref[0] = yb.astype(o_ref.dtype)


def _fused_layer(patches, w2d, *, n_phase, n_img, ohw, gamma=None, beta=None,
                 relu=False, residual=None, tanh=False):
    m = patches.shape[1]
    cout = w2d.shape[0] // n_phase
    has_norm = gamma is not None
    has_res = residual is not None

    inputs = [patches, w2d]
    if has_norm:
        inputs += [gamma.astype(jnp.float32), beta.astype(jnp.float32)]
    if has_res:
        inputs.append(residual.astype(jnp.float32))

    kern = functools.partial(
        _fused_conv_kernel, n_phase=n_phase, n_img=n_img, ohw=ohw,
        has_norm=has_norm, relu=relu, has_res=has_res, tanh=tanh, eps=1e-5)

    # Whole layer is VMEM-resident at these sizes (<1 MiB); see TODO(synk) for M-tiling.
    return pl.pallas_call(
        kern,
        out_shape=jax.ShapeDtypeStruct((n_phase, cout, m), jnp.float32),
        compiler_params=pltpu.CompilerParams(vmem_limit_bytes=32 * 1024 * 1024),
    )(*inputs)


# --------------------------------------------------------- per-layer XLA glue (patches)

def _conv_patches(a, k, stride, padding, reflect):
    """Transposed im2col: a [Cin, N, H, W] f32 -> patches [Cin*k*k, N*OH*OW] bf16."""
    if padding:
        mode = "reflect" if reflect else "constant"
        a = jnp.pad(a, ((0, 0), (0, 0), (padding, padding), (padding, padding)), mode=mode)
    cin, n, hp, wp = a.shape
    oh = (hp - k) // stride + 1
    ow = (wp - k) // stride + 1
    cols = []
    for di in range(k):
        for dj in range(k):
            cols.append(a[:, :, di:di + (oh - 1) * stride + 1:stride,
                          dj:dj + (ow - 1) * stride + 1:stride])
    p = jnp.stack(cols, axis=1).reshape(cin * k * k, n * oh * ow)
    return p.astype(jnp.bfloat16), oh, ow


def _convT_patches(a, padding):
    """2x2 sub-pixel taps for a 3x3 / stride-2 transposed conv.
    a [Cin, N, H, W] -> patches [Cin*4, N*OH2*OW2] bf16 (OH2 = OH/2)."""
    cin, n, h, w = a.shape
    shift = (padding - 1) // 2
    oh2, ow2 = h + 1 - padding, w + 1 - padding
    ap = jnp.pad(a, ((0, 0), (0, 0), (0, 1), (0, 1)))      # bottom/right zero pad
    cols = []
    for da in range(2):
        for db in range(2):
            cols.append(ap[:, :, shift + da:shift + da + oh2,
                           shift + db:shift + db + ow2])
    p = jnp.stack(cols, axis=1).reshape(cin * 4, n * oh2 * ow2)
    return p.astype(jnp.bfloat16), oh2, ow2


# ------------------------------------------------------------------------ layer wrappers

def _cbn_affine(embed_table, y):
    """utils.ConditionalBatchNorm2d affine params for labels y -> gamma/beta [C, N]."""
    emb = embed_table[y]                                   # [N, 2C]
    c = emb.shape[1] // 2
    return emb[:, :c].T, emb[:, c:].T


def _conv_layer(a, w2d, *, k, stride=1, padding=0, reflect=False,
                gamma=None, beta=None, relu=False, residual=None, tanh=False,
                out_channels=None):
    n_img = a.shape[1]
    patches, oh, ow = _conv_patches(a, k, stride, padding, reflect)
    res2d = None
    if residual is not None:
        res2d = residual.reshape(residual.shape[0], -1)
    out = _fused_layer(patches, w2d, n_phase=1, n_img=n_img, ohw=oh * ow,
                       gamma=gamma, beta=beta, relu=relu, residual=res2d, tanh=tanh)
    cout = w2d.shape[0]
    out = out.reshape(cout, n_img, oh, ow)
    if out_channels is not None and out_channels != cout:
        out = out[:out_channels]                           # drop zero-padded weight rows
    return out


def _convT_layer(a, w2d, *, padding, gamma, beta, relu):
    n_img = a.shape[1]
    patches, oh2, ow2 = _convT_patches(a, padding)
    out = _fused_layer(patches, w2d, n_phase=4, n_img=n_img, ohw=oh2 * ow2,
                       gamma=gamma, beta=beta, relu=relu)
    cout = w2d.shape[0] // 4
    # interleave the 4 sub-pixel phases: [4, C, N*OH2*OW2] -> [C, N, 2*OH2, 2*OW2]
    out = out.reshape(2, 2, cout, n_img, oh2, ow2)
    out = jnp.transpose(out, (2, 3, 4, 0, 5, 1)).reshape(cout, n_img, 2 * oh2, 2 * ow2)
    return out


# --------------------------------------------------------------------- model forward

def generator_forward(params, x_nchw, y, out_channels=1):
    # channel-major (lane-dense) activation layout [C, N, H, W], f32 between layers
    a = jnp.transpose(x_nchw, (1, 0, 2, 3)).astype(jnp.float32)

    g, b = _cbn_affine(params["norm1"], y)
    h = _conv_layer(a, params["c1"], k=7, padding=3, reflect=True,
                    gamma=g, beta=b, relu=True)

    g, b = _cbn_affine(params["downnorm1"], y)
    h = _conv_layer(h, params["down1"], k=3, stride=2, padding=3,
                    gamma=g, beta=b, relu=False)           # torch relu goes to dead name
    g, b = _cbn_affine(params["downnorm2"], y)
    h = _conv_layer(h, params["down2"], k=3, stride=2, padding=1,
                    gamma=g, beta=b, relu=False)           # torch relu goes to dead name
    g, b = _cbn_affine(params["downnorm3"], y)
    h = _conv_layer(h, params["down3"], k=3, stride=2, padding=1,
                    gamma=g, beta=b, relu=True)            # relu'd tensor feeds res blocks

    # torch forward overwrites x_ with res1..res4(x); only res4(x) reaches the output.
    g1, b1 = _cbn_affine(params["res4_norm1"], y)
    r = _conv_layer(h, params["res4_c1"], k=3, padding=1, reflect=True,
                    gamma=g1, beta=b1, relu=True)
    g2, b2 = _cbn_affine(params["res4_norm2"], y)
    h = _conv_layer(r, params["res4_c2"], k=3, padding=1, reflect=True,
                    gamma=g2, beta=b2, relu=False, residual=h)   # skip add fused in-kernel

    g, b = _cbn_affine(params["upnorm1"], y)
    h = _convT_layer(h, params["up1"], padding=1, gamma=g, beta=b, relu=True)
    g, b = _cbn_affine(params["upnorm2"], y)
    h = _convT_layer(h, params["up2"], padding=1, gamma=g, beta=b, relu=False)  # dead X_
    g, b = _cbn_affine(params["upnorm3"], y)
    h = _convT_layer(h, params["up3"], padding=3, gamma=g, beta=b, relu=False)  # dead X_

    h = _conv_layer(h, params["c2"], k=7, padding=3, reflect=True, tanh=True,
                    out_channels=out_channels)
    return jnp.transpose(h, (1, 0, 2, 3))                  # back to NCHW


# ----------------------------------------------------------------------- parameters

def spectral_normalize(w, dim, key, n_iter=5):
    """Deterministic power-iteration spectral norm (setup-time glue, weights are synthetic)."""
    perm = (dim,) + tuple(i for i in range(w.ndim) if i != dim)
    wmat = jnp.transpose(w, perm).reshape(w.shape[dim], -1)
    u = jax.random.normal(key, (wmat.shape[0],), jnp.float32)
    u = u / (jnp.linalg.norm(u) + 1e-12)
    v = None
    for _ in range(n_iter):
        v = wmat.T @ u
        v = v / (jnp.linalg.norm(v) + 1e-12)
        u = wmat @ v
        u = u / (jnp.linalg.norm(u) + 1e-12)
    sigma = u @ (wmat @ v)
    return w / sigma


def pack_conv(w_oihw, pad_to=0):
    """[Cout, Cin, k, k] -> pre-packed GEMM weight [Cout, Cin*k*k] bf16 (init time)."""
    cout = w_oihw.shape[0]
    w = w_oihw.reshape(cout, -1)
    if pad_to > cout:
        w = jnp.pad(w, ((0, pad_to - cout), (0, 0)))       # zero rows, sliced off after
    return w.astype(jnp.bfloat16)


def pack_convT(w_iohw):
    """ConvTranspose2d weight [Cin, Cout, 3, 3] -> sub-pixel phase GEMM weight
    [4*Cout, 4*Cin] bf16; phase ph=2r+s uses only its legal taps (others are zero)."""
    cin, cout, kh, kw = w_iohw.shape
    assert kh == 3 and kw == 3
    # equivalent direct-conv weight: spatial flip + in/out channel swap
    wc = jnp.transpose(w_iohw[:, :, ::-1, ::-1], (1, 0, 2, 3))   # [Cout, Cin, 3, 3]

    def taps(r):
        # phase parity 0 -> centre tap only; parity 1 -> the two outer taps
        return [(0, 1)] if r == 0 else [(0, 0), (1, 2)]

    blocks = []
    for r in range(2):
        for s in range(2):
            pw = jnp.zeros((cout, cin, 2, 2), jnp.float32)
            for da, ka in taps(r):
                for db, kb in taps(s):
                    pw = pw.at[:, :, da, db].set(wc[:, :, ka, kb])
            blocks.append(pw.reshape(cout, cin * 4))
    return jnp.concatenate(blocks, axis=0).astype(jnp.bfloat16)


def init_params(key, in_channels=1, conv_dim=8, num_classes=10):
    d = conv_dim
    keys = iter(jax.random.split(key, 64))

    def conv_w(cout, cin, k):
        return 0.02 * jax.random.normal(next(keys), (cout, cin, k, k), jnp.float32)

    def convT_w(cin, cout, k):
        return 0.02 * jax.random.normal(next(keys), (cin, cout, k, k), jnp.float32)

    def embed_w(c):  # ConditionalBatchNorm2d embedding: gamma ~ N(1, .02), beta = 0
        g = 1.0 + 0.02 * jax.random.normal(next(keys), (num_classes, c), jnp.float32)
        b = jnp.zeros((num_classes, c), jnp.float32)
        return jnp.concatenate([g, b], axis=1)

    def sn(w, dim):
        return spectral_normalize(w, dim, next(keys))

    p = {}
    p["c1"] = pack_conv(sn(conv_w(d, in_channels, 7), 0))
    p["norm1"] = embed_w(d)
    p["down1"] = pack_conv(sn(conv_w(2 * d, d, 3), 0));     p["downnorm1"] = embed_w(2 * d)
    p["down2"] = pack_conv(sn(conv_w(4 * d, 2 * d, 3), 0)); p["downnorm2"] = embed_w(4 * d)
    p["down3"] = pack_conv(sn(conv_w(8 * d, 4 * d, 3), 0)); p["downnorm3"] = embed_w(8 * d)
    for i in (1, 2, 3, 4):   # res1-3 params exist in the module but do not affect the output
        p[f"res{i}_c1"] = pack_conv(conv_w(8 * d, 8 * d, 3)); p[f"res{i}_norm1"] = embed_w(8 * d)
        p[f"res{i}_c2"] = pack_conv(conv_w(8 * d, 8 * d, 3)); p[f"res{i}_norm2"] = embed_w(8 * d)
    p["up1"] = pack_convT(sn(convT_w(8 * d, 4 * d, 3), 1)); p["upnorm1"] = embed_w(4 * d)
    p["up2"] = pack_convT(sn(convT_w(4 * d, 2 * d, 3), 1)); p["upnorm2"] = embed_w(2 * d)
    p["up3"] = pack_convT(sn(convT_w(2 * d, d, 3), 1));     p["upnorm3"] = embed_w(d)
    p["c2"] = pack_conv(sn(conv_w(in_channels, d, 7), 0), pad_to=8)
    return p


# ------------------------------------------------------------------------------- main

if __name__ == "__main__":
    key = jax.random.PRNGKey(0)
    pkey, xkey, ykey = jax.random.split(key, 3)

    # small MNIST-like config: batch=2, in_channels=1, 28x28, conv_dim=8, 10 classes
    params = init_params(pkey, in_channels=1, conv_dim=8, num_classes=10)
    x = jax.random.normal(xkey, (2, 1, 28, 28), jnp.float32)
    y = jax.random.randint(ykey, (2,), 0, 10)

    fwd = jax.jit(generator_forward)
    out = jax.block_until_ready(fwd(params, x, y))
    assert out.shape == (2, 1, 28, 28), out.shape
    assert bool(jnp.all(jnp.isfinite(out)))
    print("KERNEL_OK")
</pallas_src>

<mosaic_0001>
module attributes {stable_mosaic.version = 11 : i64} {
  func.func @_fused_conv_kernel(%arg0: memref<49x1568xbf16, #tpu.memory_space<vmem>>, %arg1: memref<8x49xbf16, #tpu.memory_space<vmem>>, %arg2: memref<8x2xf32, #tpu.memory_space<vmem>>, %arg3: memref<8x2xf32, #tpu.memory_space<vmem>>, %arg4: memref<1x8x1568xf32, #tpu.memory_space<vmem>>) attributes {dimension_semantics = [], scalar_prefetch = 0 : i64, scratch_operands = 0 : i64, tpu.core_type = #tpu.core_type<tc>} {
    %c0 = arith.constant 0 : index
    %c0_0 = arith.constant 0 : index
    %0 = vector.load %arg1[%c0, %c0_0] : memref<8x49xbf16, #tpu.memory_space<vmem>>, vector<8x49xbf16>
    %c0_1 = arith.constant 0 : index
    %c0_2 = arith.constant 0 : index
    %1 = vector.load %arg0[%c0_1, %c0_2] : memref<49x1568xbf16, #tpu.memory_space<vmem>>, vector<49x1568xbf16>
    %cst = arith.constant dense<0.000000e+00> : vector<8x1568xf32>
    %2 = tpu.matmul %0, %1, %cst {dimension_numbers = #tpu.dot_dimension_numbers<[1], [0], [0], [1], [0, 0, 1, 1], [], []>} : vector<8x49xbf16>, vector<49x1568xbf16>, vector<8x1568xf32> -> vector<8x1568xf32>
    %cst_3 = arith.constant dense<0.000000e+00> : vector<8xf32>
    %3 = vector.multi_reduction <add>, %2, %cst_3 [1] : vector<8x1568xf32> to vector<8xf32>
    %4 = vector.shape_cast %3 : vector<8xf32> to vector<8x1xf32>
    %5 = arith.mulf %2, %2 : vector<8x1568xf32>
    %cst_4 = arith.constant dense<0.000000e+00> : vector<8xf32>
    %6 = vector.multi_reduction <add>, %5, %cst_4 [1] : vector<8x1568xf32> to vector<8xf32>
    %7 = vector.shape_cast %6 : vector<8xf32> to vector<8x1xf32>
    %cst_5 = arith.constant 6.37755089E-4 : f32
    %8 = vector.broadcast %cst_5 : f32 to vector<8x1xf32>
    %9 = arith.mulf %4, %8 : vector<8x1xf32>
    %cst_6 = arith.constant 6.37755089E-4 : f32
    %10 = vector.broadcast %cst_6 : f32 to vector<8x1xf32>
    %11 = arith.mulf %7, %10 : vector<8x1xf32>
    %12 = arith.mulf %9, %9 : vector<8x1xf32>
    %13 = arith.subf %11, %12 : vector<8x1xf32>
    %cst_7 = arith.constant 0.000000e+00 : f32
    %14 = vector.broadcast %cst_7 : f32 to vector<8x1xf32>
    %15 = arith.maximumf %13, %14 : vector<8x1xf32>
    %cst_8 = arith.constant 9.99999974E-6 : f32
    %16 = vector.broadcast %cst_8 : f32 to vector<8x1xf32>
    %17 = arith.addf %15, %16 : vector<8x1xf32>
    %18 = math.rsqrt %17 : vector<8x1xf32>
    %c0_9 = arith.constant 0 : index
    %c0_10 = arith.constant 0 : index
    %19 = vector.load %arg2[%c0_9, %c0_10] : memref<8x2xf32, #tpu.memory_space<vmem>>, vector<8x2xf32>
    %c0_11 = arith.constant 0 : index
    %c0_12 = arith.constant 0 : index
    %20 = vector.load %arg3[%c0_11, %c0_12] : memref<8x2xf32, #tpu.memory_space<vmem>>, vector<8x2xf32>
    %21 = vector.broadcast %18 : vector<8x1xf32> to vector<8x2xf32>
    %22 = arith.mulf %21, %19 : vector<8x2xf32>
    %23 = vector.broadcast %9 : vector<8x1xf32> to vector<8x2xf32>
    %24 = arith.mulf %23, %22 : vector<8x2xf32>
    %25 = arith.subf %20, %24 : vector<8x2xf32>
    %26 = tpu.iota {dimensions = array<i32: 1>} : vector<1x1568xi32>
    %27 = vector.extract_strided_slice %22 {offsets = [0, 0], sizes = [8, 1], strides = [1, 1]} : vector<8x2xf32> to vector<8x1xf32>
    %28 = vector.shape_cast %27 : vector<8x1xf32> to vector<8x1xf32>
    %29 = vector.broadcast %28 : vector<8x1xf32> to vector<8x1568xf32>
    %30 = vector.extract_strided_slice %25 {offsets = [0, 0], sizes = [8, 1], strides = [1, 1]} : vector<8x2xf32> to vector<8x1xf32>
    %31 = vector.shape_cast %30 : vector<8x1xf32> to vector<8x1xf32>
    %32 = vector.broadcast %31 : vector<8x1xf32> to vector<8x1568xf32>
    %c784_i32 = arith.constant 784 : i32
    %33 = vector.broadcast %c784_i32 : i32 to vector<1x1568xi32>
    %34 = arith.cmpi sge, %26, %33 : vector<1x1568xi32>
    %35 = vector.extract_strided_slice %22 {offsets = [0, 1], sizes = [8, 1], strides = [1, 1]} : vector<8x2xf32> to vector<8x1xf32>
    %36 = vector.shape_cast %34 : vector<1x1568xi1> to vector<1x1568xi1>
    %37 = vector.broadcast %36 : vector<1x1568xi1> to vector<8x1568xi1>
    %38 = vector.shape_cast %35 : vector<8x1xf32> to vector<8x1xf32>
    %39 = vector.broadcast %38 : vector<8x1xf32> to vector<8x1568xf32>
    %40 = arith.select %37, %39, %29 : vector<8x1568xi1>, vector<8x1568xf32>
    %41 = vector.extract_strided_slice %25 {offsets = [0, 1], sizes = [8, 1], strides = [1, 1]} : vector<8x2xf32> to vector<8x1xf32>
    %42 = vector.shape_cast %34 : vector<1x1568xi1> to vector<1x1568xi1>
    %43 = vector.broadcast %42 : vector<1x1568xi1> to vector<8x1568xi1>
    %44 = vector.shape_cast %41 : vector<8x1xf32> to vector<8x1xf32>
    %45 = vector.broadcast %44 : vector<8x1xf32> to vector<8x1568xf32>
    %46 = arith.select %43, %45, %32 : vector<8x1568xi1>, vector<8x1568xf32>
    %47 = arith.mulf %2, %40 : vector<8x1568xf32>
    %48 = arith.addf %47, %46 : vector<8x1568xf32>
    %cst_13 = arith.constant 0.000000e+00 : f32
    %49 = vector.broadcast %cst_13 : f32 to vector<8x1568xf32>
    %50 = arith.maximumf %48, %49 : vector<8x1568xf32>
    %c0_14 = arith.constant 0 : index
    %c0_15 = arith.constant 0 : index
    %c0_16 = arith.constant 0 : index
    %51 = vector.load %arg4[%c0_14, %c0_15, %c0_16] : memref<1x8x1568xf32, #tpu.memory_space<vmem>>, vector<1x8x1568xf32>
    %52 = vector.shape_cast %51 : vector<1x8x1568xf32> to vector<8x1568xf32>
    %53 = vector.shape_cast %50 : vector<8x1568xf32> to vector<1x8x1568xf32>
    tpu.vector_store %arg4[%c0_14, %c0_15, %c0_16], %53 {strides = array<i32>} : memref<1x8x1568xf32, #tpu.memory_space<vmem>>, vector<1x8x1568xf32>,
    return
  }
}

module attributes {stable_mosaic.version = 11 : i64} {
  func.func @_fused_conv_kernel(%arg0: memref<72x512xbf16, #tpu.memory_space<vmem>>, %arg1: memref<16x72xbf16, #tpu.memory_space<vmem>>, %arg2: memref<16x2xf32, #tpu.memory_space<vmem>>, %arg3: memref<16x2xf32, #tpu.memory_space<vmem>>, %arg4: memref<1x16x512xf32, #tpu.memory_space<vmem>>) attributes {dimension_semantics = [], scalar_prefetch = 0 : i64, scratch_operands = 0 : i64, tpu.core_type = #tpu.core_type<tc>} {
    %c0 = arith.constant 0 : index
    %c0_0 = arith.constant 0 : index
    %0 = vector.load %arg1[%c0, %c0_0] : memref<16x72xbf16, #tpu.memory_space<vmem>>, vector<16x72xbf16>
    %c0_1 = arith.constant 0 : index
    %c0_2 = arith.constant 0 : index
    %1 = vector.load %arg0[%c0_1, %c0_2] : memref<72x512xbf16, #tpu.memory_space<vmem>>, vector<72x512xbf16>
    %cst = arith.constant dense<0.000000e+00> : vector<16x512xf32>
    %2 = tpu.matmul %0, %1, %cst {dimension_numbers = #tpu.dot_dimension_numbers<[1], [0], [0], [1], [0, 0, 1, 1], [], []>} : vector<16x72xbf16>, vector<72x512xbf16>, vector<16x512xf32> -> vector<16x512xf32>
    %cst_3 = arith.constant dense<0.000000e+00> : vector<16xf32>
    %3 = vector.multi_reduction <add>, %2, %cst_3 [1] : vector<16x512xf32> to vector<16xf32>
    %4 = vector.shape_cast %3 : vector<16xf32> to vector<16x1xf32>
    %5 = arith.mulf %2, %2 : vector<16x512xf32>
    %cst_4 = arith.constant dense<0.000000e+00> : vector<16xf32>
    %6 = vector.multi_reduction <add>, %5, %cst_4 [1] : vector<16x512xf32> to vector<16xf32>
    %7 = vector.shape_cast %6 : vector<16xf32> to vector<16x1xf32>
    %cst_5 = arith.constant 0.001953125 : f32
    %8 = vector.broadcast %cst_5 : f32 to vector<16x1xf32>
    %9 = arith.mulf %4, %8 : vector<16x1xf32>
    %cst_6 = arith.constant 0.001953125 : f32
    %10 = vector.broadcast %cst_6 : f32 to vector<16x1xf32>
    %11 = arith.mulf %7, %10 : vector<16x1xf32>
    %12 = arith.mulf %9, %9 : vector<16x1xf32>
    %13 = arith.subf %11, %12 : vector<16x1xf32>
    %cst_7 = arith.constant 0.000000e+00 : f32
    %14 = vector.broadcast %cst_7 : f32 to vector<16x1xf32>
    %15 = arith.maximumf %13, %14 : vector<16x1xf32>
    %cst_8 = arith.constant 9.99999974E-6 : f32
    %16 = vector.broadcast %cst_8 : f32 to vector<16x1xf32>
    %17 = arith.addf %15, %16 : vector<16x1xf32>
    %18 = math.rsqrt %17 : vector<16x1xf32>
    %c0_9 = arith.constant 0 : index
    %c0_10 = arith.constant 0 : index
    %19 = vector.load %arg2[%c0_9, %c0_10] : memref<16x2xf32, #tpu.memory_space<vmem>>, vector<16x2xf32>
    %c0_11 = arith.constant 0 : index
    %c0_12 = arith.constant 0 : index
    %20 = vector.load %arg3[%c0_11, %c0_12] : memref<16x2xf32, #tpu.memory_space<vmem>>, vector<16x2xf32>
    %21 = vector.broadcast %18 : vector<16x1xf32> to vector<16x2xf32>
    %22 = arith.mulf %21, %19 : vector<16x2xf32>
    %23 = vector.broadcast %9 : vector<16x1xf32> to vector<16x2xf32>
    %24 = arith.mulf %23, %22 : vector<16x2xf32>
    %25 = arith.subf %20, %24 : vector<16x2xf32>
    %26 = tpu.iota {dimensions = array<i32: 1>} : vector<1x512xi32>
    %27 = vector.extract_strided_slice %22 {offsets = [0, 0], sizes = [16, 1], strides = [1, 1]} : vector<16x2xf32> to vector<16x1xf32>
    %28 = vector.shape_cast %27 : vector<16x1xf32> to vector<16x1xf32>
    %29 = vector.broadcast %28 : vector<16x1xf32> to vector<16x512xf32>
    %30 = vector.extract_strided_slice %25 {offsets = [0, 0], sizes = [16, 1], strides = [1, 1]} : vector<16x2xf32> to vector<16x1xf32>
    %31 = vector.shape_cast %30 : vector<16x1xf32> to vector<16x1xf32>
    %32 = vector.broadcast %31 : vector<16x1xf32> to vector<16x512xf32>
    %c256_i32 = arith.constant 256 : i32
    %33 = vector.broadcast %c256_i32 : i32 to vector<1x512xi32>
    %34 = arith.cmpi sge, %26, %33 : vector<1x512xi32>
    %35 = vector.extract_strided_slice %22 {offsets = [0, 1], sizes = [16, 1], strides = [1, 1]} : vector<16x2xf32> to vector<16x1xf32>
    %36 = vector.shape_cast %34 : vector<1x512xi1> to vector<1x512xi1>
    %37 = vector.broadcast %36 : vector<1x512xi1> to vector<16x512xi1>
    %38 = vector.shape_cast %35 : vector<16x1xf32> to vector<16x1xf32>
    %39 = vector.broadcast %38 : vector<16x1xf32> to vector<16x512xf32>
    %40 = arith.select %37, %39, %29 : vector<16x512xi1>, vector<16x512xf32>
    %41 = vector.extract_strided_slice %25 {offsets = [0, 1], sizes = [16, 1], strides = [1, 1]} : vector<16x2xf32> to vector<16x1xf32>
    %42 = vector.shape_cast %34 : vector<1x512xi1> to vector<1x512xi1>
    %43 = vector.broadcast %42 : vector<1x512xi1> to vector<16x512xi1>
    %44 = vector.shape_cast %41 : vector<16x1xf32> to vector<16x1xf32>
    %45 = vector.broadcast %44 : vector<16x1xf32> to vector<16x512xf32>
    %46 = arith.select %43, %45, %32 : vector<16x512xi1>, vector<16x512xf32>
    %47 = arith.mulf %2, %40 : vector<16x512xf32>
    %48 = arith.addf %47, %46 : vector<16x512xf32>
    %c0_13 = arith.constant 0 : index
    %c0_14 = arith.constant 0 : index
    %c0_15 = arith.constant 0 : index
    %49 = vector.load %arg4[%c0_13, %c0_14, %c0_15] : memref<1x16x512xf32, #tpu.memory_space<vmem>>, vector<1x16x512xf32>
    %50 = vector.shape_cast %49 : vector<1x16x512xf32> to vector<16x512xf32>
    %51 = vector.shape_cast %48 : vector<16x512xf32> to vector<1x16x512xf32>
    tpu.vector_store %arg4[%c0_13, %c0_14, %c0_15], %51 {strides = array<i32>} : memref<1x16x512xf32, #tpu.memory_space<vmem>>, vector<1x16x512xf32>,
    return
  }
}

module attributes {stable_mosaic.version = 11 : i64} {
  func.func @_fused_conv_kernel(%arg0: memref<144x128xbf16, #tpu.memory_space<vmem>>, %arg1: memref<32x144xbf16, #tpu.memory_space<vmem>>, %arg2: memref<32x2xf32, #tpu.memory_space<vmem>>, %arg3: memref<32x2xf32, #tpu.memory_space<vmem>>, %arg4: memref<1x32x128xf32, #tpu.memory_space<vmem>>) attributes {dimension_semantics = [], scalar_prefetch = 0 : i64, scratch_operands = 0 : i64, tpu.core_type = #tpu.core_type<tc>} {
    %c0 = arith.constant 0 : index
    %c0_0 = arith.constant 0 : index
    %0 = vector.load %arg1[%c0, %c0_0] : memref<32x144xbf16, #tpu.memory_space<vmem>>, vector<32x144xbf16>
    %c0_1 = arith.constant 0 : index
    %c0_2 = arith.constant 0 : index
    %1 = vector.load %arg0[%c0_1, %c0_2] : memref<144x128xbf16, #tpu.memory_space<vmem>>, vector<144x128xbf16>
    %cst = arith.constant dense<0.000000e+00> : vector<32x128xf32>
    %2 = tpu.matmul %0, %1, %cst {dimension_numbers = #tpu.dot_dimension_numbers<[1], [0], [0], [1], [0, 0, 1, 1], [], []>} : vector<32x144xbf16>, vector<144x128xbf16>, vector<32x128xf32> -> vector<32x128xf32>
    %cst_3 = arith.constant dense<0.000000e+00> : vector<32xf32>
    %3 = vector.multi_reduction <add>, %2, %cst_3 [1] : vector<32x128xf32> to vector<32xf32>
    %4 = vector.shape_cast %3 : vector<32xf32> to vector<32x1xf32>
    %5 = arith.mulf %2, %2 : vector<32x128xf32>
    %cst_4 = arith.constant dense<0.000000e+00> : vector<32xf32>
    %6 = vector.multi_reduction <add>, %5, %cst_4 [1] : vector<32x128xf32> to vector<32xf32>
    %7 = vector.shape_cast %6 : vector<32xf32> to vector<32x1xf32>
    %cst_5 = arith.constant 7.812500e-03 : f32
    %8 = vector.broadcast %cst_5 : f32 to vector<32x1xf32>
    %9 = arith.mulf %4, %8 : vector<32x1xf32>
    %cst_6 = arith.constant 7.812500e-03 : f32
    %10 = vector.broadcast %cst_6 : f32 to vector<32x1xf32>
    %11 = arith.mulf %7, %10 : vector<32x1xf32>
    %12 = arith.mulf %9, %9 : vector<32x1xf32>
    %13 = arith.subf %11, %12 : vector<32x1xf32>
    %cst_7 = arith.constant 0.000000e+00 : f32
    %14 = vector.broadcast %cst_7 : f32 to vector<32x1xf32>
    %15 = arith.maximumf %13, %14 : vector<32x1xf32>
    %cst_8 = arith.constant 9.99999974E-6 : f32
    %16 = vector.broadcast %cst_8 : f32 to vector<32x1xf32>
    %17 = arith.addf %15, %16 : vector<32x1xf32>
    %18 = math.rsqrt %17 : vector<32x1xf32>
    %c0_9 = arith.constant 0 : index
    %c0_10 = arith.constant 0 : index
    %19 = vector.load %arg2[%c0_9, %c0_10] : memref<32x2xf32, #tpu.memory_space<vmem>>, vector<32x2xf32>
    %c0_11 = arith.constant 0 : index
    %c0_12 = arith.constant 0 : index
    %20 = vector.load %arg3[%c0_11, %c0_12] : memref<32x2xf32, #tpu.memory_space<vmem>>, vector<32x2xf32>
    %21 = vector.broadcast %18 : vector<32x1xf32> to vector<32x2xf32>
    %22 = arith.mulf %21, %19 : vector<32x2xf32>
    %23 = vector.broadcast %9 : vector<32x1xf32> to vector<32x2xf32>
    %24 = arith.mulf %23, %22 : vector<32x2xf32>
    %25 = arith.subf %20, %24 : vector<32x2xf32>
    %26 = tpu.iota {dimensions = array<i32: 1>} : vector<1x128xi32>
    %27 = vector.extract_strided_slice %22 {offsets = [0, 0], sizes = [32, 1], strides = [1, 1]} : vector<32x2xf32> to vector<32x1xf32>
    %28 = vector.shape_cast %27 : vector<32x1xf32> to vector<32x1xf32>
    %29 = vector.broadcast %28 : vector<32x1xf32> to vector<32x128xf32>
    %30 = vector.extract_strided_slice %25 {offsets = [0, 0], sizes = [32, 1], strides = [1, 1]} : vector<32x2xf32> to vector<32x1xf32>
    %31 = vector.shape_cast %30 : vector<32x1xf32> to vector<32x1xf32>
    %32 = vector.broadcast %31 : vector<32x1xf32> to vector<32x128xf32>
    %c64_i32 = arith.constant 64 : i32
    %33 = vector.broadcast %c64_i32 : i32 to vector<1x128xi32>
    %34 = arith.cmpi sge, %26, %33 : vector<1x128xi32>
    %35 = vector.extract_strided_slice %22 {offsets = [0, 1], sizes = [32, 1], strides = [1, 1]} : vector<32x2xf32> to vector<32x1xf32>
    %36 = vector.shape_cast %34 : vector<1x128xi1> to vector<1x128xi1>
    %37 = vector.broadcast %36 : vector<1x128xi1> to vector<32x128xi1>
    %38 = vector.shape_cast %35 : vector<32x1xf32> to vector<32x1xf32>
    %39 = vector.broadcast %38 : vector<32x1xf32> to vector<32x128xf32>
    %40 = arith.select %37, %39, %29 : vector<32x128xi1>, vector<32x128xf32>
    %41 = vector.extract_strided_slice %25 {offsets = [0, 1], sizes = [32, 1], strides = [1, 1]} : vector<32x2xf32> to vector<32x1xf32>
    %42 = vector.shape_cast %34 : vector<1x128xi1> to vector<1x128xi1>
    %43 = vector.broadcast %42 : vector<1x128xi1> to vector<32x128xi1>
    %44 = vector.shape_cast %41 : vector<32x1xf32> to vector<32x1xf32>
    %45 = vector.broadcast %44 : vector<32x1xf32> to vector<32x128xf32>
    %46 = arith.select %43, %45, %32 : vector<32x128xi1>, vector<32x128xf32>
    %47 = arith.mulf %2, %40 : vector<32x128xf32>
    %48 = arith.addf %47, %46 : vector<32x128xf32>
    %c0_13 = arith.constant 0 : index
    %c0_14 = arith.constant 0 : index
    %c0_15 = arith.constant 0 : index
    %49 = vector.load %arg4[%c0_13, %c0_14, %c0_15] : memref<1x32x128xf32, #tpu.memory_space<vmem>>, vector<1x32x128xf32>
    %50 = vector.shape_cast %49 : vector<1x32x128xf32> to vector<32x128xf32>
    %51 = vector.shape_cast %48 : vector<32x128xf32> to vector<1x32x128xf32>
    tpu.vector_store %arg4[%c0_13, %c0_14, %c0_15], %51 {strides = array<i32>} : memref<1x32x128xf32, #tpu.memory_space<vmem>>, vector<1x32x128xf32>,
    return
  }
}

module attributes {stable_mosaic.version = 11 : i64} {
  func.func @_fused_conv_kernel(%arg0: memref<288x32xbf16, #tpu.memory_space<vmem>>, %arg1: memref<64x288xbf16, #tpu.memory_space<vmem>>, %arg2: memref<64x2xf32, #tpu.memory_space<vmem>>, %arg3: memref<64x2xf32, #tpu.memory_space<vmem>>, %arg4: memref<1x64x32xf32, #tpu.memory_space<vmem>>) attributes {dimension_semantics = [], scalar_prefetch = 0 : i64, scratch_operands = 0 : i64, tpu.core_type = #tpu.core_type<tc>} {
    %c0 = arith.constant 0 : index
    %c0_0 = arith.constant 0 : index
    %0 = vector.load %arg1[%c0, %c0_0] : memref<64x288xbf16, #tpu.memory_space<vmem>>, vector<64x288xbf16>
    %c0_1 = arith.constant 0 : index
    %c0_2 = arith.constant 0 : index
    %1 = vector.load %arg0[%c0_1, %c0_2] : memref<288x32xbf16, #tpu.memory_space<vmem>>, vector<288x32xbf16>
    %cst = arith.constant dense<0.000000e+00> : vector<64x32xf32>
    %2 = tpu.matmul %0, %1, %cst {dimension_numbers = #tpu.dot_dimension_numbers<[1], [0], [0], [1], [0, 0, 1, 1], [], []>} : vector<64x288xbf16>, vector<288x32xbf16>, vector<64x32xf32> -> vector<64x32xf32>
    %cst_3 = arith.constant dense<0.000000e+00> : vector<64xf32>
    %3 = vector.multi_reduction <add>, %2, %cst_3 [1] : vector<64x32xf32> to vector<64xf32>
    %4 = vector.shape_cast %3 : vector<64xf32> to vector<64x1xf32>
    %5 = arith.mulf %2, %2 : vector<64x32xf32>
    %cst_4 = arith.constant dense<0.000000e+00> : vector<64xf32>
    %6 = vector.multi_reduction <add>, %5, %cst_4 [1] : vector<64x32xf32> to vector<64xf32>
    %7 = vector.shape_cast %6 : vector<64xf32> to vector<64x1xf32>
    %cst_5 = arith.constant 3.125000e-02 : f32
    %8 = vector.broadcast %cst_5 : f32 to vector<64x1xf32>
    %9 = arith.mulf %4, %8 : vector<64x1xf32>
    %cst_6 = arith.constant 3.125000e-02 : f32
    %10 = vector.broadcast %cst_6 : f32 to vector<64x1xf32>
    %11 = arith.mulf %7, %10 : vector<64x1xf32>
    %12 = arith.mulf %9, %9 : vector<64x1xf32>
    %13 = arith.subf %11, %12 : vector<64x1xf32>
    %cst_7 = arith.constant 0.000000e+00 : f32
    %14 = vector.broadcast %cst_7 : f32 to vector<64x1xf32>
    %15 = arith.maximumf %13, %14 : vector<64x1xf32>
    %cst_8 = arith.constant 9.99999974E-6 : f32
    %16 = vector.broadcast %cst_8 : f32 to vector<64x1xf32>
    %17 = arith.addf %15, %16 : vector<64x1xf32>
    %18 = math.rsqrt %17 : vector<64x1xf32>
    %c0_9 = arith.constant 0 : index
    %c0_10 = arith.constant 0 : index
    %19 = vector.load %arg2[%c0_9, %c0_10] : memref<64x2xf32, #tpu.memory_space<vmem>>, vector<64x2xf32>
    %c0_11 = arith.constant 0 : index
    %c0_12 = arith.constant 0 : index
    %20 = vector.load %arg3[%c0_11, %c0_12] : memref<64x2xf32, #tpu.memory_space<vmem>>, vector<64x2xf32>
    %21 = vector.broadcast %18 : vector<64x1xf32> to vector<64x2xf32>
    %22 = arith.mulf %21, %19 : vector<64x2xf32>
    %23 = vector.broadcast %9 : vector<64x1xf32> to vector<64x2xf32>
    %24 = arith.mulf %23, %22 : vector<64x2xf32>
    %25 = arith.subf %20, %24 : vector<64x2xf32>
    %26 = tpu.iota {dimensions = array<i32: 1>} : vector<1x32xi32>
    %27 = vector.extract_strided_slice %22 {offsets = [0, 0], sizes = [64, 1], strides = [1, 1]} : vector<64x2xf32> to vector<64x1xf32>
    %28 = vector.shape_cast %27 : vector<64x1xf32> to vector<64x1xf32>
    %29 = vector.broadcast %28 : vector<64x1xf32> to vector<64x32xf32>
    %30 = vector.extract_strided_slice %25 {offsets = [0, 0], sizes = [64, 1], strides = [1, 1]} : vector<64x2xf32> to vector<64x1xf32>
    %31 = vector.shape_cast %30 : vector<64x1xf32> to vector<64x1xf32>
    %32 = vector.broadcast %31 : vector<64x1xf32> to vector<64x32xf32>
    %c16_i32 = arith.constant 16 : i32
    %33 = vector.broadcast %c16_i32 : i32 to vector<1x32xi32>
    %34 = arith.cmpi sge, %26, %33 : vector<1x32xi32>
    %35 = vector.extract_strided_slice %22 {offsets = [0, 1], sizes = [64, 1], strides = [1, 1]} : vector<64x2xf32> to vector<64x1xf32>
    %36 = vector.shape_cast %34 : vector<1x32xi1> to vector<1x32xi1>
    %37 = vector.broadcast %36 : vector<1x32xi1> to vector<64x32xi1>
    %38 = vector.shape_cast %35 : vector<64x1xf32> to vector<64x1xf32>
    %39 = vector.broadcast %38 : vector<64x1xf32> to vector<64x32xf32>
    %40 = arith.select %37, %39, %29 : vector<64x32xi1>, vector<64x32xf32>
    %41 = vector.extract_strided_slice %25 {offsets = [0, 1], sizes = [64, 1], strides = [1, 1]} : vector<64x2xf32> to vector<64x1xf32>
    %42 = vector.shape_cast %34 : vector<1x32xi1> to vector<1x32xi1>
    %43 = vector.broadcast %42 : vector<1x32xi1> to vector<64x32xi1>
    %44 = vector.shape_cast %41 : vector<64x1xf32> to vector<64x1xf32>
    %45 = vector.broadcast %44 : vector<64x1xf32> to vector<64x32xf32>
    %46 = arith.select %43, %45, %32 : vector<64x32xi1>, vector<64x32xf32>
    %47 = arith.mulf %2, %40 : vector<64x32xf32>
    %48 = arith.addf %47, %46 : vector<64x32xf32>
    %cst_13 = arith.constant 0.000000e+00 : f32
    %49 = vector.broadcast %cst_13 : f32 to vector<64x32xf32>
    %50 = arith.maximumf %48, %49 : vector<64x32xf32>
    %c0_14 = arith.constant 0 : index
    %c0_15 = arith.constant 0 : index
    %c0_16 = arith.constant 0 : index
    %51 = vector.load %arg4[%c0_14, %c0_15, %c0_16] : memref<1x64x32xf32, #tpu.memory_space<vmem>>, vector<1x64x32xf32>
    %52 = vector.shape_cast %51 : vector<1x64x32xf32> to vector<64x32xf32>
    %53 = vector.shape_cast %50 : vector<64x32xf32> to vector<1x64x32xf32>
    tpu.vector_store %arg4[%c0_14, %c0_15, %c0_16], %53 {strides = array<i32>} : memref<1x64x32xf32, #tpu.memory_space<vmem>>, vector<1x64x32xf32>,
    return
  }
}

module attributes {stable_mosaic.version = 11 : i64} {
  func.func @_fused_conv_kernel(%arg0: memref<576x32xbf16, #tpu.memory_space<vmem>>, %arg1: memref<64x576xbf16, #tpu.memory_space<vmem>>, %arg2: memref<64x2xf32, #tpu.memory_space<vmem>>, %arg3: memref<64x2xf32, #tpu.memory_space<vmem>>, %arg4: memref<1x64x32xf32, #tpu.memory_space<vmem>>) attributes {dimension_semantics = [], scalar_prefetch = 0 : i64, scratch_operands = 0 : i64, tpu.core_type = #tpu.core_type<tc>} {
    %c0 = arith.constant 0 : index
    %c0_0 = arith.constant 0 : index
    %0 = vector.load %arg1[%c0, %c0_0] : memref<64x576xbf16, #tpu.memory_space<vmem>>, vector<64x576xbf16>
    %c0_1 = arith.constant 0 : index
    %c0_2 = arith.constant 0 : index
    %1 = vector.load %arg0[%c0_1, %c0_2] : memref<576x32xbf16, #tpu.memory_space<vmem>>, vector<576x32xbf16>
    %cst = arith.constant dense<0.000000e+00> : vector<64x32xf32>
    %2 = tpu.matmul %0, %1, %cst {dimension_numbers = #tpu.dot_dimension_numbers<[1], [0], [0], [1], [0, 0, 1, 1], [], []>} : vector<64x576xbf16>, vector<576x32xbf16>, vector<64x32xf32> -> vector<64x32xf32>
    %cst_3 = arith.constant dense<0.000000e+00> : vector<64xf32>
    %3 = vector.multi_reduction <add>, %2, %cst_3 [1] : vector<64x32xf32> to vector<64xf32>
    %4 = vector.shape_cast %3 : vector<64xf32> to vector<64x1xf32>
    %5 = arith.mulf %2, %2 : vector<64x32xf32>
    %cst_4 = arith.constant dense<0.000000e+00> : vector<64xf32>
    %6 = vector.multi_reduction <add>, %5, %cst_4 [1] : vector<64x32xf32> to vector<64xf32>
    %7 = vector.shape_cast %6 : vector<64xf32> to vector<64x1xf32>
    %cst_5 = arith.constant 3.125000e-02 : f32
    %8 = vector.broadcast %cst_5 : f32 to vector<64x1xf32>
    %9 = arith.mulf %4, %8 : vector<64x1xf32>
    %cst_6 = arith.constant 3.125000e-02 : f32
    %10 = vector.broadcast %cst_6 : f32 to vector<64x1xf32>
    %11 = arith.mulf %7, %10 : vector<64x1xf32>
    %12 = arith.mulf %9, %9 : vector<64x1xf32>
    %13 = arith.subf %11, %12 : vector<64x1xf32>
    %cst_7 = arith.constant 0.000000e+00 : f32
    %14 = vector.broadcast %cst_7 : f32 to vector<64x1xf32>
    %15 = arith.maximumf %13, %14 : vector<64x1xf32>
    %cst_8 = arith.constant 9.99999974E-6 : f32
    %16 = vector.broadcast %cst_8 : f32 to vector<64x1xf32>
    %17 = arith.addf %15, %16 : vector<64x1xf32>
    %18 = math.rsqrt %17 : vector<64x1xf32>
    %c0_9 = arith.constant 0 : index
    %c0_10 = arith.constant 0 : index
    %19 = vector.load %arg2[%c0_9, %c0_10] : memref<64x2xf32, #tpu.memory_space<vmem>>, vector<64x2xf32>
    %c0_11 = arith.constant 0 : index
    %c0_12 = arith.constant 0 : index
    %20 = vector.load %arg3[%c0_11, %c0_12] : memref<64x2xf32, #tpu.memory_space<vmem>>, vector<64x2xf32>
    %21 = vector.broadcast %18 : vector<64x1xf32> to vector<64x2xf32>
    %22 = arith.mulf %21, %19 : vector<64x2xf32>
    %23 = vector.broadcast %9 : vector<64x1xf32> to vector<64x2xf32>
    %24 = arith.mulf %23, %22 : vector<64x2xf32>
    %25 = arith.subf %20, %24 : vector<64x2xf32>
    %26 = tpu.iota {dimensions = array<i32: 1>} : vector<1x32xi32>
    %27 = vector.extract_strided_slice %22 {offsets = [0, 0], sizes = [64, 1], strides = [1, 1]} : vector<64x2xf32> to vector<64x1xf32>
    %28 = vector.shape_cast %27 : vector<64x1xf32> to vector<64x1xf32>
    %29 = vector.broadcast %28 : vector<64x1xf32> to vector<64x32xf32>
    %30 = vector.extract_strided_slice %25 {offsets = [0, 0], sizes = [64, 1], strides = [1, 1]} : vector<64x2xf32> to vector<64x1xf32>
    %31 = vector.shape_cast %30 : vector<64x1xf32> to vector<64x1xf32>
    %32 = vector.broadcast %31 : vector<64x1xf32> to vector<64x32xf32>
    %c16_i32 = arith.constant 16 : i32
    %33 = vector.broadcast %c16_i32 : i32 to vector<1x32xi32>
    %34 = arith.cmpi sge, %26, %33 : vector<1x32xi32>
    %35 = vector.extract_strided_slice %22 {offsets = [0, 1], sizes = [64, 1], strides = [1, 1]} : vector<64x2xf32> to vector<64x1xf32>
    %36 = vector.shape_cast %34 : vector<1x32xi1> to vector<1x32xi1>
    %37 = vector.broadcast %36 : vector<1x32xi1> to vector<64x32xi1>
    %38 = vector.shape_cast %35 : vector<64x1xf32> to vector<64x1xf32>
    %39 = vector.broadcast %38 : vector<64x1xf32> to vector<64x32xf32>
    %40 = arith.select %37, %39, %29 : vector<64x32xi1>, vector<64x32xf32>
    %41 = vector.extract_strided_slice %25 {offsets = [0, 1], sizes = [64, 1], strides = [1, 1]} : vector<64x2xf32> to vector<64x1xf32>
    %42 = vector.shape_cast %34 : vector<1x32xi1> to vector<1x32xi1>
    %43 = vector.broadcast %42 : vector<1x32xi1> to vector<64x32xi1>
    %44 = vector.shape_cast %41 : vector<64x1xf32> to vector<64x1xf32>
    %45 = vector.broadcast %44 : vector<64x1xf32> to vector<64x32xf32>
    %46 = arith.select %43, %45, %32 : vector<64x32xi1>, vector<64x32xf32>
    %47 = arith.mulf %2, %40 : vector<64x32xf32>
    %48 = arith.addf %47, %46 : vector<64x32xf32>
    %cst_13 = arith.constant 0.000000e+00 : f32
    %49 = vector.broadcast %cst_13 : f32 to vector<64x32xf32>
    %50 = arith.maximumf %48, %49 : vector<64x32xf32>
    %c0_14 = arith.constant 0 : index
    %c0_15 = arith.constant 0 : index
    %c0_16 = arith.constant 0 : index
    %51 = vector.load %arg4[%c0_14, %c0_15, %c0_16] : memref<1x64x32xf32, #tpu.memory_space<vmem>>, vector<1x64x32xf32>
    %52 = vector.shape_cast %51 : vector<1x64x32xf32> to vector<64x32xf32>
    %53 = vector.shape_cast %50 : vector<64x32xf32> to vector<1x64x32xf32>
    tpu.vector_store %arg4[%c0_14, %c0_15, %c0_16], %53 {strides = array<i32>} : memref<1x64x32xf32, #tpu.memory_space<vmem>>, vector<1x64x32xf32>,
    return
  }
}

module attributes {stable_mosaic.version = 11 : i64} {
  func.func @_fused_conv_kernel(%arg0: memref<576x32xbf16, #tpu.memory_space<vmem>>, %arg1: memref<64x576xbf16, #tpu.memory_space<vmem>>, %arg2: memref<64x2xf32, #tpu.memory_space<vmem>>, %arg3: memref<64x2xf32, #tpu.memory_space<vmem>>, %arg4: memref<64x32xf32, #tpu.memory_space<vmem>>, %arg5: memref<1x64x32xf32, #tpu.memory_space<vmem>>) attributes {dimension_semantics = [], scalar_prefetch = 0 : i64, scratch_operands = 0 : i64, tpu.core_type = #tpu.core_type<tc>} {
    %c0 = arith.constant 0 : index
    %c0_0 = arith.constant 0 : index
    %0 = vector.load %arg1[%c0, %c0_0] : memref<64x576xbf16, #tpu.memory_space<vmem>>, vector<64x576xbf16>
    %c0_1 = arith.constant 0 : index
    %c0_2 = arith.constant 0 : index
    %1 = vector.load %arg0[%c0_1, %c0_2] : memref<576x32xbf16, #tpu.memory_space<vmem>>, vector<576x32xbf16>
    %cst = arith.constant dense<0.000000e+00> : vector<64x32xf32>
    %2 = tpu.matmul %0, %1, %cst {dimension_numbers = #tpu.dot_dimension_numbers<[1], [0], [0], [1], [0, 0, 1, 1], [], []>} : vector<64x576xbf16>, vector<576x32xbf16>, vector<64x32xf32> -> vector<64x32xf32>
    %cst_3 = arith.constant dense<0.000000e+00> : vector<64xf32>
    %3 = vector.multi_reduction <add>, %2, %cst_3 [1] : vector<64x32xf32> to vector<64xf32>
    %4 = vector.shape_cast %3 : vector<64xf32> to vector<64x1xf32>
    %5 = arith.mulf %2, %2 : vector<64x32xf32>
    %cst_4 = arith.constant dense<0.000000e+00> : vector<64xf32>
    %6 = vector.multi_reduction <add>, %5, %cst_4 [1] : vector<64x32xf32> to vector<64xf32>
    %7 = vector.shape_cast %6 : vector<64xf32> to vector<64x1xf32>
    %cst_5 = arith.constant 3.125000e-02 : f32
    %8 = vector.broadcast %cst_5 : f32 to vector<64x1xf32>
    %9 = arith.mulf %4, %8 : vector<64x1xf32>
    %cst_6 = arith.constant 3.125000e-02 : f32
    %10 = vector.broadcast %cst_6 : f32 to vector<64x1xf32>
    %11 = arith.mulf %7, %10 : vector<64x1xf32>
    %12 = arith.mulf %9, %9 : vector<64x1xf32>
    %13 = arith.subf %11, %12 : vector<64x1xf32>
    %cst_7 = arith.constant 0.000000e+00 : f32
    %14 = vector.broadcast %cst_7 : f32 to vector<64x1xf32>
    %15 = arith.maximumf %13, %14 : vector<64x1xf32>
    %cst_8 = arith.constant 9.99999974E-6 : f32
    %16 = vector.broadcast %cst_8 : f32 to vector<64x1xf32>
    %17 = arith.addf %15, %16 : vector<64x1xf32>
    %18 = math.rsqrt %17 : vector<64x1xf32>
    %c0_9 = arith.constant 0 : index
    %c0_10 = arith.constant 0 : index
    %19 = vector.load %arg2[%c0_9, %c0_10] : memref<64x2xf32, #tpu.memory_space<vmem>>, vector<64x2xf32>
    %c0_11 = arith.constant 0 : index
    %c0_12 = arith.constant 0 : index
    %20 = vector.load %arg3[%c0_11, %c0_12] : memref<64x2xf32, #tpu.memory_space<vmem>>, vector<64x2xf32>
    %21 = vector.broadcast %18 : vector<64x1xf32> to vector<64x2xf32>
    %22 = arith.mulf %21, %19 : vector<64x2xf32>
    %23 = vector.broadcast %9 : vector<64x1xf32> to vector<64x2xf32>
    %24 = arith.mulf %23, %22 : vector<64x2xf32>
    %25 = arith.subf %20, %24 : vector<64x2xf32>
    %26 = tpu.iota {dimensions = array<i32: 1>} : vector<1x32xi32>
    %27 = vector.extract_strided_slice %22 {offsets = [0, 0], sizes = [64, 1], strides = [1, 1]} : vector<64x2xf32> to vector<64x1xf32>
    %28 = vector.shape_cast %27 : vector<64x1xf32> to vector<64x1xf32>
    %29 = vector.broadcast %28 : vector<64x1xf32> to vector<64x32xf32>
    %30 = vector.extract_strided_slice %25 {offsets = [0, 0], sizes = [64, 1], strides = [1, 1]} : vector<64x2xf32> to vector<64x1xf32>
    %31 = vector.shape_cast %30 : vector<64x1xf32> to vector<64x1xf32>
    %32 = vector.broadcast %31 : vector<64x1xf32> to vector<64x32xf32>
    %c16_i32 = arith.constant 16 : i32
    %33 = vector.broadcast %c16_i32 : i32 to vector<1x32xi32>
    %34 = arith.cmpi sge, %26, %33 : vector<1x32xi32>
    %35 = vector.extract_strided_slice %22 {offsets = [0, 1], sizes = [64, 1], strides = [1, 1]} : vector<64x2xf32> to vector<64x1xf32>
    %36 = vector.shape_cast %34 : vector<1x32xi1> to vector<1x32xi1>
    %37 = vector.broadcast %36 : vector<1x32xi1> to vector<64x32xi1>
    %38 = vector.shape_cast %35 : vector<64x1xf32> to vector<64x1xf32>
    %39 = vector.broadcast %38 : vector<64x1xf32> to vector<64x32xf32>
    %40 = arith.select %37, %39, %29 : vector<64x32xi1>, vector<64x32xf32>
    %41 = vector.extract_strided_slice %25 {offsets = [0, 1], sizes = [64, 1], strides = [1, 1]} : vector<64x2xf32> to vector<64x1xf32>
    %42 = vector.shape_cast %34 : vector<1x32xi1> to vector<1x32xi1>
    %43 = vector.broadcast %42 : vector<1x32xi1> to vector<64x32xi1>
    %44 = vector.shape_cast %41 : vector<64x1xf32> to vector<64x1xf32>
    %45 = vector.broadcast %44 : vector<64x1xf32> to vector<64x32xf32>
    %46 = arith.select %43, %45, %32 : vector<64x32xi1>, vector<64x32xf32>
    %47 = arith.mulf %2, %40 : vector<64x32xf32>
    %48 = arith.addf %47, %46 : vector<64x32xf32>
    %c0_13 = arith.constant 0 : index
    %c0_14 = arith.constant 0 : index
    %49 = vector.load %arg4[%c0_13, %c0_14] : memref<64x32xf32, #tpu.memory_space<vmem>>, vector<64x32xf32>
    %50 = arith.addf %48, %49 : vector<64x32xf32>
    %c0_15 = arith.constant 0 : index
    %c0_16 = arith.constant 0 : index
    %c0_17 = arith.constant 0 : index
    %51 = vector.load %arg5[%c0_15, %c0_16, %c0_17] : memref<1x64x32xf32, #tpu.memory_space<vmem>>, vector<1x64x32xf32>
    %52 = vector.shape_cast %51 : vector<1x64x32xf32> to vector<64x32xf32>
    %53 = vector.shape_cast %50 : vector<64x32xf32> to vector<1x64x32xf32>
    tpu.vector_store %arg5[%c0_15, %c0_16, %c0_17], %53 {strides = array<i32>} : memref<1x64x32xf32, #tpu.memory_space<vmem>>, vector<1x64x32xf32>,
    return
  }
}

module attributes {stable_mosaic.version = 11 : i64} {
  func.func @_fused_conv_kernel(%arg0: memref<256x32xbf16, #tpu.memory_space<vmem>>, %arg1: memref<128x256xbf16, #tpu.memory_space<vmem>>, %arg2: memref<32x2xf32, #tpu.memory_space<vmem>>, %arg3: memref<32x2xf32, #tpu.memory_space<vmem>>, %arg4: memref<4x32x32xf32, #tpu.memory_space<vmem>>) attributes {dimension_semantics = [], scalar_prefetch = 0 : i64, scratch_operands = 0 : i64, tpu.core_type = #tpu.core_type<tc>} {
    %c0 = arith.constant 0 : index
    %c0_0 = arith.constant 0 : index
    %0 = vector.load %arg1[%c0, %c0_0] : memref<128x256xbf16, #tpu.memory_space<vmem>>, vector<128x256xbf16>
    %c0_1 = arith.constant 0 : index
    %c0_2 = arith.constant 0 : index
    %1 = vector.load %arg0[%c0_1, %c0_2] : memref<256x32xbf16, #tpu.memory_space<vmem>>, vector<256x32xbf16>
    %cst = arith.constant dense<0.000000e+00> : vector<128x32xf32>
    %2 = tpu.matmul %0, %1, %cst {dimension_numbers = #tpu.dot_dimension_numbers<[1], [0], [0], [1], [0, 0, 1, 1], [], []>} : vector<128x256xbf16>, vector<256x32xbf16>, vector<128x32xf32> -> vector<128x32xf32>
    %cst_3 = arith.constant dense<0.000000e+00> : vector<128xf32>
    %3 = vector.multi_reduction <add>, %2, %cst_3 [1] : vector<128x32xf32> to vector<128xf32>
    %4 = vector.shape_cast %3 : vector<128xf32> to vector<128x1xf32>
    %5 = arith.mulf %2, %2 : vector<128x32xf32>
    %cst_4 = arith.constant dense<0.000000e+00> : vector<128xf32>
    %6 = vector.multi_reduction <add>, %5, %cst_4 [1] : vector<128x32xf32> to vector<128xf32>
    %7 = vector.shape_cast %6 : vector<128xf32> to vector<128x1xf32>
    %8 = vector.extract_strided_slice %4 {offsets = [0, 0], sizes = [32, 1], strides = [1, 1]} : vector<128x1xf32> to vector<32x1xf32>
    %9 = vector.extract_strided_slice %7 {offsets = [0, 0], sizes = [32, 1], strides = [1, 1]} : vector<128x1xf32> to vector<32x1xf32>
    %10 = vector.extract_strided_slice %4 {offsets = [32, 0], sizes = [32, 1], strides = [1, 1]} : vector<128x1xf32> to vector<32x1xf32>
    %11 = arith.addf %8, %10 : vector<32x1xf32>
    %12 = vector.extract_strided_slice %7 {offsets = [32, 0], sizes = [32, 1], strides = [1, 1]} : vector<128x1xf32> to vector<32x1xf32>
    %13 = arith.addf %9, %12 : vector<32x1xf32>
    %14 = vector.extract_strided_slice %4 {offsets = [64, 0], sizes = [32, 1], strides = [1, 1]} : vector<128x1xf32> to vector<32x1xf32>
    %15 = arith.addf %11, %14 : vector<32x1xf32>
    %16 = vector.extract_strided_slice %7 {offsets = [64, 0], sizes = [32, 1], strides = [1, 1]} : vector<128x1xf32> to vector<32x1xf32>
    %17 = arith.addf %13, %16 : vector<32x1xf32>
    %18 = vector.extract_strided_slice %4 {offsets = [96, 0], sizes = [32, 1], strides = [1, 1]} : vector<128x1xf32> to vector<32x1xf32>
    %19 = arith.addf %15, %18 : vector<32x1xf32>
    %20 = vector.extract_strided_slice %7 {offsets = [96, 0], sizes = [32, 1], strides = [1, 1]} : vector<128x1xf32> to vector<32x1xf32>
    %21 = arith.addf %17, %20 : vector<32x1xf32>
    %cst_5 = arith.constant 7.812500e-03 : f32
    %22 = vector.broadcast %cst_5 : f32 to vector<32x1xf32>
    %23 = arith.mulf %19, %22 : vector<32x1xf32>
    %cst_6 = arith.constant 7.812500e-03 : f32
    %24 = vector.broadcast %cst_6 : f32 to vector<32x1xf32>
    %25 = arith.mulf %21, %24 : vector<32x1xf32>
    %26 = arith.mulf %23, %23 : vector<32x1xf32>
    %27 = arith.subf %25, %26 : vector<32x1xf32>
    %cst_7 = arith.constant 0.000000e+00 : f32
    %28 = vector.broadcast %cst_7 : f32 to vector<32x1xf32>
    %29 = arith.maximumf %27, %28 : vector<32x1xf32>
    %cst_8 = arith.constant 9.99999974E-6 : f32
    %30 = vector.broadcast %cst_8 : f32 to vector<32x1xf32>
    %31 = arith.addf %29, %30 : vector<32x1xf32>
    %32 = math.rsqrt %31 : vector<32x1xf32>
    %c0_9 = arith.constant 0 : index
    %c0_10 = arith.constant 0 : index
    %33 = vector.load %arg2[%c0_9, %c0_10] : memref<32x2xf32, #tpu.memory_space<vmem>>, vector<32x2xf32>
    %c0_11 = arith.constant 0 : index
    %c0_12 = arith.constant 0 : index
    %34 = vector.load %arg3[%c0_11, %c0_12] : memref<32x2xf32, #tpu.memory_space<vmem>>, vector<32x2xf32>
    %35 = vector.broadcast %32 : vector<32x1xf32> to vector<32x2xf32>
    %36 = arith.mulf %35, %33 : vector<32x2xf32>
    %37 = vector.broadcast %23 : vector<32x1xf32> to vector<32x2xf32>
    %38 = arith.mulf %37, %36 : vector<32x2xf32>
    %39 = arith.subf %34, %38 : vector<32x2xf32>
    %40 = tpu.iota {dimensions = array<i32: 1>} : vector<1x32xi32>
    %41 = vector.extract_strided_slice %36 {offsets = [0, 0], sizes = [32, 1], strides = [1, 1]} : vector<32x2xf32> to vector<32x1xf32>
    %42 = vector.shape_cast %41 : vector<32x1xf32> to vector<32x1xf32>
    %43 = vector.broadcast %42 : vector<32x1xf32> to vector<32x32xf32>
    %44 = vector.extract_strided_slice %39 {offsets = [0, 0], sizes = [32, 1], strides = [1, 1]} : vector<32x2xf32> to vector<32x1xf32>
    %45 = vector.shape_cast %44 : vector<32x1xf32> to vector<32x1xf32>
    %46 = vector.broadcast %45 : vector<32x1xf32> to vector<32x32xf32>
    %c16_i32 = arith.constant 16 : i32
    %47 = vector.broadcast %c16_i32 : i32 to vector<1x32xi32>
    %48 = arith.cmpi sge, %40, %47 : vector<1x32xi32>
    %49 = vector.extract_strided_slice %36 {offsets = [0, 1], sizes = [32, 1], strides = [1, 1]} : vector<32x2xf32> to vector<32x1xf32>
    %50 = vector.shape_cast %48 : vector<1x32xi1> to vector<1x32xi1>
    %51 = vector.broadcast %50 : vector<1x32xi1> to vector<32x32xi1>
    %52 = vector.shape_cast %49 : vector<32x1xf32> to vector<32x1xf32>
    %53 = vector.broadcast %52 : vector<32x1xf32> to vector<32x32xf32>
    %54 = arith.select %51, %53, %43 : vector<32x32xi1>, vector<32x32xf32>
    %55 = vector.extract_strided_slice %39 {offsets = [0, 1], sizes = [32, 1], strides = [1, 1]} : vector<32x2xf32> to vector<32x1xf32>
    %56 = vector.shape_cast %48 : vector<1x32xi1> to vector<1x32xi1>
    %57 = vector.broadcast %56 : vector<1x32xi1> to vector<32x32xi1>
    %58 = vector.shape_cast %55 : vector<32x1xf32> to vector<32x1xf32>
    %59 = vector.broadcast %58 : vector<32x1xf32> to vector<32x32xf32>
    %60 = arith.select %57, %59, %46 : vector<32x32xi1>, vector<32x32xf32>
    %61 = vector.extract_strided_slice %2 {offsets = [0, 0], sizes = [32, 32], strides = [1, 1]} : vector<128x32xf32> to vector<32x32xf32>
    %62 = arith.mulf %61, %54 : vector<32x32xf32>
    %63 = arith.addf %62, %60 : vector<32x32xf32>
    %cst_13 = arith.constant 0.000000e+00 : f32
    %64 = vector.broadcast %cst_13 : f32 to vector<32x32xf32>
    %65 = arith.maximumf %63, %64 : vector<32x32xf32>
    %c0_14 = arith.constant 0 : index
    %c0_15 = arith.constant 0 : index
    %c0_16 = arith.constant 0 : index
    %66 = vector.load %arg4[%c0_14, %c0_15, %c0_16] : memref<4x32x32xf32, #tpu.memory_space<vmem>>, vector<1x32x32xf32>
    %67 = vector.shape_cast %66 : vector<1x32x32xf32> to vector<32x32xf32>
    %68 = vector.shape_cast %65 : vector<32x32xf32> to vector<1x32x32xf32>
    tpu.vector_store %arg4[%c0_14, %c0_15, %c0_16], %68 {strides = array<i32>} : memref<4x32x32xf32, #tpu.memory_space<vmem>>, vector<1x32x32xf32>,
    %69 = vector.extract_strided_slice %2 {offsets = [32, 0], sizes = [32, 32], strides = [1, 1]} : vector<128x32xf32> to vector<32x32xf32>
    %70 = arith.mulf %69, %54 : vector<32x32xf32>
    %71 = arith.addf %70, %60 : vector<32x32xf32>
    %cst_17 = arith.constant 0.000000e+00 : f32
    %72 = vector.broadcast %cst_17 : f32 to vector<32x32xf32>
    %73 = arith.maximumf %71, %72 : vector<32x32xf32>
    %c1 = arith.constant 1 : index
    %c0_18 = arith.constant 0 : index
    %c0_19 = arith.constant 0 : index
    %74 = vector.load %arg4[%c1, %c0_18, %c0_19] : memref<4x32x32xf32, #tpu.memory_space<vmem>>, vector<1x32x32xf32>
    %75 = vector.shape_cast %74 : vector<1x32x32xf32> to vector<32x32xf32>
    %76 = vector.shape_cast %73 : vector<32x32xf32> to vector<1x32x32xf32>
    tpu.vector_store %arg4[%c1, %c0_18, %c0_19], %76 {strides = array<i32>} : memref<4x32x32xf32, #tpu.memory_space<vmem>>, vector<1x32x32xf32>,
    %77 = vector.extract_strided_slice %2 {offsets = [64, 0], sizes = [32, 32], strides = [1, 1]} : vector<128x32xf32> to vector<32x32xf32>
    %78 = arith.mulf %77, %54 : vector<32x32xf32>
    %79 = arith.addf %78, %60 : vector<32x32xf32>
    %cst_20 = arith.constant 0.000000e+00 : f32
    %80 = vector.broadcast %cst_20 : f32 to vector<32x32xf32>
    %81 = arith.maximumf %79, %80 : vector<32x32xf32>
    %c2 = arith.constant 2 : index
    %c0_21 = arith.constant 0 : index
    %c0_22 = arith.constant 0 : index
    %82 = vector.load %arg4[%c2, %c0_21, %c0_22] : memref<4x32x32xf32, #tpu.memory_space<vmem>>, vector<1x32x32xf32>
    %83 = vector.shape_cast %82 : vector<1x32x32xf32> to vector<32x32xf32>
    %84 = vector.shape_cast %81 : vector<32x32xf32> to vector<1x32x32xf32>
    tpu.vector_store %arg4[%c2, %c0_21, %c0_22], %84 {strides = array<i32>} : memref<4x32x32xf32, #tpu.memory_space<vmem>>, vector<1x32x32xf32>,
    %85 = vector.extract_strided_slice %2 {offsets = [96, 0], sizes = [32, 32], strides = [1, 1]} : vector<128x32xf32> to vector<32x32xf32>
    %86 = arith.mulf %85, %54 : vector<32x32xf32>
    %87 = arith.addf %86, %60 : vector<32x32xf32>
    %cst_23 = arith.constant 0.000000e+00 : f32
    %88 = vector.broadcast %cst_23 : f32 to vector<32x32xf32>
    %89 = arith.maximumf %87, %88 : vector<32x32xf32>
    %c3 = arith.constant 3 : index
    %c0_24 = arith.constant 0 : index
    %c0_25 = arith.constant 0 : index
    %90 = vector.load %arg4[%c3, %c0_24, %c0_25] : memref<4x32x32xf32, #tpu.memory_space<vmem>>, vector<1x32x32xf32>
    %91 = vector.shape_cast %90 : vector<1x32x32xf32> to vector<32x32xf32>
    %92 = vector.shape_cast %89 : vector<32x32xf32> to vector<1x32x32xf32>
    tpu.vector_store %arg4[%c3, %c0_24, %c0_25], %92 {strides = array<i32>} : memref<4x32x32xf32, #tpu.memory_space<vmem>>, vector<1x32x32xf32>,
    return
  }
}

module attributes {stable_mosaic.version = 11 : i64} {
  func.func @_fused_conv_kernel(%arg0: memref<128x128xbf16, #tpu.memory_space<vmem>>, %arg1: memref<64x128xbf16, #tpu.memory_space<vmem>>, %arg2: memref<16x2xf32, #tpu.memory_space<vmem>>, %arg3: memref<16x2xf32, #tpu.memory_space<vmem>>, %arg4: memref<4x16x128xf32, #tpu.memory_space<vmem>>) attributes {dimension_semantics = [], scalar_prefetch = 0 : i64, scratch_operands = 0 : i64, tpu.core_type = #tpu.core_type<tc>} {
    %c0 = arith.constant 0 : index
    %c0_0 = arith.constant 0 : index
    %0 = vector.load %arg1[%c0, %c0_0] : memref<64x128xbf16, #tpu.memory_space<vmem>>, vector<64x128xbf16>
    %c0_1 = arith.constant 0 : index
    %c0_2 = arith.constant 0 : index
    %1 = vector.load %arg0[%c0_1, %c0_2] : memref<128x128xbf16, #tpu.memory_space<vmem>>, vector<128x128xbf16>
    %cst = arith.constant dense<0.000000e+00> : vector<64x128xf32>
    %2 = tpu.matmul %0, %1, %cst {dimension_numbers = #tpu.dot_dimension_numbers<[1], [0], [0], [1], [0, 0, 1, 1], [], []>} : vector<64x128xbf16>, vector<128x128xbf16>, vector<64x128xf32> -> vector<64x128xf32>
    %cst_3 = arith.constant dense<0.000000e+00> : vector<64xf32>
    %3 = vector.multi_reduction <add>, %2, %cst_3 [1] : vector<64x128xf32> to vector<64xf32>
    %4 = vector.shape_cast %3 : vector<64xf32> to vector<64x1xf32>
    %5 = arith.mulf %2, %2 : vector<64x128xf32>
    %cst_4 = arith.constant dense<0.000000e+00> : vector<64xf32>
    %6 = vector.multi_reduction <add>, %5, %cst_4 [1] : vector<64x128xf32> to vector<64xf32>
    %7 = vector.shape_cast %6 : vector<64xf32> to vector<64x1xf32>
    %8 = vector.extract_strided_slice %4 {offsets = [0, 0], sizes = [16, 1], strides = [1, 1]} : vector<64x1xf32> to vector<16x1xf32>
    %9 = vector.extract_strided_slice %7 {offsets = [0, 0], sizes = [16, 1], strides = [1, 1]} : vector<64x1xf32> to vector<16x1xf32>
    %10 = vector.extract_strided_slice %4 {offsets = [16, 0], sizes = [16, 1], strides = [1, 1]} : vector<64x1xf32> to vector<16x1xf32>
    %11 = arith.addf %8, %10 : vector<16x1xf32>
    %12 = vector.extract_strided_slice %7 {offsets = [16, 0], sizes = [16, 1], strides = [1, 1]} : vector<64x1xf32> to vector<16x1xf32>
    %13 = arith.addf %9, %12 : vector<16x1xf32>
    %14 = vector.extract_strided_slice %4 {offsets = [32, 0], sizes = [16, 1], strides = [1, 1]} : vector<64x1xf32> to vector<16x1xf32>
    %15 = arith.addf %11, %14 : vector<16x1xf32>
    %16 = vector.extract_strided_slice %7 {offsets = [32, 0], sizes = [16, 1], strides = [1, 1]} : vector<64x1xf32> to vector<16x1xf32>
    %17 = arith.addf %13, %16 : vector<16x1xf32>
    %18 = vector.extract_strided_slice %4 {offsets = [48, 0], sizes = [16, 1], strides = [1, 1]} : vector<64x1xf32> to vector<16x1xf32>
    %19 = arith.addf %15, %18 : vector<16x1xf32>
    %20 = vector.extract_strided_slice %7 {offsets = [48, 0], sizes = [16, 1], strides = [1, 1]} : vector<64x1xf32> to vector<16x1xf32>
    %21 = arith.addf %17, %20 : vector<16x1xf32>
    %cst_5 = arith.constant 0.001953125 : f32
    %22 = vector.broadcast %cst_5 : f32 to vector<16x1xf32>
    %23 = arith.mulf %19, %22 : vector<16x1xf32>
    %cst_6 = arith.constant 0.001953125 : f32
    %24 = vector.broadcast %cst_6 : f32 to vector<16x1xf32>
    %25 = arith.mulf %21, %24 : vector<16x1xf32>
    %26 = arith.mulf %23, %23 : vector<16x1xf32>
    %27 = arith.subf %25, %26 : vector<16x1xf32>
    %cst_7 = arith.constant 0.000000e+00 : f32
    %28 = vector.broadcast %cst_7 : f32 to vector<16x1xf32>
    %29 = arith.maximumf %27, %28 : vector<16x1xf32>
    %cst_8 = arith.constant 9.99999974E-6 : f32
    %30 = vector.broadcast %cst_8 : f32 to vector<16x1xf32>
    %31 = arith.addf %29, %30 : vector<16x1xf32>
    %32 = math.rsqrt %31 : vector<16x1xf32>
    %c0_9 = arith.constant 0 : index
    %c0_10 = arith.constant 0 : index
    %33 = vector.load %arg2[%c0_9, %c0_10] : memref<16x2xf32, #tpu.memory_space<vmem>>, vector<16x2xf32>
    %c0_11 = arith.constant 0 : index
    %c0_12 = arith.constant 0 : index
    %34 = vector.load %arg3[%c0_11, %c0_12] : memref<16x2xf32, #tpu.memory_space<vmem>>, vector<16x2xf32>
    %35 = vector.broadcast %32 : vector<16x1xf32> to vector<16x2xf32>
    %36 = arith.mulf %35, %33 : vector<16x2xf32>
    %37 = vector.broadcast %23 : vector<16x1xf32> to vector<16x2xf32>
    %38 = arith.mulf %37, %36 : vector<16x2xf32>
    %39 = arith.subf %34, %38 : vector<16x2xf32>
    %40 = tpu.iota {dimensions = array<i32: 1>} : vector<1x128xi32>
    %41 = vector.extract_strided_slice %36 {offsets = [0, 0], sizes = [16, 1], strides = [1, 1]} : vector<16x2xf32> to vector<16x1xf32>
    %42 = vector.shape_cast %41 : vector<16x1xf32> to vector<16x1xf32>
    %43 = vector.broadcast %42 : vector<16x1xf32> to vector<16x128xf32>
    %44 = vector.extract_strided_slice %39 {offsets = [0, 0], sizes = [16, 1], strides = [1, 1]} : vector<16x2xf32> to vector<16x1xf32>
    %45 = vector.shape_cast %44 : vector<16x1xf32> to vector<16x1xf32>
    %46 = vector.broadcast %45 : vector<16x1xf32> to vector<16x128xf32>
    %c64_i32 = arith.constant 64 : i32
    %47 = vector.broadcast %c64_i32 : i32 to vector<1x128xi32>
    %48 = arith.cmpi sge, %40, %47 : vector<1x128xi32>
    %49 = vector.extract_strided_slice %36 {offsets = [0, 1], sizes = [16, 1], strides = [1, 1]} : vector<16x2xf32> to vector<16x1xf32>
    %50 = vector.shape_cast %48 : vector<1x128xi1> to vector<1x128xi1>
    %51 = vector.broadcast %50 : vector<1x128xi1> to vector<16x128xi1>
    %52 = vector.shape_cast %49 : vector<16x1xf32> to vector<16x1xf32>
    %53 = vector.broadcast %52 : vector<16x1xf32> to vector<16x128xf32>
    %54 = arith.select %51, %53, %43 : vector<16x128xi1>, vector<16x128xf32>
    %55 = vector.extract_strided_slice %39 {offsets = [0, 1], sizes = [16, 1], strides = [1, 1]} : vector<16x2xf32> to vector<16x1xf32>
    %56 = vector.shape_cast %48 : vector<1x128xi1> to vector<1x128xi1>
    %57 = vector.broadcast %56 : vector<1x128xi1> to vector<16x128xi1>
    %58 = vector.shape_cast %55 : vector<16x1xf32> to vector<16x1xf32>
    %59 = vector.broadcast %58 : vector<16x1xf32> to vector<16x128xf32>
    %60 = arith.select %57, %59, %46 : vector<16x128xi1>, vector<16x128xf32>
    %61 = vector.extract_strided_slice %2 {offsets = [0, 0], sizes = [16, 128], strides = [1, 1]} : vector<64x128xf32> to vector<16x128xf32>
    %62 = arith.mulf %61, %54 : vector<16x128xf32>
    %63 = arith.addf %62, %60 : vector<16x128xf32>
    %c0_13 = arith.constant 0 : index
    %c0_14 = arith.constant 0 : index
    %c0_15 = arith.constant 0 : index
    %64 = vector.load %arg4[%c0_13, %c0_14, %c0_15] : memref<4x16x128xf32, #tpu.memory_space<vmem>>, vector<1x16x128xf32>
    %65 = vector.shape_cast %64 : vector<1x16x128xf32> to vector<16x128xf32>
    %66 = vector.shape_cast %63 : vector<16x128xf32> to vector<1x16x128xf32>
    tpu.vector_store %arg4[%c0_13, %c0_14, %c0_15], %66 {strides = array<i32>} : memref<4x16x128xf32, #tpu.memory_space<vmem>>, vector<1x16x128xf32>,
    %67 = vector.extract_strided_slice %2 {offsets = [16, 0], sizes = [16, 128], strides = [1, 1]} : vector<64x128xf32> to vector<16x128xf32>
    %68 = arith.mulf %67, %54 : vector<16x128xf32>
    %69 = arith.addf %68, %60 : vector<16x128xf32>
    %c1 = arith.constant 1 : index
    %c0_16 = arith.constant 0 : index
    %c0_17 = arith.constant 0 : index
    %70 = vector.load %arg4[%c1, %c0_16, %c0_17] : memref<4x16x128xf32, #tpu.memory_space<vmem>>, vector<1x16x128xf32>
    %71 = vector.shape_cast %70 : vector<1x16x128xf32> to vector<16x128xf32>
    %72 = vector.shape_cast %69 : vector<16x128xf32> to vector<1x16x128xf32>
    tpu.vector_store %arg4[%c1, %c0_16, %c0_17], %72 {strides = array<i32>} : memref<4x16x128xf32, #tpu.memory_space<vmem>>, vector<1x16x128xf32>,
    %73 = vector.extract_strided_slice %2 {offsets = [32, 0], sizes = [16, 128], strides = [1, 1]} : vector<64x128xf32> to vector<16x128xf32>
    %74 = arith.mulf %73, %54 : vector<16x128xf32>
    %75 = arith.addf %74, %60 : vector<16x128xf32>
    %c2 = arith.constant 2 : index
    %c0_18 = arith.constant 0 : index
    %c0_19 = arith.constant 0 : index
    %76 = vector.load %arg4[%c2, %c0_18, %c0_19] : memref<4x16x128xf32, #tpu.memory_space<vmem>>, vector<1x16x128xf32>
    %77 = vector.shape_cast %76 : vector<1x16x128xf32> to vector<16x128xf32>
    %78 = vector.shape_cast %75 : vector<16x128xf32> to vector<1x16x128xf32>
    tpu.vector_store %arg4[%c2, %c0_18, %c0_19], %78 {strides = array<i32>} : memref<4x16x128xf32, #tpu.memory_space<vmem>>, vector<1x16x128xf32>,
    %79 = vector.extract_strided_slice %2 {offsets = [48, 0], sizes = [16, 128], strides = [1, 1]} : vector<64x128xf32> to vector<16x128xf32>
    %80 = arith.mulf %79, %54 : vector<16x128xf32>
    %81 = arith.addf %80, %60 : vector<16x128xf32>
    %c3 = arith.constant 3 : index
    %c0_20 = arith.constant 0 : index
    %c0_21 = arith.constant 0 : index
    %82 = vector.load %arg4[%c3, %c0_20, %c0_21] : memref<4x16x128xf32, #tpu.memory_space<vmem>>, vector<1x16x128xf32>
    %83 = vector.shape_cast %82 : vector<1x16x128xf32> to vector<16x128xf32>
    %84 = vector.shape_cast %81 : vector<16x128xf32> to vector<1x16x128xf32>
    tpu.vector_store %arg4[%c3, %c0_20, %c0_21], %84 {strides = array<i32>} : memref<4x16x128xf32, #tpu.memory_space<vmem>>, vector<1x16x128xf32>,
    return
  }
}

module attributes {stable_mosaic.version = 11 : i64} {
  func.func @_fused_conv_kernel(%arg0: memref<64x392xbf16, #tpu.memory_space<vmem>>, %arg1: memref<32x64xbf16, #tpu.memory_space<vmem>>, %arg2: memref<8x2xf32, #tpu.memory_space<vmem>>, %arg3: memref<8x2xf32, #tpu.memory_space<vmem>>, %arg4: memref<4x8x392xf32, #tpu.memory_space<vmem>>) attributes {dimension_semantics = [], scalar_prefetch = 0 : i64, scratch_operands = 0 : i64, tpu.core_type = #tpu.core_type<tc>} {
    %c0 = arith.constant 0 : index
    %c0_0 = arith.constant 0 : index
    %0 = vector.load %arg1[%c0, %c0_0] : memref<32x64xbf16, #tpu.memory_space<vmem>>, vector<32x64xbf16>
    %c0_1 = arith.constant 0 : index
    %c0_2 = arith.constant 0 : index
    %1 = vector.load %arg0[%c0_1, %c0_2] : memref<64x392xbf16, #tpu.memory_space<vmem>>, vector<64x392xbf16>
    %cst = arith.constant dense<0.000000e+00> : vector<32x392xf32>
    %2 = tpu.matmul %0, %1, %cst {dimension_numbers = #tpu.dot_dimension_numbers<[1], [0], [0], [1], [0, 0, 1, 1], [], []>} : vector<32x64xbf16>, vector<64x392xbf16>, vector<32x392xf32> -> vector<32x392xf32>
    %cst_3 = arith.constant dense<0.000000e+00> : vector<32xf32>
    %3 = vector.multi_reduction <add>, %2, %cst_3 [1] : vector<32x392xf32> to vector<32xf32>
    %4 = vector.shape_cast %3 : vector<32xf32> to vector<32x1xf32>
    %5 = arith.mulf %2, %2 : vector<32x392xf32>
    %cst_4 = arith.constant dense<0.000000e+00> : vector<32xf32>
    %6 = vector.multi_reduction <add>, %5, %cst_4 [1] : vector<32x392xf32> to vector<32xf32>
    %7 = vector.shape_cast %6 : vector<32xf32> to vector<32x1xf32>
    %8 = vector.extract_strided_slice %4 {offsets = [0, 0], sizes = [8, 1], strides = [1, 1]} : vector<32x1xf32> to vector<8x1xf32>
    %9 = vector.extract_strided_slice %7 {offsets = [0, 0], sizes = [8, 1], strides = [1, 1]} : vector<32x1xf32> to vector<8x1xf32>
    %10 = vector.extract_strided_slice %4 {offsets = [8, 0], sizes = [8, 1], strides = [1, 1]} : vector<32x1xf32> to vector<8x1xf32>
    %11 = arith.addf %8, %10 : vector<8x1xf32>
    %12 = vector.extract_strided_slice %7 {offsets = [8, 0], sizes = [8, 1], strides = [1, 1]} : vector<32x1xf32> to vector<8x1xf32>
    %13 = arith.addf %9, %12 : vector<8x1xf32>
    %14 = vector.extract_strided_slice %4 {offsets = [16, 0], sizes = [8, 1], strides = [1, 1]} : vector<32x1xf32> to vector<8x1xf32>
    %15 = arith.addf %11, %14 : vector<8x1xf32>
    %16 = vector.extract_strided_slice %7 {offsets = [16, 0], sizes = [8, 1], strides = [1, 1]} : vector<32x1xf32> to vector<8x1xf32>
    %17 = arith.addf %13, %16 : vector<8x1xf32>
    %18 = vector.extract_strided_slice %4 {offsets = [24, 0], sizes = [8, 1], strides = [1, 1]} : vector<32x1xf32> to vector<8x1xf32>
    %19 = arith.addf %15, %18 : vector<8x1xf32>
    %20 = vector.extract_strided_slice %7 {offsets = [24, 0], sizes = [8, 1], strides = [1, 1]} : vector<32x1xf32> to vector<8x1xf32>
    %21 = arith.addf %17, %20 : vector<8x1xf32>
    %cst_5 = arith.constant 6.37755089E-4 : f32
    %22 = vector.broadcast %cst_5 : f32 to vector<8x1xf32>
    %23 = arith.mulf %19, %22 : vector<8x1xf32>
    %cst_6 = arith.constant 6.37755089E-4 : f32
    %24 = vector.broadcast %cst_6 : f32 to vector<8x1xf32>
    %25 = arith.mulf %21, %24 : vector<8x1xf32>
    %26 = arith.mulf %23, %23 : vector<8x1xf32>
    %27 = arith.subf %25, %26 : vector<8x1xf32>
    %cst_7 = arith.constant 0.000000e+00 : f32
    %28 = vector.broadcast %cst_7 : f32 to vector<8x1xf32>
    %29 = arith.maximumf %27, %28 : vector<8x1xf32>
    %cst_8 = arith.constant 9.99999974E-6 : f32
    %30 = vector.broadcast %cst_8 : f32 to vector<8x1xf32>
    %31 = arith.addf %29, %30 : vector<8x1xf32>
    %32 = math.rsqrt %31 : vector<8x1xf32>
    %c0_9 = arith.constant 0 : index
    %c0_10 = arith.constant 0 : index
    %33 = vector.load %arg2[%c0_9, %c0_10] : memref<8x2xf32, #tpu.memory_space<vmem>>, vector<8x2xf32>
    %c0_11 = arith.constant 0 : index
    %c0_12 = arith.constant 0 : index
    %34 = vector.load %arg3[%c0_11, %c0_12] : memref<8x2xf32, #tpu.memory_space<vmem>>, vector<8x2xf32>
    %35 = vector.broadcast %32 : vector<8x1xf32> to vector<8x2xf32>
    %36 = arith.mulf %35, %33 : vector<8x2xf32>
    %37 = vector.broadcast %23 : vector<8x1xf32> to vector<8x2xf32>
    %38 = arith.mulf %37, %36 : vector<8x2xf32>
    %39 = arith.subf %34, %38 : vector<8x2xf32>
    %40 = tpu.iota {dimensions = array<i32: 1>} : vector<1x392xi32>
    %41 = vector.extract_strided_slice %36 {offsets = [0, 0], sizes = [8, 1], strides = [1, 1]} : vector<8x2xf32> to vector<8x1xf32>
    %42 = vector.shape_cast %41 : vector<8x1xf32> to vector<8x1xf32>
    %43 = vector.broadcast %42 : vector<8x1xf32> to vector<8x392xf32>
    %44 = vector.extract_strided_slice %39 {offsets = [0, 0], sizes = [8, 1], strides = [1, 1]} : vector<8x2xf32> to vector<8x1xf32>
    %45 = vector.shape_cast %44 : vector<8x1xf32> to vector<8x1xf32>
    %46 = vector.broadcast %45 : vector<8x1xf32> to vector<8x392xf32>
    %c196_i32 = arith.constant 196 : i32
    %47 = vector.broadcast %c196_i32 : i32 to vector<1x392xi32>
    %48 = arith.cmpi sge, %40, %47 : vector<1x392xi32>
    %49 = vector.extract_strided_slice %36 {offsets = [0, 1], sizes = [8, 1], strides = [1, 1]} : vector<8x2xf32> to vector<8x1xf32>
    %50 = vector.shape_cast %48 : vector<1x392xi1> to vector<1x392xi1>
    %51 = vector.broadcast %50 : vector<1x392xi1> to vector<8x392xi1>
    %52 = vector.shape_cast %49 : vector<8x1xf32> to vector<8x1xf32>
    %53 = vector.broadcast %52 : vector<8x1xf32> to vector<8x392xf32>
    %54 = arith.select %51, %53, %43 : vector<8x392xi1>, vector<8x392xf32>
    %55 = vector.extract_strided_slice %39 {offsets = [0, 1], sizes = [8, 1], strides = [1, 1]} : vector<8x2xf32> to vector<8x1xf32>
    %56 = vector.shape_cast %48 : vector<1x392xi1> to vector<1x392xi1>
    %57 = vector.broadcast %56 : vector<1x392xi1> to vector<8x392xi1>
    %58 = vector.shape_cast %55 : vector<8x1xf32> to vector<8x1xf32>
    %59 = vector.broadcast %58 : vector<8x1xf32> to vector<8x392xf32>
    %60 = arith.select %57, %59, %46 : vector<8x392xi1>, vector<8x392xf32>
    %61 = vector.extract_strided_slice %2 {offsets = [0, 0], sizes = [8, 392], strides = [1, 1]} : vector<32x392xf32> to vector<8x392xf32>
    %62 = arith.mulf %61, %54 : vector<8x392xf32>
    %63 = arith.addf %62, %60 : vector<8x392xf32>
    %c0_13 = arith.constant 0 : index
    %c0_14 = arith.constant 0 : index
    %c0_15 = arith.constant 0 : index
    %64 = vector.load %arg4[%c0_13, %c0_14, %c0_15] : memref<4x8x392xf32, #tpu.memory_space<vmem>>, vector<1x8x392xf32>
    %65 = vector.shape_cast %64 : vector<1x8x392xf32> to vector<8x392xf32>
    %66 = vector.shape_cast %63 : vector<8x392xf32> to vector<1x8x392xf32>
    tpu.vector_store %arg4[%c0_13, %c0_14, %c0_15], %66 {strides = array<i32>} : memref<4x8x392xf32, #tpu.memory_space<vmem>>, vector<1x8x392xf32>,
    %67 = vector.extract_strided_slice %2 {offsets = [8, 0], sizes = [8, 392], strides = [1, 1]} : vector<32x392xf32> to vector<8x392xf32>
    %68 = arith.mulf %67, %54 : vector<8x392xf32>
    %69 = arith.addf %68, %60 : vector<8x392xf32>
    %c1 = arith.constant 1 : index
    %c0_16 = arith.constant 0 : index
    %c0_17 = arith.constant 0 : index
    %70 = vector.load %arg4[%c1, %c0_16, %c0_17] : memref<4x8x392xf32, #tpu.memory_space<vmem>>, vector<1x8x392xf32>
    %71 = vector.shape_cast %70 : vector<1x8x392xf32> to vector<8x392xf32>
    %72 = vector.shape_cast %69 : vector<8x392xf32> to vector<1x8x392xf32>
    tpu.vector_store %arg4[%c1, %c0_16, %c0_17], %72 {strides = array<i32>} : memref<4x8x392xf32, #tpu.memory_space<vmem>>, vector<1x8x392xf32>,
    %73 = vector.extract_strided_slice %2 {offsets = [16, 0], sizes = [8, 392], strides = [1, 1]} : vector<32x392xf32> to vector<8x392xf32>
    %74 = arith.mulf %73, %54 : vector<8x392xf32>
    %75 = arith.addf %74, %60 : vector<8x392xf32>
    %c2 = arith.constant 2 : index
    %c0_18 = arith.constant 0 : index
    %c0_19 = arith.constant 0 : index
    %76 = vector.load %arg4[%c2, %c0_18, %c0_19] : memref<4x8x392xf32, #tpu.memory_space<vmem>>, vector<1x8x392xf32>
    %77 = vector.shape_cast %76 : vector<1x8x392xf32> to vector<8x392xf32>
    %78 = vector.shape_cast %75 : vector<8x392xf32> to vector<1x8x392xf32>
    tpu.vector_store %arg4[%c2, %c0_18, %c0_19], %78 {strides = array<i32>} : memref<4x8x392xf32, #tpu.memory_space<vmem>>, vector<1x8x392xf32>,
    %79 = vector.extract_strided_slice %2 {offsets = [24, 0], sizes = [8, 392], strides = [1, 1]} : vector<32x392xf32> to vector<8x392xf32>
    %80 = arith.mulf %79, %54 : vector<8x392xf32>
    %81 = arith.addf %80, %60 : vector<8x392xf32>
    %c3 = arith.constant 3 : index
    %c0_20 = arith.constant 0 : index
    %c0_21 = arith.constant 0 : index
    %82 = vector.load %arg4[%c3, %c0_20, %c0_21] : memref<4x8x392xf32, #tpu.memory_space<vmem>>, vector<1x8x392xf32>
    %83 = vector.shape_cast %82 : vector<1x8x392xf32> to vector<8x392xf32>
    %84 = vector.shape_cast %81 : vector<8x392xf32> to vector<1x8x392xf32>
    tpu.vector_store %arg4[%c3, %c0_20, %c0_21], %84 {strides = array<i32>} : memref<4x8x392xf32, #tpu.memory_space<vmem>>, vector<1x8x392xf32>,
    return
  }
}

module attributes {stable_mosaic.version = 11 : i64} {
  func.func @_fused_conv_kernel(%arg0: memref<392x1568xbf16, #tpu.memory_space<vmem>>, %arg1: memref<8x392xbf16, #tpu.memory_space<vmem>>, %arg2: memref<1x8x1568xf32, #tpu.memory_space<vmem>>) attributes {dimension_semantics = [], scalar_prefetch = 0 : i64, scratch_operands = 0 : i64, tpu.core_type = #tpu.core_type<tc>} {
    %c0 = arith.constant 0 : index
    %c0_0 = arith.constant 0 : index
    %0 = vector.load %arg1[%c0, %c0_0] : memref<8x392xbf16, #tpu.memory_space<vmem>>, vector<8x392xbf16>
    %c0_1 = arith.constant 0 : index
    %c0_2 = arith.constant 0 : index
    %1 = vector.load %arg0[%c0_1, %c0_2] : memref<392x1568xbf16, #tpu.memory_space<vmem>>, vector<392x1568xbf16>
    %cst = arith.constant dense<0.000000e+00> : vector<8x1568xf32>
    %2 = tpu.matmul %0, %1, %cst {dimension_numbers = #tpu.dot_dimension_numbers<[1], [0], [0], [1], [0, 0, 1, 1], [], []>} : vector<8x392xbf16>, vector<392x1568xbf16>, vector<8x1568xf32> -> vector<8x1568xf32>
    %3 = math.tanh %2 : vector<8x1568xf32>
    %c0_3 = arith.constant 0 : index
    %c0_4 = arith.constant 0 : index
    %c0_5 = arith.constant 0 : index
    %4 = vector.load %arg2[%c0_3, %c0_4, %c0_5] : memref<1x8x1568xf32, #tpu.memory_space<vmem>>, vector<1x8x1568xf32>
    %5 = vector.shape_cast %4 : vector<1x8x1568xf32> to vector<8x1568xf32>
    %6 = vector.shape_cast %3 : vector<8x1568xf32> to vector<1x8x1568xf32>
    tpu.vector_store %arg2[%c0_3, %c0_4, %c0_5], %6 {strides = array<i32>} : memref<1x8x1568xf32, #tpu.memory_space<vmem>>, vector<1x8x1568xf32>,
    return
  }
}

</mosaic_0001>

<bundles_post_ra>
// kernel: generator_forward.10
= control target key start
LH: loop header
LB: loop body
LE: loop exit
PB: predicated region body
PF: predicated region fallthrough
CT: control target
= control target key end

     0   :  { %vm303_vm0 = vcmask 1040384   ;;  %v949_v2 = vmov 0   ;;  %vm299_vm1 = vcmask 400384   ;;  %vm525_vm2 = vcmask 261120   ;;  %s1403_s0 = inlined_call_operand.vmem [shape: bf16[49,1568], index: 0, kind: input, shape index: {}]   ;;  %s1404_s1 = inlined_call_operand.vmem [shape: bf16[8,49], index: 1, kind: input, shape index: {}]   ;;  %s1405_s2 = inlined_call_operand.vmem [shape: f32[8,2], index: 2, kind: input, shape index: {}]   ;;  %s1406_s3 = inlined_call_operand.vmem [shape: f32[8,2], index: 3, kind: input, shape index: {}]   ;;  %s1407_s4 = inlined_call_operand.vmem [shape: f32[1,8,1568], index: 4, kind: output, shape index: {}]  }
   0x1   :  { %v61_v0 = vld [vmem:[%s1403_s0 + $0x138] sm:$0x11]  ;;  %v62_v1 = vld [vmem:[%s1403_s0 + $0x140] sm:$0x11]  ;;  %942 = vset.pattern.permute.xlu1 %v949_v2  ;;  %944 = vset.pattern.permute.xlu2 %v949_v2  ;;  %v982_v7 = vsel %vm303_vm0, 65535, %v949_v2 }
   0x2   :  { %v195_v3 = vunpack.c.l.b16 %v61_v0  ;;  %v196_v4 = vunpack.c.h.b16 %v61_v0  ;;  %v197_v5 = vunpack.c.l.b16 %v62_v1  ;;  %v198_v6 = vunpack.c.h.b16 %v62_v1  ;;  %v838_v12 = vld [vmem:[%s1403_s0 + $0xd0] sm:$0xf]  ;;  %v933_v13 = vld [vmem:[%s1403_s0 + $0x100] sm:$0xf0]  ;;  %v927_v14 = vld [vmem:[%s1403_s0 + $0xd4] sm:$0xf] }
   0x3   :  { %v840_v15 = vld [vmem:[%s1403_s0 + $0x104] sm:$0xf0]  ;;  %v846_v16 = vld [vmem:[%s1403_s0 + $0xd8] sm:$0xf]  ;;  %v934_v21 = vld [vmem:[%s1403_s0 + $0x108] sm:$0xf0]  ;;  %v839_v25 = vor.u32 %v933_v13, %v838_v12 }
   0x4   :  { %v247_v8 = vpack.c.b16 %v195_v3, %v195_v3  ;;  %v248_v9 = vpack.c.b16 %v196_v4, %v196_v4  ;;  %v249_v10 = vpack.c.b16 %v197_v5, %v197_v5  ;;  %v250_v11 = vpack.c.b16 %v198_v6, %v198_v6  ;;  %v928_v22 = vld [vmem:[%s1403_s0 + $0xdc] sm:$0xf]  ;;  %v848_v23 = vld [vmem:[%s1403_s0 + $0x10c] sm:$0xf0]  ;;  %v786_v24 = vld [vmem:[%s1403_s0 + $0x68] sm:$0xf] }
   0x5   :  { %v843_v26 = vor.u32 %v927_v14, %v840_v15  ;;  %v920_v27 = vld [vmem:[%s1403_s0 + $0x98] sm:$0xf0]  ;;  %v914_v28 = vld [vmem:[%s1403_s0 + $0x6c] sm:$0xf]  ;;  %v788_v29 = vld [vmem:[%s1403_s0 + $0x9c] sm:$0xf0]  ;;  %v847_v30 = vor.u32 %v934_v21, %v846_v16  ;;  %v851_v31 = vor.u32 %v928_v22, %v848_v23 }
   0x6   :  { %v307_v17 = vand.u32 %v982_v7, %v247_v8  ;;  %v310_v18 = vand.u32 %v982_v7, %v248_v9  ;;  %v313_v19 = vand.u32 %v982_v7, %v249_v10  ;;  %v316_v20 = vand.u32 %v982_v7, %v250_v11  ;;  %v794_v32 = vld [vmem:[%s1403_s0 + $0x70] sm:$0xf]  ;;  %v921_v33 = vld [vmem:[%s1403_s0 + $0xa0] sm:$0xf0]  ;;  %v915_v34 = vld [vmem:[%s1403_s0 + $0x74] sm:$0xf] }
   0x7   :  { %v796_v35 = vld [vmem:[%s1403_s0 + $0xa4] sm:$0xf0]  ;;  %v64_v37 = vld [vmem:[%s1403_s0 + $0x150] sm:$0x11]  ;;  %v787_v40 = vor.u32 %v920_v27, %v786_v24  ;;  %v791_v41 = vor.u32 %v914_v28, %v788_v29  ;;  %v734_v42 = vld [vmem:[%s1403_s0] sm:$0xf]  ;;  %v795_v45 = vor.u32 %v921_v33, %v794_v32 }
   0x8   :  { %349 = vmatpush.bf16.msra.mxu0 %v307_v17  ;;  %362 = vmatpush.bf16.msra.mxu1 %v310_v18  ;;  %v63_v36 = vld [vmem:[%s1403_s0 + $0x148] sm:$0x11]  ;;  %v201_v39 = vunpack.c.l.b16 %v64_v37  ;;  %v907_v43 = vld [vmem:[%s1403_s0 + $0x30] sm:$0xf0]  ;;  %v901_v44 = vld [vmem:[%s1403_s0 + $0x4] sm:$0xf]  ;;  %v799_v46 = vor.u32 %v915_v34, %v796_v35  ;;  %v202_v50 = vunpack.c.h.b16 %v64_v37 }
   0x9   :  { %375 = vmatpush.bf16.msra.mxu2 %v313_v19  ;;  %388 = vmatpush.bf16.msra.mxu3 %v316_v20  ;;  %v199_v38 = vunpack.c.l.b16 %v63_v36  ;;  %v736_v47 = vld [vmem:[%s1403_s0 + $0x34] sm:$0xf0]  ;;  %v742_v48 = vld [vmem:[%s1403_s0 + $0x8] sm:$0xf]  ;;  %v908_v49 = vld [vmem:[%s1403_s0 + $0x38] sm:$0xf0]  ;;  %v200_v51 = vunpack.c.h.b16 %v63_v36  ;;  %v735_v56 = vor.u32 %v907_v43, %v734_v42 }
   0xa   :  { %v902_v52 = vld [vmem:[%s1403_s0 + $0xc] sm:$0xf]  ;;  %v744_v53 = vld [vmem:[%s1403_s0 + $0x3c] sm:$0xf0]  ;;  %v253_v55 = vpack.c.b16 %v201_v39, %v201_v39  ;;  %v739_v57 = vor.u32 %v901_v44, %v736_v47  ;;  %v743_v58 = vor.u32 %v908_v49, %v742_v48  ;;  %v254_v60 = vpack.c.b16 %v202_v50, %v202_v50  ;;  %v935_v1 = vld [vmem:[%s1403_s0 + $0x110] sm:$0xf0] }
   0xb   :  { %v251_v54 = vpack.c.b16 %v199_v38, %v199_v38  ;;  %v747_v59 = vor.u32 %v902_v52, %v744_v53  ;;  %v252_v61 = vpack.c.b16 %v200_v51, %v200_v51  ;;  %v854_v0 = vld [vmem:[%s1403_s0 + $0xe0] sm:$0xf]  ;;  %v862_v2 = vld [vmem:[%s1403_s0 + $0xe8] sm:$0xf]  ;;  %v936_v3 = vld [vmem:[%s1403_s0 + $0x118] sm:$0xf0] }
   0xc   :  { %350 = vmatpush.bf16.msra.mxu0 %v839_v25  ;;  %363 = vmatpush.bf16.msra.mxu1 %v843_v26  ;;  %v325_v63 = vand.u32 %v982_v7, %v253_v55  ;;  %v1083_v4 = vld [vmem:[%s1404_s1] sm:$0xf]  ;;  %v65_v5 = vld [vmem:[%s1403_s0 + $0x158] sm:$0x11]  ;;  %v328_v8 = vand.u32 %v982_v7, %v254_v60  ;;  %v930_v10 = vld [vmem:[%s1403_s0 + $0xec] sm:$0xf]  ;;  %v855_v12 = vor.u32 %v935_v1, %v854_v0 }
   0xd   :  { %376 = vmatpush.bf16.msra.mxu2 %v847_v30  ;;  %389 = vmatpush.bf16.msra.mxu3 %v851_v31  ;;  %v319_v62 = vand.u32 %v982_v7, %v251_v54  ;;  %v66_v6 = vld [vmem:[%s1403_s0 + $0x160] sm:$0x11]  ;;  %v322_v9 = vand.u32 %v982_v7, %v252_v61  ;;  %v863_v13 = vor.u32 %v936_v3, %v862_v2  ;;  %v856_v15 = vld [vmem:[%s1403_s0 + $0x114] sm:$0xf0]  ;;  %v922_v17 = vld [vmem:[%s1403_s0 + $0xa8] sm:$0xf0]  ;;  %v203_v20 = vunpack.c.l.b16 %v65_v5 }
   0xe   :  { %v864_v11 = vld [vmem:[%s1403_s0 + $0x11c] sm:$0xf0]  ;;  %v929_v14 = vld [vmem:[%s1403_s0 + $0xe4] sm:$0xf]  ;;  %v802_v16 = vld [vmem:[%s1403_s0 + $0x78] sm:$0xf]  ;;  %v205_v21 = vunpack.c.l.b16 %v66_v6  ;;  %v206_v32 = vunpack.c.h.b16 %v66_v6  ;;  %v204_v33 = vunpack.c.h.b16 %v65_v5 }
   0xf   :  { %v810_v18 = vld [vmem:[%s1403_s0 + $0x80] sm:$0xf]  ;;  %v923_v19 = vld [vmem:[%s1403_s0 + $0xb0] sm:$0xf0]  ;;  %v867_v22 = vor.u32 %v930_v10, %v864_v11  ;;  %v859_v23 = vor.u32 %v929_v14, %v856_v15  ;;  %v917_v24 = vld [vmem:[%s1403_s0 + $0x84] sm:$0xf]  ;;  %v803_v27 = vor.u32 %v922_v17, %v802_v16  ;;  %v255_v36 = vpack.c.b16 %v203_v20, %v203_v20 }
  0x10   :  { %351 = vmatpush.bf16.msra.mxu0 %v787_v40  ;;  %364 = vmatpush.bf16.msra.mxu1 %v791_v41  ;;  %v812_v25 = vld [vmem:[%s1403_s0 + $0xb4] sm:$0xf0]  ;;  %v916_v26 = vld [vmem:[%s1403_s0 + $0x7c] sm:$0xf]  ;;  %v811_v28 = vor.u32 %v923_v19, %v810_v18  ;;  %v804_v29 = vld [vmem:[%s1403_s0 + $0xac] sm:$0xf0]  ;;  %v257_v37 = vpack.c.b16 %v205_v21, %v205_v21  ;;  %v256_v47 = vpack.c.b16 %v204_v33, %v204_v33 }
  0x11   :  { %377 = vmatpush.bf16.msra.mxu2 %v795_v45  ;;  %390 = vmatpush.bf16.msra.mxu3 %v799_v46  ;;  %v750_v30 = vld [vmem:[%s1403_s0 + $0x10] sm:$0xf]  ;;  %v909_v31 = vld [vmem:[%s1403_s0 + $0x40] sm:$0xf0]  ;;  %v758_v34 = vld [vmem:[%s1403_s0 + $0x18] sm:$0xf]  ;;  %v815_v38 = vor.u32 %v917_v24, %v812_v25  ;;  %v807_v39 = vor.u32 %v916_v26, %v804_v29  ;;  %v258_v46 = vpack.c.b16 %v206_v32, %v206_v32 }
  0x12   :  { %v910_v35 = vld [vmem:[%s1403_s0 + $0x48] sm:$0xf0]  ;;  %v751_v40 = vor.u32 %v909_v31, %v750_v30  ;;  %v904_v41 = vld [vmem:[%s1403_s0 + $0x1c] sm:$0xf]  ;;  %v760_v43 = vld [vmem:[%s1403_s0 + $0x4c] sm:$0xf0]  ;;  %v331_v48 = vand.u32 %v982_v7, %v255_v36  ;;  %v337_v49 = vand.u32 %v982_v7, %v257_v37  ;;  %v334_v55 = vand.u32 %v982_v7, %v256_v47 }
  0x13   :  { %v759_v42 = vor.u32 %v910_v35, %v758_v34  ;;  %v903_v44 = vld [vmem:[%s1403_s0 + $0x14] sm:$0xf]  ;;  %v752_v45 = vld [vmem:[%s1403_s0 + $0x44] sm:$0xf0]  ;;  %v878_v50 = vld [vmem:[%s1403_s0 + $0xf8] sm:$0xf]  ;;  %v763_v52 = vor.u32 %v904_v41, %v760_v43  ;;  %v340_v54 = vand.u32 %v982_v7, %v258_v46 }
  0x14   :  { %352 = vmatpush.bf16.msra.mxu0 %v735_v56  ;;  %365 = vmatpush.bf16.msra.mxu1 %v739_v57  ;;  %v938_v51 = vld [vmem:[%s1403_s0 + $0x128] sm:$0xf0]  ;;  %v755_v53 = vor.u32 %v903_v44, %v752_v45  ;;  %v870_v56 = vld [vmem:[%s1403_s0 + $0xf0] sm:$0xf]  ;;  %v937_v57 = vld [vmem:[%s1403_s0 + $0x120] sm:$0xf0] }
  0x15   :  { %378 = vmatpush.bf16.msra.mxu2 %v743_v58  ;;  %391 = vmatpush.bf16.msra.mxu3 %v747_v59  ;;  %v932_v58 = vld [vmem:[%s1403_s0 + $0xfc] sm:$0xf]  ;;  %v879_v59 = vor.u32 %v938_v51, %v878_v50  ;;  %v880_v60 = vld [vmem:[%s1403_s0 + $0x12c] sm:$0xf0]  ;;  %v931_v61 = vld [vmem:[%s1403_s0 + $0xf4] sm:$0xf]  ;;  %v871_v2 = vor.u32 %v937_v57, %v870_v56 }
  0x16   :  { %v925_v0 = vld [vmem:[%s1403_s0 + $0xc0] sm:$0xf0]  ;;  %v67_v1 = vld [vmem:[%s1403_s0 + $0x168] sm:$0x1]  ;;  %v883_v3 = vor.u32 %v932_v58, %v880_v60  ;;  %v912_v16 = vld [vmem:[%s1403_s0 + $0x58] sm:$0xf0] }
  0x17   :  { %888 = vmatmul.msk.bf16.vlgmr.msra.gmra.mxu0 %vm299_vm1, %v1083_v4  ;;  %889 = vmatmul.msk.bf16.vlgmr.msra.gmra.mxu1 %vm299_vm1, %v1083_v4  ;;  %v818_v6 = vld [vmem:[%s1403_s0 + $0x88] sm:$0xf]  ;;  %v207_v14 = vunpack.c.l.b16 %v67_v1  ;;  %v766_v20 = vld [vmem:[%s1403_s0 + $0x20] sm:$0xf]  ;;  %v911_v21 = vld [vmem:[%s1403_s0 + $0x50] sm:$0xf0] }
  0x18   :  { %401 = vmatpush.bf16.msrb.mxu0 %v319_v62  ;;  %890 = vmatmul.msk.bf16.vlgmr.msra.gmra.mxu2 %vm299_vm1, %v1083_v4  ;;  %v872_v62 = vld [vmem:[%s1403_s0 + $0x124] sm:$0xf0]  ;;  %v776_v24 = vld [vmem:[%s1403_s0 + $0x5c] sm:$0xf0]  ;;  %v905_v25 = vld [vmem:[%s1403_s0 + $0x24] sm:$0xf] }
  0x19   :  { %427 = vmatpush.bf16.msrb.mxu2 %v325_v63  ;;  %891 = vmatmul.msk.bf16.vlgmr.msra.gmra.mxu3 %vm299_vm1, %v1083_v4  ;;  %v826_v63 = vld [vmem:[%s1403_s0 + $0x90] sm:$0xf]  ;;  %v875_v5 = vor.u32 %v931_v61, %v872_v62  ;;  %v828_v11 = vld [vmem:[%s1403_s0 + $0xc4] sm:$0xf0]  ;;  %v768_v26 = vld [vmem:[%s1403_s0 + $0x54] sm:$0xf0] }
  0x1a   :  { %440 = vmatpush.bf16.msrb.mxu3 %v328_v8  ;;  %414 = vmatpush.bf16.msrb.mxu1 %v322_v9  ;;  %v924_v8 = vld [vmem:[%s1403_s0 + $0xb8] sm:$0xf0]  ;;  %v919_v9 = vld [vmem:[%s1403_s0 + $0x94] sm:$0xf]  ;;  %v827_v10 = vor.u32 %v925_v0, %v826_v63  ;;  %v774_v15 = vld [vmem:[%s1403_s0 + $0x28] sm:$0xf]  ;;  %v771_v30 = vor.u32 %v905_v25, %v768_v26 }
  0x1b   :  { %v819_v17 = vor.u32 %v924_v8, %v818_v6  ;;  %v831_v18 = vor.u32 %v919_v9, %v828_v11  ;;  %v886_v32 = vld [vmem:[%s1403_s0 + $0x100] sm:$0xf]  ;;  %v939_v33 = vld [vmem:[%s1403_s0 + $0x130] sm:$0xf0]  ;;  %v834_v35 = vld [vmem:[%s1403_s0 + $0x98] sm:$0xf] }
  0x1c   :  { %402 = vmatpush.bf16.msrb.mxu0 %v855_v12  ;;  %v918_v12 = vld [vmem:[%s1403_s0 + $0x8c] sm:$0xf]  ;;  %v887_v34 = vor.u32 %v939_v33, %v886_v32  ;;  %v782_v37 = vld [vmem:[%s1403_s0 + $0x30] sm:$0xf] }
  0x1d   :  { %428 = vmatpush.bf16.msrb.mxu2 %v863_v13  ;;  %v820_v13 = vld [vmem:[%s1403_s0 + $0xbc] sm:$0xf0] }
  0x1e   :  { %441 = vmatpush.bf16.msrb.mxu3 %v867_v22  ;;  %415 = vmatpush.bf16.msrb.mxu1 %v859_v23  ;;  %v823_v19 = vor.u32 %v918_v12, %v820_v13  ;;  %v906_v22 = vld [vmem:[%s1403_s0 + $0x2c] sm:$0xf]  ;;  %v775_v23 = vor.u32 %v912_v16, %v774_v15 }
  0x1f   :  { %v779_v29 = vor.u32 %v906_v22, %v776_v24 }
  0x20   :  { %403 = vmatpush.bf16.msrb.mxu0 %v803_v27  ;;  %v259_v27 = vpack.c.b16 %v207_v14, %v207_v14 }
  0x21   :  { %429 = vmatpush.bf16.msrb.mxu2 %v811_v28  ;;  %v767_v28 = vor.u32 %v911_v21, %v766_v20 }
  0x22   :  { %442 = vmatpush.bf16.msrb.mxu3 %v815_v38  ;;  %416 = vmatpush.bf16.msrb.mxu1 %v807_v39  ;;  %v343_v31 = vand.u32 %v982_v7, %v259_v27  ;;  %v926_v7 = vld [vmem:[%s1403_s0 + $0xc8] sm:$0xf0]  ;;  %v913_v38 = vld [vmem:[%s1403_s0 + $0x60] sm:$0xf0] }
  0x23   :  { %v835_v36 = vor.u32 %v926_v7, %v834_v35  ;;  %v783_v39 = vor.u32 %v913_v38, %v782_v37 }
  0x24   :  { %404 = vmatpush.bf16.msrb.mxu0 %v751_v40 }
  0x25   :  { %430 = vmatpush.bf16.msrb.mxu2 %v759_v42 }
  0x26   :  { %443 = vmatpush.bf16.msrb.mxu3 %v763_v52  ;;  %417 = vmatpush.bf16.msrb.mxu1 %v755_v53 }
  0x27   :  { %892 = vmatmul.msk.bf16.vlgmr.msrb.gmra.mxu0 %vm299_vm1, %v1083_v4 }
  0x28   :  { %453 = vmatpush.bf16.msra.mxu0 %v331_v48  ;;  %894 = vmatmul.msk.bf16.vlgmr.msrb.gmra.mxu2 %vm299_vm1, %v1083_v4 }
  0x29   :  { %479 = vmatpush.bf16.msra.mxu2 %v337_v49  ;;  %895 = vmatmul.msk.bf16.vlgmr.msrb.gmra.mxu3 %vm299_vm1, %v1083_v4 }
  0x2a   :  { %492 = vmatpush.bf16.msra.mxu3 %v340_v54  ;;  %466 = vmatpush.bf16.msra.mxu1 %v334_v55 }
  0x2b   :  { %893 = vmatmul.msk.bf16.vlgmr.msrb.gmra.mxu1 %vm299_vm1, %v1083_v4 }
  0x2c   :  { %454 = vmatpush.bf16.msra.mxu0 %v871_v2 }
  0x2d   :  { %480 = vmatpush.bf16.msra.mxu2 %v879_v59 }
  0x2e   :  { %493 = vmatpush.bf16.msra.mxu3 %v883_v3  ;;  %467 = vmatpush.bf16.msra.mxu1 %v875_v5 }
  0x30   :  { %455 = vmatpush.bf16.msra.mxu0 %v819_v17 }
  0x31   :  { %481 = vmatpush.bf16.msra.mxu2 %v827_v10 }
  0x32   :  { %494 = vmatpush.bf16.msra.mxu3 %v831_v18  ;;  %468 = vmatpush.bf16.msra.mxu1 %v823_v19 }
  0x34   :  { %456 = vmatpush.bf16.msra.mxu0 %v767_v28 }
  0x35   :  { %482 = vmatpush.bf16.msra.mxu2 %v775_v23 }
  0x36   :  { %495 = vmatpush.bf16.msra.mxu3 %v779_v29  ;;  %469 = vmatpush.bf16.msra.mxu1 %v771_v30 }
  0x37   :  { %896 = vmatmul.msk.bf16.vlgmr.msra.gmra.mxu0 %vm299_vm1, %v1083_v4 }
  0x38   :  { %505 = vmatpush.bf16.msrb.mxu0 %v343_v31  ;;  %898 = vmatmul.msk.bf16.vlgmr.msra.gmra.mxu2 %vm299_vm1, %v1083_v4 }
  0x39   :  { %899 = vmatmul.msk.bf16.vlgmr.msra.gmra.mxu3 %vm299_vm1, %v1083_v4 }
  0x3b   :  { %897 = vmatmul.msk.bf16.vlgmr.msra.gmra.mxu1 %vm299_vm1, %v1083_v4 }
  0x3c   :  { %506 = vmatpush.bf16.msrb.mxu0 %v887_v34 }
  0x40   :  { %507 = vmatpush.bf16.msrb.mxu0 %v835_v36 }
  0x44   :  { %508 = vmatpush.bf16.msrb.mxu0 %v783_v39 }
  0x47   :  { %900 = vmatmul.msk.bf16.vlgmr.msrb.gmra.mxu0 %vm299_vm1, %v1083_v4 }
  0x94   :  { %v1277_v40 = vpop.f32.mrf.mxu0  ;;  %v1279_v41 = vpop.f32.mrf.mxu1 }
  0x95   :  { %v514_v49 = vadd.f32 %v1279_v41, %v1277_v40  ;;  %v530_v51 = vmul.f32 %v1277_v40, %v1277_v40  ;;  %v531_v52 = vmul.f32 %v1279_v41, %v1279_v41 }
  0x97   :  { %v543_v58 = vadd.f32 %v531_v52, %v530_v51  ;;  %v950_v51 = vmov 1  }
  0x98   :  { %946 = vset.pattern.permute.xlu0 %v950_v51 }
  0x9b   :  { %v1281_v42 = vpop.f32.mrf.mxu2 }
  0x9c   :  { %v1283_v43 = vpop.f32.mrf.mxu3  ;;  %v356_v44 = vpop.f32.mrf.mxu0  ;;  %v515_v4 = vadd.f32 %v514_v49, %v1281_v42  ;;  %v532_v55 = vmul.f32 %v1281_v42, %v1281_v42 }
  0x9d   :  { %v369_v45 = vpop.f32.mrf.mxu1  ;;  %v533_v62 = vmul.f32 %v1283_v43, %v1283_v43 }
  0x9e   :  { %v516_v56 = vadd.f32 %v515_v4, %v1283_v43  ;;  %v544_v61 = vadd.f32 %v543_v58, %v532_v55 }
  0xa0   :  { %v545_v3 = vadd.f32 %v544_v61, %v533_v62 }
  0xa3   :  { %v382_v46 = vpop.f32.mrf.mxu2 }
  0xa4   :  { %v395_v47 = vpop.f32.mrf.mxu3  ;;  %v1285_v48 = vpop.f32.mrf.mxu0 }
  0xa5   :  { %v517_v59 = vadd.f32 %v516_v56, %v1285_v48  ;;  %v534_v63 = vmul.f32 %v1285_v48, %v1285_v48 }
  0xa7   :  { %v546_v8 = vadd.f32 %v545_v3, %v534_v63  ;;  %v574_v63 = vld [vmem:[%s1405_s2] sm:$0xff] }
  0xa8   :  { %v1289_v50 = vpop.f32.mrf.mxu1 }
  0xa9   :  { %v518_v0 = vadd.f32 %v517_v59, %v1289_v50  ;;  %v535_v9 = vmul.f32 %v1289_v50, %v1289_v50 }
  0xab   :  { %v1296_v53 = vpop.f32.mrf.mxu2  ;;  %v547_v13 = vadd.f32 %v546_v8, %v535_v9  ;;  %v579_v8 = vlaneseq }
  0xac   :  { %v1298_v54 = vpop.f32.mrf.mxu3  ;;  %v408_v57 = vpop.f32.mrf.mxu0  ;;  %v519_v5 = vadd.f32 %v518_v0, %v1296_v53  ;;  %v536_v11 = vmul.f32 %v1296_v53, %v1296_v53 }
  0xad   :  { %v537_v18 = vmul.f32 %v1298_v54, %v1298_v54 }
  0xae   :  { %v520_v12 = vadd.f32 %v519_v5, %v1298_v54  ;;  %v548_v17 = vadd.f32 %v547_v13, %v536_v11  ;;  %v580_v11 = vand.u32 127, %v579_v8 }
  0xb0   :  { %v421_v60 = vpop.f32.mrf.mxu1  ;;  %v549_v23 = vadd.f32 %v548_v17, %v537_v18 }
  0xb3   :  { %v434_v1 = vpop.f32.mrf.mxu2 }
  0xb4   :  { %v447_v2 = vpop.f32.mrf.mxu3  ;;  %v1310_v6 = vpop.f32.mrf.mxu0 }
  0xb5   :  { %v521_v14 = vadd.f32 %v520_v12, %v1310_v6  ;;  %v538_v20 = vmul.f32 %v1310_v6, %v1310_v6  ;;  %v575_v2 = vld [vmem:[%s1406_s3] sm:$0xff] }
  0xb7   :  { %v550_v25 = vadd.f32 %v549_v23, %v538_v20 }
  0xb8   :  { %v1314_v10 = vpop.f32.mrf.mxu1 }
  0xb9   :  { %v522_v21 = vadd.f32 %v521_v14, %v1314_v10  ;;  %v539_v26 = vmul.f32 %v1314_v10, %v1314_v10 }
  0xbb   :  { %v1320_v15 = vpop.f32.mrf.mxu2  ;;  %v551_v33 = vadd.f32 %v550_v25, %v539_v26 }
  0xbc   :  { %v1322_v16 = vpop.f32.mrf.mxu3  ;;  %v460_v19 = vpop.f32.mrf.mxu0  ;;  %v523_v24 = vadd.f32 %v522_v21, %v1320_v15  ;;  %v540_v29 = vmul.f32 %v1320_v15, %v1320_v15 }
  0xbd   :  { %v541_v7 = vmul.f32 %v1322_v16, %v1322_v16 }
  0xbe   :  { %v524_v31 = vadd.f32 %v523_v24, %v1322_v16  ;;  %v552_v36 = vadd.f32 %v551_v33, %v540_v29 }
  0xc0   :  { %v473_v22 = vpop.f32.mrf.mxu1  ;;  %v553_v39 = vadd.f32 %v552_v36, %v541_v7 }
  0xc3   :  { %v486_v27 = vpop.f32.mrf.mxu2 }
  0xc4   :  { %v499_v28 = vpop.f32.mrf.mxu3  ;;  %v1334_v30 = vpop.f32.mrf.mxu0  ;;  %v586_v27 = vadd.s32 768, %v580_v11 }
  0xc5   :  { %v526_v32 = vsel %vm525_vm2, %v1334_v30, 0.0  ;;  %v542_v35 = vmul.f32 %v1334_v30, %v1334_v30 }
  0xc6   :  { %v527_v34 = vadd.f32 %v526_v32, %v524_v31  ;;  %vm609_vm6 = vcmp.ge.s32.totalorder %v586_v27, 784 }
  0xc7   :  { %v554_v37 = vsel %vm525_vm2, %v542_v35, 0.0 }
  0xc8   :  { %528 = vadd.xlane.f32.xlu0 %v527_v34  ;;  %v555_v44 = vadd.f32 %v554_v37, %v553_v39 }
  0xcc   :  { %v512_v38 = vpop.f32.mrf.mxu0 }
  0xd0   :  { %556 = vadd.xlane.f32.xlu0 %v555_v44 }
 0x13b   :  { %v529_v45 = vpop.xlane.xlu0 %528 }
 0x13c   :  { %v558_v46 = vmul.f32 0.0006377551, %v529_v45 }
 0x13e   :  { %v560_v49 = vmul.f32 %v558_v46, %v558_v46 }
 0x143   :  { %v557_v47 = vpop.xlane.xlu0 %556 }
 0x144   :  { %v559_v4 = vmul.f32 0.0006377551, %v557_v47 }
 0x146   :  { %v561_v52 = vsub.f32 %v559_v4, %v560_v49 }
 0x148   :  { %v562_v55 = vmax.f32 %v561_v52, 0.0 }
 0x14a   :  { %v563_v56 = vadd.f32 1e-05, %v562_v55 }
 0x14c   :  { %947 = vrsqrt.f32 %v563_v56  ;;  %vm570_vm4 = vweird.f32 %v563_v56 }
 0x152   :  { %v948_v57 = vpop.eup %947 }
 0x153   :  { %v565_v58 = vmul.f32 %v948_v57, %v563_v56  ;;  %vm571_vm3 = vweird.f32 %v948_v57 }
 0x154   :  { %vm572_vm5 = vmor %vm570_vm4, %vm571_vm3 }
 0x155   :  { %v566_v59 = vmul.f32 %v948_v57, %v565_v58 }
 0x157   :  { %v567_v60 = vmul.f32 0.5, %v566_v59 }
 0x159   :  { %v568_v61 = vsub.f32 1.5, %v567_v60 }
 0x15b   :  { %v569_v62 = vmul.f32 %v948_v57, %v568_v61 }
 0x15d   :  { %v573_v0 = vsel %vm572_vm5, %v948_v57, %v569_v62 }
 0x15e   :  { %v576_v1 = vmul.f32 %v574_v63, %v573_v0 }
 0x160   :  { %595 = vperm.xlu1 %942, %v576_v1   ;;  %v577_v3 = vmul.f32 %v576_v1, %v558_v46 }
 0x162   :  { %v578_v5 = vsub.f32 %v575_v2, %v577_v3 }
 0x164   :  { %600 = vperm.xlu2 %944, %v578_v5  }
 0x168   :  { %943 = vset.pattern.permute.xlu1 %v950_v51 }
 0x169   :  { %643 = vperm.xlu1 %943, %v576_v1  }
 0x16c   :  { %945 = vset.pattern.permute.xlu2 %v950_v51 }
 0x16d   :  { %660 = vperm.xlu2 %945, %v578_v5  }
 0x1be   :  { %v601_v9 = vpop.permute.xlu2 %600 }
 0x1d2   :  { %v596_v12 = vpop.permute.xlu1 %595 }
 0x1d3   :  { %v676_v13 = vmul.f32 %v596_v12, %v1277_v40  ;;  %v677_v14 = vmul.f32 %v596_v12, %v1279_v41  ;;  %v678_v17 = vmul.f32 %v596_v12, %v1281_v42  ;;  %v679_v18 = vmul.f32 %v596_v12, %v1283_v43  ;;  %v661_v43 = vpop.permute.xlu2 %660 }
 0x1d4   :  { %v680_v19 = vmul.f32 %v596_v12, %v1285_v48  ;;  %v681_v20 = vmul.f32 %v596_v12, %v1289_v50  ;;  %v669_v38 = vsel %vm609_vm6, %v661_v43, %v601_v9 }
 0x1d5   :  { %v689_v21 = vadd.f32 %v676_v13, %v601_v9  ;;  %v690_v22 = vadd.f32 %v677_v14, %v601_v9  ;;  %v691_v23 = vadd.f32 %v678_v17, %v601_v9  ;;  %v692_v24 = vadd.f32 %v679_v18, %v601_v9 }
 0x1d6   :  { %v693_v25 = vadd.f32 %v680_v19, %v601_v9  ;;  %v694_v26 = vadd.f32 %v681_v20, %v601_v9 }
 0x1d7   :  { %v702_v28 = vmax.f32 %v689_v21, 0.0  ;;  %v703_v29 = vmax.f32 %v690_v22, 0.0  ;;  %v704_v40 = vmax.f32 %v691_v23, 0.0  ;;  %v705_v31 = vmax.f32 %v692_v24, 0.0 }
 0x1d8   :  { %v706_v41 = vmax.f32 %v693_v25, 0.0  ;;  %v707_v42 = vmax.f32 %v694_v26, 0.0 }
 0x1d9   :  { %715 = vst [vmem:[%s1407_s4] sm:$0xff] %v702_v28 }
 0x1da   :  { %716 = vst [vmem:[%s1407_s4 + $0x8] sm:$0xff] %v703_v29 }
 0x1db   :  { %717 = vst [vmem:[%s1407_s4 + $0x10] sm:$0xff] %v704_v40  ;;  %v644_v48 = vpop.permute.xlu1 %643 }
 0x1dc   :  { %718 = vst [vmem:[%s1407_s4 + $0x18] sm:$0xff] %v705_v31  ;;  %v652_v50 = vsel %vm609_vm6, %v644_v48, %v596_v12  ;;  %v683_v32 = vmul.f32 %v644_v48, %v1298_v54  ;;  %v684_v33 = vmul.f32 %v644_v48, %v1310_v6  ;;  %v685_v34 = vmul.f32 %v644_v48, %v1314_v10 }
 0x1dd   :  { %719 = vst [vmem:[%s1407_s4 + $0x20] sm:$0xff] %v706_v41  ;;  %v682_v35 = vmul.f32 %v652_v50, %v1296_v53  ;;  %v686_v7 = vmul.f32 %v644_v48, %v1320_v15  ;;  %v687_v36 = vmul.f32 %v644_v48, %v1322_v16  ;;  %v688_v37 = vmul.f32 %v644_v48, %v1334_v30 }
 0x1de   :  { %720 = vst [vmem:[%s1407_s4 + $0x28] sm:$0xff] %v707_v42  ;;  %v696_v54 = vadd.f32 %v683_v32, %v661_v43  ;;  %v697_v6 = vadd.f32 %v684_v33, %v661_v43  ;;  %v698_v10 = vadd.f32 %v685_v34, %v661_v43 }
 0x1df   :  { %v695_v39 = vadd.f32 %v682_v35, %v669_v38  ;;  %v699_v44 = vadd.f32 %v686_v7, %v661_v43  ;;  %v700_v45 = vadd.f32 %v687_v36, %v661_v43  ;;  %v701_v46 = vadd.f32 %v688_v37, %v661_v43 }
 0x1e0   :  { %v709_v47 = vmax.f32 %v696_v54, 0.0  ;;  %v710_v53 = vmax.f32 %v697_v6, 0.0  ;;  %v711_v15 = vmax.f32 %v698_v10, 0.0 }
 0x1e1   :  { %v708_v49 = vmax.f32 %v695_v39, 0.0  ;;  %v712_v4 = vmax.f32 %v699_v44, 0.0  ;;  %v713_v16 = vmax.f32 %v700_v45, 0.0  ;;  %v714_v30 = vmax.f32 %v701_v46, 0.0 }
 0x1e2   :  { %722 = vst [vmem:[%s1407_s4 + $0x38] sm:$0xff] %v709_v47 }
 0x1e3   :  { %721 = vst [vmem:[%s1407_s4 + $0x30] sm:$0xff] %v708_v49 }
 0x1e4   :  { %723 = vst [vmem:[%s1407_s4 + $0x40] sm:$0xff] %v710_v53 }
 0x1e5   :  { %724 = vst [vmem:[%s1407_s4 + $0x48] sm:$0xff] %v711_v15 }
 0x1e6   :  { %725 = vst [vmem:[%s1407_s4 + $0x50] sm:$0xff] %v712_v4 }
 0x1e7   :  { %726 = vst [vmem:[%s1407_s4 + $0x58] sm:$0xff] %v713_v16 }
 0x1e8   :  { %727 = vst.msk [vmem:[%s1407_s4 + $0x60] sm:$0xff] %vm525_vm2, %v714_v30 }

// kernel: generator_forward.11
= control target key start
LH: loop header
LB: loop body
LE: loop exit
PB: predicated region body
PF: predicated region fallthrough
CT: control target
= control target key end

     0   :  { %vm137_vm0 = vcmask 1043456   ;;  %vm133_vm1 = vcmask 588800   ;;  %s698_s0 = inlined_call_operand.vmem [shape: bf16[72,512], index: 0, kind: input, shape index: {}]   ;;  %s699_s1 = inlined_call_operand.vmem [shape: bf16[16,72], index: 1, kind: input, shape index: {}]   ;;  %s700_s2 = inlined_call_operand.vmem [shape: f32[16,2], index: 2, kind: input, shape index: {}]   ;;  %s701_s3 = inlined_call_operand.vmem [shape: f32[16,2], index: 3, kind: input, shape index: {}]   ;;  %s702_s4 = inlined_call_operand.vmem [shape: f32[1,16,512], index: 4, kind: output, shape index: {}]  }
   0x1   :  { %v36_v0 = vld [vmem:[%s698_s0 + $0x80] sm:$0xff]  ;;  %v37_v1 = vld [vmem:[%s698_s0 + $0x88] sm:$0xff]  ;;  %v460_v7 = vld [vmem:[%s698_s0 + $0x6c] sm:$0xf0] }
   0x2   :  { %v93_v2 = vunpack.c.l.b16 %v36_v0  ;;  %v94_v3 = vunpack.c.h.b16 %v36_v0  ;;  %v95_v4 = vunpack.c.l.b16 %v37_v1  ;;  %v96_v5 = vunpack.c.h.b16 %v37_v1  ;;  %v427_v6 = vld [vmem:[%s698_s0 + $0x60] sm:$0xf]  ;;  %v458_v12 = vld [vmem:[%s698_s0 + $0x64] sm:$0xf]  ;;  %v429_v13 = vld [vmem:[%s698_s0 + $0x70] sm:$0xf0] }
   0x3   :  { %v435_v14 = vld [vmem:[%s698_s0 + $0x68] sm:$0xf]  ;;  %v461_v15 = vld [vmem:[%s698_s0 + $0x74] sm:$0xf0]  ;;  %v459_v16 = vld [vmem:[%s698_s0 + $0x6c] sm:$0xf]  ;;  %v428_v22 = vor.u32 %v460_v7, %v427_v6  ;;  %v432_v23 = vor.u32 %v458_v12, %v429_v13 }
   0x4   :  { %v113_v8 = vpack.c.b16 %v93_v2, %v93_v2  ;;  %v114_v9 = vpack.c.b16 %v94_v3, %v94_v3  ;;  %v115_v10 = vpack.c.b16 %v95_v4, %v95_v4  ;;  %v116_v11 = vpack.c.b16 %v96_v5, %v96_v5  ;;  %v437_v17 = vld [vmem:[%s698_s0 + $0x78] sm:$0xf0]  ;;  %v411_v24 = vld [vmem:[%s698_s0 + $0x40] sm:$0xf]  ;;  %v456_v25 = vld [vmem:[%s698_s0 + $0x4c] sm:$0xf0] }
   0x5   :  { %v436_v26 = vor.u32 %v461_v15, %v435_v14  ;;  %v440_v27 = vor.u32 %v459_v16, %v437_v17  ;;  %v454_v28 = vld [vmem:[%s698_s0 + $0x44] sm:$0xf]  ;;  %v413_v29 = vld [vmem:[%s698_s0 + $0x50] sm:$0xf0]  ;;  %v419_v30 = vld [vmem:[%s698_s0 + $0x48] sm:$0xf]  ;;  %v412_v34 = vor.u32 %v456_v25, %v411_v24 }
   0x6   :  { %v139_v18 = vsel %vm137_vm0, %v113_v8, 0  ;;  %v142_v19 = vsel %vm137_vm0, %v114_v9, 0  ;;  %v145_v20 = vsel %vm137_vm0, %v115_v10, 0  ;;  %v148_v21 = vsel %vm137_vm0, %v116_v11, 0  ;;  %v457_v31 = vld [vmem:[%s698_s0 + $0x54] sm:$0xf0] }
   0x7   :  { %153 = vmatpush.bf16.msra.mxu0 %v139_v18  ;;  %167 = vmatpush.bf16.msra.mxu1 %v142_v19  ;;  %v455_v32 = vld [vmem:[%s698_s0 + $0x4c] sm:$0xf]  ;;  %v421_v33 = vld [vmem:[%s698_s0 + $0x58] sm:$0xf0]  ;;  %v416_v35 = vor.u32 %v454_v28, %v413_v29  ;;  %v395_v36 = vld [vmem:[%s698_s0 + $0x20] sm:$0xf]  ;;  %v420_v38 = vor.u32 %v457_v31, %v419_v30 }
   0x8   :  { %181 = vmatpush.bf16.msra.mxu2 %v145_v20  ;;  %195 = vmatpush.bf16.msra.mxu3 %v148_v21  ;;  %v452_v37 = vld [vmem:[%s698_s0 + $0x2c] sm:$0xf0]  ;;  %v424_v39 = vor.u32 %v455_v32, %v421_v33  ;;  %v450_v40 = vld [vmem:[%s698_s0 + $0x24] sm:$0xf]  ;;  %v397_v41 = vld [vmem:[%s698_s0 + $0x30] sm:$0xf0] }
   0x9   :  { %v403_v42 = vld [vmem:[%s698_s0 + $0x28] sm:$0xf]  ;;  %v453_v43 = vld [vmem:[%s698_s0 + $0x34] sm:$0xf0]  ;;  %v451_v44 = vld [vmem:[%s698_s0 + $0x2c] sm:$0xf]  ;;  %v396_v46 = vor.u32 %v452_v37, %v395_v36  ;;  %v400_v47 = vor.u32 %v450_v40, %v397_v41 }
   0xa   :  { %v405_v45 = vld [vmem:[%s698_s0 + $0x38] sm:$0xf0]  ;;  %v379_v48 = vld [vmem:[%s698_s0] sm:$0xf]  ;;  %v448_v49 = vld [vmem:[%s698_s0 + $0xc] sm:$0xf0]  ;;  %v404_v50 = vor.u32 %v453_v43, %v403_v42 }
   0xb   :  { %154 = vmatpush.bf16.msra.mxu0 %v428_v22  ;;  %168 = vmatpush.bf16.msra.mxu1 %v432_v23  ;;  %v408_v51 = vor.u32 %v451_v44, %v405_v45  ;;  %v446_v52 = vld [vmem:[%s698_s0 + $0x4] sm:$0xf]  ;;  %v381_v53 = vld [vmem:[%s698_s0 + $0x10] sm:$0xf0]  ;;  %v387_v54 = vld [vmem:[%s698_s0 + $0x8] sm:$0xf]  ;;  %v380_v58 = vor.u32 %v448_v49, %v379_v48 }
   0xc   :  { %182 = vmatpush.bf16.msra.mxu2 %v436_v26  ;;  %196 = vmatpush.bf16.msra.mxu3 %v440_v27  ;;  %v449_v55 = vld [vmem:[%s698_s0 + $0x14] sm:$0xf0]  ;;  %v447_v56 = vld [vmem:[%s698_s0 + $0xc] sm:$0xf]  ;;  %v389_v57 = vld [vmem:[%s698_s0 + $0x18] sm:$0xf0]  ;;  %v384_v59 = vor.u32 %v446_v52, %v381_v53 }
   0xd   :  { %v388_v60 = vor.u32 %v449_v55, %v387_v54  ;;  %v392_v61 = vor.u32 %v447_v56, %v389_v57  ;;  %v445_v62 = vld [vmem:[%s699_s1] sm:$0xff]  ;;  %v474_v27 = vmov 1   ;;  %v475_v28 = vmov 0  }
   0xe   :  { %465 = vset.pattern.permute.xlu0 %v474_v27  ;;  %464 = vset.pattern.permute.xlu2 %v475_v28  ;;  %v266_v53 = vld [vmem:[%s700_s2] sm:$0xff] }
   0xf   :  { %155 = vmatpush.bf16.msra.mxu0 %v412_v34  ;;  %169 = vmatpush.bf16.msra.mxu1 %v416_v35 }
  0x10   :  { %183 = vmatpush.bf16.msra.mxu2 %v420_v38  ;;  %197 = vmatpush.bf16.msra.mxu3 %v424_v39 }
  0x11   :  { %466 = vset.pattern.permute.xlu1 %v474_v27 }
  0x13   :  { %156 = vmatpush.bf16.msra.mxu0 %v396_v46  ;;  %170 = vmatpush.bf16.msra.mxu1 %v400_v47 }
  0x14   :  { %184 = vmatpush.bf16.msra.mxu2 %v404_v50  ;;  %198 = vmatpush.bf16.msra.mxu3 %v408_v51 }
  0x17   :  { %157 = vmatpush.bf16.msra.mxu0 %v380_v58  ;;  %171 = vmatpush.bf16.msra.mxu1 %v384_v59 }
  0x18   :  { %185 = vmatpush.bf16.msra.mxu2 %v388_v60  ;;  %199 = vmatpush.bf16.msra.mxu3 %v392_v61  ;;  %v267_v60 = vld [vmem:[%s700_s2 + $0x8] sm:$0xff] }
  0x1a   :  { %441 = vmatmul.msk.bf16.vlgmr.msra.gmra.mxu0 %vm133_vm1, %v445_v62  ;;  %442 = vmatmul.msk.bf16.vlgmr.msra.gmra.mxu1 %vm133_vm1, %v445_v62 }
  0x1b   :  { %443 = vmatmul.msk.bf16.vlgmr.msra.gmra.mxu2 %vm133_vm1, %v445_v62  ;;  %444 = vmatmul.msk.bf16.vlgmr.msra.gmra.mxu3 %vm133_vm1, %v445_v62 }
  0x97   :  { %v610_v63 = vpop.f32.mrf.mxu0  ;;  %v612_v0 = vpop.f32.mrf.mxu1 }
  0x98   :  { %v216_v1 = vmul.f32 %v610_v63, %v610_v63  ;;  %v217_v2 = vmul.f32 %v612_v0, %v612_v0  ;;  %v206_v3 = vadd.f32 %v612_v0, %v610_v63 }
  0x9a   :  { %v224_v4 = vadd.f32 %v217_v2, %v216_v1  ;;  %v268_v2 = vld [vmem:[%s701_s3] sm:$0xff] }
  0x9e   :  { %v620_v5 = vpop.f32.mrf.mxu2  ;;  %v622_v6 = vpop.f32.mrf.mxu3 }
  0x9f   :  { %v218_v7 = vmul.f32 %v620_v5, %v620_v5  ;;  %v207_v8 = vadd.f32 %v206_v3, %v620_v5  ;;  %v219_v9 = vmul.f32 %v622_v6, %v622_v6  ;;  %v629_v10 = vpop.f32.mrf.mxu0  ;;  %v631_v11 = vpop.f32.mrf.mxu1 }
  0xa0   :  { %v220_v14 = vmul.f32 %v629_v10, %v629_v10  ;;  %v221_v15 = vmul.f32 %v631_v11, %v631_v11  ;;  %v211_v17 = vadd.f32 %v631_v11, %v629_v10 }
  0xa1   :  { %v208_v12 = vadd.f32 %v207_v8, %v622_v6  ;;  %v225_v13 = vadd.f32 %v224_v4, %v218_v7  ;;  %v269_v7 = vld [vmem:[%s701_s3 + $0x8] sm:$0xff] }
  0xa2   :  { %v229_v20 = vadd.f32 %v221_v15, %v220_v14 }
  0xa3   :  { %209 = vadd.xlane.f32.xlu0 %v208_v12  ;;  %v226_v16 = vadd.f32 %v225_v13, %v219_v9 }
  0xa5   :  { %227 = vadd.xlane.f32.xlu1 %v226_v16 }
  0xa6   :  { %v640_v18 = vpop.f32.mrf.mxu2  ;;  %v642_v19 = vpop.f32.mrf.mxu3 }
  0xa7   :  { %v212_v21 = vadd.f32 %v211_v17, %v640_v18  ;;  %v222_v22 = vmul.f32 %v640_v18, %v640_v18  ;;  %v223_v23 = vmul.f32 %v642_v19, %v642_v19 }
  0xa9   :  { %v213_v24 = vadd.f32 %v212_v21, %v642_v19  ;;  %v230_v25 = vadd.f32 %v229_v20, %v222_v22 }
  0xab   :  { %214 = vadd.xlane.f32.xlu0 %v213_v24  ;;  %v231_v26 = vadd.f32 %v230_v25, %v223_v23 }
  0xad   :  { %232 = vadd.xlane.f32.xlu1 %v231_v26 }
 0x116   :  { %v210_v29 = vpop.xlane.xlu0 %209 }
 0x117   :  { %v234_v30 = vmul.f32 0.001953125, %v210_v29 }
 0x118   :  { %v228_v31 = vpop.xlane.xlu1 %227 }
 0x119   :  { %v238_v32 = vmul.f32 %v234_v30, %v234_v30  ;;  %v236_v33 = vmul.f32 0.001953125, %v228_v31 }
 0x11b   :  { %v240_v34 = vsub.f32 %v236_v33, %v238_v32 }
 0x11d   :  { %v242_v35 = vmax.f32 %v240_v34, 0.0 }
 0x11e   :  { %v215_v36 = vpop.xlane.xlu0 %214 }
 0x11f   :  { %v244_v37 = vadd.f32 1e-05, %v242_v35  ;;  %v235_v38 = vmul.f32 0.001953125, %v215_v36 }
 0x120   :  { %v233_v39 = vpop.xlane.xlu1 %232 }
 0x121   :  { %470 = vrsqrt.f32 %v244_v37  ;;  %v239_v40 = vmul.f32 %v235_v38, %v235_v38  ;;  %v237_v41 = vmul.f32 0.001953125, %v233_v39  ;;  %vm252_vm3 = vweird.f32 %v244_v37 }
 0x123   :  { %v241_v42 = vsub.f32 %v237_v41, %v239_v40 }
 0x125   :  { %v243_v43 = vmax.f32 %v241_v42, 0.0 }
 0x127   :  { %v471_v44 = vpop.eup %470  ;;  %v245_v45 = vadd.f32 1e-05, %v243_v43 }
 0x128   :  { %v247_v46 = vmul.f32 %v471_v44, %v244_v37  ;;  %vm253_vm2 = vweird.f32 %v471_v44 }
 0x129   :  { %472 = vrsqrt.f32 %v245_v45  ;;  %vm254_vm4 = vmor %vm252_vm3, %vm253_vm2  ;;  %vm262_vm6 = vweird.f32 %v245_v45 }
 0x12a   :  { %v248_v47 = vmul.f32 %v471_v44, %v247_v46 }
 0x12c   :  { %v249_v48 = vmul.f32 0.5, %v248_v47 }
 0x12e   :  { %v250_v49 = vsub.f32 1.5, %v249_v48 }
 0x12f   :  { %v473_v50 = vpop.eup %472 }
 0x130   :  { %v257_v51 = vmul.f32 %v473_v50, %v245_v45  ;;  %v251_v52 = vmul.f32 %v471_v44, %v250_v49  ;;  %vm263_vm5 = vweird.f32 %v473_v50 }
 0x131   :  { %vm264_vm7 = vmor %vm262_vm6, %vm263_vm5 }
 0x132   :  { %v258_v54 = vmul.f32 %v473_v50, %v257_v51  ;;  %v255_v55 = vsel %vm254_vm4, %v471_v44, %v251_v52 }
 0x133   :  { %v270_v56 = vmul.f32 %v266_v53, %v255_v55 }
 0x134   :  { %v259_v57 = vmul.f32 0.5, %v258_v54 }
 0x135   :  { %283 = vperm.xlu2 %464, %v270_v56   ;;  %314 = vperm.xlu0 %465, %v270_v56   ;;  %v272_v1 = vmul.f32 %v270_v56, %v234_v30 }
 0x136   :  { %v260_v58 = vsub.f32 1.5, %v259_v57 }
 0x137   :  { %v274_v3 = vsub.f32 %v268_v2, %v272_v1 }
 0x138   :  { %v261_v59 = vmul.f32 %v473_v50, %v260_v58 }
 0x13a   :  { %v265_v61 = vsel %vm264_vm7, %v473_v50, %v261_v59 }
 0x13b   :  { %v271_v62 = vmul.f32 %v267_v60, %v265_v61 }
 0x13d   :  { %318 = vperm.xlu1 %466, %v271_v62   ;;  %288 = vperm.xlu2 %464, %v271_v62   ;;  %v273_v4 = vmul.f32 %v271_v62, %v235_v38 }
 0x13f   :  { %v275_v8 = vsub.f32 %v269_v7, %v273_v4 }
 0x145   :  { %293 = vperm.xlu2 %464, %v274_v3  }
 0x14d   :  { %467 = vset.pattern.permute.xlu2 %v474_v27 }
 0x14e   :  { %330 = vperm.xlu2 %467, %v274_v3  }
 0x156   :  { %468 = vset.pattern.permute.xlu2 %v475_v28 }
 0x157   :  { %298 = vperm.xlu2 %468, %v275_v8  }
 0x15f   :  { %469 = vset.pattern.permute.xlu2 %v474_v27 }
 0x160   :  { %334 = vperm.xlu2 %469, %v275_v8  }
 0x18f   :  { %v284_v9 = vpop.permute.xlu2 %283 }
 0x190   :  { %v345_v13 = vmul.f32 %v284_v9, %v610_v63  ;;  %v346_v14 = vmul.f32 %v284_v9, %v612_v0 }
 0x197   :  { %v289_v12 = vpop.permute.xlu2 %288 }
 0x198   :  { %v349_v0 = vmul.f32 %v289_v12, %v629_v10  ;;  %v350_v25 = vmul.f32 %v289_v12, %v631_v11 }
 0x19f   :  { %v294_v15 = vpop.permute.xlu2 %293 }
 0x1a0   :  { %v353_v16 = vadd.f32 %v345_v13, %v294_v15  ;;  %v354_v17 = vadd.f32 %v346_v14, %v294_v15 }
 0x1a2   :  { %361 = vst [vmem:[%s702_s4] sm:$0xff] %v353_v16 }
 0x1a3   :  { %362 = vst [vmem:[%s702_s4 + $0x8] sm:$0xff] %v354_v17 }
 0x1a7   :  { %v315_v20 = vpop.permute.xlu0 %314 }
 0x1a8   :  { %v347_v21 = vmul.f32 %v315_v20, %v620_v5  ;;  %v348_v22 = vmul.f32 %v315_v20, %v622_v6  ;;  %v331_v23 = vpop.permute.xlu2 %330 }
 0x1aa   :  { %v355_v63 = vadd.f32 %v347_v21, %v331_v23  ;;  %v356_v24 = vadd.f32 %v348_v22, %v331_v23 }
 0x1ac   :  { %363 = vst [vmem:[%s702_s4 + $0x10] sm:$0xff] %v355_v63 }
 0x1ad   :  { %364 = vst [vmem:[%s702_s4 + $0x18] sm:$0xff] %v356_v24 }
 0x1af   :  { %v319_v6 = vpop.permute.xlu1 %318 }
 0x1b0   :  { %v351_v28 = vmul.f32 %v319_v6, %v640_v18  ;;  %v352_v29 = vmul.f32 %v319_v6, %v642_v19 }
 0x1b1   :  { %v299_v26 = vpop.permute.xlu2 %298 }
 0x1b2   :  { %v357_v27 = vadd.f32 %v349_v0, %v299_v26  ;;  %v358_v5 = vadd.f32 %v350_v25, %v299_v26 }
 0x1b4   :  { %365 = vst [vmem:[%s702_s4 + $0x20] sm:$0xff] %v357_v27 }
 0x1b5   :  { %366 = vst [vmem:[%s702_s4 + $0x28] sm:$0xff] %v358_v5 }
 0x1ba   :  { %v335_v30 = vpop.permute.xlu2 %334 }
 0x1bb   :  { %v359_v10 = vadd.f32 %v351_v28, %v335_v30  ;;  %v360_v31 = vadd.f32 %v352_v29, %v335_v30 }
 0x1bd   :  { %367 = vst [vmem:[%s702_s4 + $0x30] sm:$0xff] %v359_v10 }
 0x1be   :  { %368 = vst [vmem:[%s702_s4 + $0x38] sm:$0xff] %v360_v31 }

// kernel: generator_forward.12
= control target key start
LH: loop header
LB: loop body
LE: loop exit
PB: predicated region body
PF: predicated region fallthrough
CT: control target
= control target key end

     0   :  { %vm112_vm0 = vcmask 130048   ;;  %v459_v37 = vmov 1   ;;  %v460_v38 = vmov 0   ;;  %s634_s0 = inlined_call_operand.vmem [shape: bf16[144,128], index: 0, kind: input, shape index: {}]   ;;  %s635_s1 = inlined_call_operand.vmem [shape: bf16[32,144], index: 1, kind: input, shape index: {}]   ;;  %s636_s2 = inlined_call_operand.vmem [shape: f32[32,2], index: 2, kind: input, shape index: {}]   ;;  %s637_s3 = inlined_call_operand.vmem [shape: f32[32,2], index: 3, kind: input, shape index: {}]   ;;  %s638_s4 = inlined_call_operand.vmem [shape: f32[1,32,128], index: 4, kind: output, shape index: {}]  }
   0x1   :  { %v427_v0 = vld [vmem:[%s634_s0 + $0x38] sm:$0xff]  ;;  %v428_v1 = vld [vmem:[%s634_s0 + $0x40] sm:$0xff]  ;;  %v426_v2 = vld [vmem:[%s634_s0 + $0x30] sm:$0xff]  ;;  %440 = vset.pattern.permute.xlu0 %v459_v37  ;;  %439 = vset.pattern.permute.xlu2 %v460_v38 }
   0x2   :  { %119 = vmatpush.bf16.msra.mxu0 %v427_v0  ;;  %429 = vmatpush.bf16.msra.mxu2 %v427_v0  ;;  %v416_v3 = vld [vmem:[%s635_s1 + $0x4] sm:$0xf]  ;;  %v366_v4 = vld [vmem:[%s635_s1 + $0x8] sm:$0xf0]  ;;  %v423_v8 = vld [vmem:[%s634_s0 + $0x18] sm:$0xff] }
   0x3   :  { %145 = vmatpush.bf16.msra.mxu1 %v428_v1  ;;  %v369_v5 = vor.u32 %v416_v3, %v366_v4  ;;  %v425_v6 = vld [vmem:[%s634_s0 + $0x28] sm:$0xff]  ;;  %v424_v7 = vld [vmem:[%s634_s0 + $0x20] sm:$0xff]  ;;  %v418_v9 = vld [vmem:[%s635_s1 + $0x14] sm:$0xf]  ;;  %441 = vset.pattern.permute.xlu1 %v459_v37 }
   0x4   :  { %v374_v10 = vld [vmem:[%s635_s1 + $0x18] sm:$0xf0]  ;;  %v422_v11 = vld [vmem:[%s634_s0 + $0x10] sm:$0xff]  ;;  %v421_v13 = vld [vmem:[%s634_s0 + $0x8] sm:$0xff] }
   0x5   :  { %v377_v12 = vor.u32 %v418_v9, %v374_v10  ;;  %v420_v14 = vld [vmem:[%s634_s0] sm:$0xff]  ;;  %v417_v16 = vld [vmem:[%s635_s1 + $0x4] sm:$0xf0]  ;;  %v372_v17 = vld [vmem:[%s635_s1 + $0x10] sm:$0xf] }
   0x6   :  { %120 = vmatpush.bf16.msra.mxu0 %v426_v2  ;;  %430 = vmatpush.bf16.msra.mxu2 %v426_v2  ;;  %v364_v15 = vld [vmem:[%s635_s1] sm:$0xf]  ;;  %v419_v18 = vld [vmem:[%s635_s1 + $0x14] sm:$0xf0] }
   0x7   :  { %414 = vmatmul.msk.bf16.vlgmr.msra.gmra.mxu1 %vm112_vm0, %v369_v5  ;;  %v365_v19 = vor.u32 %v417_v16, %v364_v15  ;;  %v373_v20 = vor.u32 %v419_v18, %v372_v17 }
   0xa   :  { %121 = vmatpush.bf16.msra.mxu0 %v425_v6  ;;  %431 = vmatpush.bf16.msra.mxu2 %v425_v6 }
   0xe   :  { %122 = vmatpush.bf16.msra.mxu0 %v424_v7  ;;  %432 = vmatpush.bf16.msra.mxu2 %v424_v7 }
  0x12   :  { %123 = vmatpush.bf16.msra.mxu0 %v423_v8  ;;  %433 = vmatpush.bf16.msra.mxu2 %v423_v8 }
  0x16   :  { %124 = vmatpush.bf16.msra.mxu0 %v422_v11  ;;  %434 = vmatpush.bf16.msra.mxu2 %v422_v11 }
  0x17   :  { %415 = vmatmul.msk.bf16.gmra.mxu1 %vm112_vm0, %v377_v12 }
  0x1a   :  { %125 = vmatpush.bf16.msra.mxu0 %v421_v13  ;;  %435 = vmatpush.bf16.msra.mxu2 %v421_v13  ;;  %v241_v13 = vld [vmem:[%s636_s2] sm:$0xff] }
  0x1e   :  { %126 = vmatpush.bf16.msra.mxu0 %v420_v14  ;;  %436 = vmatpush.bf16.msra.mxu2 %v420_v14 }
  0x21   :  { %127 = vmatmul.bf16.vlgmr.msra.gmra.mxu0 %v365_v19  ;;  %132 = vmatmul.bf16.vlgmr.msra.gmra.mxu2 %v373_v20  ;;  %v245_v20 = vld [vmem:[%s637_s3] sm:$0xff] }
  0x84   :  { %v147_v21 = vpop.f32.mrf.mxu1 }
  0x8c   :  { %v149_v22 = vpop.f32.mrf.mxu1 }
  0x94   :  { %v152_v25 = vpop.f32.mrf.mxu1 }
  0x9c   :  { %v154_v32 = vpop.f32.mrf.mxu1 }
  0x9e   :  { %v128_v23 = vpop.f32.mrf.mxu0 }
  0x9f   :  { %v539_v24 = vadd.f32 %v147_v21, %v128_v23 }
  0xa1   :  { %157 = vadd.xlane.f32.xlu0 %v539_v24  ;;  %v165_v26 = vmul.f32 %v539_v24, %v539_v24 }
  0xa3   :  { %169 = vadd.xlane.f32.xlu2 %v165_v26 }
  0xa4   :  { %v133_v27 = vpop.f32.mrf.mxu2 }
  0xa5   :  { %v544_v28 = vadd.f32 %v152_v25, %v133_v27 }
  0xa6   :  { %v130_v29 = vpop.f32.mrf.mxu0 }
  0xa7   :  { %v546_v30 = vadd.f32 %v149_v22, %v130_v29  ;;  %161 = vadd.xlane.f32.xlu1 %v544_v28  ;;  %v167_v35 = vmul.f32 %v544_v28, %v544_v28 }
  0xa9   :  { %159 = vadd.xlane.f32.xlu0 %v546_v30  ;;  %v166_v31 = vmul.f32 %v546_v30, %v546_v30 }
  0xab   :  { %171 = vadd.xlane.f32.xlu2 %v166_v31  ;;  %v242_v31 = vld [vmem:[%s636_s2 + $0x8] sm:$0xff] }
  0xac   :  { %v135_v33 = vpop.f32.mrf.mxu2 }
  0xad   :  { %v552_v34 = vadd.f32 %v154_v32, %v135_v33 }
  0xaf   :  { %163 = vadd.xlane.f32.xlu1 %v552_v34  ;;  %v168_v36 = vmul.f32 %v552_v34, %v552_v34 }
  0xb1   :  { %173 = vadd.xlane.f32.xlu0 %v167_v35 }
  0xb7   :  { %175 = vadd.xlane.f32.xlu1 %v168_v36 }
 0x114   :  { %v158_v39 = vpop.xlane.xlu0 %157 }
 0x115   :  { %v177_v40 = vmul.f32 0.0078125, %v158_v39 }
 0x116   :  { %v170_v41 = vpop.xlane.xlu2 %169 }
 0x117   :  { %v185_v42 = vmul.f32 %v177_v40, %v177_v40  ;;  %v181_v43 = vmul.f32 0.0078125, %v170_v41 }
 0x119   :  { %v189_v44 = vsub.f32 %v181_v43, %v185_v42  ;;  %v243_v42 = vld [vmem:[%s636_s2 + $0x10] sm:$0xff] }
 0x11a   :  { %v162_v45 = vpop.xlane.xlu1 %161 }
 0x11b   :  { %v193_v46 = vmax.f32 %v189_v44, 0.0  ;;  %v564_v51 = vmul.f32 0.0078125, %v162_v45 }
 0x11c   :  { %v160_v47 = vpop.xlane.xlu0 %159 }
 0x11d   :  { %v197_v48 = vadd.f32 1e-05, %v193_v46  ;;  %v562_v49 = vmul.f32 0.0078125, %v160_v47  ;;  %v187_v56 = vmul.f32 %v564_v51, %v564_v51  ;;  %v246_v47 = vld [vmem:[%s637_s3 + $0x8] sm:$0xff] }
 0x11e   :  { %v172_v50 = vpop.xlane.xlu2 %171 }
 0x11f   :  { %451 = vrsqrt.f32 %v197_v48  ;;  %v186_v52 = vmul.f32 %v562_v49, %v562_v49  ;;  %v182_v53 = vmul.f32 0.0078125, %v172_v50  ;;  %vm207_vm2 = vweird.f32 %v197_v48 }
 0x121   :  { %v190_v54 = vsub.f32 %v182_v53, %v186_v52 }
 0x122   :  { %v164_v55 = vpop.xlane.xlu1 %163 }
 0x123   :  { %v194_v57 = vmax.f32 %v190_v54, 0.0  ;;  %v570_v63 = vmul.f32 0.0078125, %v164_v55 }
 0x124   :  { %v174_v58 = vpop.xlane.xlu0 %173 }
 0x125   :  { %v452_v59 = vpop.eup %451  ;;  %v198_v60 = vadd.f32 1e-05, %v194_v57  ;;  %v183_v61 = vmul.f32 0.0078125, %v174_v58  ;;  %v188_v5 = vmul.f32 %v570_v63, %v570_v63 }
 0x126   :  { %v202_v62 = vmul.f32 %v452_v59, %v197_v48  ;;  %vm208_vm1 = vweird.f32 %v452_v59 }
 0x127   :  { %453 = vrsqrt.f32 %v198_v60  ;;  %v191_v0 = vsub.f32 %v183_v61, %v187_v56  ;;  %vm209_vm3 = vmor %vm207_vm2, %vm208_vm1  ;;  %vm217_vm5 = vweird.f32 %v198_v60 }
 0x128   :  { %v203_v1 = vmul.f32 %v452_v59, %v202_v62 }
 0x129   :  { %v195_v2 = vmax.f32 %v191_v0, 0.0 }
 0x12a   :  { %v204_v3 = vmul.f32 0.5, %v203_v1  ;;  %v176_v4 = vpop.xlane.xlu1 %175 }
 0x12b   :  { %v199_v6 = vadd.f32 1e-05, %v195_v2  ;;  %v184_v7 = vmul.f32 0.0078125, %v176_v4 }
 0x12c   :  { %v205_v8 = vsub.f32 1.5, %v204_v3 }
 0x12d   :  { %v454_v9 = vpop.eup %453  ;;  %455 = vrsqrt.f32 %v199_v6  ;;  %v192_v10 = vsub.f32 %v184_v7, %v188_v5  ;;  %vm227_vm8 = vweird.f32 %v199_v6 }
 0x12e   :  { %v212_v11 = vmul.f32 %v454_v9, %v198_v60  ;;  %v206_v12 = vmul.f32 %v452_v59, %v205_v8  ;;  %vm218_vm4 = vweird.f32 %v454_v9 }
 0x12f   :  { %v196_v14 = vmax.f32 %v192_v10, 0.0  ;;  %vm219_vm6 = vmor %vm217_vm5, %vm218_vm4 }
 0x130   :  { %v213_v15 = vmul.f32 %v454_v9, %v212_v11  ;;  %v210_v16 = vsel %vm209_vm3, %v452_v59, %v206_v12  ;;  %v248_v59 = vld [vmem:[%s637_s3 + $0x18] sm:$0xff] }
 0x131   :  { %v200_v17 = vadd.f32 1e-05, %v196_v14  ;;  %v249_v18 = vmul.f32 %v241_v13, %v210_v16 }
 0x132   :  { %v214_v19 = vmul.f32 0.5, %v213_v15 }
 0x133   :  { %v456_v21 = vpop.eup %455  ;;  %457 = vrsqrt.f32 %v200_v17  ;;  %307 = vperm.xlu0 %440, %v249_v18   ;;  %265 = vperm.xlu2 %439, %v249_v18   ;;  %v253_v22 = vmul.f32 %v249_v18, %v177_v40  ;;  %vm237_vm11 = vweird.f32 %v200_v17 }
 0x134   :  { %v215_v23 = vsub.f32 1.5, %v214_v19  ;;  %v222_v25 = vmul.f32 %v456_v21, %v199_v6  ;;  %vm228_vm7 = vweird.f32 %v456_v21 }
 0x135   :  { %v257_v26 = vsub.f32 %v245_v20, %v253_v22  ;;  %vm229_vm9 = vmor %vm227_vm8, %vm228_vm7 }
 0x136   :  { %v223_v27 = vmul.f32 %v456_v21, %v222_v25  ;;  %v216_v29 = vmul.f32 %v454_v9, %v215_v23 }
 0x137   :  { %327 = vperm.xlu1 %441, %v257_v26  }
 0x138   :  { %v224_v32 = vmul.f32 0.5, %v223_v27  ;;  %v220_v33 = vsel %vm219_vm6, %v454_v9, %v216_v29 }
 0x139   :  { %v458_v35 = vpop.eup %457  ;;  %v250_v36 = vmul.f32 %v242_v31, %v220_v33 }
 0x13a   :  { %v225_v39 = vsub.f32 1.5, %v224_v32  ;;  %v232_v41 = vmul.f32 %v458_v35, %v200_v17  ;;  %vm238_vm10 = vweird.f32 %v458_v35 }
 0x13b   :  { %444 = vset.pattern.permute.xlu0 %v460_v38  ;;  %285 = vperm.xlu2 %439, %v257_v26   ;;  %v254_v46 = vmul.f32 %v250_v36, %v562_v49  ;;  %v247_v49 = vld [vmem:[%s637_s3 + $0x10] sm:$0xff]  ;;  %vm239_vm12 = vmor %vm237_vm11, %vm238_vm10 }
 0x13c   :  { %270 = vperm.xlu0 %444, %v250_v36   ;;  %v226_v40 = vmul.f32 %v456_v21, %v225_v39  ;;  %v233_v43 = vmul.f32 %v458_v35, %v232_v41 }
 0x13d   :  { %v258_v50 = vsub.f32 %v246_v47, %v254_v46 }
 0x13e   :  { %v230_v44 = vsel %vm229_vm9, %v456_v21, %v226_v40  ;;  %v234_v48 = vmul.f32 0.5, %v233_v43 }
 0x13f   :  { %442 = vset.pattern.permute.xlu1 %v460_v38  ;;  %v251_v45 = vmul.f32 %v243_v42, %v230_v44 }
 0x140   :  { %v235_v52 = vsub.f32 1.5, %v234_v48 }
 0x141   :  { %275 = vperm.xlu1 %442, %v251_v45   ;;  %v255_v53 = vmul.f32 %v251_v45, %v564_v51  ;;  %v244_v51 = vld [vmem:[%s636_s2 + $0x18] sm:$0xff] }
 0x142   :  { %v236_v54 = vmul.f32 %v458_v35, %v235_v52 }
 0x143   :  { %445 = vset.pattern.permute.xlu2 %v459_v37  ;;  %v259_v55 = vsub.f32 %v247_v49, %v255_v53 }
 0x144   :  { %311 = vperm.xlu2 %445, %v250_v36   ;;  %449 = vset.pattern.permute.xlu0 %v459_v37  ;;  %v240_v56 = vsel %vm239_vm12, %v458_v35, %v236_v54 }
 0x145   :  { %331 = vperm.xlu0 %449, %v258_v50   ;;  %v252_v57 = vmul.f32 %v244_v51, %v240_v56 }
 0x147   :  { %v256_v58 = vmul.f32 %v252_v57, %v570_v63 }
 0x149   :  { %443 = vset.pattern.permute.xlu1 %v459_v37  ;;  %v260_v60 = vsub.f32 %v248_v59, %v256_v58 }
 0x14a   :  { %315 = vperm.xlu1 %443, %v251_v45  }
 0x14c   :  { %446 = vset.pattern.permute.xlu2 %v460_v38 }
 0x14d   :  { %295 = vperm.xlu2 %446, %v259_v55  }
 0x152   :  { %447 = vset.pattern.permute.xlu1 %v460_v38  ;;  %v261_v38 = vlaneseq }
 0x153   :  { %290 = vperm.xlu1 %447, %v258_v50  }
 0x154   :  { %v262_v1 = vand.u32 127, %v261_v38 }
 0x155   :  { %280 = vperm.xlu2 %446, %v252_v57  }
 0x156   :  { %vm303_vm13 = vcmp.ge.s32.totalorder %v262_v1, 64 }
 0x15b   :  { %300 = vperm.xlu1 %447, %v260_v60  }
 0x15d   :  { %448 = vset.pattern.permute.xlu2 %v459_v37 }
 0x15e   :  { %319 = vperm.xlu2 %448, %v252_v57  }
 0x163   :  { %450 = vset.pattern.permute.xlu1 %v459_v37 }
 0x164   :  { %339 = vperm.xlu1 %450, %v260_v60  }
 0x166   :  { %335 = vperm.xlu2 %448, %v259_v55  }
 0x18d   :  { %v266_v61 = vpop.permute.xlu2 %265 }
 0x195   :  { %v286_v62 = vpop.permute.xlu2 %285 }
 0x19e   :  { %v312_v0 = vpop.permute.xlu2 %311 }
 0x1a5   :  { %v308_v63 = vpop.permute.xlu0 %307 }
 0x1a6   :  { %v322_v2 = vsel %vm303_vm13, %v308_v63, %v266_v61 }
 0x1a7   :  { %v296_v3 = vpop.permute.xlu2 %295  ;;  %v346_v4 = vmul.f32 %v322_v2, %v539_v24 }
 0x1a9   :  { %v328_v5 = vpop.permute.xlu1 %327 }
 0x1aa   :  { %v342_v6 = vsel %vm303_vm13, %v328_v5, %v286_v62 }
 0x1ab   :  { %v350_v7 = vadd.f32 %v346_v4, %v342_v6 }
 0x1ad   :  { %354 = vst [vmem:[%s638_s4] sm:$0xff] %v350_v7 }
 0x1ae   :  { %v271_v10 = vpop.permute.xlu0 %270 }
 0x1af   :  { %v281_v37 = vpop.permute.xlu2 %280  ;;  %v323_v15 = vsel %vm303_vm13, %v312_v0, %v271_v10 }
 0x1b0   :  { %v347_v17 = vmul.f32 %v323_v15, %v546_v30 }
 0x1b3   :  { %v276_v8 = vpop.permute.xlu1 %275 }
 0x1b7   :  { %v332_v18 = vpop.permute.xlu0 %331 }
 0x1b8   :  { %v320_v9 = vpop.permute.xlu2 %319 }
 0x1b9   :  { %v325_v22 = vsel %vm303_vm13, %v320_v9, %v281_v37 }
 0x1ba   :  { %v349_v23 = vmul.f32 %v325_v22, %v552_v34 }
 0x1bc   :  { %v316_v11 = vpop.permute.xlu1 %315 }
 0x1bd   :  { %v324_v12 = vsel %vm303_vm13, %v316_v11, %v276_v8 }
 0x1be   :  { %v348_v13 = vmul.f32 %v324_v12, %v544_v28 }
 0x1c0   :  { %v336_v14 = vpop.permute.xlu2 %335 }
 0x1c1   :  { %v344_v24 = vsel %vm303_vm13, %v336_v14, %v296_v3 }
 0x1c2   :  { %v352_v16 = vadd.f32 %v348_v13, %v344_v24 }
 0x1c4   :  { %356 = vst [vmem:[%s638_s4 + $0x10] sm:$0xff] %v352_v16 }
 0x1c5   :  { %v291_v19 = vpop.permute.xlu1 %290 }
 0x1c6   :  { %v343_v20 = vsel %vm303_vm13, %v332_v18, %v291_v19 }
 0x1c7   :  { %v351_v21 = vadd.f32 %v347_v17, %v343_v20 }
 0x1c9   :  { %355 = vst [vmem:[%s638_s4 + $0x8] sm:$0xff] %v351_v21 }
 0x1cd   :  { %v301_v28 = vpop.permute.xlu1 %300 }
 0x1d6   :  { %v340_v25 = vpop.permute.xlu1 %339 }
 0x1d7   :  { %v345_v26 = vsel %vm303_vm13, %v340_v25, %v301_v28 }
 0x1d8   :  { %v353_v27 = vadd.f32 %v349_v23, %v345_v26 }
 0x1da   :  { %357 = vst [vmem:[%s638_s4 + $0x18] sm:$0xff] %v353_v27 }

// kernel: generator_forward.13
= control target key start
LH: loop header
LB: loop body
LE: loop exit
PB: predicated region body
PF: predicated region fallthrough
CT: control target
= control target key end

     0   :  { %vm238_vm0 = vcmask 261120   ;;  %s1374_s0 = inlined_call_operand.vmem [shape: bf16[288,32], index: 0, kind: input, shape index: {}]   ;;  %s1375_s1 = inlined_call_operand.vmem [shape: bf16[64,288], index: 1, kind: input, shape index: {}]   ;;  %s1376_s2 = inlined_call_operand.vmem [shape: f32[64,2], index: 2, kind: input, shape index: {}]   ;;  %s1377_s3 = inlined_call_operand.vmem [shape: f32[64,2], index: 3, kind: input, shape index: {}]   ;;  %s1378_s4 = inlined_call_operand.vmem [shape: f32[1,64,32], index: 4, kind: output, shape index: {}]  }
   0x1   :  { %v906_v0 = vld [vmem:[%s1374_s0 + $0x38] sm:$0xff]  ;;  %v916_v2 = vld [vmem:[%s1374_s0 + $0x88] sm:$0xff]  ;;  %v905_v3 = vld [vmem:[%s1374_s0 + $0x30] sm:$0xff] }
   0x2   :  { %v914_v1 = vld [vmem:[%s1374_s0 + $0x78] sm:$0xff]  ;;  %251 = vmatpush.bf16.msra.mxu0 %v906_v0  ;;  %917 = vmatpush.bf16.msra.mxu3 %v906_v0  ;;  %v913_v4 = vld [vmem:[%s1374_s0 + $0x70] sm:$0xff]  ;;  %v915_v5 = vld [vmem:[%s1374_s0 + $0x80] sm:$0xff] }
   0x3   :  { %925 = vmatpush.bf16.msra.mxu1 %v914_v1  ;;  %315 = vmatpush.bf16.msra.mxu2 %v916_v2  ;;  %v773_v6 = vld [vmem:[%s1375_s1 + $0x8] sm:$0xf]  ;;  %v889_v7 = vld [vmem:[%s1375_s1 + $0x10] sm:$0xf0]  ;;  %v903_v11 = vld [vmem:[%s1374_s0 + $0x20] sm:$0xff] }
   0x4   :  { %v904_v8 = vld [vmem:[%s1374_s0 + $0x28] sm:$0xff]  ;;  %v774_v10 = vor.u32 %v889_v7, %v773_v6  ;;  %v911_v12 = vld [vmem:[%s1374_s0 + $0x60] sm:$0xff]  ;;  %v902_v13 = vld [vmem:[%s1374_s0 + $0x18] sm:$0xff] }
   0x5   :  { %v912_v9 = vld [vmem:[%s1374_s0 + $0x68] sm:$0xff]  ;;  %v910_v14 = vld [vmem:[%s1374_s0 + $0x58] sm:$0xff]  ;;  %v901_v15 = vld [vmem:[%s1374_s0 + $0x10] sm:$0xff] }
   0x6   :  { %252 = vmatpush.bf16.msra.mxu0 %v905_v3  ;;  %918 = vmatpush.bf16.msra.mxu3 %v905_v3  ;;  %v909_v16 = vld [vmem:[%s1374_s0 + $0x50] sm:$0xff]  ;;  %v785_v17 = vld [vmem:[%s1375_s1 + $0x20] sm:$0xf]  ;;  %v892_v18 = vld [vmem:[%s1375_s1 + $0x28] sm:$0xf0] }
   0x7   :  { %926 = vmatpush.bf16.msra.mxu1 %v913_v4  ;;  %316 = vmatpush.bf16.msra.mxu2 %v915_v5  ;;  %v900_v19 = vld [vmem:[%s1374_s0 + $0x8] sm:$0xff]  ;;  %v786_v21 = vor.u32 %v892_v18, %v785_v17  ;;  %v899_v22 = vld [vmem:[%s1374_s0] sm:$0xff]  ;;  %v777_v23 = vld [vmem:[%s1375_s1 + $0x18] sm:$0xf] }
   0x8   :  { %v908_v20 = vld [vmem:[%s1374_s0 + $0x48] sm:$0xff]  ;;  %v891_v24 = vld [vmem:[%s1375_s1 + $0x20] sm:$0xf0]  ;;  %v765_v25 = vld [vmem:[%s1375_s1] sm:$0xf] }
   0x9   :  { %v888_v26 = vld [vmem:[%s1375_s1 + $0x8] sm:$0xf0]  ;;  %v907_v27 = vld [vmem:[%s1374_s0 + $0x40] sm:$0xff]  ;;  %v890_v28 = vld [vmem:[%s1375_s1 + $0x1c] sm:$0xf]  ;;  %v778_v30 = vor.u32 %v891_v24, %v777_v23 }
   0xa   :  { %253 = vmatpush.bf16.msra.mxu0 %v904_v8  ;;  %919 = vmatpush.bf16.msra.mxu3 %v904_v8  ;;  %v779_v29 = vld [vmem:[%s1375_s1 + $0x24] sm:$0xf0]  ;;  %v766_v31 = vor.u32 %v888_v26, %v765_v25  ;;  %v797_v33 = vld [vmem:[%s1375_s1 + $0x38] sm:$0xf]  ;;  %v895_v34 = vld [vmem:[%s1375_s1 + $0x40] sm:$0xf0] }
   0xb   :  { %927 = vmatpush.bf16.msra.mxu1 %v912_v9  ;;  %883 = vmatmul.msk.bf16.vlgmr.msra.gmra.mxu2 %vm238_vm0, %v774_v10  ;;  %v782_v32 = vor.u32 %v890_v28, %v779_v29  ;;  %v798_v35 = vor.u32 %v895_v34, %v797_v33  ;;  %v789_v36 = vld [vmem:[%s1375_s1 + $0x30] sm:$0xf]  ;;  %v894_v37 = vld [vmem:[%s1375_s1 + $0x38] sm:$0xf0]  ;;  %v893_v38 = vld [vmem:[%s1375_s1 + $0x34] sm:$0xf] }
   0xc   :  { %v791_v39 = vld [vmem:[%s1375_s1 + $0x3c] sm:$0xf0]  ;;  %v790_v40 = vor.u32 %v894_v37, %v789_v36  ;;  %v809_v42 = vld [vmem:[%s1375_s1 + $0x50] sm:$0xf]  ;;  %v898_v43 = vld [vmem:[%s1375_s1 + $0x58] sm:$0xf0] }
   0xd   :  { %v794_v41 = vor.u32 %v893_v38, %v791_v39  ;;  %v887_v44 = vld [vmem:[%s1375_s1 + $0x4] sm:$0xf]  ;;  %v767_v45 = vld [vmem:[%s1375_s1 + $0xc] sm:$0xf0]  ;;  %v810_v46 = vor.u32 %v898_v43, %v809_v42  ;;  %v801_v48 = vld [vmem:[%s1375_s1 + $0x48] sm:$0xf] }
   0xe   :  { %254 = vmatpush.bf16.msra.mxu0 %v903_v11  ;;  %920 = vmatpush.bf16.msra.mxu3 %v903_v11  ;;  %v770_v47 = vor.u32 %v887_v44, %v767_v45  ;;  %v897_v49 = vld [vmem:[%s1375_s1 + $0x50] sm:$0xf0]  ;;  %v896_v50 = vld [vmem:[%s1375_s1 + $0x4c] sm:$0xf]  ;;  %v803_v51 = vld [vmem:[%s1375_s1 + $0x54] sm:$0xf0] }
   0xf   :  { %928 = vmatpush.bf16.msra.mxu1 %v911_v12  ;;  %v802_v52 = vor.u32 %v897_v49, %v801_v48  ;;  %v806_v53 = vor.u32 %v896_v50, %v803_v51 }
  0x12   :  { %255 = vmatpush.bf16.msra.mxu0 %v902_v13  ;;  %921 = vmatpush.bf16.msra.mxu3 %v902_v13 }
  0x13   :  { %929 = vmatpush.bf16.msra.mxu1 %v910_v14 }
  0x16   :  { %256 = vmatpush.bf16.msra.mxu0 %v901_v15  ;;  %922 = vmatpush.bf16.msra.mxu3 %v901_v15 }
  0x17   :  { %930 = vmatpush.bf16.msra.mxu1 %v909_v16 }
  0x1a   :  { %257 = vmatpush.bf16.msra.mxu0 %v900_v19  ;;  %923 = vmatpush.bf16.msra.mxu3 %v900_v19 }
  0x1b   :  { %931 = vmatpush.bf16.msra.mxu1 %v908_v20  ;;  %884 = vmatmul.msk.bf16.gmra.mxu2 %vm238_vm0, %v786_v21 }
  0x1e   :  { %258 = vmatpush.bf16.msra.mxu0 %v899_v22  ;;  %924 = vmatpush.bf16.msra.mxu3 %v899_v22 }
  0x1f   :  { %932 = vmatpush.bf16.msra.mxu1 %v907_v27 }
  0x21   :  { %264 = vmatmul.bf16.vlgmr.msra.gmra.mxu3 %v778_v30  ;;  %259 = vmatmul.bf16.vlgmr.msra.gmra.mxu0 %v766_v31 }
  0x22   :  { %280 = vmatpush.bf16.msrb.mxu0 %v914_v1  ;;  %293 = vmatmul.bf16.vlgmr.msra.gmra.mxu1 %v782_v32 }
  0x26   :  { %281 = vmatpush.bf16.msrb.mxu0 %v913_v4 }
  0x2a   :  { %282 = vmatpush.bf16.msrb.mxu0 %v912_v9 }
  0x2b   :  { %885 = vmatmul.msk.bf16.gmra.mxu2 %vm238_vm0, %v798_v35 }
  0x2e   :  { %283 = vmatpush.bf16.msrb.mxu0 %v911_v12 }
  0x31   :  { %269 = vmatmul.bf16.gmra.mxu3 %v790_v40 }
  0x32   :  { %284 = vmatpush.bf16.msrb.mxu0 %v910_v14  ;;  %298 = vmatmul.bf16.gmra.mxu1 %v794_v41 }
  0x36   :  { %285 = vmatpush.bf16.msrb.mxu0 %v909_v16 }
  0x3a   :  { %286 = vmatpush.bf16.msrb.mxu0 %v908_v20 }
  0x3b   :  { %886 = vmatmul.msk.bf16.gmra.mxu2 %vm238_vm0, %v810_v46 }
  0x3e   :  { %287 = vmatpush.bf16.msrb.mxu0 %v907_v27 }
  0x41   :  { %288 = vmatmul.bf16.vlgmr.msrb.gmra.mxu0 %v770_v47  ;;  %274 = vmatmul.bf16.gmra.mxu3 %v802_v52 }
  0x42   :  { %303 = vmatmul.bf16.gmra.mxu1 %v806_v53 }
  0x8e   :  { %v318_v54 = vpop.f32.mrf.mxu2 }
  0x96   :  { %v320_v55 = vpop.f32.mrf.mxu2 }
  0x9e   :  { %v323_v56 = vpop.f32.mrf.mxu2  ;;  %v260_v63 = vpop.f32.mrf.mxu0 }
  0x9f   :  { %v294_v57 = vpop.f32.mrf.mxu1 }
  0xa4   :  { %v265_v58 = vpop.f32.mrf.mxu3 }
  0xa5   :  { %v295_v59 = vadd.f32 %v294_v57, %v265_v58 }
  0xa6   :  { %v325_v62 = vpop.f32.mrf.mxu2  ;;  %v262_v9 = vpop.f32.mrf.mxu0 }
  0xa7   :  { %v1126_v60 = vadd.f32 %v323_v56, %v295_v59  ;;  %v296_v61 = vpop.f32.mrf.mxu1  ;;  %v969_v56 = vmov 0  }
  0xa8   :  { %935 = vset.pattern.permute.xlu0 %v969_v56  ;;  %937 = vset.pattern.permute.xlu2 %v969_v56 }
  0xa9   :  { %v344_v0 = vsel %vm238_vm0, %v1126_v60, 0.0  ;;  %v364_v1 = vmul.f32 %v1126_v60, %v1126_v60  ;;  %939 = vset.pattern.permute.xlu1 %v969_v56 }
  0xaa   :  { %345 = vadd.xlane.f32.xlu1 %v344_v0 }
  0xab   :  { %v376_v5 = vsel %vm238_vm0, %v364_v1, 0.0 }
  0xac   :  { %v267_v2 = vpop.f32.mrf.mxu3 }
  0xad   :  { %v297_v3 = vadd.f32 %v296_v61, %v267_v2 }
  0xae   :  { %v328_v7 = vpop.f32.mrf.mxu2 }
  0xaf   :  { %v1132_v4 = vadd.f32 %v325_v62, %v297_v3  ;;  %v299_v6 = vpop.f32.mrf.mxu1 }
  0xb1   :  { %v365_v8 = vmul.f32 %v1132_v4, %v1132_v4  ;;  %v347_v13 = vsel %vm238_vm0, %v1132_v4, 0.0 }
  0xb2   :  { %377 = vadd.xlane.f32.xlu1 %v376_v5 }
  0xb3   :  { %v379_v10 = vsel %vm238_vm0, %v365_v8, 0.0 }
  0xb4   :  { %380 = vadd.xlane.f32.xlu2 %v379_v10  ;;  %v270_v11 = vpop.f32.mrf.mxu3 }
  0xb5   :  { %v300_v23 = vadd.f32 %v299_v6, %v270_v11 }
  0xb6   :  { %v330_v14 = vpop.f32.mrf.mxu2 }
  0xb7   :  { %v301_v12 = vpop.f32.mrf.mxu1  ;;  %v1152_v31 = vadd.f32 %v328_v7, %v300_v23 }
  0xb9   :  { %v350_v35 = vsel %vm238_vm0, %v1152_v31, 0.0  ;;  %v366_v36 = vmul.f32 %v1152_v31, %v1152_v31 }
  0xba   :  { %348 = vadd.xlane.f32.xlu1 %v347_v13 }
  0xbb   :  { %v382_v41 = vsel %vm238_vm0, %v366_v36, 0.0  ;;  %v532_v36 = vld [vmem:[%s1377_s3 + $0x10] sm:$0xff] }
  0xbc   :  { %v272_v17 = vpop.f32.mrf.mxu3 }
  0xbd   :  { %v302_v18 = vadd.f32 %v301_v12, %v272_v17 }
  0xbe   :  { %v289_v15 = vpop.f32.mrf.mxu0  ;;  %v333_v27 = vpop.f32.mrf.mxu2 }
  0xbf   :  { %v290_v16 = vadd.f32 %v289_v15, %v260_v63  ;;  %v1142_v20 = vadd.f32 %v330_v14, %v302_v18  ;;  %v304_v24 = vpop.f32.mrf.mxu1 }
  0xc1   :  { %v1140_v19 = vadd.f32 %v318_v54, %v290_v16  ;;  %v367_v25 = vmul.f32 %v1142_v20, %v1142_v20  ;;  %v353_v44 = vsel %vm238_vm0, %v1142_v20, 0.0 }
  0xc3   :  { %v338_v21 = vsel %vm238_vm0, %v1140_v19, 0.0  ;;  %v362_v22 = vmul.f32 %v1140_v19, %v1140_v19  ;;  %v385_v29 = vsel %vm238_vm0, %v367_v25, 0.0 }
  0xc4   :  { %339 = vadd.xlane.f32.xlu0 %v338_v21  ;;  %386 = vadd.xlane.f32.xlu1 %v385_v29  ;;  %v275_v32 = vpop.f32.mrf.mxu3 }
  0xc5   :  { %v370_v26 = vsel %vm238_vm0, %v362_v22, 0.0  ;;  %v305_v42 = vadd.f32 %v304_v24, %v275_v32 }
  0xc6   :  { %v291_v28 = vpop.f32.mrf.mxu0  ;;  %371 = vadd.xlane.f32.xlu2 %v370_v26  ;;  %v335_v39 = vpop.f32.mrf.mxu2 }
  0xc7   :  { %v292_v30 = vadd.f32 %v291_v28, %v262_v9  ;;  %v306_v37 = vpop.f32.mrf.mxu1  ;;  %v1169_v46 = vadd.f32 %v333_v27, %v305_v42  ;;  %v524_v28 = vld [vmem:[%s1376_s2 + $0x10] sm:$0xff] }
  0xc9   :  { %v1154_v33 = vadd.f32 %v320_v55, %v292_v30  ;;  %v368_v48 = vmul.f32 %v1169_v46, %v1169_v46  ;;  %v356_v51 = vsel %vm238_vm0, %v1169_v46, 0.0 }
  0xcb   :  { %v341_v34 = vsel %vm238_vm0, %v1154_v33, 0.0  ;;  %v363_v47 = vmul.f32 %v1154_v33, %v1154_v33  ;;  %v388_v50 = vsel %vm238_vm0, %v368_v48, 0.0 }
  0xcc   :  { %342 = vadd.xlane.f32.xlu0 %v341_v34  ;;  %v277_v38 = vpop.f32.mrf.mxu3 }
  0xcd   :  { %v307_v40 = vadd.f32 %v306_v37, %v277_v38  ;;  %v373_v49 = vsel %vm238_vm0, %v363_v47, 0.0 }
  0xce   :  { %351 = vadd.xlane.f32.xlu2 %v350_v35 }
  0xcf   :  { %v1163_v43 = vadd.f32 %v335_v39, %v307_v40 }
  0xd1   :  { %v359_v45 = vsel %vm238_vm0, %v1163_v43, 0.0  ;;  %v369_v52 = vmul.f32 %v1163_v43, %v1163_v43 }
  0xd2   :  { %360 = vadd.xlane.f32.xlu1 %v359_v45 }
  0xd3   :  { %v391_v53 = vsel %vm238_vm0, %v369_v52, 0.0 }
  0xd4   :  { %383 = vadd.xlane.f32.xlu0 %v382_v41 }
  0xd6   :  { %354 = vadd.xlane.f32.xlu2 %v353_v44 }
  0xdc   :  { %374 = vadd.xlane.f32.xlu0 %v373_v49 }
  0xde   :  { %389 = vadd.xlane.f32.xlu2 %v388_v50 }
  0xe4   :  { %357 = vadd.xlane.f32.xlu0 %v356_v51 }
  0xec   :  { %392 = vadd.xlane.f32.xlu0 %v391_v53 }
 0x11d   :  { %v346_v54 = vpop.xlane.xlu1 %345 }
 0x11e   :  { %v396_v55 = vmul.f32 0.03125, %v346_v54  ;;  %v525_v54 = vld [vmem:[%s1376_s2 + $0x18] sm:$0xff] }
 0x120   :  { %v412_v57 = vmul.f32 %v396_v55, %v396_v55 }
 0x125   :  { %v378_v58 = vpop.xlane.xlu1 %377 }
 0x126   :  { %v404_v59 = vmul.f32 0.03125, %v378_v58 }
 0x127   :  { %v381_v0 = vpop.xlane.xlu2 %380 }
 0x128   :  { %v420_v61 = vsub.f32 %v404_v59, %v412_v57  ;;  %v405_v3 = vmul.f32 0.03125, %v381_v0 }
 0x12a   :  { %v428_v62 = vmax.f32 %v420_v61, 0.0 }
 0x12c   :  { %v436_v63 = vadd.f32 1e-05, %v428_v62  ;;  %v970_v62 = vmov 1  }
 0x12d   :  { %v349_v1 = vpop.xlane.xlu1 %348 }
 0x12e   :  { %953 = vrsqrt.f32 %v436_v63  ;;  %v1185_v2 = vmul.f32 0.03125, %v349_v1  ;;  %vm468_vm2 = vweird.f32 %v436_v63 }
 0x130   :  { %v413_v5 = vmul.f32 %v1185_v2, %v1185_v2 }
 0x132   :  { %v421_v6 = vsub.f32 %v405_v3, %v413_v5 }
 0x134   :  { %v954_v7 = vpop.eup %953  ;;  %v429_v8 = vmax.f32 %v421_v6, 0.0 }
 0x135   :  { %v463_v10 = vmul.f32 %v954_v7, %v436_v63  ;;  %vm469_vm1 = vweird.f32 %v954_v7 }
 0x136   :  { %v437_v12 = vadd.f32 1e-05, %v429_v8  ;;  %vm470_vm3 = vmor %vm468_vm2, %vm469_vm1 }
 0x137   :  { %v340_v9 = vpop.xlane.xlu0 %339  ;;  %v464_v14 = vmul.f32 %v954_v7, %v463_v10  ;;  %v387_v61 = vpop.xlane.xlu1 %386 }
 0x138   :  { %v1189_v11 = vmul.f32 0.03125, %v340_v9  ;;  %955 = vrsqrt.f32 %v437_v12  ;;  %vm478_vm5 = vweird.f32 %v437_v12  ;;  %v522_v9 = vld [vmem:[%s1376_s2] sm:$0xff] }
 0x139   :  { %v372_v13 = vpop.xlane.xlu2 %371  ;;  %v465_v17 = vmul.f32 0.5, %v464_v14 }
 0x13a   :  { %v410_v15 = vmul.f32 %v1189_v11, %v1189_v11  ;;  %v402_v16 = vmul.f32 0.03125, %v372_v13 }
 0x13b   :  { %v466_v21 = vsub.f32 1.5, %v465_v17 }
 0x13c   :  { %v418_v18 = vsub.f32 %v402_v16, %v410_v15 }
 0x13d   :  { %v467_v25 = vmul.f32 %v954_v7, %v466_v21 }
 0x13e   :  { %v426_v22 = vmax.f32 %v418_v18, 0.0  ;;  %v956_v26 = vpop.eup %955 }
 0x13f   :  { %v343_v23 = vpop.xlane.xlu0 %342  ;;  %v473_v29 = vmul.f32 %v956_v26, %v437_v12  ;;  %v471_v32 = vsel %vm470_vm3, %v954_v7, %v467_v25  ;;  %vm479_vm4 = vweird.f32 %v956_v26  ;;  %v407_v7 = vmul.f32 0.03125, %v387_v61  ;;  %v534_v61 = vld [vmem:[%s1377_s3 + $0x20] sm:$0xff] }
 0x140   :  { %v434_v24 = vadd.f32 1e-05, %v426_v22  ;;  %v540_v35 = vmul.f32 %v524_v28, %v471_v32  ;;  %vm480_vm6 = vmor %vm478_vm5, %vm479_vm4  ;;  %v1203_v52 = vmul.f32 0.03125, %v343_v23 }
 0x141   :  { %v352_v27 = vpop.xlane.xlu2 %351  ;;  %v474_v34 = vmul.f32 %v956_v26, %v473_v29  ;;  %v533_v29 = vld [vmem:[%s1377_s3 + $0x18] sm:$0xff] }
 0x142   :  { %957 = vrsqrt.f32 %v434_v24  ;;  %v1196_v30 = vmul.f32 0.03125, %v352_v27  ;;  %576 = vperm.xlu0 %935, %v540_v35   ;;  %v548_v39 = vmul.f32 %v540_v35, %v396_v55  ;;  %v411_v3 = vmul.f32 %v1203_v52, %v1203_v52 }
 0x143   :  { %v475_v37 = vmul.f32 0.5, %v474_v34  ;;  %vm448_vm8 = vweird.f32 %v434_v24 }
 0x144   :  { %v414_v38 = vmul.f32 %v1196_v30, %v1196_v30  ;;  %v556_v45 = vsub.f32 %v532_v36, %v548_v39 }
 0x145   :  { %v476_v42 = vsub.f32 1.5, %v475_v37  ;;  %v361_v23 = vpop.xlane.xlu1 %360 }
 0x146   :  { %616 = vperm.xlu2 %937, %v556_v45   ;;  %v1227_v34 = vmul.f32 0.03125, %v361_v23 }
 0x147   :  { %v384_v40 = vpop.xlane.xlu0 %383  ;;  %v477_v48 = vmul.f32 %v956_v26, %v476_v42 }
 0x148   :  { %v958_v41 = vpop.eup %957  ;;  %v406_v44 = vmul.f32 0.03125, %v384_v40  ;;  %v417_v40 = vmul.f32 %v1227_v34, %v1227_v34 }
 0x149   :  { %v443_v47 = vmul.f32 %v958_v41, %v434_v24  ;;  %v355_v50 = vpop.xlane.xlu2 %354  ;;  %v481_v55 = vsel %vm480_vm6, %v956_v26, %v477_v48  ;;  %vm449_vm7 = vweird.f32 %v958_v41 }
 0x14a   :  { %v422_v49 = vsub.f32 %v406_v44, %v414_v38  ;;  %v1208_v58 = vmul.f32 0.03125, %v355_v50  ;;  %936 = vset.pattern.permute.xlu0 %v970_v62  ;;  %v541_v1 = vmul.f32 %v525_v54, %v481_v55  ;;  %vm450_vm9 = vmor %vm448_vm8, %vm449_vm7  ;;  %v530_v54 = vld [vmem:[%s1377_s3] sm:$0xff] }
 0x14b   :  { %v444_v51 = vmul.f32 %v958_v41, %v443_v47  ;;  %656 = vperm.xlu0 %936, %v540_v35   ;;  %v526_v47 = vld [vmem:[%s1376_s2 + $0x20] sm:$0xff] }
 0x14c   :  { %v430_v53 = vmax.f32 %v422_v49, 0.0  ;;  %v415_v6 = vmul.f32 %v1208_v58, %v1208_v58  ;;  %v549_v24 = vmul.f32 %v541_v1, %v1185_v2 }
 0x14d   :  { %v445_v57 = vmul.f32 0.5, %v444_v51 }
 0x14e   :  { %v438_v59 = vadd.f32 1e-05, %v430_v53  ;;  %581 = vperm.xlu2 %937, %v541_v1   ;;  %v423_v15 = vsub.f32 %v407_v7, %v415_v6  ;;  %v557_v2 = vsub.f32 %v533_v29, %v549_v24 }
 0x14f   :  { %v446_v63 = vsub.f32 1.5, %v445_v57  ;;  %v375_v0 = vpop.xlane.xlu0 %374 }
 0x150   :  { %959 = vrsqrt.f32 %v438_v59  ;;  %v403_v5 = vmul.f32 0.03125, %v375_v0  ;;  %v431_v28 = vmax.f32 %v423_v15, 0.0  ;;  %vm488_vm10 = vweird.f32 %v438_v59  ;;  %v531_v15 = vld [vmem:[%s1377_s3 + $0x8] sm:$0xff] }
 0x151   :  { %v447_v8 = vmul.f32 %v958_v41, %v446_v63  ;;  %v390_v16 = vpop.xlane.xlu2 %389 }
 0x152   :  { %v419_v10 = vsub.f32 %v403_v5, %v411_v3  ;;  %v408_v26 = vmul.f32 0.03125, %v390_v16  ;;  %v1229_v38 = vadd.f32 1e-05, %v431_v28  ;;  %v528_v28 = vld [vmem:[%s1376_s2 + $0x30] sm:$0xff] }
 0x153   :  { %v451_v12 = vsel %vm450_vm9, %v958_v41, %v447_v8  ;;  %696 = vperm.xlu0 %936, %v556_v45   ;;  %v523_v8 = vld [vmem:[%s1376_s2 + $0x8] sm:$0xff] }
 0x154   :  { %v427_v13 = vmax.f32 %v419_v10, 0.0  ;;  %v538_v14 = vmul.f32 %v522_v9, %v451_v12  ;;  %vm498_vm7 = vweird.f32 %v1229_v38 }
 0x156   :  { %v960_v17 = vpop.eup %959  ;;  %v435_v18 = vadd.f32 1e-05, %v427_v13  ;;  %566 = vperm.xlu1 %939, %v538_v14   ;;  %938 = vset.pattern.permute.xlu2 %v970_v62  ;;  %v546_v50 = vmul.f32 %v538_v14, %v1189_v11 }
 0x157   :  { %v483_v21 = vmul.f32 %v960_v17, %v438_v59  ;;  %v358_v22 = vpop.xlane.xlu0 %357  ;;  %660 = vperm.xlu2 %938, %v541_v1   ;;  %vm489_vm11 = vweird.f32 %v960_v17 }
 0x158   :  { %961 = vrsqrt.f32 %v435_v18  ;;  %v1219_v25 = vmul.f32 0.03125, %v358_v22  ;;  %vm490_vm12 = vmor %vm488_vm10, %vm489_vm11  ;;  %v554_v0 = vsub.f32 %v530_v54, %v546_v50  ;;  %vm458_vm14 = vweird.f32 %v435_v18  ;;  %v535_v54 = vld [vmem:[%s1377_s3 + $0x28] sm:$0xff] }
 0x159   :  { %v484_v27 = vmul.f32 %v960_v17, %v483_v21  ;;  %963 = vrsqrt.f32 %v1229_v38 }
 0x15a   :  { %v416_v32 = vmul.f32 %v1219_v25, %v1219_v25 }
 0x15b   :  { %v485_v35 = vmul.f32 0.5, %v484_v27  ;;  %942 = vset.pattern.permute.xlu0 %v969_v56 }
 0x15c   :  { %v424_v36 = vsub.f32 %v408_v26, %v416_v32 }
 0x15d   :  { %v486_v37 = vsub.f32 1.5, %v485_v35 }
 0x15e   :  { %v962_v39 = vpop.eup %961  ;;  %621 = vperm.xlu1 %939, %v557_v2   ;;  %v432_v41 = vmax.f32 %v424_v36, 0.0  ;;  %v536_v36 = vld [vmem:[%s1377_s3 + $0x30] sm:$0xff] }
 0x15f   :  { %v487_v42 = vmul.f32 %v960_v17, %v486_v37  ;;  %v453_v44 = vmul.f32 %v962_v39, %v435_v18  ;;  %v393_v45 = vpop.xlane.xlu0 %392  ;;  %648 = vperm.xlu2 %938, %v538_v14   ;;  %vm459_vm13 = vweird.f32 %v962_v39  ;;  %v1248_v6 = vpop.eup %963 }
 0x160   :  { %v440_v48 = vadd.f32 1e-05, %v432_v41  ;;  %v409_v49 = vmul.f32 0.03125, %v393_v45  ;;  %vm460_vm15 = vmor %vm458_vm14, %vm459_vm13  ;;  %v493_v12 = vmul.f32 %v1248_v6, %v1229_v38  ;;  %v529_v41 = vld [vmem:[%s1376_s2 + $0x38] sm:$0xff]  ;;  %vm499_vm8 = vweird.f32 %v1248_v6 }
 0x161   :  { %v491_v51 = vsel %vm490_vm12, %v960_v17, %v487_v42  ;;  %v454_v53 = vmul.f32 %v962_v39, %v453_v44  ;;  %vm500_vm9 = vmor %vm498_vm7, %vm499_vm8  ;;  %v537_v38 = vld [vmem:[%s1377_s3 + $0x38] sm:$0xff] }
 0x162   :  { %965 = vrsqrt.f32 %v440_v48  ;;  %v425_v55 = vsub.f32 %v409_v49, %v417_v40  ;;  %v542_v57 = vmul.f32 %v526_v47, %v491_v51  ;;  %vm508_vm1 = vweird.f32 %v440_v48 }
 0x163   :  { %v455_v59 = vmul.f32 0.5, %v454_v53  ;;  %v494_v21 = vmul.f32 %v1248_v6, %v493_v12 }
 0x164   :  { %v433_v63 = vmax.f32 %v425_v55, 0.0  ;;  %v550_v11 = vmul.f32 %v542_v57, %v1196_v30 }
 0x165   :  { %v456_v1 = vsub.f32 1.5, %v455_v59  ;;  %v495_v29 = vmul.f32 0.5, %v494_v21 }
 0x166   :  { %v441_v3 = vadd.f32 1e-05, %v433_v63  ;;  %606 = vperm.xlu1 %939, %v554_v0   ;;  %v1246_v5 = vsub.f32 %v534_v61, %v550_v11  ;;  %v562_v61 = vlaneseq }
 0x167   :  { %v457_v7 = vmul.f32 %v962_v39, %v456_v1  ;;  %700 = vperm.xlu2 %938, %v557_v2  }
 0x168   :  { %v966_v9 = vpop.eup %965  ;;  %967 = vrsqrt.f32 %v441_v3  ;;  %626 = vperm.xlu0 %942, %v1246_v5   ;;  %vm518_vm4 = vweird.f32 %v441_v3  ;;  %v1299_v63 = vand.u32 127, %v562_v61 }
 0x169   :  { %v461_v30 = vsel %vm460_vm15, %v962_v39, %v457_v7  ;;  %v503_v10 = vmul.f32 %v966_v9, %v440_v48  ;;  %vm509_vm2 = vweird.f32 %v966_v9  ;;  %v496_v39 = vsub.f32 1.5, %v495_v29  ;;  %v527_v48 = vld [vmem:[%s1376_s2 + $0x28] sm:$0xff] }
 0x16a   :  { %v539_v13 = vmul.f32 %v523_v8, %v461_v30  ;;  %vm510_vm3 = vmor %vm508_vm1, %vm509_vm2  ;;  %vm644_vm10 = vcmp.ge.s32.totalorder %v1299_v63, 16 }
 0x16b   :  { %v504_v14 = vmul.f32 %v966_v9, %v503_v10  ;;  %v497_v47 = vmul.f32 %v1248_v6, %v496_v39 }
 0x16c   :  { %v547_v16 = vmul.f32 %v539_v13, %v1203_v52 }
 0x16d   :  { %v505_v17 = vmul.f32 0.5, %v504_v14 }
 0x16e   :  { %v968_v18 = vpop.eup %967  ;;  %586 = vperm.xlu1 %939, %v542_v57   ;;  %v555_v22 = vsub.f32 %v531_v15, %v547_v16 }
 0x16f   :  { %v506_v23 = vsub.f32 1.5, %v505_v17  ;;  %v513_v24 = vmul.f32 %v968_v18, %v441_v3  ;;  %688 = vperm.xlu2 %938, %v554_v0   ;;  %vm519_vm5 = vweird.f32 %v968_v18 }
 0x170   :  { %611 = vperm.xlu0 %942, %v555_v22   ;;  %vm520_vm6 = vmor %vm518_vm4, %vm519_vm5 }
 0x171   :  { %v514_v26 = vmul.f32 %v968_v18, %v513_v24  ;;  %v507_v27 = vmul.f32 %v966_v9, %v506_v23 }
 0x173   :  { %v515_v52 = vmul.f32 0.5, %v514_v26  ;;  %v511_v32 = vsel %vm510_vm3, %v966_v9, %v507_v27 }
 0x174   :  { %v544_v35 = vmul.f32 %v528_v28, %v511_v32 }
 0x175   :  { %v516_v2 = vsub.f32 1.5, %v515_v52 }
 0x176   :  { %940 = vset.pattern.permute.xlu1 %v970_v62  ;;  %v552_v37 = vmul.f32 %v544_v35, %v1219_v25  ;;  %v501_v25 = vsel %vm500_vm9, %v1248_v6, %v497_v47 }
 0x177   :  { %664 = vperm.xlu1 %940, %v542_v57   ;;  %v517_v40 = vmul.f32 %v968_v18, %v516_v2  ;;  %941 = vset.pattern.permute.xlu2 %v969_v56  ;;  %v543_v50 = vmul.f32 %v527_v48, %v501_v25 }
 0x178   :  { %948 = vset.pattern.permute.xlu0 %v970_v62  ;;  %v560_v42 = vsub.f32 %v536_v36, %v552_v37  ;;  %571 = vperm.xlu2 %941, %v539_v13  }
 0x179   :  { %v521_v44 = vsel %vm520_vm6, %v968_v18, %v517_v40  ;;  %v551_v53 = vmul.f32 %v543_v50, %v1208_v58 }
 0x17a   :  { %v545_v45 = vmul.f32 %v529_v41, %v521_v44 }
 0x17c   :  { %676 = vperm.xlu0 %948, %v545_v45   ;;  %v553_v49 = vmul.f32 %v545_v45, %v1227_v34  ;;  %v559_v34 = vsub.f32 %v535_v54, %v551_v53 }
 0x17e   :  { %v561_v51 = vsub.f32 %v537_v38, %v553_v49 }
 0x17f   :  { %652 = vperm.xlu1 %940, %v539_v13  }
 0x180   :  { %591 = vperm.xlu2 %941, %v543_v50  }
 0x184   :  { %949 = vset.pattern.permute.xlu0 %v969_v56 }
 0x185   :  { %641 = vperm.xlu0 %949, %v561_v51  }
 0x187   :  { %704 = vperm.xlu1 %940, %v1246_v5  }
 0x188   :  { %943 = vset.pattern.permute.xlu2 %v970_v62 }
 0x189   :  { %668 = vperm.xlu2 %943, %v543_v50  }
 0x18d   :  { %950 = vset.pattern.permute.xlu0 %v970_v62 }
 0x18e   :  { %708 = vperm.xlu0 %950, %v559_v34  }
 0x18f   :  { %692 = vperm.xlu1 %940, %v555_v22  }
 0x191   :  { %944 = vset.pattern.permute.xlu2 %v969_v56 }
 0x192   :  { %631 = vperm.xlu2 %944, %v559_v34  }
 0x197   :  { %945 = vset.pattern.permute.xlu1 %v969_v56 }
 0x198   :  { %596 = vperm.xlu1 %945, %v544_v35  }
 0x19a   :  { %601 = vperm.xlu2 %944, %v545_v45  }
 0x1a0   :  { %946 = vset.pattern.permute.xlu1 %v970_v62  ;;  %v617_v58 = vpop.permute.xlu2 %616 }
 0x1a1   :  { %672 = vperm.xlu1 %946, %v544_v35  }
 0x1a2   :  { %951 = vset.pattern.permute.xlu2 %v970_v62 }
 0x1a3   :  { %712 = vperm.xlu2 %951, %v560_v42  }
 0x1a8   :  { %v582_v55 = vpop.permute.xlu2 %581 }
 0x1a9   :  { %947 = vset.pattern.permute.xlu1 %v969_v56 }
 0x1aa   :  { %636 = vperm.xlu1 %947, %v560_v42  }
 0x1b1   :  { %v661_v59 = vpop.permute.xlu2 %660 }
 0x1b2   :  { %952 = vset.pattern.permute.xlu1 %v970_v62  ;;  %v682_v7 = vsel %vm644_vm10, %v661_v59, %v582_v55 }
 0x1b3   :  { %716 = vperm.xlu1 %952, %v561_v51   ;;  %v730_v30 = vmul.f32 %v682_v7, %v1132_v4 }
 0x1b4   :  { %v577_v57 = vpop.permute.xlu0 %576 }
 0x1b9   :  { %v649_v11 = vpop.permute.xlu2 %648 }
 0x1bd   :  { %v657_v0 = vpop.permute.xlu0 %656 }
 0x1be   :  { %v681_v1 = vsel %vm644_vm10, %v657_v0, %v577_v57 }
 0x1bf   :  { %v729_v56 = vmul.f32 %v681_v1, %v1126_v60 }
 0x1c1   :  { %v701_v9 = vpop.permute.xlu2 %700 }
 0x1c5   :  { %v697_v5 = vpop.permute.xlu0 %696 }
 0x1c6   :  { %v721_v62 = vsel %vm644_vm10, %v697_v5, %v617_v58 }
 0x1c7   :  { %v737_v6 = vadd.f32 %v729_v56, %v721_v62 }
 0x1c8   :  { %v567_v3 = vpop.permute.xlu1 %566 }
 0x1c9   :  { %v745_v8 = vmax.f32 %v737_v6, 0.0  ;;  %v679_v14 = vsel %vm644_vm10, %v649_v11, %v567_v3  ;;  %v689_v16 = vpop.permute.xlu2 %688 }
 0x1ca   :  { %v727_v15 = vmul.f32 %v679_v14, %v1140_v19 }
 0x1cb   :  { %753 = vst.msk [vmem:[%s1378_s4 + $0x10] sm:$0xff] %vm238_vm0, %v745_v8 }
 0x1d0   :  { %v622_v10 = vpop.permute.xlu1 %621 }
 0x1d1   :  { %v722_v60 = vsel %vm644_vm10, %v701_v9, %v622_v10 }
 0x1d2   :  { %v738_v12 = vadd.f32 %v730_v30, %v722_v60  ;;  %v572_v24 = vpop.permute.xlu2 %571 }
 0x1d4   :  { %v746_v13 = vmax.f32 %v738_v12, 0.0 }
 0x1d6   :  { %754 = vst.msk [vmem:[%s1378_s4 + $0x18] sm:$0xff] %vm238_vm0, %v746_v13 }
 0x1d8   :  { %v607_v17 = vpop.permute.xlu1 %606 }
 0x1d9   :  { %v719_v4 = vsel %vm644_vm10, %v689_v16, %v607_v17 }
 0x1da   :  { %v735_v18 = vadd.f32 %v727_v15, %v719_v4  ;;  %v627_v22 = vpop.permute.xlu0 %626  ;;  %v592_v28 = vpop.permute.xlu2 %591 }
 0x1dc   :  { %v743_v21 = vmax.f32 %v735_v18, 0.0 }
 0x1de   :  { %751 = vst.msk [vmem:[%s1378_s4] sm:$0xff] %vm238_vm0, %v743_v21 }
 0x1e0   :  { %v587_v23 = vpop.permute.xlu1 %586 }
 0x1e2   :  { %v612_v26 = vpop.permute.xlu0 %611 }
 0x1e3   :  { %v669_v52 = vpop.permute.xlu2 %668 }
 0x1e4   :  { %v684_v40 = vsel %vm644_vm10, %v669_v52, %v592_v28 }
 0x1e5   :  { %v732_v44 = vmul.f32 %v684_v40, %v1142_v20 }
 0x1e9   :  { %v665_v27 = vpop.permute.xlu1 %664 }
 0x1ea   :  { %v683_v32 = vsel %vm644_vm10, %v665_v27, %v587_v23 }
 0x1eb   :  { %v731_v2 = vmul.f32 %v683_v32, %v1152_v31 }
 0x1ec   :  { %v632_v31 = vpop.permute.xlu2 %631 }
 0x1ee   :  { %v677_v29 = vpop.permute.xlu0 %676 }
 0x1f1   :  { %v653_v19 = vpop.permute.xlu1 %652 }
 0x1f2   :  { %v680_v42 = vsel %vm644_vm10, %v653_v19, %v572_v24 }
 0x1f3   :  { %v728_v47 = vmul.f32 %v680_v42, %v1154_v33 }
 0x1f4   :  { %v602_v33 = vpop.permute.xlu2 %601 }
 0x1f5   :  { %v686_v11 = vsel %vm644_vm10, %v677_v29, %v602_v33 }
 0x1f6   :  { %v734_v1 = vmul.f32 %v686_v11, %v1163_v43 }
 0x1f7   :  { %v642_v35 = vpop.permute.xlu0 %641 }
 0x1f9   :  { %v705_v36 = vpop.permute.xlu1 %704 }
 0x1fa   :  { %v723_v37 = vsel %vm644_vm10, %v705_v36, %v627_v22 }
 0x1fb   :  { %v739_v39 = vadd.f32 %v731_v2, %v723_v37 }
 0x1fd   :  { %v747_v41 = vmax.f32 %v739_v39, 0.0  ;;  %v713_v58 = vpop.permute.xlu2 %712 }
 0x1ff   :  { %755 = vst.msk [vmem:[%s1378_s4 + $0x20] sm:$0xff] %vm238_vm0, %v747_v41 }
 0x200   :  { %v709_v45 = vpop.permute.xlu0 %708 }
 0x201   :  { %v724_v25 = vsel %vm644_vm10, %v709_v45, %v632_v31  ;;  %v693_v48 = vpop.permute.xlu1 %692 }
 0x202   :  { %v740_v49 = vadd.f32 %v732_v44, %v724_v25  ;;  %v720_v38 = vsel %vm644_vm10, %v693_v48, %v612_v26 }
 0x203   :  { %v736_v50 = vadd.f32 %v728_v47, %v720_v38 }
 0x204   :  { %v748_v51 = vmax.f32 %v740_v49, 0.0 }
 0x205   :  { %v744_v53 = vmax.f32 %v736_v50, 0.0 }
 0x206   :  { %756 = vst.msk [vmem:[%s1378_s4 + $0x28] sm:$0xff] %vm238_vm0, %v748_v51 }
 0x207   :  { %752 = vst.msk [vmem:[%s1378_s4 + $0x8] sm:$0xff] %vm238_vm0, %v744_v53 }
 0x20a   :  { %v597_v20 = vpop.permute.xlu1 %596 }
 0x213   :  { %v673_v54 = vpop.permute.xlu1 %672 }
 0x214   :  { %v685_v34 = vsel %vm644_vm10, %v673_v54, %v597_v20 }
 0x215   :  { %v733_v55 = vmul.f32 %v685_v34, %v1169_v46 }
 0x21c   :  { %v637_v57 = vpop.permute.xlu1 %636 }
 0x21d   :  { %v725_v59 = vsel %vm644_vm10, %v713_v58, %v637_v57 }
 0x21e   :  { %v741_v61 = vadd.f32 %v733_v55, %v725_v59 }
 0x220   :  { %v749_v0 = vmax.f32 %v741_v61, 0.0 }
 0x222   :  { %757 = vst.msk [vmem:[%s1378_s4 + $0x30] sm:$0xff] %vm238_vm0, %v749_v0 }
 0x225   :  { %v717_v3 = vpop.permute.xlu1 %716 }
 0x226   :  { %v726_v46 = vsel %vm644_vm10, %v717_v3, %v642_v35 }
 0x227   :  { %v742_v56 = vadd.f32 %v734_v1, %v726_v46 }
 0x229   :  { %v750_v5 = vmax.f32 %v742_v56, 0.0 }
 0x22b   :  { %758 = vst.msk [vmem:[%s1378_s4 + $0x38] sm:$0xff] %vm238_vm0, %v750_v5 }

// kernel: generator_forward.14
= control target key start
LH: loop header
LB: loop body
LE: loop exit
PB: predicated region body
PF: predicated region fallthrough
CT: control target
= control target key end

     0   :  { %vm430_vm0 = vcmask 523264   ;;  %vm588_vm1 = vcmask 261120   ;;  %s1883_s0 = inlined_call_operand.vmem [shape: bf16[576,32], index: 0, kind: input, shape index: {}]   ;;  %s1884_s1 = inlined_call_operand.vmem [shape: bf16[64,576], index: 1, kind: input, shape index: {}]   ;;  %s1885_s2 = inlined_call_operand.vmem [shape: f32[64,2], index: 2, kind: input, shape index: {}]   ;;  %s1886_s3 = inlined_call_operand.vmem [shape: f32[64,2], index: 3, kind: input, shape index: {}]   ;;  %s1887_s4 = inlined_call_operand.vmem [shape: f32[1,64,32], index: 4, kind: output, shape index: {}]  }
   0x1   :  { %v1269_v0 = vld [vmem:[%s1883_s0 + $0x38] sm:$0xff]  ;;  %v1268_v1 = vld [vmem:[%s1883_s0 + $0x30] sm:$0xff]  ;;  %v1267_v4 = vld [vmem:[%s1883_s0 + $0x28] sm:$0xff] }
   0x2   :  { %1298 = vmatpush.bf16.msra.mxu1 %v1269_v0  ;;  %1299 = vmatpush.bf16.msra.mxu2 %v1269_v0  ;;  %v1293_v2 = vld [vmem:[%s1883_s0 + $0xf8] sm:$0xff]  ;;  %v1292_v3 = vld [vmem:[%s1883_s0 + $0xf0] sm:$0xff]  ;;  %v1291_v5 = vld [vmem:[%s1883_s0 + $0xe8] sm:$0xff] }
   0x3   :  { %443 = vmatpush.bf16.msra.mxu0 %v1269_v0  ;;  %530 = vmatpush.bf16.msra.mxu3 %v1293_v2  ;;  %v1266_v6 = vld [vmem:[%s1883_s0 + $0x20] sm:$0xff]  ;;  %v1265_v8 = vld [vmem:[%s1883_s0 + $0x18] sm:$0xff]  ;;  %v1264_v10 = vld [vmem:[%s1883_s0 + $0x10] sm:$0xff] }
   0x4   :  { %v1290_v7 = vld [vmem:[%s1883_s0 + $0xe0] sm:$0xff]  ;;  %v1289_v9 = vld [vmem:[%s1883_s0 + $0xd8] sm:$0xff]  ;;  %v1288_v11 = vld [vmem:[%s1883_s0 + $0xd0] sm:$0xff] }
   0x5   :  { %v1263_v12 = vld [vmem:[%s1883_s0 + $0x8] sm:$0xff]  ;;  %v1262_v14 = vld [vmem:[%s1883_s0] sm:$0xff]  ;;  %v1249_v16 = vld [vmem:[%s1884_s1 + $0x38] sm:$0xf0] }
   0x6   :  { %1300 = vmatpush.bf16.msra.mxu1 %v1268_v1  ;;  %1301 = vmatpush.bf16.msra.mxu2 %v1268_v1  ;;  %v1287_v13 = vld [vmem:[%s1883_s0 + $0xc8] sm:$0xff]  ;;  %v1076_v17 = vld [vmem:[%s1884_s1 + $0x78] sm:$0xf]  ;;  %v1016_v21 = vld [vmem:[%s1884_s1] sm:$0xf] }
   0x7   :  { %444 = vmatpush.bf16.msra.mxu0 %v1268_v1  ;;  %531 = vmatpush.bf16.msra.mxu3 %v1292_v3  ;;  %v1036_v15 = vld [vmem:[%s1884_s1 + $0x28] sm:$0xf]  ;;  %v1259_v18 = vld [vmem:[%s1884_s1 + $0x88] sm:$0xf0]  ;;  %v1285_v19 = vld [vmem:[%s1883_s0 + $0xb8] sm:$0xff] }
   0x8   :  { %v1277_v20 = vld [vmem:[%s1883_s0 + $0x78] sm:$0xff]  ;;  %v1286_v22 = vld [vmem:[%s1883_s0 + $0xc0] sm:$0xff]  ;;  %v1037_v23 = vor.u32 %v1249_v16, %v1036_v15  ;;  %v1077_v24 = vor.u32 %v1259_v18, %v1076_v17  ;;  %v1244_v25 = vld [vmem:[%s1884_s1 + $0x10] sm:$0xf0] }
   0x9   :  { %v1243_v26 = vld [vmem:[%s1884_s1 + $0xc] sm:$0xf]  ;;  %v1026_v27 = vld [vmem:[%s1884_s1 + $0x1c] sm:$0xf0]  ;;  %v1297_v28 = vld [vmem:[%s1883_s0 + $0x118] sm:$0xff]  ;;  %v1017_v31 = vor.u32 %v1244_v25, %v1016_v21 }
   0xa   :  { %1302 = vmatpush.bf16.msra.mxu1 %v1267_v4  ;;  %1303 = vmatpush.bf16.msra.mxu2 %v1267_v4  ;;  %v1284_v29 = vld [vmem:[%s1883_s0 + $0xb0] sm:$0xff]  ;;  %v1029_v32 = vor.u32 %v1243_v26, %v1026_v27  ;;  %v1283_v34 = vld [vmem:[%s1883_s0 + $0xa8] sm:$0xff]  ;;  %v1282_v37 = vld [vmem:[%s1883_s0 + $0xa0] sm:$0xff] }
   0xb   :  { %445 = vmatpush.bf16.msra.mxu0 %v1267_v4  ;;  %532 = vmatpush.bf16.msra.mxu3 %v1291_v5  ;;  %v1276_v30 = vld [vmem:[%s1883_s0 + $0x70] sm:$0xff]  ;;  %v1275_v35 = vld [vmem:[%s1883_s0 + $0x68] sm:$0xff]  ;;  %v1274_v38 = vld [vmem:[%s1883_s0 + $0x60] sm:$0xff] }
   0xc   :  { %v1296_v33 = vld [vmem:[%s1883_s0 + $0x110] sm:$0xff]  ;;  %v1295_v36 = vld [vmem:[%s1883_s0 + $0x108] sm:$0xff]  ;;  %v1254_v40 = vld [vmem:[%s1884_s1 + $0x60] sm:$0xf0] }
   0xd   :  { %v1056_v39 = vld [vmem:[%s1884_s1 + $0x50] sm:$0xf]  ;;  %v1294_v41 = vld [vmem:[%s1883_s0 + $0x100] sm:$0xff]  ;;  %v1281_v42 = vld [vmem:[%s1883_s0 + $0x98] sm:$0xff] }
   0xe   :  { %1304 = vmatpush.bf16.msra.mxu1 %v1266_v6  ;;  %1305 = vmatpush.bf16.msra.mxu2 %v1266_v6  ;;  %v1273_v43 = vld [vmem:[%s1883_s0 + $0x58] sm:$0xff]  ;;  %v1032_v44 = vld [vmem:[%s1884_s1 + $0x10] sm:$0xf]  ;;  %v1057_v45 = vor.u32 %v1254_v40, %v1056_v39  ;;  %v1246_v46 = vld [vmem:[%s1884_s1 + $0x20] sm:$0xf0] }
   0xf   :  { %446 = vmatpush.bf16.msra.mxu0 %v1266_v6  ;;  %533 = vmatpush.bf16.msra.mxu3 %v1290_v7  ;;  %v1248_v47 = vld [vmem:[%s1884_s1 + $0x34] sm:$0xf]  ;;  %v1046_v48 = vld [vmem:[%s1884_s1 + $0x44] sm:$0xf0]  ;;  %v1033_v51 = vor.u32 %v1246_v46, %v1032_v44  ;;  %v1278_v55 = vld [vmem:[%s1883_s0 + $0x80] sm:$0xff] }
  0x10   :  { %v1280_v49 = vld [vmem:[%s1883_s0 + $0x90] sm:$0xff]  ;;  %v1049_v52 = vor.u32 %v1248_v47, %v1046_v48  ;;  %v1279_v53 = vld [vmem:[%s1883_s0 + $0x88] sm:$0xff]  ;;  %v1270_v56 = vld [vmem:[%s1883_s0 + $0x40] sm:$0xff] }
  0x11   :  { %v1272_v50 = vld [vmem:[%s1883_s0 + $0x50] sm:$0xff]  ;;  %v1271_v54 = vld [vmem:[%s1883_s0 + $0x48] sm:$0xff]  ;;  %v1245_v58 = vld [vmem:[%s1884_s1 + $0x18] sm:$0xf0] }
  0x12   :  { %1306 = vmatpush.bf16.msra.mxu1 %v1265_v8  ;;  %1307 = vmatpush.bf16.msra.mxu2 %v1265_v8  ;;  %v1024_v57 = vld [vmem:[%s1884_s1 + $0x8] sm:$0xf]  ;;  %v1242_v60 = vld [vmem:[%s1884_s1 + $0x4] sm:$0xf]  ;;  %v1018_v61 = vld [vmem:[%s1884_s1 + $0x14] sm:$0xf0] }
  0x13   :  { %447 = vmatpush.bf16.msra.mxu0 %v1265_v8  ;;  %534 = vmatpush.bf16.msra.mxu3 %v1289_v9  ;;  %v1025_v59 = vor.u32 %v1245_v58, %v1024_v57  ;;  %v1052_v62 = vld [vmem:[%s1884_s1 + $0x38] sm:$0xf]  ;;  %v1021_v63 = vor.u32 %v1242_v60, %v1018_v61  ;;  %v1251_v0 = vld [vmem:[%s1884_s1 + $0x48] sm:$0xf0]  ;;  %v1253_v1 = vld [vmem:[%s1884_s1 + $0x5c] sm:$0xf] }
  0x14   :  { %v1066_v2 = vld [vmem:[%s1884_s1 + $0x6c] sm:$0xf0]  ;;  %v1053_v3 = vor.u32 %v1251_v0, %v1052_v62  ;;  %v1250_v6 = vld [vmem:[%s1884_s1 + $0x40] sm:$0xf0]  ;;  %v1247_v8 = vld [vmem:[%s1884_s1 + $0x2c] sm:$0xf] }
  0x15   :  { %v1069_v4 = vor.u32 %v1253_v1, %v1066_v2  ;;  %v1044_v5 = vld [vmem:[%s1884_s1 + $0x30] sm:$0xf]  ;;  %v1038_v9 = vld [vmem:[%s1884_s1 + $0x3c] sm:$0xf0]  ;;  %v1064_v17 = vld [vmem:[%s1884_s1 + $0x58] sm:$0xf] }
  0x16   :  { %1308 = vmatpush.bf16.msra.mxu1 %v1264_v10  ;;  %1309 = vmatpush.bf16.msra.mxu2 %v1264_v10  ;;  %v1045_v7 = vor.u32 %v1250_v6, %v1044_v5  ;;  %v1255_v18 = vld [vmem:[%s1884_s1 + $0x68] sm:$0xf0]  ;;  %v1058_v21 = vld [vmem:[%s1884_s1 + $0x64] sm:$0xf0]  ;;  %v1084_v26 = vld [vmem:[%s1884_s1 + $0x80] sm:$0xf] }
  0x17   :  { %448 = vmatpush.bf16.msra.mxu0 %v1264_v10  ;;  %535 = vmatpush.bf16.msra.mxu3 %v1288_v11  ;;  %v1072_v10 = vld [vmem:[%s1884_s1 + $0x60] sm:$0xf]  ;;  %v1041_v11 = vor.u32 %v1247_v8, %v1038_v9  ;;  %v1260_v27 = vld [vmem:[%s1884_s1 + $0x90] sm:$0xf0] }
  0x1a   :  { %1310 = vmatpush.bf16.msra.mxu1 %v1263_v12  ;;  %1311 = vmatpush.bf16.msra.mxu2 %v1263_v12 }
  0x1b   :  { %449 = vmatpush.bf16.msra.mxu0 %v1263_v12  ;;  %536 = vmatpush.bf16.msra.mxu3 %v1287_v13  ;;  %v1256_v12 = vld [vmem:[%s1884_s1 + $0x70] sm:$0xf0]  ;;  %v1258_v13 = vld [vmem:[%s1884_s1 + $0x84] sm:$0xf] }
  0x1c   :  { %v1073_v15 = vor.u32 %v1256_v12, %v1072_v10 }
  0x1e   :  { %1312 = vmatpush.bf16.msra.mxu1 %v1262_v14  ;;  %1313 = vmatpush.bf16.msra.mxu2 %v1262_v14 }
  0x1f   :  { %450 = vmatpush.bf16.msra.mxu0 %v1262_v14  ;;  %537 = vmatpush.bf16.msra.mxu3 %v1286_v22  ;;  %v1086_v14 = vld [vmem:[%s1884_s1 + $0x94] sm:$0xf0] }
  0x20   :  { %v1089_v16 = vor.u32 %v1258_v13, %v1086_v14 }
  0x21   :  { %456 = vmatmul.bf16.vlgmr.msra.gmra.mxu1 %v1037_v23  ;;  %466 = vmatmul.bf16.vlgmr.msra.gmra.mxu2 %v1077_v24  ;;  %v1092_v23 = vld [vmem:[%s1884_s1 + $0x88] sm:$0xf]  ;;  %v1261_v24 = vld [vmem:[%s1884_s1 + $0x98] sm:$0xf0] }
  0x22   :  { %501 = vmatpush.bf16.msrb.mxu2 %v1285_v19  ;;  %472 = vmatpush.bf16.msrb.mxu1 %v1277_v20  ;;  %v1065_v19 = vor.u32 %v1255_v18, %v1064_v17  ;;  %v1252_v20 = vld [vmem:[%s1884_s1 + $0x54] sm:$0xf]  ;;  %v1093_v25 = vor.u32 %v1261_v24, %v1092_v23 }
  0x23   :  { %563 = vmatpush.bf16.msrb.mxu0 %v1297_v28  ;;  %538 = vmatmul.bf16.vlgmr.msra.gmra.mxu3 %v1029_v32  ;;  %v1061_v22 = vor.u32 %v1252_v20, %v1058_v21  ;;  %v1085_v28 = vor.u32 %v1260_v27, %v1084_v26 }
  0x24   :  { %451 = vmatmul.bf16.vlgmr.msra.gmra.mxu0 %v1017_v31 }
  0x26   :  { %502 = vmatpush.bf16.msrb.mxu2 %v1284_v29  ;;  %473 = vmatpush.bf16.msrb.mxu1 %v1276_v30  ;;  %v1257_v29 = vld [vmem:[%s1884_s1 + $0x7c] sm:$0xf]  ;;  %v1078_v30 = vld [vmem:[%s1884_s1 + $0x8c] sm:$0xf0] }
  0x27   :  { %564 = vmatpush.bf16.msrb.mxu0 %v1296_v33  ;;  %v1081_v31 = vor.u32 %v1257_v29, %v1078_v30 }
  0x2a   :  { %503 = vmatpush.bf16.msrb.mxu2 %v1283_v34  ;;  %474 = vmatpush.bf16.msrb.mxu1 %v1275_v35 }
  0x2b   :  { %565 = vmatpush.bf16.msrb.mxu0 %v1295_v36 }
  0x2e   :  { %504 = vmatpush.bf16.msrb.mxu2 %v1282_v37  ;;  %475 = vmatpush.bf16.msrb.mxu1 %v1274_v38 }
  0x2f   :  { %566 = vmatpush.bf16.msrb.mxu0 %v1294_v41 }
  0x31   :  { %461 = vmatmul.bf16.gmra.mxu1 %v1057_v45 }
  0x32   :  { %505 = vmatpush.bf16.msrb.mxu2 %v1281_v42  ;;  %476 = vmatpush.bf16.msrb.mxu1 %v1273_v43 }
  0x33   :  { %543 = vmatmul.bf16.gmra.mxu3 %v1049_v52 }
  0x34   :  { %1238 = vmatmul.msk.bf16.vlgmr.msrb.gmra.mxu0 %vm430_vm0, %v1033_v51 }
  0x36   :  { %506 = vmatpush.bf16.msrb.mxu2 %v1280_v49  ;;  %477 = vmatpush.bf16.msrb.mxu1 %v1272_v50 }
  0x3a   :  { %507 = vmatpush.bf16.msrb.mxu2 %v1279_v53  ;;  %478 = vmatpush.bf16.msrb.mxu1 %v1271_v54 }
  0x3e   :  { %508 = vmatpush.bf16.msrb.mxu2 %v1278_v55  ;;  %479 = vmatpush.bf16.msrb.mxu1 %v1270_v56 }
  0x41   :  { %509 = vmatmul.bf16.vlgmr.msrb.gmra.mxu2 %v1025_v59  ;;  %480 = vmatmul.bf16.vlgmr.msrb.gmra.mxu1 %v1021_v63 }
  0x43   :  { %548 = vmatmul.bf16.gmra.mxu3 %v1069_v4 }
  0x44   :  { %1239 = vmatmul.msk.bf16.gmra.mxu0 %vm430_vm0, %v1053_v3 }
  0x51   :  { %514 = vmatmul.bf16.gmra.mxu2 %v1045_v7  ;;  %485 = vmatmul.bf16.gmra.mxu1 %v1041_v11 }
  0x53   :  { %553 = vmatmul.bf16.gmra.mxu3 %v1089_v16 }
  0x54   :  { %1240 = vmatmul.msk.bf16.gmra.mxu0 %vm430_vm0, %v1073_v15 }
  0x61   :  { %519 = vmatmul.bf16.gmra.mxu2 %v1065_v19  ;;  %490 = vmatmul.bf16.gmra.mxu1 %v1061_v22 }
  0x64   :  { %1241 = vmatmul.msk.bf16.gmra.mxu0 %vm430_vm0, %v1093_v25 }
  0x71   :  { %524 = vmatmul.bf16.gmra.mxu2 %v1085_v28  ;;  %495 = vmatmul.bf16.gmra.mxu1 %v1081_v31 }
  0x9e   :  { %v457_v32 = vpop.f32.mrf.mxu1 }
  0xa1   :  { %v452_v33 = vpop.f32.mrf.mxu0 }
  0xa4   :  { %v1612_v37 = vpop.f32.mrf.mxu2 }
  0xa6   :  { %v459_v34 = vpop.f32.mrf.mxu1  ;;  %v539_v38 = vpop.f32.mrf.mxu3 }
  0xa9   :  { %v454_v35 = vpop.f32.mrf.mxu0 }
  0xac   :  { %v1614_v41 = vpop.f32.mrf.mxu2 }
  0xae   :  { %v462_v36 = vpop.f32.mrf.mxu1  ;;  %v541_v44 = vpop.f32.mrf.mxu3 }
  0xb1   :  { %v568_v40 = vpop.f32.mrf.mxu0 }
  0xb6   :  { %v464_v39 = vpop.f32.mrf.mxu1  ;;  %v544_v55 = vpop.f32.mrf.mxu3 }
  0xb9   :  { %v570_v46 = vpop.f32.mrf.mxu0 }
  0xbe   :  { %v481_v42 = vpop.f32.mrf.mxu1  ;;  %v546_v2 = vpop.f32.mrf.mxu3 }
  0xbf   :  { %v482_v43 = vadd.f32 %v481_v42, %v452_v33 }
  0xc1   :  { %v573_v58 = vpop.f32.mrf.mxu0 }
  0xc4   :  { %v510_v45 = vpop.f32.mrf.mxu2 }
  0xc5   :  { %v511_v47 = vadd.f32 %v510_v45, %v482_v43 }
  0xc6   :  { %v483_v49 = vpop.f32.mrf.mxu1  ;;  %v549_v13 = vpop.f32.mrf.mxu3 }
  0xc7   :  { %v540_v48 = vadd.f32 %v539_v38, %v511_v47  ;;  %v484_v51 = vadd.f32 %v483_v49, %v454_v35 }
  0xc9   :  { %v1616_v50 = vadd.f32 %v568_v40, %v540_v48  ;;  %v575_v5 = vpop.f32.mrf.mxu0 }
  0xcb   :  { %v589_v52 = vsel %vm588_vm1, %v1616_v50, 0.0  ;;  %v613_v53 = vmul.f32 %v1616_v50, %v1616_v50 }
  0xcc   :  { %v512_v54 = vpop.f32.mrf.mxu2  ;;  %590 = vadd.xlane.f32.xlu0 %v589_v52 }
  0xcd   :  { %v513_v56 = vadd.f32 %v512_v54, %v484_v51  ;;  %v621_v57 = vsel %vm588_vm1, %v613_v53, 0.0 }
  0xce   :  { %622 = vadd.xlane.f32.xlu2 %v621_v57  ;;  %v486_v61 = vpop.f32.mrf.mxu1  ;;  %v551_v26 = vpop.f32.mrf.mxu3 }
  0xcf   :  { %v542_v59 = vadd.f32 %v541_v44, %v513_v56  ;;  %v487_v62 = vadd.f32 %v486_v61, %v457_v32 }
  0xd1   :  { %v1623_v60 = vadd.f32 %v570_v46, %v542_v59  ;;  %v578_v16 = vpop.f32.mrf.mxu0 }
  0xd3   :  { %v592_v63 = vsel %vm588_vm1, %v1623_v60, 0.0  ;;  %v614_v4 = vmul.f32 %v1623_v60, %v1623_v60 }
  0xd4   :  { %v515_v0 = vpop.f32.mrf.mxu2  ;;  %593 = vadd.xlane.f32.xlu0 %v592_v63 }
  0xd5   :  { %v516_v1 = vadd.f32 %v515_v0, %v487_v62  ;;  %v624_v10 = vsel %vm588_vm1, %v614_v4, 0.0 }
  0xd6   :  { %v488_v6 = vpop.f32.mrf.mxu1  ;;  %v554_v43 = vpop.f32.mrf.mxu3 }
  0xd7   :  { %v545_v3 = vadd.f32 %v544_v55, %v516_v1  ;;  %v489_v8 = vadd.f32 %v488_v6, %v459_v34 }
  0xd9   :  { %v1629_v7 = vadd.f32 %v573_v58, %v545_v3  ;;  %v580_v30 = vpop.f32.mrf.mxu0  ;;  %v1354_v3 = vmov 0  }
  0xda   :  { %1316 = vset.pattern.permute.xlu1 %v1354_v3  ;;  %1320 = vset.pattern.permute.xlu0 %v1354_v3 }
  0xdb   :  { %v595_v9 = vsel %vm588_vm1, %v1629_v7, 0.0  ;;  %v615_v15 = vmul.f32 %v1629_v7, %v1629_v7 }
  0xdc   :  { %v517_v11 = vpop.f32.mrf.mxu2  ;;  %596 = vadd.xlane.f32.xlu1 %v595_v9  ;;  %625 = vadd.xlane.f32.xlu0 %v624_v10 }
  0xdd   :  { %v518_v12 = vadd.f32 %v517_v11, %v489_v8  ;;  %v627_v20 = vsel %vm588_vm1, %v615_v15, 0.0 }
  0xde   :  { %v491_v18 = vpop.f32.mrf.mxu1  ;;  %v556_v57 = vpop.f32.mrf.mxu3 }
  0xdf   :  { %v547_v14 = vadd.f32 %v546_v2, %v518_v12  ;;  %v492_v19 = vadd.f32 %v491_v18, %v462_v36  ;;  %v1353_v2 = vmov 1  }
  0xe0   :  { %1317 = vset.pattern.permute.xlu2 %v1353_v2 }
  0xe1   :  { %v1636_v17 = vadd.f32 %v575_v5, %v547_v14  ;;  %v583_v46 = vpop.f32.mrf.mxu0 }
  0xe3   :  { %v616_v21 = vmul.f32 %v1636_v17, %v1636_v17  ;;  %v598_v31 = vsel %vm588_vm1, %v1636_v17, 0.0 }
  0xe4   :  { %v520_v22 = vpop.f32.mrf.mxu2  ;;  %628 = vadd.xlane.f32.xlu1 %v627_v20 }
  0xe5   :  { %v521_v23 = vadd.f32 %v520_v22, %v492_v19  ;;  %v630_v24 = vsel %vm588_vm1, %v616_v21, 0.0 }
  0xe6   :  { %631 = vadd.xlane.f32.xlu2 %v630_v24  ;;  %v493_v28 = vpop.f32.mrf.mxu1 }
  0xe7   :  { %v550_v25 = vadd.f32 %v549_v13, %v521_v23  ;;  %v494_v29 = vadd.f32 %v493_v28, %v464_v39 }
  0xe9   :  { %v1642_v27 = vadd.f32 %v578_v16, %v550_v25  ;;  %v585_v61 = vpop.f32.mrf.mxu0 }
  0xeb   :  { %v617_v32 = vmul.f32 %v1642_v27, %v1642_v27  ;;  %v601_v35 = vsel %vm588_vm1, %v1642_v27, 0.0 }
  0xec   :  { %v522_v33 = vpop.f32.mrf.mxu2  ;;  %599 = vadd.xlane.f32.xlu1 %v598_v31 }
  0xed   :  { %v523_v34 = vadd.f32 %v522_v33, %v494_v29  ;;  %v633_v36 = vsel %vm588_vm1, %v617_v32, 0.0 }
  0xee   :  { %602 = vadd.xlane.f32.xlu2 %v601_v35  ;;  %634 = vadd.xlane.f32.xlu0 %v633_v36  ;;  %v496_v39 = vpop.f32.mrf.mxu1  ;;  %v773_v35 = vld [vmem:[%s1885_s2] sm:$0xff] }
  0xef   :  { %v552_v38 = vadd.f32 %v551_v26, %v523_v34  ;;  %v497_v42 = vadd.f32 %v496_v39, %v1612_v37 }
  0xf1   :  { %v1651_v40 = vadd.f32 %v580_v30, %v552_v38 }
  0xf3   :  { %v618_v44 = vmul.f32 %v1651_v40, %v1651_v40  ;;  %v604_v49 = vsel %vm588_vm1, %v1651_v40, 0.0 }
  0xf4   :  { %v525_v45 = vpop.f32.mrf.mxu2 }
  0xf5   :  { %v526_v47 = vadd.f32 %v525_v45, %v497_v42  ;;  %v636_v48 = vsel %vm588_vm1, %v618_v44, 0.0 }
  0xf6   :  { %637 = vadd.xlane.f32.xlu1 %v636_v48  ;;  %605 = vadd.xlane.f32.xlu2 %v604_v49  ;;  %v498_v53 = vpop.f32.mrf.mxu1 }
  0xf7   :  { %v555_v51 = vadd.f32 %v554_v43, %v526_v47  ;;  %v499_v37 = vadd.f32 %v498_v53, %v1614_v41 }
  0xf9   :  { %v1659_v52 = vadd.f32 %v583_v46, %v555_v51 }
  0xfb   :  { %v607_v54 = vsel %vm588_vm1, %v1659_v52, 0.0  ;;  %v619_v55 = vmul.f32 %v1659_v52, %v1659_v52 }
  0xfc   :  { %v527_v56 = vpop.f32.mrf.mxu2  ;;  %608 = vadd.xlane.f32.xlu0 %v607_v54 }
  0xfd   :  { %v528_v58 = vadd.f32 %v527_v56, %v499_v37  ;;  %v639_v59 = vsel %vm588_vm1, %v619_v55, 0.0  ;;  %v781_v37 = vld [vmem:[%s1886_s3] sm:$0xff] }
  0xfe   :  { %640 = vadd.xlane.f32.xlu2 %v639_v59 }
  0xff   :  { %v557_v62 = vadd.f32 %v556_v57, %v528_v58 }
 0x101   :  { %v1667_v63 = vadd.f32 %v585_v61, %v557_v62 }
 0x103   :  { %v610_v41 = vsel %vm588_vm1, %v1667_v63, 0.0  ;;  %v620_v0 = vmul.f32 %v1667_v63, %v1667_v63 }
 0x104   :  { %611 = vadd.xlane.f32.xlu1 %v610_v41 }
 0x105   :  { %v642_v1 = vsel %vm588_vm1, %v620_v0, 0.0 }
 0x106   :  { %643 = vadd.xlane.f32.xlu0 %v642_v1 }
 0x13f   :  { %v591_v4 = vpop.xlane.xlu0 %590 }
 0x140   :  { %v645_v5 = vmul.f32 0.03125, %v591_v4 }
 0x141   :  { %v623_v6 = vpop.xlane.xlu2 %622 }
 0x142   :  { %v661_v8 = vmul.f32 %v645_v5, %v645_v5  ;;  %v653_v9 = vmul.f32 0.03125, %v623_v6 }
 0x144   :  { %v669_v10 = vsub.f32 %v653_v9, %v661_v8 }
 0x146   :  { %v677_v11 = vmax.f32 %v669_v10, 0.0  ;;  %v774_v10 = vld [vmem:[%s1885_s2 + $0x8] sm:$0xff] }
 0x147   :  { %v594_v12 = vpop.xlane.xlu0 %593 }
 0x148   :  { %v685_v13 = vadd.f32 1e-05, %v677_v11  ;;  %v1677_v14 = vmul.f32 0.03125, %v594_v12 }
 0x14a   :  { %1337 = vrsqrt.f32 %v685_v13  ;;  %v662_v19 = vmul.f32 %v1677_v14, %v1677_v14  ;;  %vm699_vm3 = vweird.f32 %v685_v13 }
 0x14f   :  { %v597_v15 = vpop.xlane.xlu1 %596  ;;  %v626_v16 = vpop.xlane.xlu0 %625 }
 0x150   :  { %v1338_v18 = vpop.eup %1337  ;;  %v654_v20 = vmul.f32 0.03125, %v626_v16  ;;  %v1681_v24 = vmul.f32 0.03125, %v597_v15 }
 0x151   :  { %v694_v21 = vmul.f32 %v1338_v18, %v685_v13  ;;  %vm700_vm2 = vweird.f32 %v1338_v18 }
 0x152   :  { %v670_v22 = vsub.f32 %v654_v20, %v662_v19  ;;  %v663_v31 = vmul.f32 %v1681_v24, %v1681_v24  ;;  %vm701_vm4 = vmor %vm699_vm3, %vm700_vm2 }
 0x153   :  { %v695_v23 = vmul.f32 %v1338_v18, %v694_v21  ;;  %v782_v21 = vld [vmem:[%s1886_s3 + $0x8] sm:$0xff] }
 0x154   :  { %v678_v25 = vmax.f32 %v670_v22, 0.0 }
 0x155   :  { %v696_v26 = vmul.f32 0.5, %v695_v23 }
 0x156   :  { %v686_v28 = vadd.f32 1e-05, %v678_v25 }
 0x157   :  { %v697_v29 = vsub.f32 1.5, %v696_v26  ;;  %v629_v30 = vpop.xlane.xlu1 %628 }
 0x158   :  { %1339 = vrsqrt.f32 %v686_v28  ;;  %v655_v32 = vmul.f32 0.03125, %v629_v30  ;;  %vm709_vm6 = vweird.f32 %v686_v28 }
 0x159   :  { %v632_v33 = vpop.xlane.xlu2 %631  ;;  %v698_v34 = vmul.f32 %v1338_v18, %v697_v29 }
 0x15a   :  { %v671_v36 = vsub.f32 %v655_v32, %v663_v31  ;;  %v656_v54 = vmul.f32 0.03125, %v632_v33  ;;  %v775_v32 = vld [vmem:[%s1885_s2 + $0x10] sm:$0xff] }
 0x15b   :  { %v702_v38 = vsel %vm701_vm4, %v1338_v18, %v698_v34 }
 0x15c   :  { %v679_v39 = vmax.f32 %v671_v36, 0.0  ;;  %v789_v42 = vmul.f32 %v773_v35, %v702_v38 }
 0x15e   :  { %v1340_v43 = vpop.eup %1339  ;;  %v687_v44 = vadd.f32 1e-05, %v679_v39  ;;  %899 = vperm.xlu2 %1317, %v789_v42   ;;  %817 = vperm.xlu1 %1316, %v789_v42   ;;  %v797_v48 = vmul.f32 %v789_v42, %v645_v5 }
 0x15f   :  { %v704_v45 = vmul.f32 %v1340_v43, %v686_v28  ;;  %v600_v46 = vpop.xlane.xlu1 %599  ;;  %vm710_vm5 = vweird.f32 %v1340_v43 }
 0x160   :  { %1341 = vrsqrt.f32 %v687_v44  ;;  %v1688_v47 = vmul.f32 0.03125, %v600_v46  ;;  %v805_v62 = vsub.f32 %v781_v37, %v797_v48  ;;  %vm711_vm7 = vmor %vm709_vm6, %vm710_vm5  ;;  %vm719_vm9 = vweird.f32 %v687_v44  ;;  %v783_v48 = vld [vmem:[%s1886_s3 + $0x10] sm:$0xff] }
 0x161   :  { %v705_v49 = vmul.f32 %v1340_v43, %v704_v45  ;;  %v603_v51 = vpop.xlane.xlu2 %602  ;;  %v635_v53 = vpop.xlane.xlu0 %634 }
 0x162   :  { %v664_v55 = vmul.f32 %v1688_v47, %v1688_v47  ;;  %v1695_v56 = vmul.f32 0.03125, %v603_v51  ;;  %v657_v61 = vmul.f32 0.03125, %v635_v53 }
 0x163   :  { %v706_v57 = vmul.f32 0.5, %v705_v49 }
 0x164   :  { %v672_v58 = vsub.f32 %v656_v54, %v664_v55  ;;  %v665_v59 = vmul.f32 %v1695_v56, %v1695_v56 }
 0x165   :  { %v707_v41 = vsub.f32 1.5, %v706_v57 }
 0x166   :  { %v1342_v0 = vpop.eup %1341  ;;  %v680_v1 = vmax.f32 %v672_v58, 0.0  ;;  %v673_v4 = vsub.f32 %v657_v61, %v665_v59  ;;  %939 = vperm.xlu2 %1317, %v805_v62   ;;  %857 = vperm.xlu1 %1316, %v805_v62  }
 0x167   :  { %v714_v5 = vmul.f32 %v1342_v0, %v687_v44  ;;  %v708_v6 = vmul.f32 %v1340_v43, %v707_v41  ;;  %vm720_vm8 = vweird.f32 %v1342_v0  ;;  %v776_v41 = vld [vmem:[%s1885_s2 + $0x18] sm:$0xff] }
 0x168   :  { %v1699_v8 = vadd.f32 1e-05, %v680_v1  ;;  %v681_v9 = vmax.f32 %v673_v4, 0.0  ;;  %vm721_vm10 = vmor %vm719_vm9, %vm720_vm8 }
 0x169   :  { %v715_v11 = vmul.f32 %v1342_v0, %v714_v5  ;;  %v606_v12 = vpop.xlane.xlu2 %605  ;;  %v712_v13 = vsel %vm711_vm7, %v1340_v43, %v708_v6  ;;  %v638_v16 = vpop.xlane.xlu1 %637 }
 0x16a   :  { %1343 = vrsqrt.f32 %v1699_v8  ;;  %v1705_v15 = vadd.f32 1e-05, %v681_v9  ;;  %v1707_v19 = vmul.f32 0.03125, %v606_v12  ;;  %v790_v20 = vmul.f32 %v774_v10, %v712_v13  ;;  %v784_v12 = vld [vmem:[%s1886_s3 + $0x18] sm:$0xff] }
 0x16b   :  { %v716_v18 = vmul.f32 0.5, %v715_v11  ;;  %v658_v23 = vmul.f32 0.03125, %v638_v16  ;;  %vm729_vm12 = vweird.f32 %v1699_v8 }
 0x16c   :  { %1345 = vrsqrt.f32 %v1705_v15  ;;  %v666_v25 = vmul.f32 %v1707_v19, %v1707_v19  ;;  %v798_v26 = vmul.f32 %v790_v20, %v1677_v14  ;;  %vm739_vm15 = vweird.f32 %v1705_v15 }
 0x16d   :  { %v717_v22 = vsub.f32 1.5, %v716_v18 }
 0x16e   :  { %1318 = vset.pattern.permute.xlu2 %v1354_v3  ;;  %1319 = vset.pattern.permute.xlu1 %v1353_v2  ;;  %v674_v29 = vsub.f32 %v658_v23, %v666_v25  ;;  %v806_v31 = vsub.f32 %v782_v21, %v798_v26 }
 0x16f   :  { %v718_v28 = vmul.f32 %v1342_v0, %v717_v22  ;;  %903 = vperm.xlu1 %1319, %v790_v20   ;;  %822 = vperm.xlu2 %1318, %v790_v20   ;;  %v609_v30 = vpop.xlane.xlu0 %608 }
 0x170   :  { %v1344_v33 = vpop.eup %1343  ;;  %v1722_v34 = vmul.f32 0.03125, %v609_v30  ;;  %v682_v36 = vmax.f32 %v674_v29, 0.0  ;;  %862 = vperm.xlu0 %1320, %v806_v31   ;;  %v777_v30 = vld [vmem:[%s1885_s2 + $0x20] sm:$0xff] }
 0x171   :  { %v722_v14 = vsel %vm721_vm10, %v1342_v0, %v718_v28  ;;  %v724_v35 = vmul.f32 %v1344_v33, %v1699_v8  ;;  %v641_v38 = vpop.xlane.xlu2 %640  ;;  %vm730_vm11 = vweird.f32 %v1344_v33 }
 0x172   :  { %v1725_v39 = vpop.eup %1345  ;;  %v667_v42 = vmul.f32 %v1722_v34, %v1722_v34  ;;  %v659_v43 = vmul.f32 0.03125, %v641_v38  ;;  %v791_v44 = vmul.f32 %v775_v32, %v722_v14  ;;  %v1734_v49 = vadd.f32 1e-05, %v682_v36  ;;  %vm731_vm13 = vmor %vm729_vm12, %vm730_vm11  ;;  %v779_v36 = vld [vmem:[%s1885_s2 + $0x30] sm:$0xff] }
 0x173   :  { %v725_v45 = vmul.f32 %v1344_v33, %v724_v35  ;;  %v734_v46 = vmul.f32 %v1725_v39, %v1705_v15  ;;  %vm740_vm14 = vweird.f32 %v1725_v39 }
 0x174   :  { %v675_v51 = vsub.f32 %v659_v43, %v667_v42  ;;  %v799_v53 = vmul.f32 %v791_v44, %v1681_v24  ;;  %1347 = vrsqrt.f32 %v1734_v49  ;;  %vm741_vm0 = vmor %vm739_vm15, %vm740_vm14  ;;  %vm749_vm6 = vweird.f32 %v1734_v49 }
 0x175   :  { %v726_v37 = vmul.f32 0.5, %v725_v45  ;;  %v735_v54 = vmul.f32 %v1725_v39, %v734_v46  ;;  %v787_v46 = vld [vmem:[%s1886_s3 + $0x30] sm:$0xff] }
 0x176   :  { %v683_v55 = vmax.f32 %v675_v51, 0.0  ;;  %v807_v57 = vsub.f32 %v783_v48, %v799_v53  ;;  %v785_v48 = vld [vmem:[%s1886_s3 + $0x20] sm:$0xff] }
 0x177   :  { %v727_v58 = vsub.f32 1.5, %v726_v37  ;;  %v612_v59 = vpop.xlane.xlu1 %611  ;;  %943 = vperm.xlu1 %1319, %v806_v31   ;;  %v736_v0 = vmul.f32 0.5, %v735_v54 }
 0x178   :  { %v691_v61 = vadd.f32 1e-05, %v683_v55  ;;  %v1739_v62 = vmul.f32 0.03125, %v612_v59  ;;  %867 = vperm.xlu2 %1318, %v807_v57   ;;  %827 = vperm.xlu0 %1320, %v791_v44   ;;  %v780_v59 = vld [vmem:[%s1885_s2 + $0x38] sm:$0xff] }
 0x179   :  { %v728_v24 = vmul.f32 %v1344_v33, %v727_v58  ;;  %v644_v1 = vpop.xlane.xlu0 %643  ;;  %v737_v11 = vsub.f32 1.5, %v736_v0 }
 0x17a   :  { %1349 = vrsqrt.f32 %v691_v61  ;;  %v668_v4 = vmul.f32 %v1739_v62, %v1739_v62  ;;  %v660_v5 = vmul.f32 0.03125, %v644_v1  ;;  %v1750_v13 = vpop.eup %1347  ;;  %vm759_vm3 = vweird.f32 %v691_v61 }
 0x17b   :  { %v732_v6 = vsel %vm731_vm13, %v1344_v33, %v728_v24  ;;  %v744_v22 = vmul.f32 %v1750_v13, %v1734_v49  ;;  %v738_v25 = vmul.f32 %v1725_v39, %v737_v11  ;;  %vm750_vm5 = vweird.f32 %v1750_v13  ;;  %v788_v24 = vld [vmem:[%s1886_s3 + $0x38] sm:$0xff] }
 0x17c   :  { %v792_v9 = vmul.f32 %v776_v41, %v732_v6  ;;  %v676_v10 = vsub.f32 %v660_v5, %v668_v4  ;;  %vm751_vm8 = vmor %vm749_vm6, %vm750_vm5  ;;  %v813_v6 = vlaneseq }
 0x17d   :  { %v745_v26 = vmul.f32 %v1750_v13, %v744_v22  ;;  %v742_v29 = vsel %vm741_vm0, %v1725_v39, %v738_v25 }
 0x17e   :  { %v800_v8 = vmul.f32 %v792_v9, %v1688_v47  ;;  %v684_v16 = vmax.f32 %v676_v10, 0.0  ;;  %v793_v33 = vmul.f32 %v777_v30, %v742_v29  ;;  %v1808_v10 = vand.u32 127, %v813_v6 }
 0x17f   :  { %1323 = vset.pattern.permute.xlu1 %v1354_v3  ;;  %v746_v14 = vmul.f32 0.5, %v745_v26 }
 0x180   :  { %v1350_v18 = vpop.eup %1349  ;;  %v692_v20 = vadd.f32 1e-05, %v684_v16  ;;  %832 = vperm.xlu2 %1318, %v792_v9   ;;  %v808_v21 = vsub.f32 %v784_v12, %v800_v8  ;;  %1321 = vset.pattern.permute.xlu0 %v1353_v2  ;;  %v801_v45 = vmul.f32 %v793_v33, %v1695_v56  ;;  %vm895_vm11 = vcmp.ge.s32.totalorder %v1808_v10, 16 }
 0x181   :  { %v754_v23 = vmul.f32 %v1350_v18, %v691_v61  ;;  %907 = vperm.xlu0 %1321, %v791_v44   ;;  %vm760_vm2 = vweird.f32 %v1350_v18  ;;  %v747_v43 = vsub.f32 1.5, %v746_v14 }
 0x182   :  { %1351 = vrsqrt.f32 %v692_v20  ;;  %872 = vperm.xlu1 %1323, %v808_v21   ;;  %vm761_vm4 = vmor %vm759_vm3, %vm760_vm2  ;;  %v809_v55 = vsub.f32 %v785_v48, %v801_v45  ;;  %vm769_vm9 = vweird.f32 %v692_v20 }
 0x183   :  { %v755_v47 = vmul.f32 %v1350_v18, %v754_v23  ;;  %v748_v54 = vmul.f32 %v1750_v13, %v747_v43 }
 0x185   :  { %v756_v28 = vmul.f32 0.5, %v755_v47 }
 0x187   :  { %v757_v31 = vsub.f32 1.5, %v756_v28 }
 0x188   :  { %v1352_v32 = vpop.eup %1351  ;;  %1322 = vset.pattern.permute.xlu2 %v1353_v2 }
 0x189   :  { %v764_v15 = vmul.f32 %v1352_v32, %v692_v20  ;;  %911 = vperm.xlu2 %1322, %v792_v9   ;;  %v758_v35 = vmul.f32 %v1350_v18, %v757_v31  ;;  %947 = vperm.xlu0 %1321, %v807_v57   ;;  %vm770_vm7 = vweird.f32 %v1352_v32  ;;  %v752_v57 = vsel %vm751_vm8, %v1750_v13, %v748_v54 }
 0x18a   :  { %837 = vperm.xlu1 %1323, %v793_v33   ;;  %vm771_vm10 = vmor %vm769_vm9, %vm770_vm7 }
 0x18b   :  { %v765_v38 = vmul.f32 %v1352_v32, %v764_v15  ;;  %v762_v39 = vsel %vm761_vm4, %v1350_v18, %v758_v35 }
 0x18c   :  { %v795_v42 = vmul.f32 %v779_v36, %v762_v39 }
 0x18d   :  { %v766_v44 = vmul.f32 0.5, %v765_v38 }
 0x18e   :  { %v803_v51 = vmul.f32 %v795_v42, %v1722_v34  ;;  %v778_v34 = vld [vmem:[%s1885_s2 + $0x28] sm:$0xff] }
 0x18f   :  { %v767_v53 = vsub.f32 1.5, %v766_v44  ;;  %v794_v61 = vmul.f32 %v778_v34, %v752_v57 }
 0x190   :  { %v811_v37 = vsub.f32 %v787_v46, %v803_v51 }
 0x191   :  { %951 = vperm.xlu2 %1322, %v808_v21   ;;  %1325 = vset.pattern.permute.xlu0 %v1354_v3  ;;  %v768_v56 = vmul.f32 %v1352_v32, %v767_v53  ;;  %v802_v1 = vmul.f32 %v794_v61, %v1707_v19 }
 0x192   :  { %1324 = vset.pattern.permute.xlu1 %v1353_v2  ;;  %877 = vperm.xlu0 %1325, %v809_v55  }
 0x193   :  { %915 = vperm.xlu1 %1324, %v793_v33   ;;  %v772_v58 = vsel %vm771_vm10, %v1352_v32, %v768_v56 }
 0x194   :  { %v796_v49 = vmul.f32 %v780_v59, %v772_v58 }
 0x196   :  { %v804_v41 = vmul.f32 %v796_v49, %v1739_v62  ;;  %v786_v62 = vld [vmem:[%s1886_s3 + $0x28] sm:$0xff] }
 0x197   :  { %v810_v4 = vsub.f32 %v786_v62, %v802_v1 }
 0x198   :  { %v812_v0 = vsub.f32 %v788_v24, %v804_v41 }
 0x199   :  { %1326 = vset.pattern.permute.xlu2 %v1354_v3 }
 0x19a   :  { %842 = vperm.xlu2 %1326, %v794_v61   ;;  %1332 = vset.pattern.permute.xlu0 %v1353_v2 }
 0x19b   :  { %955 = vperm.xlu1 %1324, %v809_v55   ;;  %927 = vperm.xlu0 %1332, %v796_v49  }
 0x1a2   :  { %1327 = vset.pattern.permute.xlu2 %v1353_v2 }
 0x1a3   :  { %919 = vperm.xlu2 %1327, %v794_v61   ;;  %1329 = vset.pattern.permute.xlu1 %v1354_v3 }
 0x1a4   :  { %1333 = vset.pattern.permute.xlu0 %v1354_v3  ;;  %847 = vperm.xlu1 %1329, %v795_v42  }
 0x1a5   :  { %892 = vperm.xlu0 %1333, %v812_v0  }
 0x1ab   :  { %1328 = vset.pattern.permute.xlu2 %v1354_v3 }
 0x1ac   :  { %882 = vperm.xlu2 %1328, %v810_v4   ;;  %1330 = vset.pattern.permute.xlu1 %v1353_v2 }
 0x1ad   :  { %1334 = vset.pattern.permute.xlu0 %v1353_v2  ;;  %923 = vperm.xlu1 %1330, %v795_v42  }
 0x1ae   :  { %959 = vperm.xlu0 %1334, %v810_v4  }
 0x1b4   :  { %852 = vperm.xlu2 %1328, %v796_v49  }
 0x1b5   :  { %1331 = vset.pattern.permute.xlu1 %v1354_v3 }
 0x1b6   :  { %887 = vperm.xlu1 %1331, %v811_v37  }
 0x1b8   :  { %v900_v5 = vpop.permute.xlu2 %899 }
 0x1bc   :  { %1335 = vset.pattern.permute.xlu2 %v1353_v2 }
 0x1bd   :  { %963 = vperm.xlu2 %1335, %v811_v37  }
 0x1be   :  { %1336 = vset.pattern.permute.xlu1 %v1353_v2 }
 0x1bf   :  { %967 = vperm.xlu1 %1336, %v812_v0  }
 0x1c0   :  { %v940_v19 = vpop.permute.xlu2 %939 }
 0x1c9   :  { %v823_v9 = vpop.permute.xlu2 %822 }
 0x1d0   :  { %v818_v11 = vpop.permute.xlu1 %817 }
 0x1d1   :  { %v930_v12 = vsel %vm895_vm11, %v900_v5, %v818_v11 }
 0x1d2   :  { %v868_v3 = vpop.permute.xlu2 %867  ;;  %v978_v13 = vmul.f32 %v930_v12, %v1616_v50 }
 0x1d8   :  { %v858_v8 = vpop.permute.xlu1 %857 }
 0x1d9   :  { %v970_v16 = vsel %vm895_vm11, %v940_v19, %v858_v8 }
 0x1da   :  { %v986_v2 = vadd.f32 %v978_v13, %v970_v16  ;;  %v833_v20 = vpop.permute.xlu2 %832 }
 0x1dc   :  { %v994_v18 = vmax.f32 %v986_v2, 0.0 }
 0x1de   :  { %1002 = vst.msk [vmem:[%s1887_s4] sm:$0xff] %vm588_vm1, %v994_v18 }
 0x1e1   :  { %v904_v21 = vpop.permute.xlu1 %903 }
 0x1e2   :  { %v863_v22 = vpop.permute.xlu0 %862  ;;  %v931_v23 = vsel %vm895_vm11, %v904_v21, %v823_v9 }
 0x1e3   :  { %v979_v25 = vmul.f32 %v931_v23, %v1623_v60  ;;  %v912_v26 = vpop.permute.xlu2 %911 }
 0x1e4   :  { %v933_v31 = vsel %vm895_vm11, %v912_v26, %v833_v20 }
 0x1e5   :  { %v981_v33 = vmul.f32 %v933_v31, %v1636_v17 }
 0x1e9   :  { %v944_v50 = vpop.permute.xlu1 %943 }
 0x1ea   :  { %v971_v47 = vsel %vm895_vm11, %v944_v50, %v863_v22  ;;  %v828_v29 = vpop.permute.xlu0 %827 }
 0x1eb   :  { %v987_v28 = vadd.f32 %v979_v25, %v971_v47  ;;  %v952_v60 = vpop.permute.xlu2 %951 }
 0x1ed   :  { %v995_v30 = vmax.f32 %v987_v28, 0.0 }
 0x1ef   :  { %1003 = vst.msk [vmem:[%s1887_s4 + $0x8] sm:$0xff] %vm588_vm1, %v995_v30 }
 0x1f3   :  { %v908_v32 = vpop.permute.xlu0 %907 }
 0x1f4   :  { %v873_v14 = vpop.permute.xlu1 %872  ;;  %v932_v36 = vsel %vm895_vm11, %v908_v32, %v828_v29  ;;  %v843_v45 = vpop.permute.xlu2 %842 }
 0x1f5   :  { %v973_v15 = vsel %vm895_vm11, %v952_v60, %v873_v14  ;;  %v980_v39 = vmul.f32 %v932_v36, %v1629_v7 }
 0x1f6   :  { %v989_v35 = vadd.f32 %v981_v33, %v973_v15 }
 0x1f8   :  { %v997_v38 = vmax.f32 %v989_v35, 0.0 }
 0x1fa   :  { %1005 = vst.msk [vmem:[%s1887_s4 + $0x18] sm:$0xff] %vm588_vm1, %v997_v38 }
 0x1fb   :  { %v948_v42 = vpop.permute.xlu0 %947 }
 0x1fc   :  { %v972_v17 = vsel %vm895_vm11, %v948_v42, %v868_v3  ;;  %v838_v43 = vpop.permute.xlu1 %837 }
 0x1fd   :  { %v988_v44 = vadd.f32 %v980_v39, %v972_v17  ;;  %v920_v53 = vpop.permute.xlu2 %919 }
 0x1fe   :  { %v935_v49 = vsel %vm895_vm11, %v920_v53, %v843_v45 }
 0x1ff   :  { %v996_v46 = vmax.f32 %v988_v44, 0.0  ;;  %v983_v24 = vmul.f32 %v935_v49, %v1651_v40 }
 0x201   :  { %1004 = vst.msk [vmem:[%s1887_s4 + $0x10] sm:$0xff] %vm588_vm1, %v996_v46 }
 0x204   :  { %v878_v48 = vpop.permute.xlu0 %877 }
 0x205   :  { %v916_v51 = vpop.permute.xlu1 %915 }
 0x206   :  { %v934_v37 = vsel %vm895_vm11, %v916_v51, %v838_v43  ;;  %v883_v58 = vpop.permute.xlu2 %882 }
 0x207   :  { %v982_v7 = vmul.f32 %v934_v37, %v1642_v27 }
 0x20d   :  { %v956_v54 = vpop.permute.xlu1 %955  ;;  %v928_v56 = vpop.permute.xlu0 %927 }
 0x20e   :  { %v974_v55 = vsel %vm895_vm11, %v956_v54, %v878_v48  ;;  %v853_v41 = vpop.permute.xlu2 %852 }
 0x20f   :  { %v990_v34 = vadd.f32 %v982_v7, %v974_v55  ;;  %v937_v3 = vsel %vm895_vm11, %v928_v56, %v853_v41 }
 0x210   :  { %v985_v13 = vmul.f32 %v937_v3, %v1667_v63 }
 0x211   :  { %v998_v57 = vmax.f32 %v990_v34, 0.0 }
 0x213   :  { %1006 = vst.msk [vmem:[%s1887_s4 + $0x20] sm:$0xff] %vm588_vm1, %v998_v57 }
 0x216   :  { %v848_v59 = vpop.permute.xlu1 %847 }
 0x217   :  { %v893_v61 = vpop.permute.xlu0 %892  ;;  %v964_v19 = vpop.permute.xlu2 %963 }
 0x21f   :  { %v924_v27 = vpop.permute.xlu1 %923 }
 0x220   :  { %v960_v0 = vpop.permute.xlu0 %959  ;;  %v936_v5 = vsel %vm895_vm11, %v924_v27, %v848_v59 }
 0x221   :  { %v975_v1 = vsel %vm895_vm11, %v960_v0, %v883_v58  ;;  %v984_v6 = vmul.f32 %v936_v5, %v1659_v52 }
 0x222   :  { %v991_v62 = vadd.f32 %v983_v24, %v975_v1 }
 0x224   :  { %v999_v4 = vmax.f32 %v991_v62, 0.0 }
 0x226   :  { %1007 = vst.msk [vmem:[%s1887_s4 + $0x28] sm:$0xff] %vm588_vm1, %v999_v4 }
 0x228   :  { %v888_v9 = vpop.permute.xlu1 %887 }
 0x229   :  { %v976_v40 = vsel %vm895_vm11, %v964_v19, %v888_v9 }
 0x22a   :  { %v992_v11 = vadd.f32 %v984_v6, %v976_v40 }
 0x22c   :  { %v1000_v12 = vmax.f32 %v992_v11, 0.0 }
 0x22e   :  { %1008 = vst.msk [vmem:[%s1887_s4 + $0x30] sm:$0xff] %vm588_vm1, %v1000_v12 }
 0x231   :  { %v968_v8 = vpop.permute.xlu1 %967 }
 0x232   :  { %v977_v52 = vsel %vm895_vm11, %v968_v8, %v893_v61 }
 0x233   :  { %v993_v16 = vadd.f32 %v985_v13, %v977_v52 }
 0x235   :  { %v1001_v2 = vmax.f32 %v993_v16, 0.0 }
 0x237   :  { %1009 = vst.msk [vmem:[%s1887_s4 + $0x38] sm:$0xff] %vm588_vm1, %v1001_v2 }

// kernel: generator_forward.15
= control target key start
LH: loop header
LB: loop body
LE: loop exit
PB: predicated region body
PF: predicated region fallthrough
CT: control target
= control target key end

     0   :  { %vm433_vm0 = vcmask 523264   ;;  %vm591_vm1 = vcmask 261120   ;;  %s1923_s0 = inlined_call_operand.vmem [shape: bf16[576,32], index: 0, kind: input, shape index: {}]   ;;  %s1924_s1 = inlined_call_operand.vmem [shape: bf16[64,576], index: 1, kind: input, shape index: {}]   ;;  %s1925_s2 = inlined_call_operand.vmem [shape: f32[64,2], index: 2, kind: input, shape index: {}]   ;;  %s1926_s3 = inlined_call_operand.vmem [shape: f32[64,2], index: 3, kind: input, shape index: {}]   ;;  %s1927_s4 = inlined_call_operand.vmem [shape: f32[64,32], index: 4, kind: input, shape index: {}]   ;;  %s1928_s5 = inlined_call_operand.vmem [shape: f32[1,64,32], index: 5, kind: output, shape index: {}]  }
   0x1   :  { %v1280_v0 = vld [vmem:[%s1923_s0 + $0x38] sm:$0xff]  ;;  %v1279_v1 = vld [vmem:[%s1923_s0 + $0x30] sm:$0xff]  ;;  %v1278_v4 = vld [vmem:[%s1923_s0 + $0x28] sm:$0xff] }
   0x2   :  { %1309 = vmatpush.bf16.msra.mxu1 %v1280_v0  ;;  %1310 = vmatpush.bf16.msra.mxu2 %v1280_v0  ;;  %v1304_v2 = vld [vmem:[%s1923_s0 + $0xf8] sm:$0xff]  ;;  %v1303_v3 = vld [vmem:[%s1923_s0 + $0xf0] sm:$0xff]  ;;  %v1302_v5 = vld [vmem:[%s1923_s0 + $0xe8] sm:$0xff] }
   0x3   :  { %446 = vmatpush.bf16.msra.mxu0 %v1280_v0  ;;  %533 = vmatpush.bf16.msra.mxu3 %v1304_v2  ;;  %v1277_v6 = vld [vmem:[%s1923_s0 + $0x20] sm:$0xff]  ;;  %v1276_v8 = vld [vmem:[%s1923_s0 + $0x18] sm:$0xff]  ;;  %v1275_v10 = vld [vmem:[%s1923_s0 + $0x10] sm:$0xff] }
   0x4   :  { %v1301_v7 = vld [vmem:[%s1923_s0 + $0xe0] sm:$0xff]  ;;  %v1300_v9 = vld [vmem:[%s1923_s0 + $0xd8] sm:$0xff]  ;;  %v1299_v11 = vld [vmem:[%s1923_s0 + $0xd0] sm:$0xff] }
   0x5   :  { %v1274_v12 = vld [vmem:[%s1923_s0 + $0x8] sm:$0xff]  ;;  %v1273_v14 = vld [vmem:[%s1923_s0] sm:$0xff]  ;;  %v1260_v16 = vld [vmem:[%s1924_s1 + $0x38] sm:$0xf0] }
   0x6   :  { %1311 = vmatpush.bf16.msra.mxu1 %v1279_v1  ;;  %1312 = vmatpush.bf16.msra.mxu2 %v1279_v1  ;;  %v1298_v13 = vld [vmem:[%s1923_s0 + $0xc8] sm:$0xff]  ;;  %v1087_v17 = vld [vmem:[%s1924_s1 + $0x78] sm:$0xf]  ;;  %v1027_v21 = vld [vmem:[%s1924_s1] sm:$0xf] }
   0x7   :  { %447 = vmatpush.bf16.msra.mxu0 %v1279_v1  ;;  %534 = vmatpush.bf16.msra.mxu3 %v1303_v3  ;;  %v1047_v15 = vld [vmem:[%s1924_s1 + $0x28] sm:$0xf]  ;;  %v1270_v18 = vld [vmem:[%s1924_s1 + $0x88] sm:$0xf0]  ;;  %v1296_v19 = vld [vmem:[%s1923_s0 + $0xb8] sm:$0xff] }
   0x8   :  { %v1288_v20 = vld [vmem:[%s1923_s0 + $0x78] sm:$0xff]  ;;  %v1297_v22 = vld [vmem:[%s1923_s0 + $0xc0] sm:$0xff]  ;;  %v1048_v23 = vor.u32 %v1260_v16, %v1047_v15  ;;  %v1088_v24 = vor.u32 %v1270_v18, %v1087_v17  ;;  %v1255_v25 = vld [vmem:[%s1924_s1 + $0x10] sm:$0xf0] }
   0x9   :  { %v1254_v26 = vld [vmem:[%s1924_s1 + $0xc] sm:$0xf]  ;;  %v1037_v27 = vld [vmem:[%s1924_s1 + $0x1c] sm:$0xf0]  ;;  %v1308_v28 = vld [vmem:[%s1923_s0 + $0x118] sm:$0xff]  ;;  %v1028_v31 = vor.u32 %v1255_v25, %v1027_v21 }
   0xa   :  { %1313 = vmatpush.bf16.msra.mxu1 %v1278_v4  ;;  %1314 = vmatpush.bf16.msra.mxu2 %v1278_v4  ;;  %v1295_v29 = vld [vmem:[%s1923_s0 + $0xb0] sm:$0xff]  ;;  %v1040_v32 = vor.u32 %v1254_v26, %v1037_v27  ;;  %v1294_v34 = vld [vmem:[%s1923_s0 + $0xa8] sm:$0xff]  ;;  %v1293_v37 = vld [vmem:[%s1923_s0 + $0xa0] sm:$0xff] }
   0xb   :  { %448 = vmatpush.bf16.msra.mxu0 %v1278_v4  ;;  %535 = vmatpush.bf16.msra.mxu3 %v1302_v5  ;;  %v1287_v30 = vld [vmem:[%s1923_s0 + $0x70] sm:$0xff]  ;;  %v1286_v35 = vld [vmem:[%s1923_s0 + $0x68] sm:$0xff]  ;;  %v1285_v38 = vld [vmem:[%s1923_s0 + $0x60] sm:$0xff] }
   0xc   :  { %v1307_v33 = vld [vmem:[%s1923_s0 + $0x110] sm:$0xff]  ;;  %v1306_v36 = vld [vmem:[%s1923_s0 + $0x108] sm:$0xff]  ;;  %v1265_v40 = vld [vmem:[%s1924_s1 + $0x60] sm:$0xf0] }
   0xd   :  { %v1067_v39 = vld [vmem:[%s1924_s1 + $0x50] sm:$0xf]  ;;  %v1305_v41 = vld [vmem:[%s1923_s0 + $0x100] sm:$0xff]  ;;  %v1292_v42 = vld [vmem:[%s1923_s0 + $0x98] sm:$0xff] }
   0xe   :  { %1315 = vmatpush.bf16.msra.mxu1 %v1277_v6  ;;  %1316 = vmatpush.bf16.msra.mxu2 %v1277_v6  ;;  %v1284_v43 = vld [vmem:[%s1923_s0 + $0x58] sm:$0xff]  ;;  %v1043_v44 = vld [vmem:[%s1924_s1 + $0x10] sm:$0xf]  ;;  %v1068_v45 = vor.u32 %v1265_v40, %v1067_v39  ;;  %v1257_v46 = vld [vmem:[%s1924_s1 + $0x20] sm:$0xf0] }
   0xf   :  { %449 = vmatpush.bf16.msra.mxu0 %v1277_v6  ;;  %536 = vmatpush.bf16.msra.mxu3 %v1301_v7  ;;  %v1259_v47 = vld [vmem:[%s1924_s1 + $0x34] sm:$0xf]  ;;  %v1057_v48 = vld [vmem:[%s1924_s1 + $0x44] sm:$0xf0]  ;;  %v1044_v51 = vor.u32 %v1257_v46, %v1043_v44  ;;  %v1289_v55 = vld [vmem:[%s1923_s0 + $0x80] sm:$0xff] }
  0x10   :  { %v1291_v49 = vld [vmem:[%s1923_s0 + $0x90] sm:$0xff]  ;;  %v1060_v52 = vor.u32 %v1259_v47, %v1057_v48  ;;  %v1290_v53 = vld [vmem:[%s1923_s0 + $0x88] sm:$0xff]  ;;  %v1281_v56 = vld [vmem:[%s1923_s0 + $0x40] sm:$0xff] }
  0x11   :  { %v1283_v50 = vld [vmem:[%s1923_s0 + $0x50] sm:$0xff]  ;;  %v1282_v54 = vld [vmem:[%s1923_s0 + $0x48] sm:$0xff]  ;;  %v1256_v58 = vld [vmem:[%s1924_s1 + $0x18] sm:$0xf0] }
  0x12   :  { %1317 = vmatpush.bf16.msra.mxu1 %v1276_v8  ;;  %1318 = vmatpush.bf16.msra.mxu2 %v1276_v8  ;;  %v1035_v57 = vld [vmem:[%s1924_s1 + $0x8] sm:$0xf]  ;;  %v1253_v60 = vld [vmem:[%s1924_s1 + $0x4] sm:$0xf]  ;;  %v1029_v61 = vld [vmem:[%s1924_s1 + $0x14] sm:$0xf0] }
  0x13   :  { %450 = vmatpush.bf16.msra.mxu0 %v1276_v8  ;;  %537 = vmatpush.bf16.msra.mxu3 %v1300_v9  ;;  %v1036_v59 = vor.u32 %v1256_v58, %v1035_v57  ;;  %v1063_v62 = vld [vmem:[%s1924_s1 + $0x38] sm:$0xf]  ;;  %v1032_v63 = vor.u32 %v1253_v60, %v1029_v61  ;;  %v1262_v0 = vld [vmem:[%s1924_s1 + $0x48] sm:$0xf0]  ;;  %v1264_v1 = vld [vmem:[%s1924_s1 + $0x5c] sm:$0xf] }
  0x14   :  { %v1077_v2 = vld [vmem:[%s1924_s1 + $0x6c] sm:$0xf0]  ;;  %v1064_v3 = vor.u32 %v1262_v0, %v1063_v62  ;;  %v1261_v6 = vld [vmem:[%s1924_s1 + $0x40] sm:$0xf0]  ;;  %v1258_v8 = vld [vmem:[%s1924_s1 + $0x2c] sm:$0xf] }
  0x15   :  { %v1080_v4 = vor.u32 %v1264_v1, %v1077_v2  ;;  %v1055_v5 = vld [vmem:[%s1924_s1 + $0x30] sm:$0xf]  ;;  %v1049_v9 = vld [vmem:[%s1924_s1 + $0x3c] sm:$0xf0]  ;;  %v1075_v17 = vld [vmem:[%s1924_s1 + $0x58] sm:$0xf] }
  0x16   :  { %1319 = vmatpush.bf16.msra.mxu1 %v1275_v10  ;;  %1320 = vmatpush.bf16.msra.mxu2 %v1275_v10  ;;  %v1056_v7 = vor.u32 %v1261_v6, %v1055_v5  ;;  %v1266_v18 = vld [vmem:[%s1924_s1 + $0x68] sm:$0xf0]  ;;  %v1069_v21 = vld [vmem:[%s1924_s1 + $0x64] sm:$0xf0]  ;;  %v1095_v26 = vld [vmem:[%s1924_s1 + $0x80] sm:$0xf] }
  0x17   :  { %451 = vmatpush.bf16.msra.mxu0 %v1275_v10  ;;  %538 = vmatpush.bf16.msra.mxu3 %v1299_v11  ;;  %v1083_v10 = vld [vmem:[%s1924_s1 + $0x60] sm:$0xf]  ;;  %v1052_v11 = vor.u32 %v1258_v8, %v1049_v9  ;;  %v1271_v27 = vld [vmem:[%s1924_s1 + $0x90] sm:$0xf0] }
  0x1a   :  { %1321 = vmatpush.bf16.msra.mxu1 %v1274_v12  ;;  %1322 = vmatpush.bf16.msra.mxu2 %v1274_v12 }
  0x1b   :  { %452 = vmatpush.bf16.msra.mxu0 %v1274_v12  ;;  %539 = vmatpush.bf16.msra.mxu3 %v1298_v13  ;;  %v1267_v12 = vld [vmem:[%s1924_s1 + $0x70] sm:$0xf0]  ;;  %v1269_v13 = vld [vmem:[%s1924_s1 + $0x84] sm:$0xf] }
  0x1c   :  { %v1084_v15 = vor.u32 %v1267_v12, %v1083_v10 }
  0x1e   :  { %1323 = vmatpush.bf16.msra.mxu1 %v1273_v14  ;;  %1324 = vmatpush.bf16.msra.mxu2 %v1273_v14 }
  0x1f   :  { %453 = vmatpush.bf16.msra.mxu0 %v1273_v14  ;;  %540 = vmatpush.bf16.msra.mxu3 %v1297_v22  ;;  %v1097_v14 = vld [vmem:[%s1924_s1 + $0x94] sm:$0xf0] }
  0x20   :  { %v1100_v16 = vor.u32 %v1269_v13, %v1097_v14 }
  0x21   :  { %459 = vmatmul.bf16.vlgmr.msra.gmra.mxu1 %v1048_v23  ;;  %469 = vmatmul.bf16.vlgmr.msra.gmra.mxu2 %v1088_v24  ;;  %v1103_v23 = vld [vmem:[%s1924_s1 + $0x88] sm:$0xf]  ;;  %v1272_v24 = vld [vmem:[%s1924_s1 + $0x98] sm:$0xf0] }
  0x22   :  { %504 = vmatpush.bf16.msrb.mxu2 %v1296_v19  ;;  %475 = vmatpush.bf16.msrb.mxu1 %v1288_v20  ;;  %v1076_v19 = vor.u32 %v1266_v18, %v1075_v17  ;;  %v1263_v20 = vld [vmem:[%s1924_s1 + $0x54] sm:$0xf]  ;;  %v1104_v25 = vor.u32 %v1272_v24, %v1103_v23 }
  0x23   :  { %566 = vmatpush.bf16.msrb.mxu0 %v1308_v28  ;;  %541 = vmatmul.bf16.vlgmr.msra.gmra.mxu3 %v1040_v32  ;;  %v1072_v22 = vor.u32 %v1263_v20, %v1069_v21  ;;  %v1096_v28 = vor.u32 %v1271_v27, %v1095_v26 }
  0x24   :  { %454 = vmatmul.bf16.vlgmr.msra.gmra.mxu0 %v1028_v31 }
  0x26   :  { %505 = vmatpush.bf16.msrb.mxu2 %v1295_v29  ;;  %476 = vmatpush.bf16.msrb.mxu1 %v1287_v30  ;;  %v1268_v29 = vld [vmem:[%s1924_s1 + $0x7c] sm:$0xf]  ;;  %v1089_v30 = vld [vmem:[%s1924_s1 + $0x8c] sm:$0xf0] }
  0x27   :  { %567 = vmatpush.bf16.msrb.mxu0 %v1307_v33  ;;  %v1092_v31 = vor.u32 %v1268_v29, %v1089_v30 }
  0x2a   :  { %506 = vmatpush.bf16.msrb.mxu2 %v1294_v34  ;;  %477 = vmatpush.bf16.msrb.mxu1 %v1286_v35 }
  0x2b   :  { %568 = vmatpush.bf16.msrb.mxu0 %v1306_v36 }
  0x2e   :  { %507 = vmatpush.bf16.msrb.mxu2 %v1293_v37  ;;  %478 = vmatpush.bf16.msrb.mxu1 %v1285_v38 }
  0x2f   :  { %569 = vmatpush.bf16.msrb.mxu0 %v1305_v41 }
  0x31   :  { %464 = vmatmul.bf16.gmra.mxu1 %v1068_v45 }
  0x32   :  { %508 = vmatpush.bf16.msrb.mxu2 %v1292_v42  ;;  %479 = vmatpush.bf16.msrb.mxu1 %v1284_v43 }
  0x33   :  { %546 = vmatmul.bf16.gmra.mxu3 %v1060_v52 }
  0x34   :  { %1249 = vmatmul.msk.bf16.vlgmr.msrb.gmra.mxu0 %vm433_vm0, %v1044_v51 }
  0x36   :  { %509 = vmatpush.bf16.msrb.mxu2 %v1291_v49  ;;  %480 = vmatpush.bf16.msrb.mxu1 %v1283_v50 }
  0x3a   :  { %510 = vmatpush.bf16.msrb.mxu2 %v1290_v53  ;;  %481 = vmatpush.bf16.msrb.mxu1 %v1282_v54 }
  0x3e   :  { %511 = vmatpush.bf16.msrb.mxu2 %v1289_v55  ;;  %482 = vmatpush.bf16.msrb.mxu1 %v1281_v56 }
  0x41   :  { %512 = vmatmul.bf16.vlgmr.msrb.gmra.mxu2 %v1036_v59  ;;  %483 = vmatmul.bf16.vlgmr.msrb.gmra.mxu1 %v1032_v63 }
  0x43   :  { %551 = vmatmul.bf16.gmra.mxu3 %v1080_v4 }
  0x44   :  { %1250 = vmatmul.msk.bf16.gmra.mxu0 %vm433_vm0, %v1064_v3 }
  0x51   :  { %517 = vmatmul.bf16.gmra.mxu2 %v1056_v7  ;;  %488 = vmatmul.bf16.gmra.mxu1 %v1052_v11 }
  0x53   :  { %556 = vmatmul.bf16.gmra.mxu3 %v1100_v16 }
  0x54   :  { %1251 = vmatmul.msk.bf16.gmra.mxu0 %vm433_vm0, %v1084_v15 }
  0x61   :  { %522 = vmatmul.bf16.gmra.mxu2 %v1076_v19  ;;  %493 = vmatmul.bf16.gmra.mxu1 %v1072_v22 }
  0x64   :  { %1252 = vmatmul.msk.bf16.gmra.mxu0 %vm433_vm0, %v1104_v25 }
  0x71   :  { %527 = vmatmul.bf16.gmra.mxu2 %v1096_v28  ;;  %498 = vmatmul.bf16.gmra.mxu1 %v1092_v31 }
  0x9e   :  { %v460_v32 = vpop.f32.mrf.mxu1 }
  0xa1   :  { %v455_v33 = vpop.f32.mrf.mxu0 }
  0xa4   :  { %v1628_v37 = vpop.f32.mrf.mxu2 }
  0xa6   :  { %v462_v34 = vpop.f32.mrf.mxu1  ;;  %v542_v38 = vpop.f32.mrf.mxu3 }
  0xa9   :  { %v457_v35 = vpop.f32.mrf.mxu0 }
  0xac   :  { %v1630_v41 = vpop.f32.mrf.mxu2 }
  0xae   :  { %v465_v36 = vpop.f32.mrf.mxu1  ;;  %v544_v44 = vpop.f32.mrf.mxu3 }
  0xb1   :  { %v571_v40 = vpop.f32.mrf.mxu0 }
  0xb6   :  { %v467_v39 = vpop.f32.mrf.mxu1  ;;  %v547_v55 = vpop.f32.mrf.mxu3 }
  0xb9   :  { %v573_v46 = vpop.f32.mrf.mxu0 }
  0xbe   :  { %v484_v42 = vpop.f32.mrf.mxu1  ;;  %v549_v2 = vpop.f32.mrf.mxu3 }
  0xbf   :  { %v485_v43 = vadd.f32 %v484_v42, %v455_v33 }
  0xc1   :  { %v576_v58 = vpop.f32.mrf.mxu0 }
  0xc4   :  { %v513_v45 = vpop.f32.mrf.mxu2 }
  0xc5   :  { %v514_v47 = vadd.f32 %v513_v45, %v485_v43 }
  0xc6   :  { %v486_v49 = vpop.f32.mrf.mxu1  ;;  %v552_v13 = vpop.f32.mrf.mxu3 }
  0xc7   :  { %v543_v48 = vadd.f32 %v542_v38, %v514_v47  ;;  %v487_v51 = vadd.f32 %v486_v49, %v457_v35 }
  0xc9   :  { %v1632_v50 = vadd.f32 %v571_v40, %v543_v48  ;;  %v578_v5 = vpop.f32.mrf.mxu0 }
  0xcb   :  { %v592_v52 = vsel %vm591_vm1, %v1632_v50, 0.0  ;;  %v616_v53 = vmul.f32 %v1632_v50, %v1632_v50 }
  0xcc   :  { %v515_v54 = vpop.f32.mrf.mxu2  ;;  %593 = vadd.xlane.f32.xlu0 %v592_v52 }
  0xcd   :  { %v516_v56 = vadd.f32 %v515_v54, %v487_v51  ;;  %v624_v57 = vsel %vm591_vm1, %v616_v53, 0.0 }
  0xce   :  { %625 = vadd.xlane.f32.xlu2 %v624_v57  ;;  %v489_v61 = vpop.f32.mrf.mxu1  ;;  %v554_v26 = vpop.f32.mrf.mxu3 }
  0xcf   :  { %v545_v59 = vadd.f32 %v544_v44, %v516_v56  ;;  %v490_v62 = vadd.f32 %v489_v61, %v460_v32 }
  0xd1   :  { %v1639_v60 = vadd.f32 %v573_v46, %v545_v59  ;;  %v581_v16 = vpop.f32.mrf.mxu0 }
  0xd3   :  { %v595_v63 = vsel %vm591_vm1, %v1639_v60, 0.0  ;;  %v617_v4 = vmul.f32 %v1639_v60, %v1639_v60 }
  0xd4   :  { %v518_v0 = vpop.f32.mrf.mxu2  ;;  %596 = vadd.xlane.f32.xlu0 %v595_v63 }
  0xd5   :  { %v519_v1 = vadd.f32 %v518_v0, %v490_v62  ;;  %v627_v10 = vsel %vm591_vm1, %v617_v4, 0.0 }
  0xd6   :  { %v491_v6 = vpop.f32.mrf.mxu1  ;;  %v557_v43 = vpop.f32.mrf.mxu3 }
  0xd7   :  { %v548_v3 = vadd.f32 %v547_v55, %v519_v1  ;;  %v492_v8 = vadd.f32 %v491_v6, %v462_v34 }
  0xd9   :  { %v1645_v7 = vadd.f32 %v576_v58, %v548_v3  ;;  %v583_v30 = vpop.f32.mrf.mxu0  ;;  %v1365_v3 = vmov 0  }
  0xda   :  { %1327 = vset.pattern.permute.xlu1 %v1365_v3  ;;  %1331 = vset.pattern.permute.xlu0 %v1365_v3 }
  0xdb   :  { %v598_v9 = vsel %vm591_vm1, %v1645_v7, 0.0  ;;  %v618_v15 = vmul.f32 %v1645_v7, %v1645_v7 }
  0xdc   :  { %v520_v11 = vpop.f32.mrf.mxu2  ;;  %599 = vadd.xlane.f32.xlu1 %v598_v9  ;;  %628 = vadd.xlane.f32.xlu0 %v627_v10 }
  0xdd   :  { %v521_v12 = vadd.f32 %v520_v11, %v492_v8  ;;  %v630_v20 = vsel %vm591_vm1, %v618_v15, 0.0 }
  0xde   :  { %v494_v18 = vpop.f32.mrf.mxu1  ;;  %v559_v57 = vpop.f32.mrf.mxu3 }
  0xdf   :  { %v550_v14 = vadd.f32 %v549_v2, %v521_v12  ;;  %v495_v19 = vadd.f32 %v494_v18, %v465_v36  ;;  %v1364_v2 = vmov 1  }
  0xe0   :  { %1328 = vset.pattern.permute.xlu2 %v1364_v2 }
  0xe1   :  { %v1652_v17 = vadd.f32 %v578_v5, %v550_v14  ;;  %v586_v46 = vpop.f32.mrf.mxu0 }
  0xe3   :  { %v619_v21 = vmul.f32 %v1652_v17, %v1652_v17  ;;  %v601_v31 = vsel %vm591_vm1, %v1652_v17, 0.0 }
  0xe4   :  { %v523_v22 = vpop.f32.mrf.mxu2  ;;  %631 = vadd.xlane.f32.xlu1 %v630_v20 }
  0xe5   :  { %v524_v23 = vadd.f32 %v523_v22, %v495_v19  ;;  %v633_v24 = vsel %vm591_vm1, %v619_v21, 0.0 }
  0xe6   :  { %634 = vadd.xlane.f32.xlu2 %v633_v24  ;;  %v496_v28 = vpop.f32.mrf.mxu1 }
  0xe7   :  { %v553_v25 = vadd.f32 %v552_v13, %v524_v23  ;;  %v497_v29 = vadd.f32 %v496_v28, %v467_v39 }
  0xe9   :  { %v1658_v27 = vadd.f32 %v581_v16, %v553_v25  ;;  %v588_v61 = vpop.f32.mrf.mxu0 }
  0xeb   :  { %v620_v32 = vmul.f32 %v1658_v27, %v1658_v27  ;;  %v604_v35 = vsel %vm591_vm1, %v1658_v27, 0.0 }
  0xec   :  { %v525_v33 = vpop.f32.mrf.mxu2  ;;  %602 = vadd.xlane.f32.xlu1 %v601_v31 }
  0xed   :  { %v526_v34 = vadd.f32 %v525_v33, %v497_v29  ;;  %v636_v36 = vsel %vm591_vm1, %v620_v32, 0.0 }
  0xee   :  { %605 = vadd.xlane.f32.xlu2 %v604_v35  ;;  %637 = vadd.xlane.f32.xlu0 %v636_v36  ;;  %v499_v39 = vpop.f32.mrf.mxu1  ;;  %v776_v35 = vld [vmem:[%s1925_s2] sm:$0xff] }
  0xef   :  { %v555_v38 = vadd.f32 %v554_v26, %v526_v34  ;;  %v500_v42 = vadd.f32 %v499_v39, %v1628_v37 }
  0xf1   :  { %v1667_v40 = vadd.f32 %v583_v30, %v555_v38 }
  0xf3   :  { %v621_v44 = vmul.f32 %v1667_v40, %v1667_v40  ;;  %v607_v49 = vsel %vm591_vm1, %v1667_v40, 0.0 }
  0xf4   :  { %v528_v45 = vpop.f32.mrf.mxu2 }
  0xf5   :  { %v529_v47 = vadd.f32 %v528_v45, %v500_v42  ;;  %v639_v48 = vsel %vm591_vm1, %v621_v44, 0.0 }
  0xf6   :  { %640 = vadd.xlane.f32.xlu1 %v639_v48  ;;  %608 = vadd.xlane.f32.xlu2 %v607_v49  ;;  %v501_v53 = vpop.f32.mrf.mxu1 }
  0xf7   :  { %v558_v51 = vadd.f32 %v557_v43, %v529_v47  ;;  %v502_v37 = vadd.f32 %v501_v53, %v1630_v41 }
  0xf9   :  { %v1675_v52 = vadd.f32 %v586_v46, %v558_v51 }
  0xfb   :  { %v610_v54 = vsel %vm591_vm1, %v1675_v52, 0.0  ;;  %v622_v55 = vmul.f32 %v1675_v52, %v1675_v52 }
  0xfc   :  { %v530_v56 = vpop.f32.mrf.mxu2  ;;  %611 = vadd.xlane.f32.xlu0 %v610_v54 }
  0xfd   :  { %v531_v58 = vadd.f32 %v530_v56, %v502_v37  ;;  %v642_v59 = vsel %vm591_vm1, %v622_v55, 0.0  ;;  %v784_v37 = vld [vmem:[%s1926_s3] sm:$0xff] }
  0xfe   :  { %643 = vadd.xlane.f32.xlu2 %v642_v59 }
  0xff   :  { %v560_v62 = vadd.f32 %v559_v57, %v531_v58 }
 0x101   :  { %v1683_v63 = vadd.f32 %v588_v61, %v560_v62 }
 0x103   :  { %v613_v41 = vsel %vm591_vm1, %v1683_v63, 0.0  ;;  %v623_v0 = vmul.f32 %v1683_v63, %v1683_v63 }
 0x104   :  { %614 = vadd.xlane.f32.xlu1 %v613_v41 }
 0x105   :  { %v645_v1 = vsel %vm591_vm1, %v623_v0, 0.0 }
 0x106   :  { %646 = vadd.xlane.f32.xlu0 %v645_v1 }
 0x13f   :  { %v594_v4 = vpop.xlane.xlu0 %593 }
 0x140   :  { %v648_v5 = vmul.f32 0.03125, %v594_v4 }
 0x141   :  { %v626_v6 = vpop.xlane.xlu2 %625 }
 0x142   :  { %v664_v8 = vmul.f32 %v648_v5, %v648_v5  ;;  %v656_v9 = vmul.f32 0.03125, %v626_v6 }
 0x144   :  { %v672_v10 = vsub.f32 %v656_v9, %v664_v8 }
 0x146   :  { %v680_v11 = vmax.f32 %v672_v10, 0.0  ;;  %v777_v10 = vld [vmem:[%s1925_s2 + $0x8] sm:$0xff] }
 0x147   :  { %v597_v12 = vpop.xlane.xlu0 %596 }
 0x148   :  { %v688_v13 = vadd.f32 1e-05, %v680_v11  ;;  %v1693_v14 = vmul.f32 0.03125, %v597_v12 }
 0x14a   :  { %1348 = vrsqrt.f32 %v688_v13  ;;  %v665_v19 = vmul.f32 %v1693_v14, %v1693_v14  ;;  %vm702_vm3 = vweird.f32 %v688_v13 }
 0x14f   :  { %v600_v15 = vpop.xlane.xlu1 %599  ;;  %v629_v16 = vpop.xlane.xlu0 %628 }
 0x150   :  { %v1349_v18 = vpop.eup %1348  ;;  %v657_v20 = vmul.f32 0.03125, %v629_v16  ;;  %v1697_v24 = vmul.f32 0.03125, %v600_v15 }
 0x151   :  { %v697_v21 = vmul.f32 %v1349_v18, %v688_v13  ;;  %vm703_vm2 = vweird.f32 %v1349_v18 }
 0x152   :  { %v673_v22 = vsub.f32 %v657_v20, %v665_v19  ;;  %v666_v31 = vmul.f32 %v1697_v24, %v1697_v24  ;;  %vm704_vm4 = vmor %vm702_vm3, %vm703_vm2 }
 0x153   :  { %v698_v23 = vmul.f32 %v1349_v18, %v697_v21  ;;  %v785_v21 = vld [vmem:[%s1926_s3 + $0x8] sm:$0xff] }
 0x154   :  { %v681_v25 = vmax.f32 %v673_v22, 0.0 }
 0x155   :  { %v699_v26 = vmul.f32 0.5, %v698_v23 }
 0x156   :  { %v689_v28 = vadd.f32 1e-05, %v681_v25 }
 0x157   :  { %v700_v29 = vsub.f32 1.5, %v699_v26  ;;  %v632_v30 = vpop.xlane.xlu1 %631 }
 0x158   :  { %1350 = vrsqrt.f32 %v689_v28  ;;  %v658_v32 = vmul.f32 0.03125, %v632_v30  ;;  %vm712_vm6 = vweird.f32 %v689_v28 }
 0x159   :  { %v635_v33 = vpop.xlane.xlu2 %634  ;;  %v701_v34 = vmul.f32 %v1349_v18, %v700_v29 }
 0x15a   :  { %v674_v36 = vsub.f32 %v658_v32, %v666_v31  ;;  %v659_v54 = vmul.f32 0.03125, %v635_v33  ;;  %v778_v32 = vld [vmem:[%s1925_s2 + $0x10] sm:$0xff] }
 0x15b   :  { %v705_v38 = vsel %vm704_vm4, %v1349_v18, %v701_v34 }
 0x15c   :  { %v682_v39 = vmax.f32 %v674_v36, 0.0  ;;  %v792_v42 = vmul.f32 %v776_v35, %v705_v38 }
 0x15e   :  { %v1351_v43 = vpop.eup %1350  ;;  %v690_v44 = vadd.f32 1e-05, %v682_v39  ;;  %902 = vperm.xlu2 %1328, %v792_v42   ;;  %820 = vperm.xlu1 %1327, %v792_v42   ;;  %v800_v48 = vmul.f32 %v792_v42, %v648_v5 }
 0x15f   :  { %v707_v45 = vmul.f32 %v1351_v43, %v689_v28  ;;  %v603_v46 = vpop.xlane.xlu1 %602  ;;  %vm713_vm5 = vweird.f32 %v1351_v43 }
 0x160   :  { %1352 = vrsqrt.f32 %v690_v44  ;;  %v1704_v47 = vmul.f32 0.03125, %v603_v46  ;;  %v808_v62 = vsub.f32 %v784_v37, %v800_v48  ;;  %vm714_vm7 = vmor %vm712_vm6, %vm713_vm5  ;;  %vm722_vm9 = vweird.f32 %v690_v44  ;;  %v786_v48 = vld [vmem:[%s1926_s3 + $0x10] sm:$0xff] }
 0x161   :  { %v708_v49 = vmul.f32 %v1351_v43, %v707_v45  ;;  %v606_v51 = vpop.xlane.xlu2 %605  ;;  %v638_v53 = vpop.xlane.xlu0 %637 }
 0x162   :  { %v667_v55 = vmul.f32 %v1704_v47, %v1704_v47  ;;  %v1711_v56 = vmul.f32 0.03125, %v606_v51  ;;  %v660_v61 = vmul.f32 0.03125, %v638_v53 }
 0x163   :  { %v709_v57 = vmul.f32 0.5, %v708_v49 }
 0x164   :  { %v675_v58 = vsub.f32 %v659_v54, %v667_v55  ;;  %v668_v59 = vmul.f32 %v1711_v56, %v1711_v56 }
 0x165   :  { %v710_v41 = vsub.f32 1.5, %v709_v57 }
 0x166   :  { %v1353_v0 = vpop.eup %1352  ;;  %v683_v1 = vmax.f32 %v675_v58, 0.0  ;;  %v676_v4 = vsub.f32 %v660_v61, %v668_v59  ;;  %942 = vperm.xlu2 %1328, %v808_v62   ;;  %860 = vperm.xlu1 %1327, %v808_v62  }
 0x167   :  { %v717_v5 = vmul.f32 %v1353_v0, %v690_v44  ;;  %v711_v6 = vmul.f32 %v1351_v43, %v710_v41  ;;  %vm723_vm8 = vweird.f32 %v1353_v0  ;;  %v779_v41 = vld [vmem:[%s1925_s2 + $0x18] sm:$0xff] }
 0x168   :  { %v1715_v8 = vadd.f32 1e-05, %v683_v1  ;;  %v684_v9 = vmax.f32 %v676_v4, 0.0  ;;  %vm724_vm10 = vmor %vm722_vm9, %vm723_vm8 }
 0x169   :  { %v718_v11 = vmul.f32 %v1353_v0, %v717_v5  ;;  %v609_v12 = vpop.xlane.xlu2 %608  ;;  %v715_v13 = vsel %vm714_vm7, %v1351_v43, %v711_v6  ;;  %v641_v16 = vpop.xlane.xlu1 %640 }
 0x16a   :  { %1354 = vrsqrt.f32 %v1715_v8  ;;  %v1721_v15 = vadd.f32 1e-05, %v684_v9  ;;  %v1723_v19 = vmul.f32 0.03125, %v609_v12  ;;  %v793_v20 = vmul.f32 %v777_v10, %v715_v13  ;;  %v787_v12 = vld [vmem:[%s1926_s3 + $0x18] sm:$0xff] }
 0x16b   :  { %v719_v18 = vmul.f32 0.5, %v718_v11  ;;  %v661_v23 = vmul.f32 0.03125, %v641_v16  ;;  %vm732_vm12 = vweird.f32 %v1715_v8 }
 0x16c   :  { %1356 = vrsqrt.f32 %v1721_v15  ;;  %v669_v25 = vmul.f32 %v1723_v19, %v1723_v19  ;;  %v801_v26 = vmul.f32 %v793_v20, %v1693_v14  ;;  %vm742_vm15 = vweird.f32 %v1721_v15 }
 0x16d   :  { %v720_v22 = vsub.f32 1.5, %v719_v18 }
 0x16e   :  { %1329 = vset.pattern.permute.xlu2 %v1365_v3  ;;  %1330 = vset.pattern.permute.xlu1 %v1364_v2  ;;  %v677_v29 = vsub.f32 %v661_v23, %v669_v25  ;;  %v809_v31 = vsub.f32 %v785_v21, %v801_v26 }
 0x16f   :  { %v721_v28 = vmul.f32 %v1353_v0, %v720_v22  ;;  %906 = vperm.xlu1 %1330, %v793_v20   ;;  %825 = vperm.xlu2 %1329, %v793_v20   ;;  %v612_v30 = vpop.xlane.xlu0 %611 }
 0x170   :  { %v1355_v33 = vpop.eup %1354  ;;  %v1738_v34 = vmul.f32 0.03125, %v612_v30  ;;  %v685_v36 = vmax.f32 %v677_v29, 0.0  ;;  %865 = vperm.xlu0 %1331, %v809_v31   ;;  %v780_v30 = vld [vmem:[%s1925_s2 + $0x20] sm:$0xff] }
 0x171   :  { %v725_v14 = vsel %vm724_vm10, %v1353_v0, %v721_v28  ;;  %v727_v35 = vmul.f32 %v1355_v33, %v1715_v8  ;;  %v644_v38 = vpop.xlane.xlu2 %643  ;;  %vm733_vm11 = vweird.f32 %v1355_v33 }
 0x172   :  { %v1741_v39 = vpop.eup %1356  ;;  %v670_v42 = vmul.f32 %v1738_v34, %v1738_v34  ;;  %v662_v43 = vmul.f32 0.03125, %v644_v38  ;;  %v794_v44 = vmul.f32 %v778_v32, %v725_v14  ;;  %v1750_v49 = vadd.f32 1e-05, %v685_v36  ;;  %vm734_vm13 = vmor %vm732_vm12, %vm733_vm11  ;;  %v782_v36 = vld [vmem:[%s1925_s2 + $0x30] sm:$0xff] }
 0x173   :  { %v728_v45 = vmul.f32 %v1355_v33, %v727_v35  ;;  %v737_v46 = vmul.f32 %v1741_v39, %v1721_v15  ;;  %vm743_vm14 = vweird.f32 %v1741_v39 }
 0x174   :  { %v678_v51 = vsub.f32 %v662_v43, %v670_v42  ;;  %v802_v53 = vmul.f32 %v794_v44, %v1697_v24  ;;  %1358 = vrsqrt.f32 %v1750_v49  ;;  %vm744_vm0 = vmor %vm742_vm15, %vm743_vm14  ;;  %vm752_vm6 = vweird.f32 %v1750_v49 }
 0x175   :  { %v729_v37 = vmul.f32 0.5, %v728_v45  ;;  %v738_v54 = vmul.f32 %v1741_v39, %v737_v46  ;;  %v790_v46 = vld [vmem:[%s1926_s3 + $0x30] sm:$0xff] }
 0x176   :  { %v686_v55 = vmax.f32 %v678_v51, 0.0  ;;  %v810_v57 = vsub.f32 %v786_v48, %v802_v53  ;;  %v788_v48 = vld [vmem:[%s1926_s3 + $0x20] sm:$0xff] }
 0x177   :  { %v730_v58 = vsub.f32 1.5, %v729_v37  ;;  %v615_v59 = vpop.xlane.xlu1 %614  ;;  %946 = vperm.xlu1 %1330, %v809_v31   ;;  %v739_v0 = vmul.f32 0.5, %v738_v54 }
 0x178   :  { %v694_v61 = vadd.f32 1e-05, %v686_v55  ;;  %v1755_v62 = vmul.f32 0.03125, %v615_v59  ;;  %870 = vperm.xlu2 %1329, %v810_v57   ;;  %830 = vperm.xlu0 %1331, %v794_v44   ;;  %v783_v59 = vld [vmem:[%s1925_s2 + $0x38] sm:$0xff] }
 0x179   :  { %v731_v24 = vmul.f32 %v1355_v33, %v730_v58  ;;  %v647_v1 = vpop.xlane.xlu0 %646  ;;  %v740_v11 = vsub.f32 1.5, %v739_v0 }
 0x17a   :  { %1360 = vrsqrt.f32 %v694_v61  ;;  %v671_v4 = vmul.f32 %v1755_v62, %v1755_v62  ;;  %v663_v5 = vmul.f32 0.03125, %v647_v1  ;;  %v1766_v13 = vpop.eup %1358  ;;  %vm762_vm3 = vweird.f32 %v694_v61 }
 0x17b   :  { %v735_v6 = vsel %vm734_vm13, %v1355_v33, %v731_v24  ;;  %v747_v22 = vmul.f32 %v1766_v13, %v1750_v49  ;;  %v741_v25 = vmul.f32 %v1741_v39, %v740_v11  ;;  %vm753_vm5 = vweird.f32 %v1766_v13  ;;  %v791_v24 = vld [vmem:[%s1926_s3 + $0x38] sm:$0xff] }
 0x17c   :  { %v795_v9 = vmul.f32 %v779_v41, %v735_v6  ;;  %v679_v10 = vsub.f32 %v663_v5, %v671_v4  ;;  %vm754_vm8 = vmor %vm752_vm6, %vm753_vm5  ;;  %v816_v6 = vlaneseq }
 0x17d   :  { %v748_v26 = vmul.f32 %v1766_v13, %v747_v22  ;;  %v745_v29 = vsel %vm744_vm0, %v1741_v39, %v741_v25 }
 0x17e   :  { %v803_v8 = vmul.f32 %v795_v9, %v1704_v47  ;;  %v687_v16 = vmax.f32 %v679_v10, 0.0  ;;  %v796_v33 = vmul.f32 %v780_v30, %v745_v29  ;;  %v1824_v10 = vand.u32 127, %v816_v6  ;;  %v1002_v6 = vld [vmem:[%s1927_s4 + $0x28] sm:$0xff] }
 0x17f   :  { %1334 = vset.pattern.permute.xlu1 %v1365_v3  ;;  %v749_v14 = vmul.f32 0.5, %v748_v26  ;;  %v998_v26 = vld [vmem:[%s1927_s4 + $0x8] sm:$0xff] }
 0x180   :  { %v1361_v18 = vpop.eup %1360  ;;  %v695_v20 = vadd.f32 1e-05, %v687_v16  ;;  %835 = vperm.xlu2 %1329, %v795_v9   ;;  %v811_v21 = vsub.f32 %v787_v12, %v803_v8  ;;  %1332 = vset.pattern.permute.xlu0 %v1364_v2  ;;  %v804_v45 = vmul.f32 %v796_v33, %v1711_v56  ;;  %vm898_vm11 = vcmp.ge.s32.totalorder %v1824_v10, 16 }
 0x181   :  { %v757_v23 = vmul.f32 %v1361_v18, %v694_v61  ;;  %910 = vperm.xlu0 %1332, %v794_v44   ;;  %vm763_vm2 = vweird.f32 %v1361_v18  ;;  %v750_v43 = vsub.f32 1.5, %v749_v14 }
 0x182   :  { %1362 = vrsqrt.f32 %v695_v20  ;;  %875 = vperm.xlu1 %1334, %v811_v21   ;;  %vm764_vm4 = vmor %vm762_vm3, %vm763_vm2  ;;  %v812_v55 = vsub.f32 %v788_v48, %v804_v45  ;;  %vm772_vm9 = vweird.f32 %v695_v20  ;;  %v999_v45 = vld [vmem:[%s1927_s4 + $0x10] sm:$0xff] }
 0x183   :  { %v758_v47 = vmul.f32 %v1361_v18, %v757_v23  ;;  %v751_v54 = vmul.f32 %v1766_v13, %v750_v43 }
 0x185   :  { %v759_v28 = vmul.f32 0.5, %v758_v47 }
 0x187   :  { %v760_v31 = vsub.f32 1.5, %v759_v28 }
 0x188   :  { %v1363_v32 = vpop.eup %1362  ;;  %1333 = vset.pattern.permute.xlu2 %v1364_v2 }
 0x189   :  { %v767_v15 = vmul.f32 %v1363_v32, %v695_v20  ;;  %914 = vperm.xlu2 %1333, %v795_v9   ;;  %v761_v35 = vmul.f32 %v1361_v18, %v760_v31  ;;  %950 = vperm.xlu0 %1332, %v810_v57   ;;  %vm773_vm7 = vweird.f32 %v1363_v32  ;;  %v755_v57 = vsel %vm754_vm8, %v1766_v13, %v751_v54 }
 0x18a   :  { %840 = vperm.xlu1 %1334, %v796_v33   ;;  %vm774_vm10 = vmor %vm772_vm9, %vm773_vm7 }
 0x18b   :  { %v768_v38 = vmul.f32 %v1363_v32, %v767_v15  ;;  %v765_v39 = vsel %vm764_vm4, %v1361_v18, %v761_v35 }
 0x18c   :  { %v798_v42 = vmul.f32 %v782_v36, %v765_v39  ;;  %v1000_v36 = vld [vmem:[%s1927_s4 + $0x18] sm:$0xff] }
 0x18d   :  { %v769_v44 = vmul.f32 0.5, %v768_v38 }
 0x18e   :  { %v806_v51 = vmul.f32 %v798_v42, %v1738_v34  ;;  %v781_v34 = vld [vmem:[%s1925_s2 + $0x28] sm:$0xff] }
 0x18f   :  { %v770_v53 = vsub.f32 1.5, %v769_v44  ;;  %v797_v61 = vmul.f32 %v781_v34, %v755_v57 }
 0x190   :  { %v814_v37 = vsub.f32 %v790_v46, %v806_v51 }
 0x191   :  { %954 = vperm.xlu2 %1333, %v811_v21   ;;  %1336 = vset.pattern.permute.xlu0 %v1365_v3  ;;  %v771_v56 = vmul.f32 %v1363_v32, %v770_v53  ;;  %v805_v1 = vmul.f32 %v797_v61, %v1723_v19 }
 0x192   :  { %1335 = vset.pattern.permute.xlu1 %v1364_v2  ;;  %880 = vperm.xlu0 %1336, %v812_v55  }
 0x193   :  { %918 = vperm.xlu1 %1335, %v796_v33   ;;  %v775_v58 = vsel %vm774_vm10, %v1363_v32, %v771_v56 }
 0x194   :  { %v799_v49 = vmul.f32 %v783_v59, %v775_v58  ;;  %v1001_v58 = vld [vmem:[%s1927_s4 + $0x20] sm:$0xff] }
 0x196   :  { %v807_v41 = vmul.f32 %v799_v49, %v1755_v62  ;;  %v789_v62 = vld [vmem:[%s1926_s3 + $0x28] sm:$0xff] }
 0x197   :  { %v813_v4 = vsub.f32 %v789_v62, %v805_v1 }
 0x198   :  { %v815_v0 = vsub.f32 %v791_v24, %v807_v41 }
 0x199   :  { %1337 = vset.pattern.permute.xlu2 %v1365_v3 }
 0x19a   :  { %845 = vperm.xlu2 %1337, %v797_v61   ;;  %1343 = vset.pattern.permute.xlu0 %v1364_v2 }
 0x19b   :  { %958 = vperm.xlu1 %1335, %v812_v55   ;;  %930 = vperm.xlu0 %1343, %v799_v49  }
 0x1a2   :  { %1338 = vset.pattern.permute.xlu2 %v1364_v2 }
 0x1a3   :  { %922 = vperm.xlu2 %1338, %v797_v61   ;;  %1340 = vset.pattern.permute.xlu1 %v1365_v3 }
 0x1a4   :  { %1344 = vset.pattern.permute.xlu0 %v1365_v3  ;;  %850 = vperm.xlu1 %1340, %v798_v42  }
 0x1a5   :  { %895 = vperm.xlu0 %1344, %v815_v0  }
 0x1ab   :  { %1339 = vset.pattern.permute.xlu2 %v1365_v3 }
 0x1ac   :  { %885 = vperm.xlu2 %1339, %v813_v4   ;;  %1341 = vset.pattern.permute.xlu1 %v1364_v2 }
 0x1ad   :  { %1345 = vset.pattern.permute.xlu0 %v1364_v2  ;;  %926 = vperm.xlu1 %1341, %v798_v42  }
 0x1ae   :  { %962 = vperm.xlu0 %1345, %v813_v4  }
 0x1b4   :  { %855 = vperm.xlu2 %1339, %v799_v49  }
 0x1b5   :  { %1342 = vset.pattern.permute.xlu1 %v1365_v3 }
 0x1b6   :  { %890 = vperm.xlu1 %1342, %v814_v37  }
 0x1b8   :  { %v903_v5 = vpop.permute.xlu2 %902 }
 0x1bc   :  { %1346 = vset.pattern.permute.xlu2 %v1364_v2 }
 0x1bd   :  { %966 = vperm.xlu2 %1346, %v814_v37  }
 0x1be   :  { %1347 = vset.pattern.permute.xlu1 %v1364_v2  ;;  %v997_v2 = vld [vmem:[%s1927_s4] sm:$0xff] }
 0x1bf   :  { %970 = vperm.xlu1 %1347, %v815_v0  }
 0x1c0   :  { %v943_v19 = vpop.permute.xlu2 %942 }
 0x1c9   :  { %v826_v9 = vpop.permute.xlu2 %825 }
 0x1d0   :  { %v821_v11 = vpop.permute.xlu1 %820 }
 0x1d1   :  { %v933_v12 = vsel %vm898_vm11, %v903_v5, %v821_v11 }
 0x1d2   :  { %v871_v3 = vpop.permute.xlu2 %870  ;;  %v981_v13 = vmul.f32 %v933_v12, %v1632_v50 }
 0x1d8   :  { %v861_v8 = vpop.permute.xlu1 %860 }
 0x1d9   :  { %v973_v16 = vsel %vm898_vm11, %v943_v19, %v861_v8 }
 0x1da   :  { %v989_v18 = vadd.f32 %v981_v13, %v973_v16  ;;  %v836_v21 = vpop.permute.xlu2 %835 }
 0x1dc   :  { %v1005_v20 = vadd.f32 %v997_v2, %v989_v18  ;;  %v1003_v2 = vld [vmem:[%s1927_s4 + $0x30] sm:$0xff] }
 0x1de   :  { %1013 = vst.msk [vmem:[%s1928_s5] sm:$0xff] %vm591_vm1, %v1005_v20 }
 0x1e1   :  { %v907_v22 = vpop.permute.xlu1 %906 }
 0x1e2   :  { %v866_v23 = vpop.permute.xlu0 %865  ;;  %v934_v50 = vsel %vm898_vm11, %v907_v22, %v826_v9 }
 0x1e3   :  { %v982_v25 = vmul.f32 %v934_v50, %v1639_v60  ;;  %v915_v29 = vpop.permute.xlu2 %914 }
 0x1e4   :  { %v936_v60 = vsel %vm898_vm11, %v915_v29, %v836_v21 }
 0x1e5   :  { %v984_v14 = vmul.f32 %v936_v60, %v1652_v17 }
 0x1e9   :  { %v947_v47 = vpop.permute.xlu1 %946 }
 0x1ea   :  { %v974_v28 = vsel %vm898_vm11, %v947_v47, %v866_v23  ;;  %v831_v31 = vpop.permute.xlu0 %830  ;;  %v1004_v23 = vld [vmem:[%s1927_s4 + $0x38] sm:$0xff] }
 0x1eb   :  { %v990_v30 = vadd.f32 %v982_v25, %v974_v28  ;;  %v955_v15 = vpop.permute.xlu2 %954 }
 0x1ed   :  { %v1006_v32 = vadd.f32 %v998_v26, %v990_v30 }
 0x1ef   :  { %1014 = vst.msk [vmem:[%s1928_s5 + $0x8] sm:$0xff] %vm591_vm1, %v1006_v32 }
 0x1f3   :  { %v911_v33 = vpop.permute.xlu0 %910 }
 0x1f4   :  { %v876_v35 = vpop.permute.xlu1 %875  ;;  %v935_v42 = vsel %vm898_vm11, %v911_v33, %v831_v31  ;;  %v846_v53 = vpop.permute.xlu2 %845 }
 0x1f5   :  { %v976_v38 = vsel %vm898_vm11, %v955_v15, %v876_v35  ;;  %v983_v17 = vmul.f32 %v935_v42, %v1645_v7 }
 0x1f6   :  { %v992_v39 = vadd.f32 %v984_v14, %v976_v38 }
 0x1f8   :  { %v1008_v43 = vadd.f32 %v1000_v36, %v992_v39 }
 0x1fa   :  { %1016 = vst.msk [vmem:[%s1928_s5 + $0x18] sm:$0xff] %vm591_vm1, %v1008_v43 }
 0x1fb   :  { %v951_v44 = vpop.permute.xlu0 %950 }
 0x1fc   :  { %v975_v46 = vsel %vm898_vm11, %v951_v44, %v871_v3  ;;  %v841_v48 = vpop.permute.xlu1 %840 }
 0x1fd   :  { %v991_v51 = vadd.f32 %v983_v17, %v975_v46  ;;  %v923_v7 = vpop.permute.xlu2 %922 }
 0x1ff   :  { %v1007_v37 = vadd.f32 %v999_v45, %v991_v51 }
 0x201   :  { %1015 = vst.msk [vmem:[%s1928_s5 + $0x10] sm:$0xff] %vm591_vm1, %v1007_v37 }
 0x204   :  { %v881_v54 = vpop.permute.xlu0 %880 }
 0x205   :  { %v919_v55 = vpop.permute.xlu1 %918 }
 0x206   :  { %v937_v56 = vsel %vm898_vm11, %v919_v55, %v841_v48  ;;  %v886_v24 = vpop.permute.xlu2 %885 }
 0x207   :  { %v985_v34 = vmul.f32 %v937_v56, %v1658_v27  ;;  %v938_v27 = vsel %vm898_vm11, %v923_v7, %v846_v53 }
 0x208   :  { %v986_v5 = vmul.f32 %v938_v27, %v1667_v40 }
 0x20d   :  { %v959_v57 = vpop.permute.xlu1 %958  ;;  %v931_v61 = vpop.permute.xlu0 %930 }
 0x20e   :  { %v977_v59 = vsel %vm898_vm11, %v959_v57, %v881_v54  ;;  %v856_v62 = vpop.permute.xlu2 %855 }
 0x20f   :  { %v993_v49 = vadd.f32 %v985_v34, %v977_v59  ;;  %v940_v21 = vsel %vm898_vm11, %v931_v61, %v856_v62 }
 0x211   :  { %v1009_v41 = vadd.f32 %v1001_v58, %v993_v49 }
 0x213   :  { %1017 = vst.msk [vmem:[%s1928_s5 + $0x20] sm:$0xff] %vm591_vm1, %v1009_v41 }
 0x216   :  { %v851_v0 = vpop.permute.xlu1 %850 }
 0x217   :  { %v896_v1 = vpop.permute.xlu0 %895  ;;  %v967_v13 = vpop.permute.xlu2 %966 }
 0x21f   :  { %v927_v4 = vpop.permute.xlu1 %926 }
 0x220   :  { %v963_v19 = vpop.permute.xlu0 %962  ;;  %v939_v3 = vsel %vm898_vm11, %v927_v4, %v851_v0 }
 0x221   :  { %v978_v9 = vsel %vm898_vm11, %v963_v19, %v886_v24  ;;  %v987_v40 = vmul.f32 %v939_v3, %v1675_v52  ;;  %v988_v52 = vmul.f32 %v940_v21, %v1683_v63 }
 0x222   :  { %v994_v11 = vadd.f32 %v986_v5, %v978_v9 }
 0x224   :  { %v1010_v12 = vadd.f32 %v1002_v6, %v994_v11 }
 0x226   :  { %1018 = vst.msk [vmem:[%s1928_s5 + $0x28] sm:$0xff] %vm591_vm1, %v1010_v12 }
 0x228   :  { %v891_v8 = vpop.permute.xlu1 %890 }
 0x229   :  { %v979_v16 = vsel %vm898_vm11, %v967_v13, %v891_v8 }
 0x22a   :  { %v995_v18 = vadd.f32 %v987_v40, %v979_v16 }
 0x22c   :  { %v1011_v20 = vadd.f32 %v1003_v2, %v995_v18 }
 0x22e   :  { %1019 = vst.msk [vmem:[%s1928_s5 + $0x30] sm:$0xff] %vm591_vm1, %v1011_v20 }
 0x231   :  { %v971_v22 = vpop.permute.xlu1 %970 }
 0x232   :  { %v980_v50 = vsel %vm898_vm11, %v971_v22, %v896_v1 }
 0x233   :  { %v996_v25 = vadd.f32 %v988_v52, %v980_v50 }
 0x235   :  { %v1012_v47 = vadd.f32 %v1004_v23, %v996_v25 }
 0x237   :  { %1020 = vst.msk [vmem:[%s1928_s5 + $0x38] sm:$0xff] %vm591_vm1, %v1012_v47 }

// kernel: generator_forward.16
= control target key start
LH: loop header
LB: loop body
LE: loop exit
PB: predicated region body
PF: predicated region fallthrough
CT: control target
= control target key end

     0   :  { %vm339_vm0 = vcmask 261120   ;;  %s1373_s0 = inlined_call_operand.vmem [shape: bf16[256,32], index: 0, kind: input, shape index: {}]   ;;  %s1374_s1 = inlined_call_operand.vmem [shape: bf16[128,256], index: 1, kind: input, shape index: {}]   ;;  %s1375_s2 = inlined_call_operand.vmem [shape: f32[32,2], index: 2, kind: input, shape index: {}]   ;;  %s1376_s3 = inlined_call_operand.vmem [shape: f32[32,2], index: 3, kind: input, shape index: {}]   ;;  %s1377_s4 = inlined_call_operand.vmem [shape: f32[4,32,32], index: 4, kind: output, shape index: {}]  }
   0x1   :  { %v879_v0 = vld [vmem:[%s1373_s0 + $0x38] sm:$0xff]  ;;  %v878_v2 = vld [vmem:[%s1373_s0 + $0x30] sm:$0xff]  ;;  %v877_v4 = vld [vmem:[%s1373_s0 + $0x28] sm:$0xff] }
   0x2   :  { %v887_v1 = vld [vmem:[%s1373_s0 + $0x78] sm:$0xff]  ;;  %241 = vmatpush.bf16.msra.mxu0 %v879_v0  ;;  %888 = vmatpush.bf16.msra.mxu2 %v879_v0  ;;  %v886_v3 = vld [vmem:[%s1373_s0 + $0x70] sm:$0xff]  ;;  %v885_v5 = vld [vmem:[%s1373_s0 + $0x68] sm:$0xff] }
   0x3   :  { %290 = vmatpush.bf16.msra.mxu1 %v887_v1  ;;  %896 = vmatpush.bf16.msra.mxu3 %v887_v1  ;;  %v876_v6 = vld [vmem:[%s1373_s0 + $0x20] sm:$0xff]  ;;  %v875_v8 = vld [vmem:[%s1373_s0 + $0x18] sm:$0xff]  ;;  %v874_v10 = vld [vmem:[%s1373_s0 + $0x10] sm:$0xff] }
   0x4   :  { %v884_v7 = vld [vmem:[%s1373_s0 + $0x60] sm:$0xff]  ;;  %v883_v9 = vld [vmem:[%s1373_s0 + $0x58] sm:$0xff]  ;;  %v882_v11 = vld [vmem:[%s1373_s0 + $0x50] sm:$0xff] }
   0x5   :  { %v873_v12 = vld [vmem:[%s1373_s0 + $0x8] sm:$0xff]  ;;  %v872_v14 = vld [vmem:[%s1373_s0] sm:$0xff]  ;;  %v726_v28 = vld [vmem:[%s1374_s1 + $0x10] sm:$0xf] }
   0x6   :  { %242 = vmatpush.bf16.msra.mxu0 %v878_v2  ;;  %889 = vmatpush.bf16.msra.mxu2 %v878_v2  ;;  %v881_v13 = vld [vmem:[%s1373_s0 + $0x48] sm:$0xff]  ;;  %v880_v15 = vld [vmem:[%s1373_s0 + $0x40] sm:$0xff]  ;;  %v859_v29 = vld [vmem:[%s1374_s1 + $0x14] sm:$0xf0] }
   0x7   :  { %291 = vmatpush.bf16.msra.mxu1 %v886_v3  ;;  %897 = vmatpush.bf16.msra.mxu3 %v886_v3  ;;  %v718_v16 = vld [vmem:[%s1374_s1] sm:$0xf]  ;;  %v857_v17 = vld [vmem:[%s1374_s1 + $0x4] sm:$0xf0]  ;;  %v856_v20 = vld [vmem:[%s1374_s1 + $0x4] sm:$0xf]  ;;  %v727_v36 = vor.u32 %v859_v29, %v726_v28 }
   0x8   :  { %v750_v18 = vld [vmem:[%s1374_s1 + $0x40] sm:$0xf]  ;;  %v865_v19 = vld [vmem:[%s1374_s1 + $0x44] sm:$0xf0]  ;;  %v720_v21 = vld [vmem:[%s1374_s1 + $0x8] sm:$0xf0]  ;;  %v719_v24 = vor.u32 %v857_v17, %v718_v16 }
   0x9   :  { %v864_v22 = vld [vmem:[%s1374_s1 + $0x44] sm:$0xf]  ;;  %v752_v23 = vld [vmem:[%s1374_s1 + $0x48] sm:$0xf0]  ;;  %v751_v25 = vor.u32 %v865_v19, %v750_v18  ;;  %v723_v26 = vor.u32 %v856_v20, %v720_v21  ;;  %v758_v30 = vld [vmem:[%s1374_s1 + $0x50] sm:$0xf] }
   0xa   :  { %243 = vmatpush.bf16.msra.mxu0 %v877_v4  ;;  %890 = vmatpush.bf16.msra.mxu2 %v877_v4  ;;  %v755_v27 = vor.u32 %v864_v22, %v752_v23  ;;  %v867_v31 = vld [vmem:[%s1374_s1 + $0x54] sm:$0xf0]  ;;  %v858_v32 = vld [vmem:[%s1374_s1 + $0x14] sm:$0xf]  ;;  %v728_v33 = vld [vmem:[%s1374_s1 + $0x18] sm:$0xf0] }
   0xb   :  { %292 = vmatpush.bf16.msra.mxu1 %v885_v5  ;;  %898 = vmatpush.bf16.msra.mxu3 %v885_v5  ;;  %v866_v34 = vld [vmem:[%s1374_s1 + $0x54] sm:$0xf]  ;;  %v760_v35 = vld [vmem:[%s1374_s1 + $0x58] sm:$0xf0]  ;;  %v759_v37 = vor.u32 %v867_v31, %v758_v30  ;;  %v731_v38 = vor.u32 %v858_v32, %v728_v33  ;;  %v766_v40 = vld [vmem:[%s1374_s1 + $0x60] sm:$0xf] }
   0xc   :  { %v763_v39 = vor.u32 %v866_v34, %v760_v35  ;;  %v869_v41 = vld [vmem:[%s1374_s1 + $0x64] sm:$0xf0]  ;;  %v868_v42 = vld [vmem:[%s1374_s1 + $0x64] sm:$0xf]  ;;  %v734_v43 = vld [vmem:[%s1374_s1 + $0x20] sm:$0xf] }
   0xd   :  { %v861_v44 = vld [vmem:[%s1374_s1 + $0x24] sm:$0xf0]  ;;  %v768_v45 = vld [vmem:[%s1374_s1 + $0x68] sm:$0xf0]  ;;  %v860_v46 = vld [vmem:[%s1374_s1 + $0x24] sm:$0xf]  ;;  %v767_v48 = vor.u32 %v869_v41, %v766_v40 }
   0xe   :  { %244 = vmatpush.bf16.msra.mxu0 %v876_v6  ;;  %891 = vmatpush.bf16.msra.mxu2 %v876_v6  ;;  %v736_v47 = vld [vmem:[%s1374_s1 + $0x28] sm:$0xf0]  ;;  %v735_v49 = vor.u32 %v861_v44, %v734_v43  ;;  %v771_v50 = vor.u32 %v868_v42, %v768_v45  ;;  %v774_v52 = vld [vmem:[%s1374_s1 + $0x70] sm:$0xf]  ;;  %v871_v53 = vld [vmem:[%s1374_s1 + $0x74] sm:$0xf0] }
   0xf   :  { %293 = vmatpush.bf16.msra.mxu1 %v884_v7  ;;  %899 = vmatpush.bf16.msra.mxu3 %v884_v7  ;;  %v739_v51 = vor.u32 %v860_v46, %v736_v47  ;;  %v870_v54 = vld [vmem:[%s1374_s1 + $0x74] sm:$0xf]  ;;  %v742_v55 = vld [vmem:[%s1374_s1 + $0x30] sm:$0xf]  ;;  %v863_v56 = vld [vmem:[%s1374_s1 + $0x34] sm:$0xf0]  ;;  %v775_v60 = vor.u32 %v871_v53, %v774_v52 }
  0x10   :  { %v776_v57 = vld [vmem:[%s1374_s1 + $0x78] sm:$0xf0]  ;;  %v862_v58 = vld [vmem:[%s1374_s1 + $0x34] sm:$0xf]  ;;  %v743_v61 = vor.u32 %v863_v56, %v742_v55 }
  0x11   :  { %v744_v59 = vld [vmem:[%s1374_s1 + $0x38] sm:$0xf0]  ;;  %v779_v62 = vor.u32 %v870_v54, %v776_v57 }
  0x12   :  { %245 = vmatpush.bf16.msra.mxu0 %v875_v8  ;;  %892 = vmatpush.bf16.msra.mxu2 %v875_v8  ;;  %v747_v63 = vor.u32 %v862_v58, %v744_v59 }
  0x13   :  { %294 = vmatpush.bf16.msra.mxu1 %v883_v9  ;;  %900 = vmatpush.bf16.msra.mxu3 %v883_v9 }
  0x16   :  { %246 = vmatpush.bf16.msra.mxu0 %v874_v10  ;;  %893 = vmatpush.bf16.msra.mxu2 %v874_v10 }
  0x17   :  { %295 = vmatpush.bf16.msra.mxu1 %v882_v11  ;;  %901 = vmatpush.bf16.msra.mxu3 %v882_v11 }
  0x1a   :  { %247 = vmatpush.bf16.msra.mxu0 %v873_v12  ;;  %894 = vmatpush.bf16.msra.mxu2 %v873_v12 }
  0x1b   :  { %296 = vmatpush.bf16.msra.mxu1 %v881_v13  ;;  %902 = vmatpush.bf16.msra.mxu3 %v881_v13 }
  0x1e   :  { %248 = vmatpush.bf16.msra.mxu0 %v872_v14  ;;  %895 = vmatpush.bf16.msra.mxu2 %v872_v14 }
  0x1f   :  { %297 = vmatpush.bf16.msra.mxu1 %v880_v15  ;;  %903 = vmatpush.bf16.msra.mxu3 %v880_v15 }
  0x21   :  { %249 = vmatmul.bf16.vlgmr.msra.gmra.mxu0 %v719_v24  ;;  %269 = vmatmul.bf16.vlgmr.msra.gmra.mxu2 %v751_v25 }
  0x22   :  { %298 = vmatmul.bf16.vlgmr.msra.gmra.mxu1 %v723_v26  ;;  %318 = vmatmul.bf16.vlgmr.msra.gmra.mxu3 %v755_v27 }
  0x31   :  { %254 = vmatmul.bf16.gmra.mxu0 %v727_v36  ;;  %274 = vmatmul.bf16.gmra.mxu2 %v759_v37 }
  0x32   :  { %303 = vmatmul.bf16.gmra.mxu1 %v731_v38  ;;  %323 = vmatmul.bf16.gmra.mxu3 %v763_v39 }
  0x41   :  { %279 = vmatmul.bf16.gmra.mxu2 %v767_v48  ;;  %259 = vmatmul.bf16.gmra.mxu0 %v735_v49 }
  0x42   :  { %328 = vmatmul.bf16.gmra.mxu3 %v771_v50  ;;  %308 = vmatmul.bf16.gmra.mxu1 %v739_v51 }
  0x51   :  { %284 = vmatmul.bf16.gmra.mxu2 %v775_v60  ;;  %264 = vmatmul.bf16.gmra.mxu0 %v743_v61 }
  0x52   :  { %333 = vmatmul.bf16.gmra.mxu3 %v779_v62  ;;  %313 = vmatmul.bf16.gmra.mxu1 %v747_v63 }
  0x9e   :  { %v250_v0 = vpop.f32.mrf.mxu0 }
  0x9f   :  { %v299_v1 = vpop.f32.mrf.mxu1 }
  0xa0   :  { %v1097_v2 = vadd.f32 %v299_v1, %v250_v0 }
  0xa2   :  { %v340_v3 = vsel %vm339_vm0, %v1097_v2, 0.0  ;;  %v388_v4 = vmul.f32 %v1097_v2, %v1097_v2 }
  0xa3   :  { %341 = vadd.xlane.f32.xlu0 %v340_v3 }
  0xa4   :  { %v270_v5 = vpop.f32.mrf.mxu2  ;;  %v404_v6 = vsel %vm339_vm0, %v388_v4, 0.0 }
  0xa5   :  { %v319_v7 = vpop.f32.mrf.mxu3  ;;  %405 = vadd.xlane.f32.xlu1 %v404_v6 }
  0xa6   :  { %v1104_v8 = vadd.f32 %v319_v7, %v270_v5  ;;  %v252_v9 = vpop.f32.mrf.mxu0 }
  0xa7   :  { %v301_v10 = vpop.f32.mrf.mxu1 }
  0xa8   :  { %v1106_v11 = vadd.f32 %v301_v10, %v252_v9  ;;  %v364_v12 = vsel %vm339_vm0, %v1104_v8, 0.0  ;;  %v396_v18 = vmul.f32 %v1104_v8, %v1104_v8 }
  0xa9   :  { %365 = vadd.xlane.f32.xlu2 %v364_v12 }
  0xaa   :  { %v343_v13 = vsel %vm339_vm0, %v1106_v11, 0.0  ;;  %v389_v15 = vmul.f32 %v1106_v11, %v1106_v11  ;;  %v428_v22 = vsel %vm339_vm0, %v396_v18, 0.0 }
  0xab   :  { %344 = vadd.xlane.f32.xlu0 %v343_v13 }
  0xac   :  { %v272_v14 = vpop.f32.mrf.mxu2  ;;  %v407_v21 = vsel %vm339_vm0, %v389_v15, 0.0 }
  0xad   :  { %v321_v16 = vpop.f32.mrf.mxu3 }
  0xae   :  { %v255_v17 = vpop.f32.mrf.mxu0  ;;  %v1122_v24 = vadd.f32 %v321_v16, %v272_v14 }
  0xaf   :  { %v304_v19 = vpop.f32.mrf.mxu1 }
  0xb0   :  { %v1116_v20 = vadd.f32 %v304_v19, %v255_v17  ;;  %v397_v28 = vmul.f32 %v1122_v24, %v1122_v24  ;;  %v367_v31 = vsel %vm339_vm0, %v1122_v24, 0.0 }
  0xb1   :  { %408 = vadd.xlane.f32.xlu2 %v407_v21 }
  0xb2   :  { %v346_v23 = vsel %vm339_vm0, %v1116_v20, 0.0  ;;  %v431_v34 = vsel %vm339_vm0, %v397_v28, 0.0  ;;  %v390_v38 = vmul.f32 %v1116_v20, %v1116_v20 }
  0xb3   :  { %429 = vadd.xlane.f32.xlu0 %v428_v22  ;;  %347 = vadd.xlane.f32.xlu1 %v346_v23 }
  0xb4   :  { %v275_v25 = vpop.f32.mrf.mxu2  ;;  %v410_v40 = vsel %vm339_vm0, %v390_v38, 0.0 }
  0xb5   :  { %v324_v26 = vpop.f32.mrf.mxu3 }
  0xb6   :  { %v1124_v27 = vadd.f32 %v324_v26, %v275_v25  ;;  %v257_v32 = vpop.f32.mrf.mxu0 }
  0xb7   :  { %v306_v33 = vpop.f32.mrf.mxu1 }
  0xb8   :  { %v398_v29 = vmul.f32 %v1124_v27, %v1124_v27  ;;  %v370_v42 = vsel %vm339_vm0, %v1124_v27, 0.0  ;;  %v1147_v48 = vadd.f32 %v306_v33, %v257_v32 }
  0xba   :  { %v434_v30 = vsel %vm339_vm0, %v398_v29, 0.0  ;;  %v349_v51 = vsel %vm339_vm0, %v1147_v48, 0.0  ;;  %v391_v58 = vmul.f32 %v1147_v48, %v1147_v48 }
  0xbb   :  { %435 = vadd.xlane.f32.xlu2 %v434_v30  ;;  %368 = vadd.xlane.f32.xlu0 %v367_v31 }
  0xbc   :  { %432 = vadd.xlane.f32.xlu1 %v431_v34  ;;  %v277_v35 = vpop.f32.mrf.mxu2  ;;  %v413_v62 = vsel %vm339_vm0, %v391_v58, 0.0 }
  0xbd   :  { %v326_v36 = vpop.f32.mrf.mxu3 }
  0xbe   :  { %v1134_v37 = vadd.f32 %v326_v36, %v277_v35  ;;  %v260_v43 = vpop.f32.mrf.mxu0 }
  0xbf   :  { %v309_v41 = vpop.f32.mrf.mxu1 }
  0xc0   :  { %v373_v39 = vsel %vm339_vm0, %v1134_v37, 0.0  ;;  %v1143_v44 = vadd.f32 %v309_v41, %v260_v43  ;;  %v399_v47 = vmul.f32 %v1134_v37, %v1134_v37 }
  0xc2   :  { %v352_v49 = vsel %vm339_vm0, %v1143_v44, 0.0  ;;  %v437_v50 = vsel %vm339_vm0, %v399_v47, 0.0  ;;  %v392_v55 = vmul.f32 %v1143_v44, %v1143_v44 }
  0xc3   :  { %374 = vadd.xlane.f32.xlu2 %v373_v39  ;;  %411 = vadd.xlane.f32.xlu0 %v410_v40 }
  0xc4   :  { %371 = vadd.xlane.f32.xlu1 %v370_v42  ;;  %v280_v45 = vpop.f32.mrf.mxu2  ;;  %v416_v61 = vsel %vm339_vm0, %v392_v55, 0.0 }
  0xc5   :  { %v329_v46 = vpop.f32.mrf.mxu3 }
  0xc6   :  { %v1154_v52 = vadd.f32 %v329_v46, %v280_v45  ;;  %v262_v54 = vpop.f32.mrf.mxu0 }
  0xc7   :  { %v311_v53 = vpop.f32.mrf.mxu1 }
  0xc8   :  { %v376_v59 = vsel %vm339_vm0, %v1154_v52, 0.0  ;;  %v1162_v60 = vadd.f32 %v311_v53, %v262_v54  ;;  %v400_v0 = vmul.f32 %v1154_v52, %v1154_v52 }
  0xca   :  { %v393_v63 = vmul.f32 %v1162_v60, %v1162_v60  ;;  %v355_v6 = vsel %vm339_vm0, %v1162_v60, 0.0  ;;  %v440_v10 = vsel %vm339_vm0, %v400_v0, 0.0 }
  0xcb   :  { %438 = vadd.xlane.f32.xlu0 %v437_v50  ;;  %353 = vadd.xlane.f32.xlu2 %v352_v49 }
  0xcc   :  { %350 = vadd.xlane.f32.xlu1 %v349_v51  ;;  %v282_v56 = vpop.f32.mrf.mxu2  ;;  %v419_v5 = vsel %vm339_vm0, %v393_v63, 0.0 }
  0xcd   :  { %v331_v57 = vpop.f32.mrf.mxu3 }
  0xce   :  { %v1170_v4 = vadd.f32 %v331_v57, %v282_v56  ;;  %v265_v7 = vpop.f32.mrf.mxu0 }
  0xcf   :  { %v314_v9 = vpop.f32.mrf.mxu1 }
  0xd0   :  { %v1176_v12 = vadd.f32 %v314_v9, %v265_v7  ;;  %v401_v13 = vmul.f32 %v1170_v4, %v1170_v4  ;;  %v379_v18 = vsel %vm339_vm0, %v1170_v4, 0.0 }
  0xd2   :  { %v358_v14 = vsel %vm339_vm0, %v1176_v12, 0.0  ;;  %v443_v15 = vsel %vm339_vm0, %v401_v13, 0.0  ;;  %v394_v25 = vmul.f32 %v1176_v12, %v1176_v12 }
  0xd3   :  { %377 = vadd.xlane.f32.xlu0 %v376_v59  ;;  %417 = vadd.xlane.f32.xlu2 %v416_v61 }
  0xd4   :  { %414 = vadd.xlane.f32.xlu1 %v413_v62  ;;  %v285_v1 = vpop.f32.mrf.mxu2  ;;  %v422_v30 = vsel %vm339_vm0, %v394_v25, 0.0 }
  0xd5   :  { %v334_v3 = vpop.f32.mrf.mxu3 }
  0xd6   :  { %v1185_v19 = vadd.f32 %v334_v3, %v285_v1  ;;  %v267_v22 = vpop.f32.mrf.mxu0  ;;  %v926_v3 = vmov 1  }
  0xd7   :  { %v316_v23 = vpop.f32.mrf.mxu1  ;;  %907 = vset.pattern.permute.xlu0 %v926_v3  ;;  %908 = vset.pattern.permute.xlu1 %v926_v3 }
  0xd8   :  { %v1191_v26 = vadd.f32 %v316_v23, %v267_v22  ;;  %v382_v28 = vsel %vm339_vm0, %v1185_v19, 0.0  ;;  %v402_v31 = vmul.f32 %v1185_v19, %v1185_v19 }
  0xda   :  { %v395_v32 = vmul.f32 %v1191_v26, %v1191_v26  ;;  %v446_v33 = vsel %vm339_vm0, %v402_v31, 0.0  ;;  %v361_v35 = vsel %vm339_vm0, %v1191_v26, 0.0 }
  0xdb   :  { %420 = vadd.xlane.f32.xlu0 %v419_v5  ;;  %356 = vadd.xlane.f32.xlu2 %v355_v6  ;;  %v927_v5 = vmov 0  }
  0xdc   :  { %441 = vadd.xlane.f32.xlu1 %v440_v10  ;;  %v287_v16 = vpop.f32.mrf.mxu2  ;;  %v425_v34 = vsel %vm339_vm0, %v395_v32, 0.0  ;;  %906 = vset.pattern.permute.xlu2 %v927_v5 }
  0xdd   :  { %v336_v17 = vpop.f32.mrf.mxu3 }
  0xde   :  { %v1187_v21 = vadd.f32 %v336_v17, %v287_v16 }
  0xe0   :  { %v385_v29 = vsel %vm339_vm0, %v1187_v21, 0.0  ;;  %v403_v36 = vmul.f32 %v1187_v21, %v1187_v21 }
  0xe2   :  { %v449_v38 = vsel %vm339_vm0, %v403_v36, 0.0 }
  0xe3   :  { %444 = vadd.xlane.f32.xlu2 %v443_v15  ;;  %359 = vadd.xlane.f32.xlu0 %v358_v14 }
  0xe4   :  { %380 = vadd.xlane.f32.xlu1 %v379_v18 }
  0xeb   :  { %383 = vadd.xlane.f32.xlu2 %v382_v28  ;;  %386 = vadd.xlane.f32.xlu0 %v385_v29 }
  0xec   :  { %423 = vadd.xlane.f32.xlu1 %v422_v30 }
  0xf3   :  { %447 = vadd.xlane.f32.xlu0 %v446_v33  ;;  %426 = vadd.xlane.f32.xlu2 %v425_v34 }
  0xf4   :  { %362 = vadd.xlane.f32.xlu1 %v361_v35 }
  0xfc   :  { %450 = vadd.xlane.f32.xlu1 %v449_v38 }
 0x116   :  { %v342_v39 = vpop.xlane.xlu0 %341 }
 0x118   :  { %v406_v41 = vpop.xlane.xlu1 %405 }
 0x11c   :  { %v366_v40 = vpop.xlane.xlu2 %365 }
 0x11e   :  { %v345_v42 = vpop.xlane.xlu0 %344 }
 0x124   :  { %v409_v43 = vpop.xlane.xlu2 %408 }
 0x126   :  { %v430_v45 = vpop.xlane.xlu0 %429  ;;  %v348_v46 = vpop.xlane.xlu1 %347 }
 0x12e   :  { %v436_v47 = vpop.xlane.xlu2 %435  ;;  %v369_v49 = vpop.xlane.xlu0 %368 }
 0x12f   :  { %v433_v50 = vpop.xlane.xlu1 %432 }
 0x136   :  { %v1209_v51 = vpop.xlane.xlu2 %374  ;;  %v412_v53 = vpop.xlane.xlu0 %411 }
 0x137   :  { %v372_v54 = vpop.xlane.xlu1 %371 }
 0x13e   :  { %v1211_v55 = vpop.xlane.xlu0 %438  ;;  %v354_v56 = vpop.xlane.xlu2 %353 }
 0x13f   :  { %v351_v57 = vpop.xlane.xlu1 %350  ;;  %v452_v58 = vadd.f32 %v354_v56, %v342_v39 }
 0x141   :  { %v460_v63 = vadd.f32 %v452_v58, %v366_v40 }
 0x146   :  { %v378_v59 = vpop.xlane.xlu0 %377  ;;  %v418_v61 = vpop.xlane.xlu2 %417 }
 0x147   :  { %v1213_v62 = vpop.xlane.xlu1 %414  ;;  %v468_v0 = vadd.f32 %v460_v63, %v378_v59  ;;  %v456_v1 = vadd.f32 %v418_v61, %v406_v41 }
 0x149   :  { %v1217_v6 = vmul.f32 0.0078125, %v468_v0  ;;  %v464_v7 = vadd.f32 %v456_v1, %v430_v45 }
 0x14b   :  { %v484_v15 = vmul.f32 %v1217_v6, %v1217_v6 }
 0x14e   :  { %v421_v9 = vpop.xlane.xlu0 %420  ;;  %v357_v10 = vpop.xlane.xlu2 %356 }
 0x14f   :  { %v442_v13 = vpop.xlane.xlu1 %441  ;;  %v457_v17 = vadd.f32 %v421_v9, %v409_v43  ;;  %v453_v18 = vadd.f32 %v357_v10, %v345_v42 }
 0x150   :  { %v472_v14 = vadd.f32 %v464_v7, %v442_v13 }
 0x151   :  { %v461_v25 = vadd.f32 %v453_v18, %v369_v49  ;;  %v465_v28 = vadd.f32 %v457_v17, %v433_v50 }
 0x152   :  { %v480_v16 = vmul.f32 0.0078125, %v472_v14 }
 0x154   :  { %v488_v22 = vsub.f32 %v480_v16, %v484_v15 }
 0x156   :  { %v492_v23 = vmax.f32 %v488_v22, 0.0  ;;  %v445_v29 = vpop.xlane.xlu2 %444  ;;  %v360_v30 = vpop.xlane.xlu0 %359 }
 0x157   :  { %v381_v31 = vpop.xlane.xlu1 %380  ;;  %v473_v34 = vadd.f32 %v465_v28, %v445_v29  ;;  %v454_v36 = vadd.f32 %v360_v30, %v348_v46 }
 0x158   :  { %v496_v32 = vadd.f32 1e-05, %v492_v23  ;;  %v469_v33 = vadd.f32 %v461_v25, %v381_v31 }
 0x159   :  { %v481_v39 = vmul.f32 0.0078125, %v473_v34  ;;  %v462_v43 = vadd.f32 %v454_v36, %v372_v54 }
 0x15a   :  { %918 = vrsqrt.f32 %v496_v32  ;;  %v1222_v35 = vmul.f32 0.0078125, %v469_v33  ;;  %vm506_vm2 = vweird.f32 %v496_v32 }
 0x15c   :  { %v485_v38 = vmul.f32 %v1222_v35, %v1222_v35 }
 0x15e   :  { %v489_v40 = vsub.f32 %v481_v39, %v485_v38  ;;  %v384_v41 = vpop.xlane.xlu2 %383  ;;  %v387_v42 = vpop.xlane.xlu0 %386 }
 0x15f   :  { %v424_v45 = vpop.xlane.xlu1 %423  ;;  %v470_v58 = vadd.f32 %v462_v43, %v384_v41 }
 0x160   :  { %v919_v49 = vpop.eup %918  ;;  %v493_v50 = vmax.f32 %v489_v40, 0.0  ;;  %v458_v59 = vadd.f32 %v424_v45, %v412_v53  ;;  %v540_v53 = vld [vmem:[%s1375_s2] sm:$0xff] }
 0x161   :  { %v501_v56 = vmul.f32 %v919_v49, %v496_v32  ;;  %v1226_v1 = vmul.f32 0.0078125, %v470_v58  ;;  %vm507_vm1 = vweird.f32 %v919_v49  ;;  %v544_v32 = vld [vmem:[%s1376_s3] sm:$0xff] }
 0x162   :  { %v497_v61 = vadd.f32 1e-05, %v493_v50  ;;  %v466_v46 = vadd.f32 %v458_v59, %v436_v47  ;;  %vm508_vm3 = vmor %vm506_vm2, %vm507_vm1  ;;  %v545_v59 = vld [vmem:[%s1376_s3 + $0x8] sm:$0xff] }
 0x163   :  { %v502_v63 = vmul.f32 %v919_v49, %v501_v56  ;;  %v486_v15 = vmul.f32 %v1226_v1, %v1226_v1 }
 0x164   :  { %920 = vrsqrt.f32 %v497_v61  ;;  %vm516_vm5 = vweird.f32 %v497_v61 }
 0x165   :  { %v503_v0 = vmul.f32 0.5, %v502_v63 }
 0x166   :  { %v448_v7 = vpop.xlane.xlu0 %447  ;;  %v427_v10 = vpop.xlane.xlu2 %426 }
 0x167   :  { %v474_v9 = vadd.f32 %v466_v46, %v448_v7  ;;  %v363_v13 = vpop.xlane.xlu1 %362  ;;  %v504_v14 = vsub.f32 1.5, %v503_v0  ;;  %v459_v47 = vadd.f32 %v427_v10, %v1213_v62 }
 0x168   :  { %v455_v54 = vadd.f32 %v363_v13, %v351_v57 }
 0x169   :  { %v482_v16 = vmul.f32 0.0078125, %v474_v9  ;;  %v505_v17 = vmul.f32 %v919_v49, %v504_v14  ;;  %v467_v62 = vadd.f32 %v459_v47, %v1211_v55  ;;  %v541_v55 = vld [vmem:[%s1375_s2 + $0x8] sm:$0xff] }
 0x16a   :  { %v921_v18 = vpop.eup %920  ;;  %v463_v22 = vadd.f32 %v455_v54, %v1209_v51 }
 0x16b   :  { %v511_v23 = vmul.f32 %v921_v18, %v497_v61  ;;  %v490_v25 = vsub.f32 %v482_v16, %v486_v15  ;;  %v509_v28 = vsel %vm508_vm3, %v919_v49, %v505_v17  ;;  %vm517_vm4 = vweird.f32 %v921_v18 }
 0x16c   :  { %v471_v57 = vadd.f32 %v463_v22, %v387_v42  ;;  %v548_v29 = vmul.f32 %v540_v53, %v509_v28  ;;  %vm518_vm6 = vmor %vm516_vm5, %vm517_vm4  ;;  %v546_v53 = vld [vmem:[%s1376_s3 + $0x10] sm:$0xff]  ;;  %v543_v28 = vld [vmem:[%s1375_s2 + $0x18] sm:$0xff] }
 0x16d   :  { %v512_v30 = vmul.f32 %v921_v18, %v511_v23  ;;  %v494_v31 = vmax.f32 %v490_v25, 0.0 }
 0x16e   :  { %v1238_v33 = vmul.f32 0.0078125, %v471_v57  ;;  %606 = vperm.xlu0 %907, %v548_v29   ;;  %564 = vperm.xlu2 %906, %v548_v29   ;;  %v552_v51 = vmul.f32 %v548_v29, %v1217_v6 }
 0x16f   :  { %v513_v34 = vmul.f32 0.5, %v512_v30  ;;  %v498_v36 = vadd.f32 1e-05, %v494_v31  ;;  %v451_v38 = vpop.xlane.xlu1 %450  ;;  %v547_v30 = vld [vmem:[%s1376_s3 + $0x18] sm:$0xff] }
 0x170   :  { %v475_v39 = vadd.f32 %v467_v62, %v451_v38  ;;  %v556_v40 = vsub.f32 %v544_v32, %v552_v51  ;;  %v487_v42 = vmul.f32 %v1238_v33, %v1238_v33  ;;  %v560_v51 = vlaneseq }
 0x171   :  { %922 = vrsqrt.f32 %v498_v36  ;;  %v514_v41 = vsub.f32 1.5, %v513_v34  ;;  %vm526_vm8 = vweird.f32 %v498_v36 }
 0x172   :  { %v483_v43 = vmul.f32 0.0078125, %v475_v39  ;;  %626 = vperm.xlu1 %908, %v556_v40   ;;  %v1274_v34 = vand.u32 127, %v560_v51 }
 0x173   :  { %v515_v45 = vmul.f32 %v921_v18, %v514_v41 }
 0x174   :  { %v491_v6 = vsub.f32 %v483_v43, %v487_v42  ;;  %vm602_vm13 = vcmp.ge.s32.totalorder %v1274_v34, 16 }
 0x175   :  { %v519_v49 = vsel %vm518_vm6, %v921_v18, %v515_v45 }
 0x176   :  { %v495_v50 = vmax.f32 %v491_v6, 0.0  ;;  %584 = vperm.xlu2 %906, %v556_v40   ;;  %909 = vset.pattern.permute.xlu0 %v927_v5  ;;  %v549_v56 = vmul.f32 %v541_v55, %v519_v49 }
 0x177   :  { %v923_v58 = vpop.eup %922 }
 0x178   :  { %v521_v63 = vmul.f32 %v923_v58, %v498_v36  ;;  %v499_v0 = vadd.f32 1e-05, %v495_v50  ;;  %569 = vperm.xlu0 %909, %v549_v56   ;;  %v553_v61 = vmul.f32 %v549_v56, %v1222_v35  ;;  %vm527_vm7 = vweird.f32 %v923_v58  ;;  %v542_v35 = vld [vmem:[%s1375_s2 + $0x10] sm:$0xff] }
 0x179   :  { %vm528_vm9 = vmor %vm526_vm8, %vm527_vm7 }
 0x17a   :  { %v522_v46 = vmul.f32 %v923_v58, %v521_v63  ;;  %924 = vrsqrt.f32 %v499_v0  ;;  %911 = vset.pattern.permute.xlu1 %v927_v5  ;;  %v557_v7 = vsub.f32 %v545_v59, %v553_v61  ;;  %vm536_vm11 = vweird.f32 %v499_v0 }
 0x17c   :  { %v523_v9 = vmul.f32 0.5, %v522_v46  ;;  %589 = vperm.xlu1 %911, %v557_v7  }
 0x17e   :  { %910 = vset.pattern.permute.xlu2 %v926_v3  ;;  %v524_v10 = vsub.f32 1.5, %v523_v9 }
 0x17f   :  { %610 = vperm.xlu2 %910, %v549_v56  }
 0x180   :  { %v925_v13 = vpop.eup %924  ;;  %916 = vset.pattern.permute.xlu0 %v926_v3  ;;  %v525_v14 = vmul.f32 %v923_v58, %v524_v10 }
 0x181   :  { %v531_v54 = vmul.f32 %v925_v13, %v499_v0  ;;  %630 = vperm.xlu0 %916, %v557_v7   ;;  %vm537_vm10 = vweird.f32 %v925_v13 }
 0x182   :  { %v529_v15 = vsel %vm528_vm9, %v923_v58, %v525_v14  ;;  %vm538_vm12 = vmor %vm536_vm11, %vm537_vm10 }
 0x183   :  { %v532_v16 = vmul.f32 %v925_v13, %v531_v54  ;;  %v550_v17 = vmul.f32 %v542_v35, %v529_v15 }
 0x185   :  { %v533_v18 = vmul.f32 0.5, %v532_v16  ;;  %574 = vperm.xlu1 %911, %v550_v17   ;;  %v554_v47 = vmul.f32 %v550_v17, %v1226_v1 }
 0x187   :  { %913 = vset.pattern.permute.xlu2 %v927_v5  ;;  %v558_v22 = vsub.f32 %v546_v53, %v554_v47  ;;  %v534_v23 = vsub.f32 1.5, %v533_v18 }
 0x189   :  { %594 = vperm.xlu2 %913, %v558_v22   ;;  %v535_v25 = vmul.f32 %v925_v13, %v534_v23 }
 0x18b   :  { %v539_v57 = vsel %vm538_vm12, %v925_v13, %v535_v25 }
 0x18c   :  { %v551_v29 = vmul.f32 %v543_v28, %v539_v57 }
 0x18d   :  { %912 = vset.pattern.permute.xlu1 %v926_v3 }
 0x18e   :  { %614 = vperm.xlu1 %912, %v550_v17   ;;  %v555_v1 = vmul.f32 %v551_v29, %v1238_v33 }
 0x190   :  { %v559_v31 = vsub.f32 %v547_v30, %v555_v1 }
 0x191   :  { %579 = vperm.xlu2 %913, %v551_v29  }
 0x196   :  { %915 = vset.pattern.permute.xlu1 %v927_v5 }
 0x197   :  { %599 = vperm.xlu1 %915, %v559_v31  }
 0x199   :  { %914 = vset.pattern.permute.xlu2 %v926_v3 }
 0x19a   :  { %618 = vperm.xlu2 %914, %v551_v29  }
 0x19f   :  { %917 = vset.pattern.permute.xlu1 %v926_v3 }
 0x1a0   :  { %638 = vperm.xlu1 %917, %v559_v31  }
 0x1a2   :  { %634 = vperm.xlu2 %914, %v558_v22  }
 0x1c8   :  { %v565_v32 = vpop.permute.xlu2 %564 }
 0x1d0   :  { %v585_v62 = vpop.permute.xlu2 %584 }
 0x1d9   :  { %v611_v33 = vpop.permute.xlu2 %610 }
 0x1e0   :  { %v607_v36 = vpop.permute.xlu0 %606 }
 0x1e1   :  { %v621_v5 = vsel %vm602_vm13, %v607_v36, %v565_v32 }
 0x1e2   :  { %v645_v39 = vmul.f32 %v621_v5, %v1097_v2  ;;  %v661_v40 = vmul.f32 %v621_v5, %v1143_v44  ;;  %v678_v3 = vmul.f32 %v621_v5, %v1104_v8  ;;  %v695_v41 = vmul.f32 %v621_v5, %v1154_v52 }
 0x1e3   :  { %v595_v38 = vpop.permute.xlu2 %594 }
 0x1e4   :  { %v627_v42 = vpop.permute.xlu1 %626 }
 0x1e5   :  { %v641_v43 = vsel %vm602_vm13, %v627_v42, %v585_v62 }
 0x1e6   :  { %v649_v45 = vadd.f32 %v645_v39, %v641_v43  ;;  %v665_v55 = vadd.f32 %v661_v40, %v641_v43  ;;  %v682_v6 = vadd.f32 %v678_v3, %v641_v43  ;;  %v699_v49 = vadd.f32 %v695_v41, %v641_v43 }
 0x1e8   :  { %v653_v50 = vmax.f32 %v649_v45, 0.0  ;;  %v669_v56 = vmax.f32 %v665_v55, 0.0  ;;  %v686_v58 = vmax.f32 %v682_v6, 0.0  ;;  %v703_v59 = vmax.f32 %v699_v49, 0.0 }
 0x1ea   :  { %657 = vst.msk [vmem:[%s1377_s4] sm:$0xff] %vm339_vm0, %v653_v50  ;;  %v570_v2 = vpop.permute.xlu0 %569 }
 0x1eb   :  { %844 = vst.msk [vmem:[%s1377_s4 + $0x20] sm:$0xff] %vm339_vm0, %v669_v56  ;;  %v580_v8 = vpop.permute.xlu2 %579  ;;  %v622_v52 = vsel %vm602_vm13, %v611_v33, %v570_v2 }
 0x1ec   :  { %848 = vst.msk [vmem:[%s1377_s4 + $0x40] sm:$0xff] %vm339_vm0, %v686_v58  ;;  %v646_v63 = vmul.f32 %v622_v52, %v1106_v11  ;;  %v662_v0 = vmul.f32 %v622_v52, %v1162_v60  ;;  %v679_v61 = vmul.f32 %v622_v52, %v1122_v24  ;;  %v696_v46 = vmul.f32 %v622_v52, %v1170_v4 }
 0x1ed   :  { %852 = vst.msk [vmem:[%s1377_s4 + $0x60] sm:$0xff] %vm339_vm0, %v703_v59 }
 0x1ee   :  { %v590_v44 = vpop.permute.xlu1 %589 }
 0x1f3   :  { %v631_v7 = vpop.permute.xlu0 %630 }
 0x1f4   :  { %v642_v9 = vsel %vm602_vm13, %v631_v7, %v590_v44  ;;  %v619_v54 = vpop.permute.xlu2 %618 }
 0x1f5   :  { %v650_v10 = vadd.f32 %v646_v63, %v642_v9  ;;  %v666_v13 = vadd.f32 %v662_v0, %v642_v9  ;;  %v683_v14 = vadd.f32 %v679_v61, %v642_v9  ;;  %v700_v35 = vadd.f32 %v696_v46, %v642_v9 }
 0x1f7   :  { %v654_v15 = vmax.f32 %v650_v10, 0.0  ;;  %v670_v16 = vmax.f32 %v666_v13, 0.0  ;;  %v687_v17 = vmax.f32 %v683_v14, 0.0  ;;  %v575_v53 = vpop.permute.xlu1 %574  ;;  %v704_v11 = vmax.f32 %v700_v35, 0.0 }
 0x1f9   :  { %658 = vst.msk [vmem:[%s1377_s4 + $0x8] sm:$0xff] %vm339_vm0, %v654_v15 }
 0x1fa   :  { %845 = vst.msk [vmem:[%s1377_s4 + $0x28] sm:$0xff] %vm339_vm0, %v670_v16 }
 0x1fb   :  { %849 = vst.msk [vmem:[%s1377_s4 + $0x48] sm:$0xff] %vm339_vm0, %v687_v17 }
 0x1fc   :  { %853 = vst.msk [vmem:[%s1377_s4 + $0x68] sm:$0xff] %vm339_vm0, %v704_v11  ;;  %v635_v24 = vpop.permute.xlu2 %634 }
 0x1fd   :  { %v643_v25 = vsel %vm602_vm13, %v635_v24, %v595_v38 }
 0x200   :  { %v615_v60 = vpop.permute.xlu1 %614 }
 0x201   :  { %v623_v4 = vsel %vm602_vm13, %v615_v60, %v575_v53 }
 0x202   :  { %v647_v18 = vmul.f32 %v623_v4, %v1116_v20  ;;  %v663_v47 = vmul.f32 %v623_v4, %v1176_v12  ;;  %v680_v22 = vmul.f32 %v623_v4, %v1124_v27  ;;  %v697_v23 = vmul.f32 %v623_v4, %v1185_v19 }
 0x203   :  { %v624_v27 = vsel %vm602_vm13, %v619_v54, %v580_v8 }
 0x204   :  { %v651_v28 = vadd.f32 %v647_v18, %v643_v25  ;;  %v667_v57 = vadd.f32 %v663_v47, %v643_v25  ;;  %v684_v29 = vadd.f32 %v680_v22, %v643_v25  ;;  %v701_v1 = vadd.f32 %v697_v23, %v643_v25 }
 0x205   :  { %v648_v12 = vmul.f32 %v624_v27, %v1147_v48  ;;  %v664_v19 = vmul.f32 %v624_v27, %v1191_v26  ;;  %v681_v51 = vmul.f32 %v624_v27, %v1134_v37  ;;  %v698_v33 = vmul.f32 %v624_v27, %v1187_v21 }
 0x206   :  { %v655_v30 = vmax.f32 %v651_v28, 0.0  ;;  %v671_v31 = vmax.f32 %v667_v57, 0.0  ;;  %v688_v32 = vmax.f32 %v684_v29, 0.0  ;;  %v705_v62 = vmax.f32 %v701_v1, 0.0 }
 0x208   :  { %659 = vst.msk [vmem:[%s1377_s4 + $0x10] sm:$0xff] %vm339_vm0, %v655_v30 }
 0x209   :  { %846 = vst.msk [vmem:[%s1377_s4 + $0x30] sm:$0xff] %vm339_vm0, %v671_v31  ;;  %v600_v20 = vpop.permute.xlu1 %599 }
 0x20a   :  { %850 = vst.msk [vmem:[%s1377_s4 + $0x50] sm:$0xff] %vm339_vm0, %v688_v32 }
 0x20b   :  { %854 = vst.msk [vmem:[%s1377_s4 + $0x70] sm:$0xff] %vm339_vm0, %v705_v62 }
 0x212   :  { %v639_v36 = vpop.permute.xlu1 %638 }
 0x213   :  { %v644_v5 = vsel %vm602_vm13, %v639_v36, %v600_v20 }
 0x214   :  { %v652_v38 = vadd.f32 %v648_v12, %v644_v5  ;;  %v668_v39 = vadd.f32 %v664_v19, %v644_v5  ;;  %v685_v40 = vadd.f32 %v681_v51, %v644_v5  ;;  %v702_v3 = vadd.f32 %v698_v33, %v644_v5 }
 0x216   :  { %v656_v41 = vmax.f32 %v652_v38, 0.0  ;;  %v672_v42 = vmax.f32 %v668_v39, 0.0  ;;  %v689_v43 = vmax.f32 %v685_v40, 0.0  ;;  %v706_v45 = vmax.f32 %v702_v3, 0.0 }
 0x218   :  { %660 = vst.msk [vmem:[%s1377_s4 + $0x18] sm:$0xff] %vm339_vm0, %v656_v41 }
 0x219   :  { %847 = vst.msk [vmem:[%s1377_s4 + $0x38] sm:$0xff] %vm339_vm0, %v672_v42 }
 0x21a   :  { %851 = vst.msk [vmem:[%s1377_s4 + $0x58] sm:$0xff] %vm339_vm0, %v689_v43 }
 0x21b   :  { %855 = vst.msk [vmem:[%s1377_s4 + $0x78] sm:$0xff] %vm339_vm0, %v706_v45 }

// kernel: generator_forward.17
= control target key start
LH: loop header
LB: loop body
LE: loop exit
PB: predicated region body
PF: predicated region fallthrough
CT: control target
= control target key end

     0   :  { %v415_v45 = vmov 1   ;;  %v416_v46 = vmov 0   ;;  %s573_s0 = inlined_call_operand.vmem [shape: bf16[128,128], index: 0, kind: input, shape index: {}]   ;;  %s574_s1 = inlined_call_operand.vmem [shape: bf16[64,128], index: 1, kind: input, shape index: {}]   ;;  %s575_s2 = inlined_call_operand.vmem [shape: f32[16,2], index: 2, kind: input, shape index: {}]   ;;  %s576_s3 = inlined_call_operand.vmem [shape: f32[16,2], index: 3, kind: input, shape index: {}]   ;;  %s577_s4 = inlined_call_operand.vmem [shape: f32[4,16,128], index: 4, kind: output, shape index: {}]  }
   0x1   :  { %v377_v0 = vld [vmem:[%s573_s0 + $0x38] sm:$0xff]  ;;  %v376_v1 = vld [vmem:[%s573_s0 + $0x30] sm:$0xff]  ;;  %v375_v2 = vld [vmem:[%s573_s0 + $0x28] sm:$0xff]  ;;  %405 = vset.pattern.permute.xlu0 %v415_v45  ;;  %404 = vset.pattern.permute.xlu1 %v416_v46 }
   0x2   :  { %113 = vmatpush.bf16.msra.mxu0 %v377_v0  ;;  %378 = vmatpush.bf16.msra.mxu1 %v377_v0  ;;  %v374_v3 = vld [vmem:[%s573_s0 + $0x20] sm:$0xff]  ;;  %v373_v4 = vld [vmem:[%s573_s0 + $0x18] sm:$0xff]  ;;  %v372_v5 = vld [vmem:[%s573_s0 + $0x10] sm:$0xff] }
   0x3   :  { %379 = vmatpush.bf16.msra.mxu2 %v377_v0  ;;  %380 = vmatpush.bf16.msra.mxu3 %v377_v0  ;;  %v371_v6 = vld [vmem:[%s573_s0 + $0x8] sm:$0xff]  ;;  %v370_v7 = vld [vmem:[%s573_s0] sm:$0xff]  ;;  %v368_v10 = vld [vmem:[%s574_s1 + $0x10] sm:$0xff] }
   0x4   :  { %v366_v8 = vld [vmem:[%s574_s1] sm:$0xff]  ;;  %v367_v9 = vld [vmem:[%s574_s1 + $0x8] sm:$0xff]  ;;  %v369_v11 = vld [vmem:[%s574_s1 + $0x18] sm:$0xff]  ;;  %406 = vset.pattern.permute.xlu2 %v416_v46 }
   0x6   :  { %114 = vmatpush.bf16.msra.mxu0 %v376_v1  ;;  %381 = vmatpush.bf16.msra.mxu1 %v376_v1 }
   0x7   :  { %382 = vmatpush.bf16.msra.mxu2 %v376_v1  ;;  %383 = vmatpush.bf16.msra.mxu3 %v376_v1 }
   0xa   :  { %115 = vmatpush.bf16.msra.mxu0 %v375_v2  ;;  %384 = vmatpush.bf16.msra.mxu1 %v375_v2 }
   0xb   :  { %385 = vmatpush.bf16.msra.mxu2 %v375_v2  ;;  %386 = vmatpush.bf16.msra.mxu3 %v375_v2 }
   0xe   :  { %116 = vmatpush.bf16.msra.mxu0 %v374_v3  ;;  %387 = vmatpush.bf16.msra.mxu1 %v374_v3 }
   0xf   :  { %388 = vmatpush.bf16.msra.mxu2 %v374_v3  ;;  %389 = vmatpush.bf16.msra.mxu3 %v374_v3 }
  0x12   :  { %117 = vmatpush.bf16.msra.mxu0 %v373_v4  ;;  %390 = vmatpush.bf16.msra.mxu1 %v373_v4 }
  0x13   :  { %391 = vmatpush.bf16.msra.mxu2 %v373_v4  ;;  %392 = vmatpush.bf16.msra.mxu3 %v373_v4 }
  0x16   :  { %118 = vmatpush.bf16.msra.mxu0 %v372_v5  ;;  %393 = vmatpush.bf16.msra.mxu1 %v372_v5 }
  0x17   :  { %394 = vmatpush.bf16.msra.mxu2 %v372_v5  ;;  %395 = vmatpush.bf16.msra.mxu3 %v372_v5 }
  0x1a   :  { %119 = vmatpush.bf16.msra.mxu0 %v371_v6  ;;  %396 = vmatpush.bf16.msra.mxu1 %v371_v6 }
  0x1b   :  { %397 = vmatpush.bf16.msra.mxu2 %v371_v6  ;;  %398 = vmatpush.bf16.msra.mxu3 %v371_v6 }
  0x1e   :  { %120 = vmatpush.bf16.msra.mxu0 %v370_v7  ;;  %399 = vmatpush.bf16.msra.mxu1 %v370_v7 }
  0x1f   :  { %400 = vmatpush.bf16.msra.mxu2 %v370_v7  ;;  %401 = vmatpush.bf16.msra.mxu3 %v370_v7 }
  0x21   :  { %121 = vmatmul.bf16.vlgmr.msra.gmra.mxu0 %v366_v8  ;;  %126 = vmatmul.bf16.vlgmr.msra.gmra.mxu1 %v367_v9 }
  0x22   :  { %131 = vmatmul.bf16.vlgmr.msra.gmra.mxu2 %v368_v10  ;;  %136 = vmatmul.bf16.vlgmr.msra.gmra.mxu3 %v369_v11 }
  0x9e   :  { %v478_v12 = vpop.f32.mrf.mxu0  ;;  %v480_v13 = vpop.f32.mrf.mxu1 }
  0x9f   :  { %146 = vadd.xlane.f32.xlu1 %v480_v13  ;;  %142 = vadd.xlane.f32.xlu0 %v478_v12  ;;  %v160_v14 = vmul.f32 %v480_v13, %v480_v13  ;;  %v158_v15 = vmul.f32 %v478_v12, %v478_v12 }
  0xa1   :  { %170 = vadd.xlane.f32.xlu2 %v160_v14 }
  0xa5   :  { %v488_v16 = vpop.f32.mrf.mxu3  ;;  %v490_v17 = vpop.f32.mrf.mxu2 }
  0xa6   :  { %v494_v18 = vpop.f32.mrf.mxu0  ;;  %v496_v19 = vpop.f32.mrf.mxu1  ;;  %v162_v21 = vmul.f32 %v490_v17, %v490_v17  ;;  %v164_v26 = vmul.f32 %v488_v16, %v488_v16 }
  0xa7   :  { %154 = vadd.xlane.f32.xlu1 %v488_v16  ;;  %166 = vadd.xlane.f32.xlu0 %v158_v15  ;;  %v159_v22 = vmul.f32 %v494_v18, %v494_v18  ;;  %v161_v24 = vmul.f32 %v496_v19, %v496_v19 }
  0xa9   :  { %150 = vadd.xlane.f32.xlu2 %v490_v17 }
  0xad   :  { %v500_v20 = vpop.f32.mrf.mxu2  ;;  %v507_v23 = vpop.f32.mrf.mxu3 }
  0xae   :  { %v163_v25 = vmul.f32 %v500_v20, %v500_v20  ;;  %v165_v27 = vmul.f32 %v507_v23, %v507_v23 }
  0xaf   :  { %148 = vadd.xlane.f32.xlu1 %v496_v19  ;;  %144 = vadd.xlane.f32.xlu0 %v494_v18 }
  0xb1   :  { %152 = vadd.xlane.f32.xlu2 %v500_v20 }
  0xb7   :  { %174 = vadd.xlane.f32.xlu0 %v162_v21  ;;  %168 = vadd.xlane.f32.xlu1 %v159_v22  ;;  %v226_v22 = vld [vmem:[%s575_s2] sm:$0xff] }
  0xb9   :  { %156 = vadd.xlane.f32.xlu2 %v507_v23 }
  0xbf   :  { %172 = vadd.xlane.f32.xlu0 %v161_v24  ;;  %176 = vadd.xlane.f32.xlu1 %v163_v25 }
  0xc1   :  { %178 = vadd.xlane.f32.xlu2 %v164_v26 }
  0xc7   :  { %180 = vadd.xlane.f32.xlu0 %v165_v27 }
 0x112   :  { %v147_v28 = vpop.xlane.xlu1 %146  ;;  %v143_v29 = vpop.xlane.xlu0 %142 }
 0x113   :  { %v182_v37 = vadd.f32 %v147_v28, %v143_v29  ;;  %v227_v29 = vld [vmem:[%s575_s2 + $0x8] sm:$0xff] }
 0x114   :  { %v171_v30 = vpop.xlane.xlu2 %170 }
 0x11a   :  { %v155_v31 = vpop.xlane.xlu1 %154  ;;  %v167_v32 = vpop.xlane.xlu0 %166 }
 0x11b   :  { %v184_v44 = vadd.f32 %v171_v30, %v167_v32  ;;  %v228_v32 = vld [vmem:[%s576_s3] sm:$0xff] }
 0x11c   :  { %v151_v33 = vpop.xlane.xlu2 %150 }
 0x11d   :  { %v186_v39 = vadd.f32 %v182_v37, %v151_v33 }
 0x11f   :  { %v190_v42 = vadd.f32 %v186_v39, %v155_v31 }
 0x121   :  { %v194_v48 = vmul.f32 0.001953125, %v190_v42 }
 0x122   :  { %v145_v34 = vpop.xlane.xlu0 %144  ;;  %v149_v35 = vpop.xlane.xlu1 %148 }
 0x123   :  { %v183_v43 = vadd.f32 %v149_v35, %v145_v34  ;;  %v198_v56 = vmul.f32 %v194_v48, %v194_v48 }
 0x124   :  { %v153_v36 = vpop.xlane.xlu2 %152 }
 0x125   :  { %v187_v49 = vadd.f32 %v183_v43, %v153_v36  ;;  %v229_v36 = vld [vmem:[%s576_s3 + $0x8] sm:$0xff] }
 0x12a   :  { %v175_v38 = vpop.xlane.xlu0 %174  ;;  %v169_v41 = vpop.xlane.xlu1 %168 }
 0x12b   :  { %v188_v50 = vadd.f32 %v184_v44, %v175_v38 }
 0x12c   :  { %v157_v40 = vpop.xlane.xlu2 %156 }
 0x12d   :  { %v191_v52 = vadd.f32 %v187_v49, %v157_v40  ;;  %v236_v40 = vlaneseq }
 0x12f   :  { %v195_v58 = vmul.f32 0.001953125, %v191_v52 }
 0x131   :  { %v199_v0 = vmul.f32 %v195_v58, %v195_v58 }
 0x132   :  { %v173_v47 = vpop.xlane.xlu0 %172  ;;  %v177_v57 = vpop.xlane.xlu1 %176 }
 0x133   :  { %v185_v53 = vadd.f32 %v173_v47, %v169_v41  ;;  %v237_v41 = vand.u32 127, %v236_v40 }
 0x134   :  { %v179_v51 = vpop.xlane.xlu2 %178 }
 0x135   :  { %v192_v54 = vadd.f32 %v188_v50, %v179_v51  ;;  %v189_v59 = vadd.f32 %v185_v53, %v177_v57  ;;  %vm258_vm6 = vcmp.ge.s32.totalorder %v237_v41, 64 }
 0x137   :  { %v196_v55 = vmul.f32 0.001953125, %v192_v54 }
 0x139   :  { %v200_v60 = vsub.f32 %v196_v55, %v198_v56 }
 0x13a   :  { %v181_v61 = vpop.xlane.xlu0 %180 }
 0x13b   :  { %v202_v62 = vmax.f32 %v200_v60, 0.0  ;;  %v193_v63 = vadd.f32 %v189_v59, %v181_v61 }
 0x13d   :  { %v204_v1 = vadd.f32 1e-05, %v202_v62  ;;  %v197_v2 = vmul.f32 0.001953125, %v193_v63 }
 0x13f   :  { %411 = vrsqrt.f32 %v204_v1  ;;  %v201_v3 = vsub.f32 %v197_v2, %v199_v0  ;;  %vm212_vm1 = vweird.f32 %v204_v1 }
 0x141   :  { %v203_v4 = vmax.f32 %v201_v3, 0.0 }
 0x143   :  { %v205_v5 = vadd.f32 1e-05, %v203_v4 }
 0x145   :  { %v412_v6 = vpop.eup %411  ;;  %413 = vrsqrt.f32 %v205_v5  ;;  %vm222_vm4 = vweird.f32 %v205_v5 }
 0x146   :  { %v207_v7 = vmul.f32 %v412_v6, %v204_v1  ;;  %vm213_vm0 = vweird.f32 %v412_v6 }
 0x147   :  { %vm214_vm2 = vmor %vm212_vm1, %vm213_vm0 }
 0x148   :  { %v208_v8 = vmul.f32 %v412_v6, %v207_v7 }
 0x14a   :  { %v209_v9 = vmul.f32 0.5, %v208_v8 }
 0x14b   :  { %v414_v10 = vpop.eup %413 }
 0x14c   :  { %v217_v11 = vmul.f32 %v414_v10, %v205_v5  ;;  %v210_v14 = vsub.f32 1.5, %v209_v9  ;;  %vm223_vm3 = vweird.f32 %v414_v10 }
 0x14d   :  { %vm224_vm5 = vmor %vm222_vm4, %vm223_vm3 }
 0x14e   :  { %v218_v15 = vmul.f32 %v414_v10, %v217_v11  ;;  %v211_v21 = vmul.f32 %v412_v6, %v210_v14 }
 0x150   :  { %v219_v24 = vmul.f32 0.5, %v218_v15  ;;  %v215_v25 = vsel %vm214_vm2, %v412_v6, %v211_v21 }
 0x151   :  { %v230_v26 = vmul.f32 %v226_v22, %v215_v25 }
 0x152   :  { %v220_v27 = vsub.f32 1.5, %v219_v24 }
 0x153   :  { %262 = vperm.xlu0 %405, %v230_v26   ;;  %240 = vperm.xlu1 %404, %v230_v26   ;;  %v232_v30 = vmul.f32 %v230_v26, %v194_v48 }
 0x154   :  { %v221_v28 = vmul.f32 %v414_v10, %v220_v27 }
 0x155   :  { %v234_v34 = vsub.f32 %v228_v32, %v232_v30 }
 0x156   :  { %v225_v31 = vsel %vm224_vm5, %v414_v10, %v221_v28 }
 0x157   :  { %v231_v33 = vmul.f32 %v227_v29, %v225_v31 }
 0x159   :  { %245 = vperm.xlu2 %406, %v231_v33   ;;  %v233_v35 = vmul.f32 %v231_v33, %v195_v58 }
 0x15b   :  { %250 = vperm.xlu1 %404, %v234_v34   ;;  %v235_v37 = vsub.f32 %v229_v36, %v233_v35 }
 0x161   :  { %407 = vset.pattern.permute.xlu2 %v415_v45 }
 0x162   :  { %266 = vperm.xlu2 %407, %v231_v33  }
 0x163   :  { %409 = vset.pattern.permute.xlu1 %v415_v45 }
 0x164   :  { %272 = vperm.xlu1 %409, %v234_v34  }
 0x16a   :  { %408 = vset.pattern.permute.xlu2 %v416_v46 }
 0x16b   :  { %255 = vperm.xlu2 %408, %v235_v37  }
 0x173   :  { %410 = vset.pattern.permute.xlu2 %v415_v45 }
 0x174   :  { %276 = vperm.xlu2 %410, %v235_v37  }
 0x1b3   :  { %v246_v38 = vpop.permute.xlu2 %245 }
 0x1bc   :  { %v267_v39 = vpop.permute.xlu2 %266 }
 0x1bd   :  { %v270_v44 = vsel %vm258_vm6, %v267_v39, %v246_v38 }
 0x1be   :  { %v282_v47 = vmul.f32 %v270_v44, %v494_v18  ;;  %v288_v48 = vmul.f32 %v270_v44, %v496_v19  ;;  %v295_v49 = vmul.f32 %v270_v44, %v500_v20  ;;  %v302_v45 = vmul.f32 %v270_v44, %v507_v23 }
 0x1c5   :  { %v256_v42 = vpop.permute.xlu2 %255  ;;  %v241_v43 = vpop.permute.xlu1 %240 }
 0x1c6   :  { %v263_v52 = vpop.permute.xlu0 %262 }
 0x1c7   :  { %v269_v18 = vsel %vm258_vm6, %v263_v52, %v241_v43 }
 0x1c8   :  { %v281_v19 = vmul.f32 %v269_v18, %v478_v12  ;;  %v287_v20 = vmul.f32 %v269_v18, %v480_v13  ;;  %v294_v23 = vmul.f32 %v269_v18, %v490_v17  ;;  %v301_v58 = vmul.f32 %v269_v18, %v488_v16 }
 0x1cd   :  { %v251_v46 = vpop.permute.xlu1 %250 }
 0x1ce   :  { %v277_v50 = vpop.permute.xlu2 %276 }
 0x1cf   :  { %v280_v51 = vsel %vm258_vm6, %v277_v50, %v256_v42 }
 0x1d0   :  { %v284_v53 = vadd.f32 %v282_v47, %v280_v51  ;;  %v290_v54 = vadd.f32 %v288_v48, %v280_v51  ;;  %v297_v55 = vadd.f32 %v295_v49, %v280_v51  ;;  %v304_v56 = vadd.f32 %v302_v45, %v280_v51 }
 0x1d2   :  { %286 = vst [vmem:[%s577_s4 + $0x8] sm:$0xff] %v284_v53 }
 0x1d3   :  { %361 = vst [vmem:[%s577_s4 + $0x18] sm:$0xff] %v290_v54 }
 0x1d4   :  { %363 = vst [vmem:[%s577_s4 + $0x28] sm:$0xff] %v297_v55 }
 0x1d5   :  { %365 = vst [vmem:[%s577_s4 + $0x38] sm:$0xff] %v304_v56 }
 0x1d6   :  { %v273_v57 = vpop.permute.xlu1 %272 }
 0x1d7   :  { %v279_v59 = vsel %vm258_vm6, %v273_v57, %v251_v46 }
 0x1d8   :  { %v283_v60 = vadd.f32 %v281_v19, %v279_v59  ;;  %v289_v61 = vadd.f32 %v287_v20, %v279_v59  ;;  %v296_v62 = vadd.f32 %v294_v23, %v279_v59  ;;  %v303_v63 = vadd.f32 %v301_v58, %v279_v59 }
 0x1da   :  { %285 = vst [vmem:[%s577_s4] sm:$0xff] %v283_v60 }
 0x1db   :  { %360 = vst [vmem:[%s577_s4 + $0x10] sm:$0xff] %v289_v61 }
 0x1dc   :  { %362 = vst [vmem:[%s577_s4 + $0x20] sm:$0xff] %v296_v62 }
 0x1dd   :  { %364 = vst [vmem:[%s577_s4 + $0x30] sm:$0xff] %v303_v63 }

// kernel: generator_forward.18
= control target key start
LH: loop header
LB: loop body
LE: loop exit
PB: predicated region body
PF: predicated region fallthrough
CT: control target
= control target key end

     0   :  { %vm128_vm0 = vcmask 523264   ;;  %vm213_vm1 = vcmask 64512   ;;  %s812_s0 = inlined_call_operand.vmem [shape: bf16[64,392], index: 0, kind: input, shape index: {}]   ;;  %s813_s1 = inlined_call_operand.vmem [shape: bf16[32,64], index: 1, kind: input, shape index: {}]   ;;  %s814_s2 = inlined_call_operand.vmem [shape: f32[8,2], index: 2, kind: input, shape index: {}]   ;;  %s815_s3 = inlined_call_operand.vmem [shape: f32[8,2], index: 3, kind: input, shape index: {}]   ;;  %s816_s4 = inlined_call_operand.vmem [shape: f32[4,8,392], index: 4, kind: output, shape index: {}]  }
   0x1   :  { %v459_v0 = vld [vmem:[%s812_s0 + $0x60] sm:$0xf]  ;;  %v509_v1 = vld [vmem:[%s812_s0 + $0x6c] sm:$0xf0]  ;;  %v507_v2 = vld [vmem:[%s812_s0 + $0x64] sm:$0xf] }
   0x2   :  { %v460_v3 = vor.u32 %v509_v1, %v459_v0  ;;  %v461_v4 = vld [vmem:[%s812_s0 + $0x70] sm:$0xf0]  ;;  %v467_v5 = vld [vmem:[%s812_s0 + $0x68] sm:$0xf]  ;;  %v510_v6 = vld [vmem:[%s812_s0 + $0x74] sm:$0xf0] }
   0x3   :  { %v464_v7 = vor.u32 %v507_v2, %v461_v4  ;;  %v468_v8 = vor.u32 %v510_v6, %v467_v5  ;;  %v508_v9 = vld [vmem:[%s812_s0 + $0x6c] sm:$0xf]  ;;  %v469_v10 = vld [vmem:[%s812_s0 + $0x78] sm:$0xf0]  ;;  %v443_v11 = vld [vmem:[%s812_s0 + $0x40] sm:$0xf] }
   0x4   :  { %139 = vmatpush.bf16.msra.mxu0 %v460_v3  ;;  %v472_v12 = vor.u32 %v508_v9, %v469_v10  ;;  %v505_v13 = vld [vmem:[%s812_s0 + $0x4c] sm:$0xf0]  ;;  %v503_v14 = vld [vmem:[%s812_s0 + $0x44] sm:$0xf]  ;;  %v445_v15 = vld [vmem:[%s812_s0 + $0x50] sm:$0xf0] }
   0x5   :  { %158 = vmatpush.bf16.msra.mxu1 %v464_v7  ;;  %177 = vmatpush.bf16.msra.mxu2 %v468_v8  ;;  %v444_v16 = vor.u32 %v505_v13, %v443_v11  ;;  %v448_v17 = vor.u32 %v503_v14, %v445_v15  ;;  %v451_v18 = vld [vmem:[%s812_s0 + $0x48] sm:$0xf]  ;;  %v506_v19 = vld [vmem:[%s812_s0 + $0x54] sm:$0xf0]  ;;  %v504_v20 = vld [vmem:[%s812_s0 + $0x4c] sm:$0xf] }
   0x6   :  { %196 = vmatpush.bf16.msra.mxu3 %v472_v12  ;;  %v452_v21 = vor.u32 %v506_v19, %v451_v18  ;;  %v453_v22 = vld [vmem:[%s812_s0 + $0x58] sm:$0xf0]  ;;  %v427_v23 = vld [vmem:[%s812_s0 + $0x20] sm:$0xf]  ;;  %v501_v24 = vld [vmem:[%s812_s0 + $0x2c] sm:$0xf0] }
   0x7   :  { %v456_v25 = vor.u32 %v504_v20, %v453_v22  ;;  %v499_v26 = vld [vmem:[%s812_s0 + $0x24] sm:$0xf]  ;;  %v429_v27 = vld [vmem:[%s812_s0 + $0x30] sm:$0xf0]  ;;  %v435_v28 = vld [vmem:[%s812_s0 + $0x28] sm:$0xf]  ;;  %v428_v29 = vor.u32 %v501_v24, %v427_v23 }
   0x8   :  { %140 = vmatpush.bf16.msra.mxu0 %v444_v16  ;;  %v502_v30 = vld [vmem:[%s812_s0 + $0x34] sm:$0xf0]  ;;  %v500_v31 = vld [vmem:[%s812_s0 + $0x2c] sm:$0xf]  ;;  %v437_v32 = vld [vmem:[%s812_s0 + $0x38] sm:$0xf0]  ;;  %v432_v33 = vor.u32 %v499_v26, %v429_v27 }
   0x9   :  { %159 = vmatpush.bf16.msra.mxu1 %v448_v17  ;;  %178 = vmatpush.bf16.msra.mxu2 %v452_v21  ;;  %v436_v34 = vor.u32 %v502_v30, %v435_v28  ;;  %v411_v35 = vld [vmem:[%s812_s0] sm:$0xf]  ;;  %v497_v36 = vld [vmem:[%s812_s0 + $0xc] sm:$0xf0]  ;;  %v495_v37 = vld [vmem:[%s812_s0 + $0x4] sm:$0xf]  ;;  %v440_v38 = vor.u32 %v500_v31, %v437_v32 }
   0xa   :  { %197 = vmatpush.bf16.msra.mxu3 %v456_v25  ;;  %v413_v39 = vld [vmem:[%s812_s0 + $0x10] sm:$0xf0]  ;;  %v419_v40 = vld [vmem:[%s812_s0 + $0x8] sm:$0xf]  ;;  %v498_v41 = vld [vmem:[%s812_s0 + $0x14] sm:$0xf0]  ;;  %v412_v44 = vor.u32 %v497_v36, %v411_v35 }
   0xb   :  { %v496_v42 = vld [vmem:[%s812_s0 + $0xc] sm:$0xf]  ;;  %v421_v43 = vld [vmem:[%s812_s0 + $0x18] sm:$0xf0]  ;;  %v416_v45 = vor.u32 %v495_v37, %v413_v39  ;;  %v420_v46 = vor.u32 %v498_v41, %v419_v40  ;;  %v493_v48 = vld [vmem:[%s813_s1] sm:$0xff] }
   0xc   :  { %141 = vmatpush.bf16.msra.mxu0 %v428_v29  ;;  %v424_v47 = vor.u32 %v496_v42, %v421_v43  ;;  %v494_v49 = vld [vmem:[%s813_s1 + $0x8] sm:$0xff] }
   0xd   :  { %160 = vmatpush.bf16.msra.mxu1 %v432_v33  ;;  %179 = vmatpush.bf16.msra.mxu2 %v436_v34 }
   0xe   :  { %198 = vmatpush.bf16.msra.mxu3 %v440_v38 }
  0x10   :  { %142 = vmatpush.bf16.msra.mxu0 %v412_v44 }
  0x11   :  { %161 = vmatpush.bf16.msra.mxu1 %v416_v45  ;;  %180 = vmatpush.bf16.msra.mxu2 %v420_v46 }
  0x12   :  { %199 = vmatpush.bf16.msra.mxu3 %v424_v47 }
  0x13   :  { %473 = vmatmul.msk.bf16.vlgmr.msra.gmra.mxu0 %vm128_vm0, %v493_v48 }
  0x14   :  { %475 = vmatmul.msk.bf16.vlgmr.msra.gmra.mxu1 %vm128_vm0, %v493_v48  ;;  %477 = vmatmul.msk.bf16.vlgmr.msra.gmra.mxu2 %vm128_vm0, %v493_v48 }
  0x15   :  { %479 = vmatmul.msk.bf16.vlgmr.msra.gmra.mxu3 %vm128_vm0, %v493_v48 }
  0x23   :  { %474 = vmatmul.msk.bf16.gmra.mxu0 %vm128_vm0, %v494_v49 }
  0x24   :  { %476 = vmatmul.msk.bf16.gmra.mxu1 %vm128_vm0, %v494_v49  ;;  %478 = vmatmul.msk.bf16.gmra.mxu2 %vm128_vm0, %v494_v49 }
  0x25   :  { %480 = vmatmul.msk.bf16.gmra.mxu3 %vm128_vm0, %v494_v49 }
  0x90   :  { %v648_v50 = vpop.f32.mrf.mxu0 }
  0x91   :  { %v650_v51 = vpop.f32.mrf.mxu1  ;;  %v236_v52 = vmul.f32 %v648_v50, %v648_v50 }
  0x92   :  { %v237_v53 = vmul.f32 %v650_v51, %v650_v51  ;;  %v211_v54 = vadd.f32 %v650_v51, %v648_v50 }
  0x94   :  { %v252_v55 = vadd.f32 %v237_v53, %v236_v52 }
  0x97   :  { %v658_v56 = vpop.f32.mrf.mxu2 }
  0x98   :  { %v238_v57 = vmul.f32 %v658_v56, %v658_v56  ;;  %v662_v58 = vpop.f32.mrf.mxu3  ;;  %v664_v59 = vpop.f32.mrf.mxu0  ;;  %v212_v60 = vadd.f32 %v211_v54, %v658_v56 }
  0x99   :  { %v667_v61 = vpop.f32.mrf.mxu1  ;;  %v214_v62 = vsel %vm213_vm1, %v662_v58, 0.0  ;;  %v239_v63 = vmul.f32 %v662_v58, %v662_v58  ;;  %v240_v3 = vmul.f32 %v664_v59, %v664_v59 }
  0x9a   :  { %v215_v0 = vadd.f32 %v214_v62, %v212_v60  ;;  %v253_v1 = vadd.f32 %v252_v55, %v238_v57  ;;  %v241_v4 = vmul.f32 %v667_v61, %v667_v61  ;;  %v218_v6 = vadd.f32 %v667_v61, %v664_v59 }
  0x9b   :  { %v254_v2 = vsel %vm213_vm1, %v239_v63, 0.0  ;;  %v519_v57 = vmov 1   ;;  %v520_v60 = vmov 0  }
  0x9c   :  { %216 = vadd.xlane.f32.xlu0 %v215_v0  ;;  %v255_v5 = vadd.f32 %v254_v2, %v253_v1  ;;  %v258_v12 = vadd.f32 %v241_v4, %v240_v3  ;;  %513 = vset.pattern.permute.xlu2 %v520_v60 }
  0x9d   :  { %514 = vset.pattern.permute.xlu0 %v519_v57  ;;  %515 = vset.pattern.permute.xlu1 %v520_v60 }
  0x9e   :  { %256 = vadd.xlane.f32.xlu1 %v255_v5 }
  0x9f   :  { %v680_v7 = vpop.f32.mrf.mxu2 }
  0xa0   :  { %v242_v8 = vmul.f32 %v680_v7, %v680_v7  ;;  %v684_v9 = vpop.f32.mrf.mxu3  ;;  %v686_v10 = vpop.f32.mrf.mxu0  ;;  %v219_v11 = vadd.f32 %v218_v6, %v680_v7 }
  0xa1   :  { %v689_v13 = vpop.f32.mrf.mxu1  ;;  %v220_v14 = vsel %vm213_vm1, %v684_v9, 0.0  ;;  %v243_v15 = vmul.f32 %v684_v9, %v684_v9  ;;  %v244_v16 = vmul.f32 %v686_v10, %v686_v10 }
  0xa2   :  { %v245_v17 = vmul.f32 %v689_v13, %v689_v13  ;;  %v221_v18 = vadd.f32 %v220_v14, %v219_v11  ;;  %v259_v19 = vadd.f32 %v258_v12, %v242_v8  ;;  %v224_v21 = vadd.f32 %v689_v13, %v686_v10 }
  0xa3   :  { %v260_v20 = vsel %vm213_vm1, %v243_v15, 0.0 }
  0xa4   :  { %222 = vadd.xlane.f32.xlu0 %v221_v18  ;;  %v261_v22 = vadd.f32 %v260_v20, %v259_v19  ;;  %v264_v23 = vadd.f32 %v245_v17, %v244_v16 }
  0xa6   :  { %262 = vadd.xlane.f32.xlu2 %v261_v22 }
  0xa7   :  { %v702_v24 = vpop.f32.mrf.mxu2 }
  0xa8   :  { %v246_v25 = vmul.f32 %v702_v24, %v702_v24  ;;  %v706_v26 = vpop.f32.mrf.mxu3  ;;  %v225_v27 = vadd.f32 %v224_v21, %v702_v24  ;;  %v711_v29 = vpop.f32.mrf.mxu0 }
  0xa9   :  { %v247_v28 = vmul.f32 %v706_v26, %v706_v26  ;;  %v713_v30 = vpop.f32.mrf.mxu1  ;;  %v226_v31 = vsel %vm213_vm1, %v706_v26, 0.0  ;;  %v248_v35 = vmul.f32 %v711_v29, %v711_v29 }
  0xaa   :  { %v227_v32 = vadd.f32 %v226_v31, %v225_v27  ;;  %v265_v33 = vadd.f32 %v264_v23, %v246_v25  ;;  %v249_v36 = vmul.f32 %v713_v30, %v713_v30  ;;  %v230_v38 = vadd.f32 %v713_v30, %v711_v29  ;;  %v298_v25 = vld [vmem:[%s814_s2] sm:$0xff] }
  0xab   :  { %v266_v34 = vsel %vm213_vm1, %v247_v28, 0.0  ;;  %v299_v31 = vld [vmem:[%s815_s3] sm:$0xff] }
  0xac   :  { %228 = vadd.xlane.f32.xlu1 %v227_v32  ;;  %v267_v37 = vadd.f32 %v266_v34, %v265_v33  ;;  %v270_v40 = vadd.f32 %v249_v36, %v248_v35  ;;  %v303_v34 = vlaneseq }
  0xae   :  { %268 = vadd.xlane.f32.xlu0 %v267_v37  ;;  %v304_v36 = vand.u32 127, %v303_v34 }
  0xaf   :  { %v724_v39 = vpop.f32.mrf.mxu2 }
  0xb0   :  { %v231_v41 = vadd.f32 %v230_v38, %v724_v39  ;;  %v250_v42 = vmul.f32 %v724_v39, %v724_v39  ;;  %v729_v43 = vpop.f32.mrf.mxu3  ;;  %v305_v37 = vadd.s32 128, %v304_v36 }
  0xb1   :  { %v232_v44 = vsel %vm213_vm1, %v729_v43, 0.0  ;;  %v251_v45 = vmul.f32 %v729_v43, %v729_v43 }
  0xb2   :  { %v233_v46 = vadd.f32 %v232_v44, %v231_v41  ;;  %v271_v47 = vadd.f32 %v270_v40, %v250_v42  ;;  %vm319_vm5 = vcmp.ge.s32.totalorder %v305_v37, 196 }
  0xb3   :  { %v272_v48 = vsel %vm213_vm1, %v251_v45, 0.0 }
  0xb4   :  { %234 = vadd.xlane.f32.xlu2 %v233_v46  ;;  %v273_v49 = vadd.f32 %v272_v48, %v271_v47 }
  0xb6   :  { %274 = vadd.xlane.f32.xlu1 %v273_v49 }
 0x10f   :  { %v217_v52 = vpop.xlane.xlu0 %216 }
 0x111   :  { %v257_v53 = vpop.xlane.xlu1 %256 }
 0x117   :  { %v223_v54 = vpop.xlane.xlu0 %222 }
 0x118   :  { %v276_v63 = vadd.f32 %v223_v54, %v217_v52 }
 0x119   :  { %v263_v55 = vpop.xlane.xlu2 %262 }
 0x11a   :  { %v277_v1 = vadd.f32 %v263_v55, %v257_v53 }
 0x11f   :  { %v229_v62 = vpop.xlane.xlu1 %228 }
 0x120   :  { %v278_v2 = vadd.f32 %v276_v63, %v229_v62 }
 0x121   :  { %v269_v0 = vpop.xlane.xlu0 %268 }
 0x122   :  { %v279_v4 = vadd.f32 %v277_v1, %v269_v0 }
 0x127   :  { %v235_v3 = vpop.xlane.xlu2 %234 }
 0x128   :  { %v280_v5 = vadd.f32 %v278_v2, %v235_v3 }
 0x129   :  { %v275_v6 = vpop.xlane.xlu1 %274 }
 0x12a   :  { %v282_v8 = vmul.f32 0.0006377551, %v280_v5  ;;  %v281_v11 = vadd.f32 %v279_v4, %v275_v6 }
 0x12c   :  { %v284_v12 = vmul.f32 %v282_v8, %v282_v8  ;;  %v283_v14 = vmul.f32 0.0006377551, %v281_v11 }
 0x12e   :  { %v285_v15 = vsub.f32 %v283_v14, %v284_v12 }
 0x130   :  { %v286_v16 = vmax.f32 %v285_v15, 0.0 }
 0x132   :  { %v287_v17 = vadd.f32 1e-05, %v286_v16 }
 0x134   :  { %517 = vrsqrt.f32 %v287_v17  ;;  %vm294_vm3 = vweird.f32 %v287_v17 }
 0x13a   :  { %v518_v18 = vpop.eup %517 }
 0x13b   :  { %v289_v19 = vmul.f32 %v518_v18, %v287_v17  ;;  %vm295_vm2 = vweird.f32 %v518_v18 }
 0x13c   :  { %vm296_vm4 = vmor %vm294_vm3, %vm295_vm2 }
 0x13d   :  { %v290_v20 = vmul.f32 %v518_v18, %v289_v19 }
 0x13f   :  { %v291_v21 = vmul.f32 0.5, %v290_v20 }
 0x141   :  { %v292_v22 = vsub.f32 1.5, %v291_v21 }
 0x143   :  { %v293_v23 = vmul.f32 %v518_v18, %v292_v22 }
 0x145   :  { %v297_v27 = vsel %vm296_vm4, %v518_v18, %v293_v23 }
 0x146   :  { %v300_v28 = vmul.f32 %v298_v25, %v297_v27 }
 0x148   :  { %331 = vperm.xlu0 %514, %v300_v28   ;;  %310 = vperm.xlu2 %513, %v300_v28   ;;  %v301_v32 = vmul.f32 %v300_v28, %v282_v8 }
 0x14a   :  { %v302_v33 = vsub.f32 %v299_v31, %v301_v32 }
 0x14c   :  { %315 = vperm.xlu1 %515, %v302_v33  }
 0x150   :  { %516 = vset.pattern.permute.xlu2 %v519_v57 }
 0x151   :  { %339 = vperm.xlu2 %516, %v302_v33  }
 0x1a2   :  { %v311_v35 = vpop.permute.xlu2 %310 }
 0x1a3   :  { %v358_v60 = vmul.f32 %v311_v35, %v664_v59  ;;  %v384_v2 = vmul.f32 %v311_v35, %v711_v29 }
 0x1ab   :  { %v340_v45 = vpop.permute.xlu2 %339 }
 0x1ba   :  { %v332_v38 = vpop.permute.xlu0 %331 }
 0x1bb   :  { %v348_v40 = vmul.f32 %v332_v38, %v658_v56  ;;  %v349_v41 = vmul.f32 %v332_v38, %v662_v58  ;;  %v360_v42 = vmul.f32 %v332_v38, %v680_v7  ;;  %v361_v44 = vmul.f32 %v332_v38, %v684_v9 }
 0x1bc   :  { %v373_v46 = vmul.f32 %v332_v38, %v702_v24  ;;  %v374_v47 = vmul.f32 %v332_v38, %v706_v26  ;;  %v386_v53 = vmul.f32 %v332_v38, %v724_v39  ;;  %v387_v56 = vmul.f32 %v332_v38, %v729_v43 }
 0x1bd   :  { %v352_v48 = vadd.f32 %v348_v40, %v340_v45  ;;  %v353_v49 = vadd.f32 %v349_v41, %v340_v45  ;;  %v364_v52 = vadd.f32 %v360_v42, %v340_v45  ;;  %v365_v54 = vadd.f32 %v361_v44, %v340_v45 }
 0x1be   :  { %v316_v55 = vpop.permute.xlu1 %315  ;;  %v377_v58 = vadd.f32 %v373_v46, %v340_v45  ;;  %v335_v7 = vsel %vm319_vm5, %v332_v38, %v311_v35  ;;  %v378_v9 = vadd.f32 %v374_v47, %v340_v45  ;;  %v390_v24 = vadd.f32 %v386_v53, %v340_v45 }
 0x1bf   :  { %356 = vst [vmem:[%s816_s4 + $0x10] sm:$0xff] %v352_v48  ;;  %v346_v26 = vmul.f32 %v311_v35, %v648_v50  ;;  %v343_v39 = vsel %vm319_vm5, %v340_v45, %v316_v55  ;;  %v391_v43 = vadd.f32 %v387_v56, %v340_v45  ;;  %v347_v57 = vmul.f32 %v335_v7, %v650_v51 }
 0x1c0   :  { %357 = vst.msk [vmem:[%s816_s4 + $0x18] sm:$0xff] %vm213_vm1, %v353_v49  ;;  %v359_v50 = vmul.f32 %v335_v7, %v667_v61  ;;  %v371_v51 = vmul.f32 %v311_v35, %v686_v10  ;;  %v362_v0 = vadd.f32 %v358_v60, %v316_v55  ;;  %v372_v59 = vmul.f32 %v335_v7, %v689_v13 }
 0x1c1   :  { %483 = vst [vmem:[%s816_s4 + $0x30] sm:$0xff] %v364_v52  ;;  %v350_v62 = vadd.f32 %v346_v26, %v316_v55  ;;  %v351_v63 = vadd.f32 %v347_v57, %v343_v39  ;;  %v385_v3 = vmul.f32 %v335_v7, %v713_v30  ;;  %v388_v13 = vadd.f32 %v384_v2, %v316_v55 }
 0x1c2   :  { %484 = vst.msk [vmem:[%s816_s4 + $0x38] sm:$0xff] %vm213_vm1, %v365_v54  ;;  %v363_v1 = vadd.f32 %v359_v50, %v343_v39  ;;  %v375_v61 = vadd.f32 %v371_v51, %v316_v55  ;;  %v376_v10 = vadd.f32 %v372_v59, %v343_v39 }
 0x1c3   :  { %487 = vst [vmem:[%s816_s4 + $0x50] sm:$0xff] %v377_v58  ;;  %v389_v29 = vadd.f32 %v385_v3, %v343_v39 }
 0x1c4   :  { %488 = vst.msk [vmem:[%s816_s4 + $0x58] sm:$0xff] %vm213_vm1, %v378_v9 }
 0x1c5   :  { %491 = vst [vmem:[%s816_s4 + $0x70] sm:$0xff] %v390_v24 }
 0x1c6   :  { %492 = vst.msk [vmem:[%s816_s4 + $0x78] sm:$0xff] %vm213_vm1, %v391_v43 }
 0x1c7   :  { %354 = vst [vmem:[%s816_s4] sm:$0xff] %v350_v62 }
 0x1c8   :  { %355 = vst [vmem:[%s816_s4 + $0x8] sm:$0xff] %v351_v63 }
 0x1c9   :  { %481 = vst [vmem:[%s816_s4 + $0x20] sm:$0xff] %v362_v0 }
 0x1ca   :  { %482 = vst [vmem:[%s816_s4 + $0x28] sm:$0xff] %v363_v1 }
 0x1cb   :  { %485 = vst [vmem:[%s816_s4 + $0x40] sm:$0xff] %v375_v61 }
 0x1cc   :  { %486 = vst [vmem:[%s816_s4 + $0x48] sm:$0xff] %v376_v10 }
 0x1cd   :  { %489 = vst [vmem:[%s816_s4 + $0x60] sm:$0xff] %v388_v13 }
 0x1ce   :  { %490 = vst [vmem:[%s816_s4 + $0x68] sm:$0xff] %v389_v29 }

// kernel: generator_forward.19
= control target key start
LH: loop header
LB: loop body
LE: loop exit
PB: predicated region body
PF: predicated region fallthrough
CT: control target
= control target key end

     0   :  { %vm1991_vm0 = vcmask 1043456   ;;  %vm1987_vm1 = vcmask 64512   ;;  %vm2732_vm2 = vcmask 261120   ;;  %s6428_s0 = inlined_call_operand.vmem [shape: bf16[392,1568], index: 0, kind: input, shape index: {}]   ;;  %s6429_s1 = inlined_call_operand.vmem [shape: bf16[8,392], index: 1, kind: input, shape index: {}]   ;;  %s6430_s2 = inlined_call_operand.vmem [shape: f32[1,8,1568], index: 2, kind: output, shape index: {}]  }
   0x1   :  { %v3104_v0 = vld [vmem:[%s6428_s0 + $0x2d8] sm:$0xf]  ;;  %v4096_v1 = vld [vmem:[%s6428_s0 + $0x308] sm:$0xf0]  ;;  %v4373_v9 = vld [vmem:[%s6428_s0 + $0x9c0] sm:$0xff] }
   0x2   :  { %v3936_v2 = vld [vmem:[%s6428_s0 + $0x958] sm:$0xf]  ;;  %v3105_v3 = vor.u32 %v4096_v1, %v3104_v0  ;;  %v4304_v4 = vld [vmem:[%s6428_s0 + $0x988] sm:$0xf0]  ;;  %v3052_v10 = vld [vmem:[%s6428_s0 + $0x270] sm:$0xf]  ;;  %v1337_v12 = vunpack.c.l.b16 %v4373_v9 }
   0x3   :  { %v3520_v5 = vld [vmem:[%s6428_s0 + $0x618] sm:$0xf]  ;;  %v4200_v6 = vld [vmem:[%s6428_s0 + $0x648] sm:$0xf0]  ;;  %v3937_v7 = vor.u32 %v4304_v4, %v3936_v2  ;;  %v4083_v11 = vld [vmem:[%s6428_s0 + $0x2a0] sm:$0xf0] }
   0x4   :  { %v3521_v8 = vor.u32 %v4200_v6, %v3520_v5  ;;  %2031 = vmatpush.bf16.msra.mxu0 %v3105_v3  ;;  %v3053_v13 = vor.u32 %v4083_v11, %v3052_v10  ;;  %v3884_v14 = vld [vmem:[%s6428_s0 + $0x8f0] sm:$0xf]  ;;  %v4291_v15 = vld [vmem:[%s6428_s0 + $0x920] sm:$0xf0]  ;;  %v4090_v16 = vld [vmem:[%s6428_s0 + $0x2dc] sm:$0xf]  ;;  %v1662_v21 = vpack.c.b16 %v1337_v12, %v1337_v12 }
   0x5   :  { %2057 = vmatpush.bf16.msra.mxu2 %v3937_v7  ;;  %v3885_v17 = vor.u32 %v4291_v15, %v3884_v14  ;;  %v3106_v18 = vld [vmem:[%s6428_s0 + $0x30c] sm:$0xf0]  ;;  %v4187_v20 = vld [vmem:[%s6428_s0 + $0x5e0] sm:$0xf0]  ;;  %v3000_v24 = vld [vmem:[%s6428_s0 + $0x208] sm:$0xf] }
   0x6   :  { %2044 = vmatpush.bf16.msra.mxu1 %v3521_v8  ;;  %v3468_v19 = vld [vmem:[%s6428_s0 + $0x5b0] sm:$0xf]  ;;  %v3109_v22 = vor.u32 %v4090_v16, %v3106_v18  ;;  %v4070_v25 = vld [vmem:[%s6428_s0 + $0x238] sm:$0xf0]  ;;  %v3832_v26 = vld [vmem:[%s6428_s0 + $0x888] sm:$0xf] }
   0x7   :  { %v3469_v23 = vor.u32 %v4187_v20, %v3468_v19  ;;  %v4278_v27 = vld [vmem:[%s6428_s0 + $0x8b8] sm:$0xf0]  ;;  %v4077_v28 = vld [vmem:[%s6428_s0 + $0x274] sm:$0xf]  ;;  %v3054_v29 = vld [vmem:[%s6428_s0 + $0x2a4] sm:$0xf0]  ;;  %v3001_v31 = vor.u32 %v4070_v25, %v3000_v24 }
   0x8   :  { %v1993_v30 = vsel %vm1991_vm0, %v1662_v21, 0  ;;  %2032 = vmatpush.bf16.msra.mxu0 %v3053_v13  ;;  %v3416_v32 = vld [vmem:[%s6428_s0 + $0x548] sm:$0xf]  ;;  %v4174_v33 = vld [vmem:[%s6428_s0 + $0x578] sm:$0xf0]  ;;  %v3833_v35 = vor.u32 %v4278_v27, %v3832_v26  ;;  %v3057_v39 = vor.u32 %v4077_v28, %v3054_v29 }
   0x9   :  { %v4428_v34 = vld [vmem:[%s6429_s1 + $0x8] sm:$0xff]  ;;  %2077 = vmatpush.bf16.msra.mxu3 %v1993_v30  ;;  %2058 = vmatpush.bf16.msra.mxu2 %v3885_v17  ;;  %v2948_v36 = vld [vmem:[%s6428_s0 + $0x1a0] sm:$0xf]  ;;  %v4057_v37 = vld [vmem:[%s6428_s0 + $0x1d0] sm:$0xf0]  ;;  %v3417_v40 = vor.u32 %v4174_v33, %v3416_v32 }
   0xa   :  { %v362_v38 = vunpack.c.h.b16 %v4428_v34  ;;  %2045 = vmatpush.bf16.msra.mxu1 %v3469_v23  ;;  %v3780_v41 = vld [vmem:[%s6428_s0 + $0x820] sm:$0xf]  ;;  %v4265_v42 = vld [vmem:[%s6428_s0 + $0x850] sm:$0xf0]  ;;  %v4064_v43 = vld [vmem:[%s6428_s0 + $0x20c] sm:$0xf]  ;;  %v2949_v48 = vor.u32 %v4057_v37, %v2948_v36 }
   0xb   :  { %v3002_v44 = vld [vmem:[%s6428_s0 + $0x23c] sm:$0xf0]  ;;  %v4161_v46 = vld [vmem:[%s6428_s0 + $0x510] sm:$0xf0]  ;;  %v3781_v49 = vor.u32 %v4265_v42, %v3780_v41  ;;  %v2896_v50 = vld [vmem:[%s6428_s0 + $0x138] sm:$0xf]  ;;  %v361_v42 = vunpack.c.l.b16 %v4428_v34 }
   0xc   :  { %v3364_v45 = vld [vmem:[%s6428_s0 + $0x4e0] sm:$0xf]  ;;  %v4455_v47 = vpack.c.b16 %v362_v38, %v362_v38  ;;  %2033 = vmatpush.bf16.msra.mxu0 %v3001_v31  ;;  %v4044_v51 = vld [vmem:[%s6428_s0 + $0x168] sm:$0xf0]  ;;  %v3005_v52 = vor.u32 %v4064_v43, %v3002_v44  ;;  %v3728_v54 = vld [vmem:[%s6428_s0 + $0x7b8] sm:$0xf]  ;;  %v1338_v38 = vunpack.c.h.b16 %v4373_v9 }
   0xd   :  { %2083 = vmatpush.bf16.msrb.mxu3 %v3109_v22  ;;  %2059 = vmatpush.bf16.msra.mxu2 %v3833_v35  ;;  %v3365_v53 = vor.u32 %v4161_v46, %v3364_v45  ;;  %v4252_v55 = vld [vmem:[%s6428_s0 + $0x7e8] sm:$0xf0]  ;;  %v4051_v56 = vld [vmem:[%s6428_s0 + $0x1a4] sm:$0xf]  ;;  %v2950_v57 = vld [vmem:[%s6428_s0 + $0x1d4] sm:$0xf0]  ;;  %v2897_v60 = vor.u32 %v4044_v51, %v2896_v50 }
   0xe   :  { %3986 = vmatmul.msk.bf16.vlgmr.msra.gmra.mxu3 %vm1987_vm1, %v4455_v47  ;;  %2046 = vmatpush.bf16.msra.mxu1 %v3417_v40  ;;  %v3312_v58 = vld [vmem:[%s6428_s0 + $0x478] sm:$0xf]  ;;  %v4148_v59 = vld [vmem:[%s6428_s0 + $0x4a8] sm:$0xf0]  ;;  %v3729_v61 = vor.u32 %v4252_v55, %v3728_v54  ;;  %v2844_v62 = vld [vmem:[%s6428_s0 + $0xd0] sm:$0xf]  ;;  %v2953_v0 = vor.u32 %v4051_v56, %v2950_v57  ;;  %v1663_v54 = vpack.c.b16 %v1338_v38, %v1338_v38 }
   0xf   :  { %v4031_v63 = vld [vmem:[%s6428_s0 + $0x100] sm:$0xf0]  ;;  %v3313_v1 = vor.u32 %v4148_v59, %v3312_v58  ;;  %v3676_v2 = vld [vmem:[%s6428_s0 + $0x750] sm:$0xf]  ;;  %v4038_v4 = vld [vmem:[%s6428_s0 + $0x13c] sm:$0xf]  ;;  %v4589_v55 = vpack.c.b16 %v361_v42, %v361_v42 }
  0x10   :  { %2034 = vmatpush.bf16.msra.mxu0 %v2949_v48  ;;  %v4239_v3 = vld [vmem:[%s6428_s0 + $0x780] sm:$0xf0]  ;;  %v2898_v5 = vld [vmem:[%s6428_s0 + $0x16c] sm:$0xf0]  ;;  %v2845_v8 = vor.u32 %v4031_v63, %v2844_v62  ;;  %v2792_v11 = vld [vmem:[%s6428_s0 + $0x68] sm:$0xf] }
  0x11   :  { %2084 = vmatpush.bf16.msrb.mxu3 %v3057_v39  ;;  %2060 = vmatpush.bf16.msra.mxu2 %v3781_v49  ;;  %v3260_v6 = vld [vmem:[%s6428_s0 + $0x410] sm:$0xf]  ;;  %v4135_v7 = vld [vmem:[%s6428_s0 + $0x440] sm:$0xf0]  ;;  %v3677_v10 = vor.u32 %v4239_v3, %v3676_v2  ;;  %v4018_v12 = vld [vmem:[%s6428_s0 + $0x98] sm:$0xf0]  ;;  %v2901_v13 = vor.u32 %v4038_v4, %v2898_v5 }
  0x12   :  { %2047 = vmatpush.bf16.msra.mxu1 %v3365_v53  ;;  %v3261_v14 = vor.u32 %v4135_v7, %v3260_v6  ;;  %v3624_v15 = vld [vmem:[%s6428_s0 + $0x6e8] sm:$0xf]  ;;  %v4226_v16 = vld [vmem:[%s6428_s0 + $0x718] sm:$0xf0]  ;;  %v4025_v17 = vld [vmem:[%s6428_s0 + $0xd4] sm:$0xf]  ;;  %v2793_v21 = vor.u32 %v4018_v12, %v2792_v11 }
  0x13   :  { %v2846_v18 = vld [vmem:[%s6428_s0 + $0x104] sm:$0xf0]  ;;  %v4122_v20 = vld [vmem:[%s6428_s0 + $0x3d8] sm:$0xf0]  ;;  %v2740_v22 = vld [vmem:[%s6428_s0] sm:$0xf]  ;;  %v3625_v24 = vor.u32 %v4226_v16, %v3624_v15 }
  0x14   :  { %2035 = vmatpush.bf16.msra.mxu0 %v2897_v60  ;;  %v3208_v19 = vld [vmem:[%s6428_s0 + $0x3a8] sm:$0xf]  ;;  %v4005_v23 = vld [vmem:[%s6428_s0 + $0x30] sm:$0xf0]  ;;  %v3572_v25 = vld [vmem:[%s6428_s0 + $0x680] sm:$0xf]  ;;  %v2849_v28 = vor.u32 %v4025_v17, %v2846_v18 }
  0x15   :  { %2085 = vmatpush.bf16.msrb.mxu3 %v3005_v52  ;;  %2061 = vmatpush.bf16.msra.mxu2 %v3729_v61  ;;  %v4213_v26 = vld [vmem:[%s6428_s0 + $0x6b0] sm:$0xf0]  ;;  %v4012_v27 = vld [vmem:[%s6428_s0 + $0x6c] sm:$0xf]  ;;  %v3209_v29 = vor.u32 %v4122_v20, %v3208_v19  ;;  %v4194_v30 = vld [vmem:[%s6428_s0 + $0x61c] sm:$0xf]  ;;  %v2741_v39 = vor.u32 %v4005_v23, %v2740_v22 }
  0x16   :  { %2048 = vmatpush.bf16.msra.mxu1 %v3313_v1  ;;  %v3522_v31 = vld [vmem:[%s6428_s0 + $0x64c] sm:$0xf0]  ;;  %v12_v32 = vld [vmem:[%s6429_s1] sm:$0xff]  ;;  %v4109_v36 = vld [vmem:[%s6428_s0 + $0x370] sm:$0xf0]  ;;  %v3573_v43 = vor.u32 %v4213_v26, %v3572_v25  ;;  %v1996_v5 = vsel %vm1991_vm0, %v1663_v54, 0 }
  0x17   :  { %v2794_v33 = vld [vmem:[%s6428_s0 + $0x9c] sm:$0xf0]  ;;  %v359_v37 = vunpack.c.l.b16 %v12_v32  ;;  %v4298_v40 = vld [vmem:[%s6428_s0 + $0x95c] sm:$0xf]  ;;  %v3938_v41 = vld [vmem:[%s6428_s0 + $0x98c] sm:$0xf0]  ;;  %v3525_v44 = vor.u32 %v4194_v30, %v3522_v31  ;;  %v360_v45 = vunpack.c.h.b16 %v12_v32 }
  0x18   :  { %2036 = vmatpush.bf16.msra.mxu0 %v2845_v8  ;;  %v3156_v35 = vld [vmem:[%s6428_s0 + $0x340] sm:$0xf]  ;;  %v2797_v46 = vor.u32 %v4012_v27, %v2794_v33  ;;  %v4181_v48 = vld [vmem:[%s6428_s0 + $0x5b4] sm:$0xf]  ;;  %v3470_v49 = vld [vmem:[%s6428_s0 + $0x5e4] sm:$0xf0]  ;;  %v3941_v50 = vor.u32 %v4298_v40, %v3938_v41 }
  0x19   :  { %2086 = vmatpush.bf16.msrb.mxu3 %v2953_v0  ;;  %2062 = vmatpush.bf16.msra.mxu2 %v3677_v10  ;;  %v3157_v9 = vor.u32 %v4109_v36, %v3156_v35  ;;  %v3999_v34 = vld [vmem:[%s6428_s0 + $0x4] sm:$0xf]  ;;  %v2742_v51 = vld [vmem:[%s6428_s0 + $0x34] sm:$0xf0]  ;;  %v3112_v52 = vld [vmem:[%s6428_s0 + $0x2e0] sm:$0xf]  ;;  %v4587_v53 = vpack.c.b16 %v359_v37, %v359_v37  ;;  %v3473_v59 = vor.u32 %v4181_v48, %v3470_v49 }
  0x1a   :  { %2049 = vmatpush.bf16.msra.mxu1 %v3261_v14  ;;  %v4097_v56 = vld [vmem:[%s6428_s0 + $0x310] sm:$0xf0]  ;;  %v3886_v58 = vld [vmem:[%s6428_s0 + $0x924] sm:$0xf0]  ;;  %v4600_v60 = vpack.c.b16 %v360_v45, %v360_v45  ;;  %v3528_v61 = vld [vmem:[%s6428_s0 + $0x620] sm:$0xf]  ;;  %v2745_v63 = vor.u32 %v3999_v34, %v2742_v51 }
  0x1b   :  { %v4285_v57 = vld [vmem:[%s6428_s0 + $0x8f4] sm:$0xf]  ;;  %v4168_v0 = vld [vmem:[%s6428_s0 + $0x54c] sm:$0xf]  ;;  %v3418_v1 = vld [vmem:[%s6428_s0 + $0x57c] sm:$0xf0]  ;;  %v3113_v2 = vor.u32 %v4097_v56, %v3112_v52 }
  0x1c   :  { %2037 = vmatpush.bf16.msra.mxu0 %v2793_v21  ;;  %v4201_v62 = vld [vmem:[%s6428_s0 + $0x650] sm:$0xf0]  ;;  %v3889_v3 = vor.u32 %v4285_v57, %v3886_v58  ;;  %v3060_v4 = vld [vmem:[%s6428_s0 + $0x278] sm:$0xf]  ;;  %v4084_v6 = vld [vmem:[%s6428_s0 + $0x2a8] sm:$0xf0]  ;;  %v3421_v11 = vor.u32 %v4168_v0, %v3418_v1 }
  0x1d   :  { %2087 = vmatpush.bf16.msrb.mxu3 %v2901_v13  ;;  %2063 = vmatpush.bf16.msra.mxu2 %v3625_v24  ;;  %v4272_v7 = vld [vmem:[%s6428_s0 + $0x88c] sm:$0xf]  ;;  %v3834_v8 = vld [vmem:[%s6428_s0 + $0x8bc] sm:$0xf0]  ;;  %v3529_v10 = vor.u32 %v4201_v62, %v3528_v61  ;;  %v3476_v12 = vld [vmem:[%s6428_s0 + $0x5b8] sm:$0xf]  ;;  %v3061_v16 = vor.u32 %v4084_v6, %v3060_v4 }
  0x1e   :  { %2050 = vmatpush.bf16.msra.mxu1 %v3209_v29  ;;  %v4188_v13 = vld [vmem:[%s6428_s0 + $0x5e8] sm:$0xf0]  ;;  %v4155_v14 = vld [vmem:[%s6428_s0 + $0x4e4] sm:$0xf]  ;;  %v3366_v15 = vld [vmem:[%s6428_s0 + $0x514] sm:$0xf0]  ;;  %v3837_v17 = vor.u32 %v4272_v7, %v3834_v8 }
  0x1f   :  { %v3008_v18 = vld [vmem:[%s6428_s0 + $0x210] sm:$0xf]  ;;  %v4071_v19 = vld [vmem:[%s6428_s0 + $0x240] sm:$0xf0]  ;;  %v3782_v21 = vld [vmem:[%s6428_s0 + $0x854] sm:$0xf0]  ;;  %v3477_v22 = vor.u32 %v4188_v13, %v3476_v12  ;;  %v3369_v23 = vor.u32 %v4155_v14, %v3366_v15 }
  0x20   :  { %2038 = vmatpush.bf16.msra.mxu0 %v2741_v39  ;;  %v4259_v20 = vld [vmem:[%s6428_s0 + $0x824] sm:$0xf]  ;;  %v3424_v24 = vld [vmem:[%s6428_s0 + $0x550] sm:$0xf]  ;;  %v4142_v26 = vld [vmem:[%s6428_s0 + $0x47c] sm:$0xf] }
  0x21   :  { %2088 = vmatpush.bf16.msrb.mxu3 %v2849_v28  ;;  %2064 = vmatpush.bf16.msra.mxu2 %v3573_v43  ;;  %v4175_v25 = vld [vmem:[%s6428_s0 + $0x580] sm:$0xf0]  ;;  %v3314_v27 = vld [vmem:[%s6428_s0 + $0x4ac] sm:$0xf0]  ;;  %v3009_v28 = vor.u32 %v4071_v19, %v3008_v18  ;;  %v3785_v29 = vor.u32 %v4259_v20, %v3782_v21  ;;  %v2956_v30 = vld [vmem:[%s6428_s0 + $0x1a8] sm:$0xf] }
  0x22   :  { %2051 = vmatpush.bf16.msra.mxu1 %v3157_v9  ;;  %v4058_v31 = vld [vmem:[%s6428_s0 + $0x1d8] sm:$0xf0]  ;;  %v3730_v33 = vld [vmem:[%s6428_s0 + $0x7ec] sm:$0xf0]  ;;  %v3425_v35 = vor.u32 %v4175_v25, %v3424_v24  ;;  %v3317_v36 = vor.u32 %v4142_v26, %v3314_v27  ;;  %v3372_v37 = vld [vmem:[%s6428_s0 + $0x4e8] sm:$0xf] }
  0x23   :  { %2039 = vmatmul.bf16.vlgmr.msra.gmra.mxu0 %v4587_v53  ;;  %v4246_v32 = vld [vmem:[%s6428_s0 + $0x7bc] sm:$0xf]  ;;  %v4129_v39 = vld [vmem:[%s6428_s0 + $0x414] sm:$0xf]  ;;  %v3262_v40 = vld [vmem:[%s6428_s0 + $0x444] sm:$0xf0]  ;;  %v2957_v41 = vor.u32 %v4058_v31, %v2956_v30 }
  0x24   :  { %2096 = vmatpush.bf16.msrb.mxu0 %v3525_v44  ;;  %2065 = vmatmul.bf16.vlgmr.msra.gmra.mxu2 %v4589_v55  ;;  %v4162_v38 = vld [vmem:[%s6428_s0 + $0x518] sm:$0xf0]  ;;  %v3733_v42 = vor.u32 %v4246_v32, %v3730_v33  ;;  %v2904_v43 = vld [vmem:[%s6428_s0 + $0x140] sm:$0xf]  ;;  %v4045_v44 = vld [vmem:[%s6428_s0 + $0x170] sm:$0xf0]  ;;  %v3265_v48 = vor.u32 %v4129_v39, %v3262_v40 }
  0x25   :  { %2089 = vmatpush.bf16.msrb.mxu3 %v2797_v46  ;;  %2052 = vmatmul.bf16.vlgmr.msra.gmra.mxu1 %v4600_v60  ;;  %v4233_v45 = vld [vmem:[%s6428_s0 + $0x754] sm:$0xf]  ;;  %v3678_v46 = vld [vmem:[%s6428_s0 + $0x784] sm:$0xf0]  ;;  %v3373_v9 = vor.u32 %v4162_v38, %v3372_v37  ;;  %v3320_v49 = vld [vmem:[%s6428_s0 + $0x480] sm:$0xf]  ;;  %v2905_v54 = vor.u32 %v4045_v44, %v2904_v43 }
  0x26   :  { %2109 = vmatpush.bf16.msrb.mxu1 %v3941_v50  ;;  %2129 = vmatpush.bf16.msrb.mxu2 %v1996_v5  ;;  %v4149_v50 = vld [vmem:[%s6428_s0 + $0x4b0] sm:$0xf0]  ;;  %v4116_v34 = vld [vmem:[%s6428_s0 + $0x3ac] sm:$0xf]  ;;  %v3210_v51 = vld [vmem:[%s6428_s0 + $0x3dc] sm:$0xf0]  ;;  %v3681_v56 = vor.u32 %v4233_v45, %v3678_v46 }
  0x27   :  { %v4718_v52 = vld [vmem:[%s6428_s0 + $0x9c8] sm:$0xff]  ;;  %v2852_v57 = vld [vmem:[%s6428_s0 + $0xd8] sm:$0xf]  ;;  %v3626_v61 = vld [vmem:[%s6428_s0 + $0x71c] sm:$0xf0]  ;;  %v3321_v62 = vor.u32 %v4149_v50, %v3320_v49 }
  0x28   :  { %2097 = vmatpush.bf16.msrb.mxu0 %v3473_v59  ;;  %v4032_v58 = vld [vmem:[%s6428_s0 + $0x108] sm:$0xf0]  ;;  %v1339_v0 = vunpack.c.l.b16 %v4718_v52  ;;  %v3268_v1 = vld [vmem:[%s6428_s0 + $0x418] sm:$0xf]  ;;  %v2800_v7 = vld [vmem:[%s6428_s0 + $0x70] sm:$0xf] }
  0x29   :  { %2090 = vmatpush.bf16.msrb.mxu3 %v2745_v63  ;;  %v4220_v59 = vld [vmem:[%s6428_s0 + $0x6ec] sm:$0xf]  ;;  %v3213_v63 = vor.u32 %v4116_v34, %v3210_v51  ;;  %v3158_v4 = vld [vmem:[%s6428_s0 + $0x374] sm:$0xf0]  ;;  %v2853_v5 = vor.u32 %v4032_v58, %v2852_v57  ;;  %v3944_v8 = vld [vmem:[%s6428_s0 + $0x960] sm:$0xf] }
  0x2a   :  { %2110 = vmatpush.bf16.msrb.mxu1 %v3889_v3  ;;  %2148 = vmatpush.bf16.msra.mxu2 %v3529_v10  ;;  %v4103_v3 = vld [vmem:[%s6428_s0 + $0x344] sm:$0xf]  ;;  %v3629_v6 = vor.u32 %v4220_v59, %v3626_v61  ;;  %v4305_v10 = vld [vmem:[%s6428_s0 + $0x990] sm:$0xf0]  ;;  %v3574_v13 = vld [vmem:[%s6428_s0 + $0x6b4] sm:$0xf0] }
  0x2b   :  { %v4207_v12 = vld [vmem:[%s6428_s0 + $0x684] sm:$0xf]  ;;  %v3161_v15 = vor.u32 %v4103_v3, %v3158_v4  ;;  %v3945_v19 = vor.u32 %v4305_v10, %v3944_v8  ;;  %v2748_v20 = vld [vmem:[%s6428_s0 + $0x8] sm:$0xf]  ;;  %v4006_v21 = vld [vmem:[%s6428_s0 + $0x38] sm:$0xf0] }
  0x2c   :  { %2098 = vmatpush.bf16.msrb.mxu0 %v3421_v11  ;;  %2091 = vmatmul.bf16.vlgmr.msrb.gmra.mxu3 %v4587_v53  ;;  %v4019_v11 = vld [vmem:[%s6428_s0 + $0xa0] sm:$0xf0]  ;;  %v3892_v24 = vld [vmem:[%s6428_s0 + $0x8f8] sm:$0xf]  ;;  %v4292_v25 = vld [vmem:[%s6428_s0 + $0x928] sm:$0xf0]  ;;  %v2749_v38 = vor.u32 %v4006_v21, %v2748_v20 }
  0x2d   :  { %2135 = vmatpush.bf16.msra.mxu3 %v3113_v2  ;;  %v4136_v2 = vld [vmem:[%s6428_s0 + $0x448] sm:$0xf0]  ;;  %v4123_v18 = vld [vmem:[%s6428_s0 + $0x3e0] sm:$0xf0]  ;;  %v3114_v27 = vld [vmem:[%s6428_s0 + $0x314] sm:$0xf0] }
  0x2e   :  { %2111 = vmatpush.bf16.msrb.mxu1 %v3837_v17  ;;  %2149 = vmatpush.bf16.msra.mxu2 %v3477_v22  ;;  %v3269_v14 = vor.u32 %v4136_v2, %v3268_v1  ;;  %v3216_v17 = vld [vmem:[%s6428_s0 + $0x3b0] sm:$0xf]  ;;  %v2801_v22 = vor.u32 %v4019_v11, %v2800_v7  ;;  %v4091_v26 = vld [vmem:[%s6428_s0 + $0x2e4] sm:$0xf]  ;;  %v3164_v32 = vld [vmem:[%s6428_s0 + $0x348] sm:$0xf] }
  0x2f   :  { %v3217_v30 = vor.u32 %v4123_v18, %v3216_v17  ;;  %v4110_v33 = vld [vmem:[%s6428_s0 + $0x378] sm:$0xf0]  ;;  %v3946_v37 = vld [vmem:[%s6428_s0 + $0x994] sm:$0xf0]  ;;  %v3840_v40 = vld [vmem:[%s6428_s0 + $0x890] sm:$0xf] }
  0x30   :  { %2099 = vmatpush.bf16.msrb.mxu0 %v3369_v23  ;;  %v3577_v23 = vor.u32 %v4207_v12, %v3574_v13  ;;  %v4182_v43 = vld [vmem:[%s6428_s0 + $0x5bc] sm:$0xf]  ;;  %v3478_v44 = vld [vmem:[%s6428_s0 + $0x5ec] sm:$0xf0]  ;;  %v3165_v45 = vor.u32 %v4110_v33, %v3164_v32  ;;  %v4169_v58 = vld [vmem:[%s6428_s0 + $0x554] sm:$0xf] }
  0x31   :  { %2136 = vmatpush.bf16.msra.mxu3 %v3061_v16  ;;  %v1664_v16 = vpack.c.b16 %v1339_v0, %v1339_v0  ;;  %v4078_v46 = vld [vmem:[%s6428_s0 + $0x27c] sm:$0xf]  ;;  %v3894_v34 = vld [vmem:[%s6428_s0 + $0x92c] sm:$0xf0]  ;;  %v3481_v51 = vor.u32 %v4182_v43, %v3478_v44  ;;  %v3426_v59 = vld [vmem:[%s6428_s0 + $0x584] sm:$0xf0] }
  0x32   :  { %2112 = vmatpush.bf16.msrb.mxu1 %v3785_v29  ;;  %2150 = vmatpush.bf16.msra.mxu2 %v3425_v35  ;;  %v3530_v29 = vld [vmem:[%s6428_s0 + $0x654] sm:$0xf0]  ;;  %v3893_v35 = vor.u32 %v4292_v25, %v3892_v24  ;;  %v4286_v50 = vld [vmem:[%s6428_s0 + $0x8fc] sm:$0xf]  ;;  %v4065_v61 = vld [vmem:[%s6428_s0 + $0x214] sm:$0xf]  ;;  %v3429_v3 = vor.u32 %v4169_v58, %v3426_v59 }
  0x33   :  { %v1999_v31 = vsel %vm1991_vm0, %v1664_v16, 0  ;;  %v4273_v1 = vld [vmem:[%s6428_s0 + $0x894] sm:$0xf]  ;;  %v3842_v2 = vld [vmem:[%s6428_s0 + $0x8c4] sm:$0xf0] }
  0x34   :  { %2100 = vmatpush.bf16.msrb.mxu0 %v3317_v36  ;;  %3987 = vmatmul.msk.bf16.vlgmr.msrb.gmra.mxu2 %vm1987_vm1, %v4455_v47  ;;  %v4299_v36 = vld [vmem:[%s6428_s0 + $0x964] sm:$0xf]  ;;  %v3736_v4 = vld [vmem:[%s6428_s0 + $0x7c0] sm:$0xf]  ;;  %v4156_v7 = vld [vmem:[%s6428_s0 + $0x4ec] sm:$0xf]  ;;  %v3845_v12 = vor.u32 %v4273_v1, %v3842_v2 }
  0x35   :  { %2137 = vmatpush.bf16.msra.mxu3 %v3009_v28  ;;  %v4195_v28 = vld [vmem:[%s6428_s0 + $0x624] sm:$0xf]  ;;  %v3374_v8 = vld [vmem:[%s6428_s0 + $0x51c] sm:$0xf0]  ;;  %v4052_v10 = vld [vmem:[%s6428_s0 + $0x1ac] sm:$0xf] }
  0x36   :  { %2113 = vmatpush.bf16.msrb.mxu1 %v3733_v42  ;;  %2151 = vmatpush.bf16.msra.mxu2 %v3373_v9  ;;  %v3533_v39 = vor.u32 %v4195_v28, %v3530_v29  ;;  %v3117_v42 = vor.u32 %v4091_v26, %v3114_v27  ;;  %v3062_v9 = vld [vmem:[%s6428_s0 + $0x2ac] sm:$0xf0]  ;;  %v2958_v11 = vld [vmem:[%s6428_s0 + $0x1dc] sm:$0xf0]  ;;  %v3377_v16 = vor.u32 %v4156_v7, %v3374_v8  ;;  %v3684_v17 = vld [vmem:[%s6428_s0 + $0x758] sm:$0xf]  ;;  %v1340_v28 = vunpack.c.h.b16 %v4718_v52 }
  0x37   :  { %v3065_v57 = vor.u32 %v4078_v46, %v3062_v9  ;;  %v4240_v18 = vld [vmem:[%s6428_s0 + $0x788] sm:$0xf0]  ;;  %v4143_v20 = vld [vmem:[%s6428_s0 + $0x484] sm:$0xf]  ;;  %v3322_v21 = vld [vmem:[%s6428_s0 + $0x4b4] sm:$0xf0] }
  0x38   :  { %2101 = vmatpush.bf16.msrb.mxu0 %v3265_v48  ;;  %v3949_v48 = vor.u32 %v4299_v36, %v3946_v37  ;;  %v3685_v25 = vor.u32 %v4240_v18, %v3684_v17  ;;  %v4247_v26 = vld [vmem:[%s6428_s0 + $0x7c4] sm:$0xf]  ;;  %v3738_v27 = vld [vmem:[%s6428_s0 + $0x7f4] sm:$0xf0]  ;;  %v3325_v29 = vor.u32 %v4143_v20, %v3322_v21  ;;  %v4130_v33 = vld [vmem:[%s6428_s0 + $0x41c] sm:$0xf] }
  0x39   :  { %2138 = vmatpush.bf16.msra.mxu3 %v2957_v41  ;;  %v4279_v41 = vld [vmem:[%s6428_s0 + $0x8c0] sm:$0xf0]  ;;  %v3270_v52 = vld [vmem:[%s6428_s0 + $0x44c] sm:$0xf0]  ;;  %v3741_v37 = vor.u32 %v4247_v26, %v3738_v27  ;;  %v3580_v43 = vld [vmem:[%s6428_s0 + $0x688] sm:$0xf] }
  0x3a   :  { %2114 = vmatpush.bf16.msrb.mxu1 %v3681_v56  ;;  %2152 = vmatpush.bf16.msra.mxu2 %v3321_v62  ;;  %v3841_v49 = vor.u32 %v4279_v41, %v3840_v40  ;;  %v4266_v56 = vld [vmem:[%s6428_s0 + $0x858] sm:$0xf0]  ;;  %v3010_v62 = vld [vmem:[%s6428_s0 + $0x244] sm:$0xf0]  ;;  %v2854_v36 = vld [vmem:[%s6428_s0 + $0x10c] sm:$0xf0] }
  0x3b   :  { %v4234_v40 = vld [vmem:[%s6428_s0 + $0x75c] sm:$0xf]  ;;  %v3686_v41 = vld [vmem:[%s6428_s0 + $0x78c] sm:$0xf0]  ;;  %v4117_v46 = vld [vmem:[%s6428_s0 + $0x3b4] sm:$0xf] }
  0x3c   :  { %2102 = vmatpush.bf16.msrb.mxu0 %v3213_v63  ;;  %v3897_v63 = vor.u32 %v4286_v50, %v3894_v34  ;;  %v4214_v44 = vld [vmem:[%s6428_s0 + $0x6b8] sm:$0xf0]  ;;  %v3218_v9 = vld [vmem:[%s6428_s0 + $0x3e4] sm:$0xf0]  ;;  %v3689_v34 = vor.u32 %v4234_v40, %v3686_v41  ;;  %v4000_v59 = vld [vmem:[%s6428_s0 + $0xc] sm:$0xf] }
  0x3d   :  { %2139 = vmatpush.bf16.msra.mxu3 %v2905_v54  ;;  %v3788_v54 = vld [vmem:[%s6428_s0 + $0x828] sm:$0xf]  ;;  %v3221_v58 = vor.u32 %v4117_v46, %v3218_v9  ;;  %v2750_v1 = vld [vmem:[%s6428_s0 + $0x3c] sm:$0xf0]  ;;  %v4104_v2 = vld [vmem:[%s6428_s0 + $0x34c] sm:$0xf] }
  0x3e   :  { %2115 = vmatpush.bf16.msrb.mxu1 %v3629_v6  ;;  %2153 = vmatpush.bf16.msra.mxu2 %v3269_v14  ;;  %v3789_v0 = vor.u32 %v4266_v56, %v3788_v54  ;;  %v3013_v6 = vor.u32 %v4065_v61, %v3010_v62  ;;  %v4260_v14 = vld [vmem:[%s6428_s0 + $0x82c] sm:$0xf]  ;;  %v2802_v50 = vld [vmem:[%s6428_s0 + $0xa4] sm:$0xf0]  ;;  %v4221_v56 = vld [vmem:[%s6428_s0 + $0x6f4] sm:$0xf]  ;;  %v2753_v17 = vor.u32 %v4000_v59, %v2750_v1 }
  0x3f   :  { %v3536_v61 = vld [vmem:[%s6428_s0 + $0x628] sm:$0xf]  ;;  %v4202_v62 = vld [vmem:[%s6428_s0 + $0x658] sm:$0xf0]  ;;  %v3068_v20 = vld [vmem:[%s6428_s0 + $0x280] sm:$0xf] }
  0x40   :  { %2103 = vmatpush.bf16.msrb.mxu0 %v3161_v15  ;;  %v3790_v15 = vld [vmem:[%s6428_s0 + $0x85c] sm:$0xf0]  ;;  %v3537_v8 = vor.u32 %v4202_v62, %v3536_v61  ;;  %v4092_v26 = vld [vmem:[%s6428_s0 + $0x2ec] sm:$0xf]  ;;  %v3070_v40 = vld [vmem:[%s6428_s0 + $0x2b4] sm:$0xf0] }
  0x41   :  { %2140 = vmatpush.bf16.msra.mxu3 %v2853_v5  ;;  %v4253_v5 = vld [vmem:[%s6428_s0 + $0x7f0] sm:$0xf0]  ;;  %v3793_v24 = vor.u32 %v4260_v14, %v3790_v15  ;;  %v3484_v14 = vld [vmem:[%s6428_s0 + $0x5c0] sm:$0xf]  ;;  %v3380_v41 = vld [vmem:[%s6428_s0 + $0x4f0] sm:$0xf] }
  0x42   :  { %2116 = vmatpush.bf16.msrb.mxu1 %v3577_v23  ;;  %2154 = vmatpush.bf16.msra.mxu2 %v3217_v30  ;;  %v3737_v13 = vor.u32 %v4253_v5, %v3736_v4  ;;  %v2906_v23 = vld [vmem:[%s6428_s0 + $0x174] sm:$0xf0]  ;;  %v3632_v30 = vld [vmem:[%s6428_s0 + $0x6f0] sm:$0xf]  ;;  %v3120_v4 = vld [vmem:[%s6428_s0 + $0x2e8] sm:$0xf] }
  0x43   :  { %2104 = vmatmul.bf16.vlgmr.msrb.gmra.mxu0 %v4600_v60  ;;  %v3952_v5 = vld [vmem:[%s6428_s0 + $0x968] sm:$0xf]  ;;  %v4189_v15 = vld [vmem:[%s6428_s0 + $0x5f0] sm:$0xf0]  ;;  %v3900_v21 = vld [vmem:[%s6428_s0 + $0x900] sm:$0xf] }
  0x44   :  { %2161 = vmatpush.bf16.msra.mxu0 %v3945_v19  ;;  %v2961_v19 = vor.u32 %v4052_v10, %v2958_v11  ;;  %v4098_v10 = vld [vmem:[%s6428_s0 + $0x318] sm:$0xf0]  ;;  %v4208_v11 = vld [vmem:[%s6428_s0 + $0x68c] sm:$0xf]  ;;  %v3122_v27 = vld [vmem:[%s6428_s0 + $0x31c] sm:$0xf0] }
  0x45   :  { %2141 = vmatpush.bf16.msra.mxu3 %v2801_v22  ;;  %2117 = vmatmul.bf16.vlgmr.msrb.gmra.mxu1 %v4589_v55  ;;  %v4039_v22 = vld [vmem:[%s6428_s0 + $0x144] sm:$0xf]  ;;  %v3796_v46 = vld [vmem:[%s6428_s0 + $0x830] sm:$0xf]  ;;  %v2912_v61 = vld [vmem:[%s6428_s0 + $0x148] sm:$0xf] }
  0x46   :  { %2181 = vmatpush.bf16.msra.mxu1 %v1999_v31  ;;  %2155 = vmatpush.bf16.msra.mxu2 %v3165_v45  ;;  %v4227_v31 = vld [vmem:[%s6428_s0 + $0x720] sm:$0xf0]  ;;  %v2909_v32 = vor.u32 %v4039_v22, %v2906_v23  ;;  %v4293_v22 = vld [vmem:[%s6428_s0 + $0x930] sm:$0xf0]  ;;  %v3744_v62 = vld [vmem:[%s6428_s0 + $0x7c8] sm:$0xf] }
  0x47   :  { %v4267_v9 = vld [vmem:[%s6428_s0 + $0x860] sm:$0xf0] }
  0x48   :  { %2162 = vmatpush.bf16.msra.mxu0 %v3893_v35  ;;  %v4026_v35 = vld [vmem:[%s6428_s0 + $0xdc] sm:$0xf] }
  0x49   :  { %2142 = vmatpush.bf16.msra.mxu3 %v2749_v38  ;;  %2156 = vmatmul.bf16.vlgmr.msra.gmra.mxu2 %v4600_v60  ;;  %v3633_v38 = vor.u32 %v4227_v31, %v3632_v30  ;;  %v2857_v45 = vor.u32 %v4026_v35, %v2854_v36  ;;  %v3901_v31 = vor.u32 %v4293_v22, %v3900_v21  ;;  %v4280_v35 = vld [vmem:[%s6428_s0 + $0x8c8] sm:$0xf0]  ;;  %v2808_v22 = vld [vmem:[%s6428_s0 + $0x78] sm:$0xf] }
  0x4a   :  { %2200 = vmatpush.bf16.msrb.mxu1 %v3533_v39  ;;  %2213 = vmatpush.bf16.msrb.mxu2 %v3949_v48  ;;  %v1665_v39 = vpack.c.b16 %v1340_v28, %v1340_v28  ;;  %v4950_v48 = vld [vmem:[%s6428_s0 + $0x9d0] sm:$0xff]  ;;  %v3432_v28 = vld [vmem:[%s6428_s0 + $0x558] sm:$0xf]  ;;  %v3125_v36 = vor.u32 %v4092_v26, %v3122_v27  ;;  %v4020_v27 = vld [vmem:[%s6428_s0 + $0xa8] sm:$0xf0] }
  0x4c   :  { %2163 = vmatpush.bf16.msra.mxu0 %v3841_v49  ;;  %2143 = vmatmul.bf16.vlgmr.msra.gmra.mxu3 %v4587_v53  ;;  %v4013_v49 = vld [vmem:[%s6428_s0 + $0x74] sm:$0xf]  ;;  %v2002_v54 = vsel %vm1991_vm0, %v1665_v39, 0  ;;  %v4079_v39 = vld [vmem:[%s6428_s0 + $0x284] sm:$0xf] }
  0x4d   :  { %2187 = vmatpush.bf16.msrb.mxu3 %v3117_v42  ;;  %v3273_v42 = vor.u32 %v4130_v33, %v3270_v52  ;;  %v3016_v33 = vld [vmem:[%s6428_s0 + $0x218] sm:$0xf] }
  0x4e   :  { %2201 = vmatpush.bf16.msrb.mxu1 %v3481_v51  ;;  %2214 = vmatpush.bf16.msrb.mxu2 %v3897_v63  ;;  %v3581_v51 = vor.u32 %v4214_v44, %v3580_v43  ;;  %v1341_v63 = vunpack.c.l.b16 %v4950_v48  ;;  %v3848_v52 = vld [vmem:[%s6428_s0 + $0x898] sm:$0xf] }
  0x4f   :  { %v3849_v43 = vor.u32 %v4280_v35, %v3848_v52  ;;  %v3954_v52 = vld [vmem:[%s6428_s0 + $0x99c] sm:$0xf0]  ;;  %v2809_v35 = vor.u32 %v4020_v27, %v2808_v22  ;;  %v4073_v22 = vld [vmem:[%s6428_s0 + $0x250] sm:$0xf0]  ;;  %v4248_v27 = vld [vmem:[%s6428_s0 + $0x7cc] sm:$0xf] }
  0x50   :  { %2164 = vmatpush.bf16.msra.mxu0 %v3789_v0  ;;  %v2805_v0 = vor.u32 %v4013_v49, %v2802_v50  ;;  %v3073_v49 = vor.u32 %v4079_v39, %v3070_v40  ;;  %v2756_v40 = vld [vmem:[%s6428_s0 + $0x10] sm:$0xf] }
  0x51   :  { %2188 = vmatpush.bf16.msrb.mxu3 %v3065_v57  ;;  %v3634_v57 = vld [vmem:[%s6428_s0 + $0x724] sm:$0xf0] }
  0x52   :  { %2202 = vmatpush.bf16.msrb.mxu1 %v3429_v3  ;;  %2215 = vmatpush.bf16.msrb.mxu2 %v3845_v12  ;;  %v3166_v3 = vld [vmem:[%s6428_s0 + $0x37c] sm:$0xf0]  ;;  %v3637_v7 = vor.u32 %v4221_v56, %v3634_v57  ;;  %v3328_v56 = vld [vmem:[%s6428_s0 + $0x488] sm:$0xf]  ;;  %v4150_v57 = vld [vmem:[%s6428_s0 + $0x4b8] sm:$0xf0] }
  0x53   :  { %v3582_v12 = vld [vmem:[%s6428_s0 + $0x6bc] sm:$0xf0]  ;;  %v3329_v1 = vor.u32 %v4150_v57, %v3328_v56  ;;  %v4099_v56 = vld [vmem:[%s6428_s0 + $0x320] sm:$0xf0] }
  0x54   :  { %2165 = vmatpush.bf16.msra.mxu0 %v3737_v13  ;;  %v3169_v13 = vor.u32 %v4104_v2, %v3166_v3  ;;  %v3585_v23 = vor.u32 %v4208_v11, %v3582_v12  ;;  %v4046_v2 = vld [vmem:[%s6428_s0 + $0x178] sm:$0xf0]  ;;  %v4053_v3 = vld [vmem:[%s6428_s0 + $0x1b4] sm:$0xf]  ;;  %v3692_v11 = vld [vmem:[%s6428_s0 + $0x760] sm:$0xf] }
  0x55   :  { %2189 = vmatpush.bf16.msrb.mxu3 %v3013_v6  ;;  %3988 = vmatmul.msk.bf16.vlgmr.msra.gmra.mxu1 %vm1987_vm1, %v4455_v47  ;;  %v4306_v6 = vld [vmem:[%s6428_s0 + $0x998] sm:$0xf0]  ;;  %v4241_v12 = vld [vmem:[%s6428_s0 + $0x790] sm:$0xf0] }
  0x56   :  { %2203 = vmatpush.bf16.msrb.mxu1 %v3377_v16  ;;  %2216 = vmatpush.bf16.msrb.mxu2 %v3793_v24  ;;  %v1666_v16 = vpack.c.b16 %v1341_v63, %v1341_v63  ;;  %v3953_v18 = vor.u32 %v4306_v6, %v3952_v5  ;;  %v3485_v24 = vor.u32 %v4189_v15, %v3484_v14  ;;  %v4254_v63 = vld [vmem:[%s6428_s0 + $0x7f8] sm:$0xf0]  ;;  %v3276_v5 = vld [vmem:[%s6428_s0 + $0x420] sm:$0xf]  ;;  %v4137_v6 = vld [vmem:[%s6428_s0 + $0x450] sm:$0xf0] }
  0x57   :  { %v3277_v14 = vor.u32 %v4137_v6, %v3276_v5  ;;  %v4033_v15 = vld [vmem:[%s6428_s0 + $0x110] sm:$0xf0]  ;;  %v3544_v5 = vld [vmem:[%s6428_s0 + $0x630] sm:$0xf]  ;;  %v4203_v6 = vld [vmem:[%s6428_s0 + $0x660] sm:$0xf0] }
  0x58   :  { %2166 = vmatpush.bf16.msra.mxu0 %v3685_v25  ;;  %v4085_v25 = vld [vmem:[%s6428_s0 + $0x2b0] sm:$0xf0]  ;;  %v2005_v30 = vsel %vm1991_vm0, %v1666_v16, 0  ;;  %v4040_v16 = vld [vmem:[%s6428_s0 + $0x14c] sm:$0xf] }
  0x59   :  { %2190 = vmatpush.bf16.msrb.mxu3 %v2961_v19  ;;  %v3121_v19 = vor.u32 %v4098_v10, %v3120_v4  ;;  %v2966_v4 = vld [vmem:[%s6428_s0 + $0x1e4] sm:$0xf0]  ;;  %v2860_v10 = vld [vmem:[%s6428_s0 + $0xe0] sm:$0xf] }
  0x5a   :  { %2204 = vmatpush.bf16.msrb.mxu1 %v3325_v29  ;;  %2217 = vmatpush.bf16.msrb.mxu2 %v3741_v37  ;;  %v4176_v29 = vld [vmem:[%s6428_s0 + $0x588] sm:$0xf0]  ;;  %v2861_v21 = vor.u32 %v4033_v15, %v2860_v10  ;;  %v4261_v15 = vld [vmem:[%s6428_s0 + $0x834] sm:$0xf] }
  0x5b   :  { %v3433_v37 = vor.u32 %v4176_v29, %v3432_v28  ;;  %v1342_v28 = vunpack.c.h.b16 %v4950_v48  ;;  %v4027_v29 = vld [vmem:[%s6428_s0 + $0xe4] sm:$0xf]  ;;  %v4300_v48 = vld [vmem:[%s6428_s0 + $0x96c] sm:$0xf] }
  0x5c   :  { %2167 = vmatpush.bf16.msra.mxu0 %v3633_v38  ;;  %v4072_v38 = vld [vmem:[%s6428_s0 + $0x248] sm:$0xf0] }
  0x5d   :  { %2191 = vmatpush.bf16.msrb.mxu3 %v2909_v32  ;;  %v3069_v32 = vor.u32 %v4085_v25, %v3068_v20  ;;  %v3017_v44 = vor.u32 %v4072_v38, %v3016_v33  ;;  %v3693_v20 = vor.u32 %v4241_v12, %v3692_v11 }
  0x5e   :  { %2205 = vmatpush.bf16.msrb.mxu1 %v3273_v42  ;;  %2218 = vmatpush.bf16.msrb.mxu2 %v3689_v34  ;;  %v4163_v42 = vld [vmem:[%s6428_s0 + $0x520] sm:$0xf0] }
  0x5f   :  { %v3381_v50 = vor.u32 %v4163_v42, %v3380_v41  ;;  %v4059_v34 = vld [vmem:[%s6428_s0 + $0x1e0] sm:$0xf0]  ;;  %v4196_v42 = vld [vmem:[%s6428_s0 + $0x62c] sm:$0xf] }
  0x60   :  { %2168 = vmatpush.bf16.msra.mxu0 %v3581_v51  ;;  %v4066_v51 = vld [vmem:[%s6428_s0 + $0x21c] sm:$0xf]  ;;  %v4007_v41 = vld [vmem:[%s6428_s0 + $0x40] sm:$0xf0] }
  0x61   :  { %2192 = vmatpush.bf16.msrb.mxu3 %v2857_v45  ;;  %v2964_v45 = vld [vmem:[%s6428_s0 + $0x1b0] sm:$0xf] }
  0x62   :  { %2206 = vmatpush.bf16.msrb.mxu1 %v3221_v58  ;;  %2219 = vmatpush.bf16.msrb.mxu2 %v3637_v7  ;;  %v3797_v58 = vor.u32 %v4267_v9, %v3796_v46  ;;  %v2965_v59 = vor.u32 %v4059_v34, %v2964_v45  ;;  %v3745_v7 = vor.u32 %v4254_v63, %v3744_v62  ;;  %v3538_v45 = vld [vmem:[%s6428_s0 + $0x65c] sm:$0xf0]  ;;  %v4014_v46 = vld [vmem:[%s6428_s0 + $0x7c] sm:$0xf]  ;;  %v2810_v9 = vld [vmem:[%s6428_s0 + $0xac] sm:$0xf0] }
  0x63   :  { %2169 = vmatmul.bf16.vlgmr.msra.gmra.mxu0 %v4589_v55  ;;  %v3902_v34 = vld [vmem:[%s6428_s0 + $0x934] sm:$0xf0]  ;;  %v3541_v57 = vor.u32 %v4196_v42, %v3538_v45  ;;  %v2813_v62 = vor.u32 %v4014_v46, %v2810_v9  ;;  %v4047_v45 = vld [vmem:[%s6428_s0 + $0x180] sm:$0xf0] }
  0x64   :  { %2233 = vmatpush.bf16.msrb.mxu0 %v2002_v54  ;;  %v3018_v54 = vld [vmem:[%s6428_s0 + $0x24c] sm:$0xf0]  ;;  %v3388_v42 = vld [vmem:[%s6428_s0 + $0x4f8] sm:$0xf] }
  0x65   :  { %2193 = vmatpush.bf16.msrb.mxu3 %v2805_v0  ;;  %v3021_v0 = vor.u32 %v4066_v51, %v3018_v54  ;;  %v2757_v51 = vor.u32 %v4007_v41, %v2756_v40  ;;  %v3128_v54 = vld [vmem:[%s6428_s0 + $0x2f0] sm:$0xf]  ;;  %v3694_v41 = vld [vmem:[%s6428_s0 + $0x794] sm:$0xf0] }
  0x66   :  { %2207 = vmatpush.bf16.msrb.mxu1 %v3169_v13  ;;  %2220 = vmatpush.bf16.msrb.mxu2 %v3585_v23  ;;  %v2969_v13 = vor.u32 %v4053_v3, %v2966_v4  ;;  %v3640_v23 = vld [vmem:[%s6428_s0 + $0x6f8] sm:$0xf]  ;;  %v3129_v3 = vor.u32 %v4099_v56, %v3128_v54  ;;  %v3850_v4 = vld [vmem:[%s6428_s0 + $0x8cc] sm:$0xf0] }
  0x67   :  { %v5314_v9 = vld [vmem:[%s6428_s0 + $0x9d8] sm:$0xff] }
  0x68   :  { %2252 = vmatpush.bf16.msra.mxu0 %v3537_v8  ;;  %v2913_v8 = vor.u32 %v4046_v2, %v2912_v61  ;;  %v3486_v61 = vld [vmem:[%s6428_s0 + $0x5f4] sm:$0xf0]  ;;  %v2758_v2 = vld [vmem:[%s6428_s0 + $0x44] sm:$0xf0] }
  0x69   :  { %2194 = vmatpush.bf16.msrb.mxu3 %v2753_v17  ;;  %2208 = vmatmul.bf16.vlgmr.msrb.gmra.mxu1 %v4600_v60  ;;  %v2914_v17 = vld [vmem:[%s6428_s0 + $0x17c] sm:$0xf0] }
  0x6a   :  { %2265 = vmatpush.bf16.msra.mxu1 %v3953_v18  ;;  %2285 = vmatpush.bf16.msra.mxu2 %v2005_v30  ;;  %v3224_v18 = vld [vmem:[%s6428_s0 + $0x3b8] sm:$0xf]  ;;  %v2917_v25 = vor.u32 %v4040_v16, %v2914_v17  ;;  %v3545_v16 = vor.u32 %v4203_v6, %v3544_v5 }
  0x6b   :  { %2221 = vmatmul.bf16.vlgmr.msrb.gmra.mxu2 %v4589_v55  ;;  %v2862_v30 = vld [vmem:[%s6428_s0 + $0x114] sm:$0xf0] }
  0x6c   :  { %2253 = vmatpush.bf16.msra.mxu0 %v3485_v24  ;;  %2195 = vmatmul.bf16.vlgmr.msrb.gmra.mxu3 %v4587_v53  ;;  %v4228_v24 = vld [vmem:[%s6428_s0 + $0x728] sm:$0xf0]  ;;  %v2865_v38 = vor.u32 %v4027_v29, %v2862_v30  ;;  %v3746_v30 = vld [vmem:[%s6428_s0 + $0x7fc] sm:$0xf0] }
  0x6d   :  { %2239 = vmatpush.bf16.msra.mxu3 %v3121_v19  ;;  %v4124_v19 = vld [vmem:[%s6428_s0 + $0x3e8] sm:$0xf0]  ;;  %v3641_v33 = vor.u32 %v4228_v24, %v3640_v23 }
  0x6e   :  { %2266 = vmatpush.bf16.msra.mxu1 %v3901_v31  ;;  %2291 = vmatpush.bf16.msrb.mxu2 %v3125_v36  ;;  %v3225_v26 = vor.u32 %v4124_v19, %v3224_v18  ;;  %v3172_v31 = vld [vmem:[%s6428_s0 + $0x350] sm:$0xf]  ;;  %v3798_v18 = vld [vmem:[%s6428_s0 + $0x864] sm:$0xf0] }
  0x6f   :  { %v3588_v36 = vld [vmem:[%s6428_s0 + $0x690] sm:$0xf]  ;;  %v3492_v19 = vld [vmem:[%s6428_s0 + $0x5c8] sm:$0xf]  ;;  %v3801_v24 = vor.u32 %v4261_v15, %v3798_v18 }
  0x70   :  { %2254 = vmatpush.bf16.msra.mxu0 %v3433_v37  ;;  %v4215_v37 = vld [vmem:[%s6428_s0 + $0x6c0] sm:$0xf0] }
  0x71   :  { %2240 = vmatpush.bf16.msra.mxu3 %v3069_v32  ;;  %v4111_v32 = vld [vmem:[%s6428_s0 + $0x380] sm:$0xf0] }
  0x72   :  { %2267 = vmatpush.bf16.msra.mxu1 %v3849_v43  ;;  %2292 = vmatpush.bf16.msrb.mxu2 %v3073_v49  ;;  %v3173_v39 = vor.u32 %v4111_v32, %v3172_v31  ;;  %v1667_v43 = vpack.c.b16 %v1342_v28, %v1342_v28  ;;  %v3589_v49 = vor.u32 %v4215_v37, %v3588_v36  ;;  %v3440_v31 = vld [vmem:[%s6428_s0 + $0x560] sm:$0xf]  ;;  %v4177_v32 = vld [vmem:[%s6428_s0 + $0x590] sm:$0xf0]  ;;  %v4144_v36 = vld [vmem:[%s6428_s0 + $0x48c] sm:$0xf] }
  0x73   :  { %3989 = vmatmul.msk.bf16.vlgmr.msrb.gmra.mxu0 %vm1987_vm1, %v4455_v47  ;;  %v3330_v37 = vld [vmem:[%s6428_s0 + $0x4bc] sm:$0xf0] }
  0x74   :  { %2255 = vmatpush.bf16.msra.mxu0 %v3381_v50  ;;  %v4287_v50 = vld [vmem:[%s6428_s0 + $0x904] sm:$0xf]  ;;  %v3333_v46 = vor.u32 %v4144_v36, %v3330_v37  ;;  %v4294_v36 = vld [vmem:[%s6428_s0 + $0x938] sm:$0xf0]  ;;  %v4080_v37 = vld [vmem:[%s6428_s0 + $0x28c] sm:$0xf] }
  0x75   :  { %2241 = vmatpush.bf16.msra.mxu3 %v3017_v44  ;;  %v3957_v44 = vor.u32 %v4300_v48, %v3954_v52  ;;  %v3905_v63 = vor.u32 %v4287_v50, %v3902_v34  ;;  %v4060_v48 = vld [vmem:[%s6428_s0 + $0x1e8] sm:$0xf0]  ;;  %v4131_v50 = vld [vmem:[%s6428_s0 + $0x424] sm:$0xf]  ;;  %v3278_v34 = vld [vmem:[%s6428_s0 + $0x454] sm:$0xf0] }
  0x76   :  { %2268 = vmatpush.bf16.msra.mxu1 %v3797_v58  ;;  %2293 = vmatpush.bf16.msrb.mxu2 %v3021_v0  ;;  %v2008_v58 = vsel %vm1991_vm0, %v1667_v43, 0  ;;  %v4274_v0 = vld [vmem:[%s6428_s0 + $0x89c] sm:$0xf]  ;;  %v4164_v43 = vld [vmem:[%s6428_s0 + $0x528] sm:$0xf0] }
  0x77   :  { %v3853_v12 = vor.u32 %v4274_v0, %v3850_v4  ;;  %v3389_v54 = vor.u32 %v4164_v43, %v3388_v42  ;;  %v3281_v0 = vor.u32 %v4131_v50, %v3278_v34  ;;  %v4209_v4 = vld [vmem:[%s6428_s0 + $0x694] sm:$0xf]  ;;  %v4184_v42 = vld [vmem:[%s6428_s0 + $0x5cc] sm:$0xf]  ;;  %v3180_v43 = vld [vmem:[%s6428_s0 + $0x358] sm:$0xf] }
  0x78   :  { %2256 = vmatpush.bf16.msra.mxu0 %v3329_v1  ;;  %v4001_v1 = vld [vmem:[%s6428_s0 + $0x14] sm:$0xf] }
  0x79   :  { %2242 = vmatpush.bf16.msra.mxu3 %v2965_v59  ;;  %v4183_v59 = vld [vmem:[%s6428_s0 + $0x5c4] sm:$0xf]  ;;  %v2761_v11 = vor.u32 %v4001_v1, %v2758_v2  ;;  %v4118_v2 = vld [vmem:[%s6428_s0 + $0x3bc] sm:$0xf] }
  0x7a   :  { %2269 = vmatpush.bf16.msra.mxu1 %v3745_v7  ;;  %2294 = vmatpush.bf16.msrb.mxu2 %v2969_v13  ;;  %v3076_v7 = vld [vmem:[%s6428_s0 + $0x288] sm:$0xf]  ;;  %v3489_v10 = vor.u32 %v4183_v59, %v3486_v61  ;;  %v4170_v13 = vld [vmem:[%s6428_s0 + $0x55c] sm:$0xf]  ;;  %v4151_v59 = vld [vmem:[%s6428_s0 + $0x4c0] sm:$0xf0] }
  0x7b   :  { %3990 = vmatmul.msk.bf16.vlgmr.msra.gmra.mxu2 %vm1987_vm1, %v4455_v47  ;;  %v2868_v61 = vld [vmem:[%s6428_s0 + $0xe8] sm:$0xf] }
  0x7c   :  { %2257 = vmatpush.bf16.msra.mxu0 %v3277_v14  ;;  %v3434_v14 = vld [vmem:[%s6428_s0 + $0x58c] sm:$0xf0] }
  0x7d   :  { %2243 = vmatpush.bf16.msra.mxu3 %v2913_v8  ;;  %v4086_v8 = vld [vmem:[%s6428_s0 + $0x2b8] sm:$0xf0]  ;;  %v3437_v23 = vor.u32 %v4170_v13, %v3434_v14  ;;  %v4021_v13 = vld [vmem:[%s6428_s0 + $0xb0] sm:$0xf0] }
  0x7e   :  { %2270 = vmatpush.bf16.msra.mxu1 %v3693_v20  ;;  %2295 = vmatpush.bf16.msrb.mxu2 %v2917_v25  ;;  %v3077_v17 = vor.u32 %v4086_v8, %v3076_v7  ;;  %v4190_v20 = vld [vmem:[%s6428_s0 + $0x5f8] sm:$0xf0]  ;;  %v4157_v25 = vld [vmem:[%s6428_s0 + $0x4f4] sm:$0xf]  ;;  %v3590_v7 = vld [vmem:[%s6428_s0 + $0x6c4] sm:$0xf0] }
  0x7f   :  { %v3493_v28 = vor.u32 %v4190_v20, %v3492_v19  ;;  %v3284_v8 = vld [vmem:[%s6428_s0 + $0x428] sm:$0xf]  ;;  %v3593_v18 = vor.u32 %v4209_v4, %v3590_v7  ;;  %v3960_v19 = vld [vmem:[%s6428_s0 + $0x970] sm:$0xf]  ;;  %v4307_v20 = vld [vmem:[%s6428_s0 + $0x9a0] sm:$0xf0] }
  0x80   :  { %2258 = vmatpush.bf16.msra.mxu0 %v3225_v26  ;;  %v3382_v26 = vld [vmem:[%s6428_s0 + $0x524] sm:$0xf0]  ;;  %v3804_v4 = vld [vmem:[%s6428_s0 + $0x838] sm:$0xf]  ;;  %v4054_v7 = vld [vmem:[%s6428_s0 + $0x1bc] sm:$0xf] }
  0x81   :  { %2244 = vmatpush.bf16.msra.mxu3 %v2861_v21  ;;  %v3024_v21 = vld [vmem:[%s6428_s0 + $0x220] sm:$0xf]  ;;  %v3385_v52 = vor.u32 %v4157_v25, %v3382_v26  ;;  %v4093_v25 = vld [vmem:[%s6428_s0 + $0x2f4] sm:$0xf]  ;;  %v3130_v26 = vld [vmem:[%s6428_s0 + $0x324] sm:$0xf0] }
  0x82   :  { %2271 = vmatpush.bf16.msra.mxu1 %v3641_v33  ;;  %2296 = vmatpush.bf16.msrb.mxu2 %v2865_v38  ;;  %v3025_v29 = vor.u32 %v4073_v22, %v3024_v21  ;;  %v2972_v33 = vld [vmem:[%s6428_s0 + $0x1b8] sm:$0xf]  ;;  %v4235_v38 = vld [vmem:[%s6428_s0 + $0x764] sm:$0xf] }
  0x83   :  { %v2973_v40 = vor.u32 %v4060_v48, %v2972_v33  ;;  %v2764_v21 = vld [vmem:[%s6428_s0 + $0x18] sm:$0xf]  ;;  %v3961_v33 = vor.u32 %v4307_v20, %v3960_v19  ;;  %v3133_v48 = vor.u32 %v4093_v25, %v3130_v26  ;;  %v3752_v20 = vld [vmem:[%s6428_s0 + $0x7d0] sm:$0xf]  ;;  %v4145_v26 = vld [vmem:[%s6428_s0 + $0x494] sm:$0xf] }
  0x84   :  { %2259 = vmatpush.bf16.msra.mxu0 %v3173_v39  ;;  %v3441_v39 = vor.u32 %v4177_v32, %v3440_v31  ;;  %v4197_v31 = vld [vmem:[%s6428_s0 + $0x634] sm:$0xf]  ;;  %v3546_v32 = vld [vmem:[%s6428_s0 + $0x664] sm:$0xf0] }
  0x85   :  { %2245 = vmatpush.bf16.msra.mxu3 %v2809_v35  ;;  %v3749_v35 = vor.u32 %v4248_v27, %v3746_v30 }
  0x86   :  { %2272 = vmatpush.bf16.msra.mxu1 %v3589_v49  ;;  %2297 = vmatpush.bf16.msrb.mxu2 %v2813_v62  ;;  %v3697_v49 = vor.u32 %v4235_v38, %v3694_v41  ;;  %v4034_v62 = vld [vmem:[%s6428_s0 + $0x118] sm:$0xf0]  ;;  %v3078_v38 = vld [vmem:[%s6428_s0 + $0x2bc] sm:$0xf0]  ;;  %v3549_v41 = vor.u32 %v4197_v31, %v3546_v32 }
  0x87   :  { %2260 = vmatmul.bf16.vlgmr.msra.gmra.mxu0 %v4600_v60  ;;  %v2869_v6 = vor.u32 %v4034_v62, %v2868_v61  ;;  %v3081_v34 = vor.u32 %v4080_v37, %v3078_v38  ;;  %v4171_v61 = vld [vmem:[%s6428_s0 + $0x564] sm:$0xf]  ;;  %v2870_v37 = vld [vmem:[%s6428_s0 + $0x11c] sm:$0xf0] }
  0x88   :  { %2317 = vmatpush.bf16.msrb.mxu0 %v3957_v44  ;;  %v2920_v44 = vld [vmem:[%s6428_s0 + $0x150] sm:$0xf] }
  0x89   :  { %2246 = vmatpush.bf16.msra.mxu3 %v2757_v51  ;;  %2273 = vmatmul.bf16.vlgmr.msra.gmra.mxu1 %v4589_v55  ;;  %v4222_v51 = vld [vmem:[%s6428_s0 + $0x6fc] sm:$0xf]  ;;  %v2921_v56 = vor.u32 %v4047_v45, %v2920_v44  ;;  %v4112_v44 = vld [vmem:[%s6428_s0 + $0x388] sm:$0xf0]  ;;  %v3494_v45 = vld [vmem:[%s6428_s0 + $0x5fc] sm:$0xf0] }
  0x8a   :  { %2337 = vmatpush.bf16.msrb.mxu1 %v2008_v58  ;;  %2298 = vmatpush.bf16.msrb.mxu2 %v2761_v11  ;;  %v3336_v58 = vld [vmem:[%s6428_s0 + $0x490] sm:$0xf] }
  0x8b   :  { %v3337_v5 = vor.u32 %v4151_v59, %v3336_v58  ;;  %v3181_v58 = vor.u32 %v4112_v44, %v3180_v43  ;;  %v3497_v59 = vor.u32 %v4184_v42, %v3494_v45  ;;  %v3286_v43 = vld [vmem:[%s6428_s0 + $0x45c] sm:$0xf0]  ;;  %v4249_v44 = vld [vmem:[%s6428_s0 + $0x7d4] sm:$0xf]  ;;  %v3754_v45 = vld [vmem:[%s6428_s0 + $0x804] sm:$0xf0] }
  0x8c   :  { %2318 = vmatpush.bf16.msrb.mxu0 %v3905_v63  ;;  %2247 = vmatmul.bf16.vlgmr.msra.gmra.mxu3 %v4587_v53  ;;  %v1343_v63 = vunpack.c.l.b16 %v5314_v9 }
  0x8d   :  { %2304 = vmatpush.bf16.msrb.mxu3 %v3541_v57  ;;  %2299 = vmatmul.bf16.vlgmr.msrb.gmra.mxu2 %v4587_v53  ;;  %v3642_v57 = vld [vmem:[%s6428_s0 + $0x72c] sm:$0xf0] }
  0x8e   :  { %2343 = vmatpush.bf16.msra.mxu1 %v3129_v3  ;;  %2356 = vmatpush.bf16.msra.mxu2 %v3545_v16  ;;  %v3645_v1 = vor.u32 %v4222_v51, %v3642_v57  ;;  %v3226_v3 = vld [vmem:[%s6428_s0 + $0x3ec] sm:$0xf0]  ;;  %v1668_v14 = vpack.c.b16 %v1343_v63, %v1343_v63  ;;  %v4105_v16 = vld [vmem:[%s6428_s0 + $0x354] sm:$0xf]  ;;  %v3856_v51 = vld [vmem:[%s6428_s0 + $0x8a0] sm:$0xf] }
  0x8f   :  { %v3229_v15 = vor.u32 %v4118_v2, %v3226_v3  ;;  %v3026_v57 = vld [vmem:[%s6428_s0 + $0x254] sm:$0xf0] }
  0x90   :  { %2319 = vmatpush.bf16.msrb.mxu0 %v3853_v12  ;;  %v2816_v12 = vld [vmem:[%s6428_s0 + $0x80] sm:$0xf]  ;;  %v2011_v27 = vsel %vm1991_vm0, %v1668_v14, 0  ;;  %v3442_v63 = vld [vmem:[%s6428_s0 + $0x594] sm:$0xf0] }
  0x91   :  { %2305 = vmatpush.bf16.msrb.mxu3 %v3489_v10  ;;  %v4138_v10 = vld [vmem:[%s6428_s0 + $0x458] sm:$0xf0]  ;;  %v5359_v11 = vpop.f32.mrf.mxu3 }
  0x92   :  { %2344 = vmatpush.bf16.msra.mxu1 %v3077_v17  ;;  %2357 = vmatpush.bf16.msra.mxu2 %v3493_v28  ;;  %v3174_v17 = vld [vmem:[%s6428_s0 + $0x384] sm:$0xf0]  ;;  %v3285_v22 = vor.u32 %v4138_v10, %v3284_v8  ;;  %v3232_v28 = vld [vmem:[%s6428_s0 + $0x3c0] sm:$0xf]  ;;  %v2974_v8 = vld [vmem:[%s6428_s0 + $0x1ec] sm:$0xf0]  ;;  %v3445_v10 = vor.u32 %v4171_v61, %v3442_v63  ;;  %v1344_v61 = vunpack.c.h.b16 %v5314_v9 }
  0x93   :  { %v3177_v30 = vor.u32 %v4105_v16, %v3174_v17  ;;  %v4275_v16 = vld [vmem:[%s6428_s0 + $0x8a4] sm:$0xf]  ;;  %v3858_v17 = vld [vmem:[%s6428_s0 + $0x8d4] sm:$0xf0]  ;;  %v2977_v19 = vor.u32 %v4054_v7, %v2974_v8  ;;  %v4236_v63 = vld [vmem:[%s6428_s0 + $0x76c] sm:$0xf] }
  0x94   :  { %2320 = vmatpush.bf16.msrb.mxu0 %v3801_v24  ;;  %v4008_v24 = vld [vmem:[%s6428_s0 + $0x48] sm:$0xf0]  ;;  %v3596_v9 = vld [vmem:[%s6428_s0 + $0x698] sm:$0xf]  ;;  %v5581_v7 = vld [vmem:[%s6428_s0 + $0x9e0] sm:$0xff] }
  0x95   :  { %2306 = vmatpush.bf16.msrb.mxu3 %v3437_v23  ;;  %v2817_v23 = vor.u32 %v4021_v13, %v2816_v12  ;;  %v4158_v12 = vld [vmem:[%s6428_s0 + $0x4fc] sm:$0xf] }
  0x96   :  { %2345 = vmatpush.bf16.msra.mxu1 %v3025_v29  ;;  %2358 = vmatpush.bf16.msra.mxu2 %v3441_v39  ;;  %v4125_v29 = vld [vmem:[%s6428_s0 + $0x3f0] sm:$0xf0] }
  0x97   :  { %v3233_v39 = vor.u32 %v4125_v29, %v3232_v28  ;;  %v3338_v28 = vld [vmem:[%s6428_s0 + $0x4c4] sm:$0xf0]  ;;  %v4262_v29 = vld [vmem:[%s6428_s0 + $0x83c] sm:$0xf] }
  0x98   :  { %2321 = vmatpush.bf16.msrb.mxu0 %v3749_v35  ;;  %v2765_v35 = vor.u32 %v4008_v24, %v2764_v21  ;;  %v2922_v24 = vld [vmem:[%s6428_s0 + $0x184] sm:$0xf0] }
  0x99   :  { %2307 = vmatpush.bf16.msrb.mxu3 %v3385_v52  ;;  %3991 = vmatmul.msk.bf16.vlgmr.msrb.gmra.mxu1 %vm1987_vm1, %v4455_v47  ;;  %v3908_v52 = vld [vmem:[%s6428_s0 + $0x908] sm:$0xf] }
  0x9a   :  { %2346 = vmatpush.bf16.msra.mxu1 %v2973_v40  ;;  %2359 = vmatpush.bf16.msra.mxu2 %v3389_v54  ;;  %v2081_v40 = vpop.f32.mrf.mxu3  ;;  %v3909_v50 = vor.u32 %v4294_v36, %v3908_v52  ;;  %v4281_v54 = vld [vmem:[%s6428_s0 + $0x8d0] sm:$0xf0]  ;;  %v4028_v36 = vld [vmem:[%s6428_s0 + $0xec] sm:$0xf] }
  0x9b   :  { %v3857_v2 = vor.u32 %v4281_v54, %v3856_v51  ;;  %v4132_v40 = vld [vmem:[%s6428_s0 + $0x42c] sm:$0xf]  ;;  %v4015_v51 = vld [vmem:[%s6428_s0 + $0x84] sm:$0xf]  ;;  %v2818_v54 = vld [vmem:[%s6428_s0 + $0xb4] sm:$0xf0] }
  0x9c   :  { %2322 = vmatpush.bf16.msrb.mxu0 %v3697_v49  ;;  %v3962_v49 = vld [vmem:[%s6428_s0 + $0x9a4] sm:$0xf0] }
  0x9d   :  { %2308 = vmatpush.bf16.msrb.mxu3 %v3333_v46  ;;  %v4301_v46 = vld [vmem:[%s6428_s0 + $0x974] sm:$0xf] }
  0x9e   :  { %2347 = vmatpush.bf16.msra.mxu1 %v2921_v56  ;;  %2360 = vmatpush.bf16.msra.mxu2 %v3337_v5  ;;  %v4067_v56 = vld [vmem:[%s6428_s0 + $0x224] sm:$0xf]  ;;  %v3965_v62 = vor.u32 %v4301_v46, %v3962_v49 }
  0x9f   :  { %v3029_v3 = vor.u32 %v4067_v56, %v3026_v57  ;;  %v3289_v57 = vor.u32 %v4132_v40, %v3286_v43 }
  0xa0   :  { %2323 = vmatpush.bf16.msrb.mxu0 %v3645_v1  ;;  %v3910_v1 = vld [vmem:[%s6428_s0 + $0x93c] sm:$0xf0]  ;;  %v2040_v5 = vpop.f32.mrf.mxu0 }
  0xa1   :  { %2309 = vmatpush.bf16.msrb.mxu3 %v3281_v0  ;;  %v4288_v0 = vld [vmem:[%s6428_s0 + $0x90c] sm:$0xf] }
  0xa2   :  { %2348 = vmatpush.bf16.msra.mxu1 %v2869_v6  ;;  %2361 = vmatpush.bf16.msra.mxu2 %v3285_v22  ;;  %v4268_v6 = vld [vmem:[%s6428_s0 + $0x868] sm:$0xf0]  ;;  %v3913_v13 = vor.u32 %v4288_v0, %v3910_v1  ;;  %v2053_v14 = vpop.f32.mrf.mxu1  ;;  %v4255_v22 = vld [vmem:[%s6428_s0 + $0x800] sm:$0xf0]  ;;  %v3702_v0 = vld [vmem:[%s6428_s0 + $0x79c] sm:$0xf0] }
  0xa3   :  { %v2054_v21 = vadd.f32 %v2053_v14, %v2040_v5  ;;  %v3753_v32 = vor.u32 %v4255_v22, %v3752_v20  ;;  %v4002_v5 = vld [vmem:[%s6428_s0 + $0x1c] sm:$0xf]  ;;  %v4204_v14 = vld [vmem:[%s6428_s0 + $0x668] sm:$0xf0]  ;;  %v3968_v22 = vld [vmem:[%s6428_s0 + $0x978] sm:$0xf] }
  0xa4   :  { %2324 = vmatpush.bf16.msrb.mxu0 %v3593_v18  ;;  %v3805_v18 = vor.u32 %v4268_v6, %v3804_v4  ;;  %v2766_v6 = vld [vmem:[%s6428_s0 + $0x4c] sm:$0xf0] }
  0xa5   :  { %2310 = vmatpush.bf16.msrb.mxu3 %v3229_v15  ;;  %v3390_v15 = vld [vmem:[%s6428_s0 + $0x52c] sm:$0xf0] }
  0xa6   :  { %2349 = vmatpush.bf16.msra.mxu1 %v2817_v23  ;;  %2362 = vmatpush.bf16.msra.mxu2 %v3233_v39  ;;  %v4041_v23 = vld [vmem:[%s6428_s0 + $0x154] sm:$0xf]  ;;  %v3393_v25 = vor.u32 %v4158_v12, %v3390_v15  ;;  %v3341_v39 = vor.u32 %v4145_v26, %v3338_v28  ;;  %v1669_v12 = vpack.c.b16 %v1344_v61, %v1344_v61  ;;  %v3136_v26 = vld [vmem:[%s6428_s0 + $0x2f8] sm:$0xf]  ;;  %v4074_v61 = vld [vmem:[%s6428_s0 + $0x258] sm:$0xf0] }
  0xa7   :  { %2325 = vmatmul.bf16.vlgmr.msrb.gmra.mxu0 %v4589_v55  ;;  %v2066_v31 = vpop.f32.mrf.mxu2  ;;  %v3705_v15 = vor.u32 %v4236_v63, %v3702_v0  ;;  %v4165_v63 = vld [vmem:[%s6428_s0 + $0x530] sm:$0xf0] }
  0xa8   :  { %2389 = vmatpush.bf16.msra.mxu0 %v2011_v27  ;;  %v3861_v27 = vor.u32 %v4275_v16, %v3858_v17  ;;  %v2067_v52 = vadd.f32 %v2066_v31, %v2054_v21  ;;  %v2042_v38 = vpop.f32.mrf.mxu0  ;;  %v3182_v17 = vld [vmem:[%s6428_s0 + $0x38c] sm:$0xf0]  ;;  %v2769_v21 = vor.u32 %v4002_v5, %v2766_v6 }
  0xa9   :  { %2311 = vmatpush.bf16.msrb.mxu3 %v3177_v30  ;;  %v3806_v30 = vld [vmem:[%s6428_s0 + $0x86c] sm:$0xf0]  ;;  %v4295_v38 = vld [vmem:[%s6428_s0 + $0x940] sm:$0xf0] }
  0xaa   :  { %2350 = vmatpush.bf16.msra.mxu1 %v2765_v35  ;;  %2363 = vmatpush.bf16.msra.mxu2 %v3181_v58  ;;  %v4242_v35 = vld [vmem:[%s6428_s0 + $0x798] sm:$0xf0]  ;;  %v2080_v42 = vadd.f32 %v5359_v11, %v2067_v52  ;;  %v2055_v46 = vpop.f32.mrf.mxu1  ;;  %v2873_v11 = vor.u32 %v4028_v36, %v2870_v37  ;;  %v4119_v58 = vld [vmem:[%s6428_s0 + $0x3c4] sm:$0xf]  ;;  %v3500_v31 = vld [vmem:[%s6428_s0 + $0x5d0] sm:$0xf] }
  0xab   :  { %v4210_v52 = vld [vmem:[%s6428_s0 + $0x69c] sm:$0xf]  ;;  %v3916_v37 = vld [vmem:[%s6428_s0 + $0x910] sm:$0xf] }
  0xac   :  { %2395 = vmatpush.bf16.msrb.mxu0 %v3133_v48  ;;  %2312 = vmatmul.bf16.vlgmr.msrb.gmra.mxu3 %v4600_v60  ;;  %v3700_v48 = vld [vmem:[%s6428_s0 + $0x768] sm:$0xf]  ;;  %4311 = vtanh.f32 %v2080_v42  ;;  %v4087_v42 = vld [vmem:[%s6428_s0 + $0x2c0] sm:$0xf0] }
  0xad   :  { %2369 = vmatpush.bf16.msra.mxu3 %v3961_v33  ;;  %2351 = vmatmul.bf16.vlgmr.msra.gmra.mxu1 %v4587_v53  ;;  %v2925_v33 = vor.u32 %v4041_v23, %v2922_v24  ;;  %v3701_v49 = vor.u32 %v4242_v35, %v3700_v48  ;;  %v4308_v23 = vld [vmem:[%s6428_s0 + $0x9a8] sm:$0xf0]  ;;  %v1345_v24 = vunpack.c.l.b16 %v5581_v7  ;;  %v3598_v35 = vld [vmem:[%s6428_s0 + $0x6cc] sm:$0xf0] }
  0xae   :  { %2408 = vmatpush.bf16.msrb.mxu1 %v3549_v41  ;;  %2421 = vmatpush.bf16.msrb.mxu2 %v3965_v62  ;;  %v3809_v41 = vor.u32 %v4262_v29, %v3806_v30  ;;  %v3234_v62 = vld [vmem:[%s6428_s0 + $0x3f4] sm:$0xf0]  ;;  %v2014_v30 = vsel %vm1991_vm0, %v1669_v12, 0  ;;  %v3969_v48 = vor.u32 %v4308_v23, %v3968_v22  ;;  %v3601_v46 = vor.u32 %v4210_v52, %v3598_v35 }
  0xaf   :  { %2364 = vmatmul.bf16.vlgmr.msra.gmra.mxu2 %v4600_v60  ;;  %v5551_v56 = vpop.f32.mrf.mxu3  ;;  %v2068_v4 = vpop.f32.mrf.mxu2  ;;  %v3237_v8 = vor.u32 %v4119_v58, %v3234_v62  ;;  %v3396_v62 = vld [vmem:[%s6428_s0 + $0x500] sm:$0xf] }
  0xb0   :  { %2396 = vmatpush.bf16.msrb.mxu0 %v3081_v34  ;;  %v4229_v34 = vld [vmem:[%s6428_s0 + $0x730] sm:$0xf0]  ;;  %v3397_v12 = vor.u32 %v4165_v63, %v3396_v62  ;;  %v1346_v62 = vunpack.c.h.b16 %v5581_v7  ;;  %v3188_v63 = vld [vmem:[%s6428_s0 + $0x360] sm:$0xf]  ;;  %v3970_v7 = vld [vmem:[%s6428_s0 + $0x9ac] sm:$0xf0] }
  0xb1   :  { %2370 = vmatpush.bf16.msra.mxu3 %v3909_v50  ;;  %v3648_v50 = vld [vmem:[%s6428_s0 + $0x700] sm:$0xf] }
  0xb2   :  { %2409 = vmatpush.bf16.msrb.mxu1 %v3497_v59  ;;  %2422 = vmatpush.bf16.msrb.mxu2 %v3913_v13  ;;  %v3757_v59 = vor.u32 %v4249_v44, %v3754_v45  ;;  %v3649_v1 = vor.u32 %v4229_v34, %v3648_v50  ;;  %v3552_v13 = vld [vmem:[%s6428_s0 + $0x638] sm:$0xf]  ;;  %v4312_v16 = vpop.eup %4311  ;;  %v3448_v44 = vld [vmem:[%s6428_s0 + $0x568] sm:$0xf]  ;;  %v4178_v45 = vld [vmem:[%s6428_s0 + $0x598] sm:$0xf0] }
  0xb3   :  { %2720 = vst [vmem:[%s6430_s2] sm:$0xff] %v4312_v16  ;;  %v3138_v50 = vld [vmem:[%s6428_s0 + $0x32c] sm:$0xf0]  ;;  %v3449_v58 = vor.u32 %v4178_v45, %v3448_v44  ;;  %v4152_v16 = vld [vmem:[%s6428_s0 + $0x4c8] sm:$0xf0] }
  0xb4   :  { %2397 = vmatpush.bf16.msrb.mxu0 %v3029_v3  ;;  %v4216_v3 = vld [vmem:[%s6428_s0 + $0x6c8] sm:$0xf0] }
  0xb5   :  { %2371 = vmatpush.bf16.msra.mxu3 %v3857_v2  ;;  %v2821_v2 = vor.u32 %v4015_v51, %v2818_v54  ;;  %v3597_v20 = vor.u32 %v4216_v3, %v3596_v9  ;;  %v3864_v51 = vld [vmem:[%s6428_s0 + $0x8a8] sm:$0xf]  ;;  %v4282_v54 = vld [vmem:[%s6428_s0 + $0x8d8] sm:$0xf0]  ;;  %v4081_v9 = vld [vmem:[%s6428_s0 + $0x294] sm:$0xf] }
  0xb6   :  { %2410 = vmatpush.bf16.msrb.mxu1 %v3445_v10  ;;  %2423 = vmatpush.bf16.msrb.mxu2 %v3861_v27  ;;  %v4106_v10 = vld [vmem:[%s6428_s0 + $0x35c] sm:$0xf]  ;;  %v4100_v27 = vld [vmem:[%s6428_s0 + $0x328] sm:$0xf0]  ;;  %v3086_v3 = vld [vmem:[%s6428_s0 + $0x2c4] sm:$0xf0] }
  0xb7   :  { %3992 = vmatmul.msk.bf16.vlgmr.msra.gmra.mxu0 %vm1987_vm1, %v4455_v47  ;;  %v2094_v28 = vpop.f32.mrf.mxu3  ;;  %v3185_v29 = vor.u32 %v4106_v10, %v3182_v17  ;;  %v3137_v36 = vor.u32 %v4100_v27, %v3136_v26  ;;  %v2131_v43 = vpop.f32.mrf.mxu2  ;;  %v4269_v10 = vld [vmem:[%s6428_s0 + $0x870] sm:$0xf0]  ;;  %v2928_v27 = vld [vmem:[%s6428_s0 + $0x158] sm:$0xf] }
  0xb8   :  { %2398 = vmatpush.bf16.msrb.mxu0 %v2977_v19  ;;  %v3650_v19 = vld [vmem:[%s6428_s0 + $0x734] sm:$0xf0]  ;;  %v4048_v28 = vld [vmem:[%s6428_s0 + $0x188] sm:$0xf0] }
  0xb9   :  { %2372 = vmatpush.bf16.msra.mxu3 %v3805_v18  ;;  %v4223_v18 = vld [vmem:[%s6428_s0 + $0x704] sm:$0xf] }
  0xba   :  { %2411 = vmatpush.bf16.msrb.mxu1 %v3393_v25  ;;  %2424 = vmatpush.bf16.msrb.mxu2 %v3809_v41  ;;  %v3553_v25 = vor.u32 %v4204_v14, %v3552_v13  ;;  %v3084_v41 = vld [vmem:[%s6428_s0 + $0x290] sm:$0xf]  ;;  %v2980_v13 = vld [vmem:[%s6428_s0 + $0x1c0] sm:$0xf] }
  0xbb   :  { %v3085_v34 = vor.u32 %v4087_v42, %v3084_v41  ;;  %v4035_v41 = vld [vmem:[%s6428_s0 + $0x120] sm:$0xf0]  ;;  %v3240_v42 = vld [vmem:[%s6428_s0 + $0x3c8] sm:$0xf] }
  0xbc   :  { %2399 = vmatpush.bf16.msrb.mxu0 %v2925_v33  ;;  %v3653_v33 = vor.u32 %v4223_v18, %v3650_v19  ;;  %v3089_v18 = vor.u32 %v4081_v9, %v3086_v3  ;;  %v4029_v3 = vld [vmem:[%s6428_s0 + $0xf4] sm:$0xf] }
  0xbd   :  { %2373 = vmatpush.bf16.msra.mxu3 %v3753_v32  ;;  %v4191_v32 = vld [vmem:[%s6428_s0 + $0x600] sm:$0xf0] }
  0xbe   :  { %2412 = vmatpush.bf16.msrb.mxu1 %v3341_v39  ;;  %2425 = vmatpush.bf16.msrb.mxu2 %v3757_v59  ;;  %v1670_v39 = vpack.c.b16 %v1345_v24, %v1345_v24  ;;  %v3501_v40 = vor.u32 %v4191_v32, %v3500_v31  ;;  %v3032_v59 = vld [vmem:[%s6428_s0 + $0x228] sm:$0xf]  ;;  %v3760_v24 = vld [vmem:[%s6428_s0 + $0x7d8] sm:$0xf] }
  0xbf   :  { %v3033_v5 = vor.u32 %v4074_v61, %v3032_v59  ;;  %v2133_v14 = vpop.f32.mrf.mxu2  ;;  %v2824_v59 = vld [vmem:[%s6428_s0 + $0x88] sm:$0xf]  ;;  %v4022_v61 = vld [vmem:[%s6428_s0 + $0xb8] sm:$0xf0] }
  0xc0   :  { %2400 = vmatpush.bf16.msrb.mxu0 %v2873_v11  ;;  %v4094_v11 = vld [vmem:[%s6428_s0 + $0x2fc] sm:$0xf]  ;;  %v1671_v14 = vpack.c.b16 %v1346_v62, %v1346_v62 }
  0xc1   :  { %2374 = vmatpush.bf16.msra.mxu3 %v3701_v49  ;;  %v3917_v49 = vor.u32 %v4295_v38, %v3916_v37  ;;  %v3141_v0 = vor.u32 %v4094_v11, %v3138_v50  ;;  %v3708_v37 = vld [vmem:[%s6428_s0 + $0x770] sm:$0xf]  ;;  %v4243_v38 = vld [vmem:[%s6428_s0 + $0x7a0] sm:$0xf0] }
  0xc2   :  { %2413 = vmatpush.bf16.msrb.mxu1 %v3289_v57  ;;  %2426 = vmatpush.bf16.msrb.mxu2 %v3705_v15  ;;  %v2017_v57 = vsel %vm1991_vm0, %v1670_v39, 0  ;;  %v2118_v4 = vpop.f32.mrf.mxu1  ;;  %v3344_v15 = vld [vmem:[%s6428_s0 + $0x498] sm:$0xf]  ;;  %v2930_v11 = vld [vmem:[%s6428_s0 + $0x18c] sm:$0xf0] }
  0xc3   :  { %v3345_v26 = vor.u32 %v4152_v16, %v3344_v15  ;;  %v4198_v16 = vld [vmem:[%s6428_s0 + $0x63c] sm:$0xf] }
  0xc4   :  { %2401 = vmatpush.bf16.msrb.mxu0 %v2821_v2  ;;  %v2105_v2 = vpop.f32.mrf.mxu0 }
  0xc5   :  { %2375 = vmatpush.bf16.msra.mxu3 %v3649_v1  ;;  %v3865_v1 = vor.u32 %v4282_v54, %v3864_v51  ;;  %v2106_v6 = vadd.f32 %v2105_v2, %v5551_v56  ;;  %v4061_v56 = vld [vmem:[%s6428_s0 + $0x1f0] sm:$0xf0]  ;;  %v3656_v54 = vld [vmem:[%s6428_s0 + $0x708] sm:$0xf]  ;;  %v4302_v2 = vld [vmem:[%s6428_s0 + $0x97c] sm:$0xf] }
  0xc6   :  { %2414 = vmatpush.bf16.msrb.mxu1 %v3237_v8  ;;  %2427 = vmatpush.bf16.msrb.mxu2 %v3653_v33  ;;  %v3812_v8 = vld [vmem:[%s6428_s0 + $0x840] sm:$0xf]  ;;  %v2981_v22 = vor.u32 %v4061_v56, %v2980_v13  ;;  %v4055_v33 = vld [vmem:[%s6428_s0 + $0x1c4] sm:$0xf]  ;;  %v4009_v56 = vld [vmem:[%s6428_s0 + $0x50] sm:$0xf0]  ;;  %v3973_v15 = vor.u32 %v4302_v2, %v3970_v7 }
  0xc7   :  { %v2119_v17 = vadd.f32 %v2118_v4, %v2106_v6  ;;  %v3813_v19 = vor.u32 %v4269_v10, %v3812_v8  ;;  %v2878_v4 = vld [vmem:[%s6428_s0 + $0x124] sm:$0xf0]  ;;  %v3604_v6 = vld [vmem:[%s6428_s0 + $0x6a0] sm:$0xf]  ;;  %v4217_v8 = vld [vmem:[%s6428_s0 + $0x6d0] sm:$0xf0] }
  0xc8   :  { %2402 = vmatpush.bf16.msrb.mxu0 %v2769_v21  ;;  %v3034_v21 = vld [vmem:[%s6428_s0 + $0x25c] sm:$0xf0]  ;;  %v3508_v7 = vld [vmem:[%s6428_s0 + $0x5d8] sm:$0xf] }
  0xc9   :  { %2376 = vmatpush.bf16.msra.mxu3 %v3597_v20  ;;  %v4068_v20 = vld [vmem:[%s6428_s0 + $0x22c] sm:$0xf]  ;;  %v2132_v23 = vadd.f32 %v2131_v43, %v2119_v17  ;;  %v4126_v43 = vld [vmem:[%s6428_s0 + $0x3f8] sm:$0xf0]  ;;  %v2772_v13 = vld [vmem:[%s6428_s0 + $0x20] sm:$0xf] }
  0xca   :  { %2415 = vmatpush.bf16.msrb.mxu1 %v3185_v29  ;;  %2428 = vmatpush.bf16.msrb.mxu2 %v3601_v46  ;;  %v3292_v29 = vld [vmem:[%s6428_s0 + $0x430] sm:$0xf]  ;;  %v3037_v31 = vor.u32 %v4068_v20, %v3034_v21  ;;  %v2120_v35 = vpop.f32.mrf.mxu1  ;;  %v3709_v46 = vor.u32 %v4243_v38, %v3708_v37  ;;  %v3605_v20 = vor.u32 %v4217_v8, %v3604_v6  ;;  %v4289_v21 = vld [vmem:[%s6428_s0 + $0x914] sm:$0xf]  ;;  %v3092_v37 = vld [vmem:[%s6428_s0 + $0x298] sm:$0xf] }
  0xcb   :  { %2403 = vmatmul.bf16.vlgmr.msrb.gmra.mxu0 %v4587_v53  ;;  %4313 = vtanh.f32 %v2132_v23  ;;  %v3554_v17 = vld [vmem:[%s6428_s0 + $0x66c] sm:$0xf0]  ;;  %v3866_v35 = vld [vmem:[%s6428_s0 + $0x8dc] sm:$0xf0]  ;;  %v4088_v38 = vld [vmem:[%s6428_s0 + $0x2c8] sm:$0xf0] }
  0xcc   :  { %2460 = vmatpush.bf16.msra.mxu0 %v3553_v25  ;;  %2377 = vmatmul.bf16.vlgmr.msra.gmra.mxu3 %v4589_v55  ;;  %v4256_v25 = vld [vmem:[%s6428_s0 + $0x808] sm:$0xf0]  ;;  %v2107_v52 = vpop.f32.mrf.mxu0  ;;  %v5760_v50 = vpop.f32.mrf.mxu2  ;;  %v3762_v6 = vld [vmem:[%s6428_s0 + $0x80c] sm:$0xf0]  ;;  %v2988_v8 = vld [vmem:[%s6428_s0 + $0x1c8] sm:$0xf] }
  0xcd   :  { %2441 = vmatpush.bf16.msrb.mxu3 %v2014_v30  ;;  %2416 = vmatmul.bf16.vlgmr.msrb.gmra.mxu1 %v4600_v60  ;;  %v4139_v30 = vld [vmem:[%s6428_s0 + $0x460] sm:$0xf0]  ;;  %v3761_v32 = vor.u32 %v4256_v25, %v3760_v24  ;;  %v2773_v24 = vor.u32 %v4009_v56, %v2772_v13  ;;  %v3144_v25 = vld [vmem:[%s6428_s0 + $0x300] sm:$0xf]  ;;  %v4276_v52 = vld [vmem:[%s6428_s0 + $0x8ac] sm:$0xf] }
  0xce   :  { %2473 = vmatpush.bf16.msra.mxu1 %v3969_v48  ;;  %2493 = vmatpush.bf16.msra.mxu2 %v2017_v57  ;;  %v2982_v48 = vld [vmem:[%s6428_s0 + $0x1f4] sm:$0xf0]  ;;  %v3293_v39 = vor.u32 %v4139_v30, %v3292_v29  ;;  %v4230_v57 = vld [vmem:[%s6428_s0 + $0x738] sm:$0xf0]  ;;  %v4016_v29 = vld [vmem:[%s6428_s0 + $0x8c] sm:$0xf] }
  0xcf   :  { %2429 = vmatmul.bf16.vlgmr.msrb.gmra.mxu2 %v4589_v55  ;;  %v2985_v44 = vor.u32 %v4055_v33, %v2982_v48  ;;  %v5750_v45 = vpop.f32.mrf.mxu3  ;;  %v3657_v9 = vor.u32 %v4230_v57, %v3656_v54  ;;  %v2826_v30 = vld [vmem:[%s6428_s0 + $0xbc] sm:$0xf0]  ;;  %v3502_v33 = vld [vmem:[%s6428_s0 + $0x604] sm:$0xf0]  ;;  %v3814_v54 = vld [vmem:[%s6428_s0 + $0x874] sm:$0xf0] }
  0xd0   :  { %2461 = vmatpush.bf16.msra.mxu0 %v3501_v40  ;;  %v2876_v40 = vld [vmem:[%s6428_s0 + $0xf0] sm:$0xf]  ;;  %v4146_v13 = vld [vmem:[%s6428_s0 + $0x49c] sm:$0xf] }
  0xd1   :  { %2447 = vmatpush.bf16.msra.mxu3 %v3137_v36  ;;  %v2929_v36 = vor.u32 %v4048_v28, %v2928_v27  ;;  %v2877_v51 = vor.u32 %v4035_v41, %v2876_v40  ;;  %v3557_v27 = vor.u32 %v4198_v16, %v3554_v17  ;;  %v2020_v28 = vsel %vm1991_vm0, %v1671_v14, 0  ;;  %v3346_v16 = vld [vmem:[%s6428_s0 + $0x4cc] sm:$0xf0] }
  0xd2   :  { %2474 = vmatpush.bf16.msra.mxu1 %v3917_v49  ;;  %2499 = vmatpush.bf16.msrb.mxu2 %v3141_v0  ;;  %v4042_v49 = vld [vmem:[%s6428_s0 + $0x15c] sm:$0xf]  ;;  %v4113_v0 = vld [vmem:[%s6428_s0 + $0x390] sm:$0xf0]  ;;  %v5802_v10 = vpop.f32.mrf.mxu1  ;;  %v3456_v17 = vld [vmem:[%s6428_s0 + $0x570] sm:$0xf] }
  0xd4   :  { %2462 = vmatpush.bf16.msra.mxu0 %v3449_v58  ;;  %v3241_v58 = vor.u32 %v4126_v43, %v3240_v42  ;;  %v2159_v23 = vpop.f32.mrf.mxu2  ;;  %v4172_v42 = vld [vmem:[%s6428_s0 + $0x56c] sm:$0xf]  ;;  %v4003_v43 = vld [vmem:[%s6428_s0 + $0x24] sm:$0xf] }
  0xd5   :  { %2448 = vmatpush.bf16.msra.mxu3 %v3085_v34  ;;  %v4314_v34 = vpop.eup %4313  ;;  %v2936_v23 = vld [vmem:[%s6428_s0 + $0x160] sm:$0xf] }
  0xd6   :  { %2475 = vmatpush.bf16.msra.mxu1 %v3865_v1  ;;  %2500 = vmatpush.bf16.msrb.mxu2 %v3089_v18  ;;  %2721 = vst [vmem:[%s6430_s2 + $0x8] sm:$0xff] %v4314_v34  ;;  %v2933_v1 = vor.u32 %v4042_v49, %v2930_v11  ;;  %v2881_v18 = vor.u32 %v4029_v3, %v2878_v4  ;;  %v3560_v49 = vld [vmem:[%s6428_s0 + $0x640] sm:$0xf]  ;;  %v4205_v11 = vld [vmem:[%s6428_s0 + $0x670] sm:$0xf0] }
  0xd7   :  { %v3093_v34 = vor.u32 %v4088_v38, %v3092_v37  ;;  %v4192_v3 = vld [vmem:[%s6428_s0 + $0x608] sm:$0xf0]  ;;  %v2884_v37 = vld [vmem:[%s6428_s0 + $0xf8] sm:$0xf] }
  0xd8   :  { %2463 = vmatpush.bf16.msra.mxu0 %v3397_v12  ;;  %v3189_v12 = vor.u32 %v4113_v0, %v3188_v63  ;;  %v4159_v63 = vld [vmem:[%s6428_s0 + $0x504] sm:$0xf]  ;;  %v3561_v0 = vor.u32 %v4205_v11, %v3560_v49  ;;  %v3509_v56 = vor.u32 %v4192_v3, %v3508_v7  ;;  %v4036_v38 = vld [vmem:[%s6428_s0 + $0x128] sm:$0xf0]  ;;  %v3242_v49 = vld [vmem:[%s6428_s0 + $0x3fc] sm:$0xf0] }
  0xd9   :  { %2449 = vmatpush.bf16.msra.mxu3 %v3033_v5  ;;  %v2825_v5 = vor.u32 %v4022_v61, %v2824_v59  ;;  %v3040_v59 = vld [vmem:[%s6428_s0 + $0x230] sm:$0xf]  ;;  %v4075_v61 = vld [vmem:[%s6428_s0 + $0x260] sm:$0xf0]  ;;  %v3976_v3 = vld [vmem:[%s6428_s0 + $0x980] sm:$0xf] }
  0xda   :  { %2476 = vmatpush.bf16.msra.mxu1 %v3813_v19  ;;  %2501 = vmatpush.bf16.msrb.mxu2 %v3037_v31  ;;  %v2146_v19 = vpop.f32.mrf.mxu3  ;;  %v2185_v40 = vpop.f32.mrf.mxu1  ;;  %v3041_v4 = vor.u32 %v4075_v61, %v3040_v59  ;;  %v4023_v59 = vld [vmem:[%s6428_s0 + $0xc0] sm:$0xf0] }
  0xdc   :  { %2464 = vmatpush.bf16.msra.mxu0 %v3345_v26  ;;  %3993 = vmatmul.msk.bf16.vlgmr.msrb.gmra.mxu3 %vm1987_vm1, %v4455_v47  ;;  %v4101_v26 = vld [vmem:[%s6428_s0 + $0x330] sm:$0xf0] }
  0xdd   :  { %2450 = vmatpush.bf16.msra.mxu3 %v2981_v22  ;;  %v3918_v22 = vld [vmem:[%s6428_s0 + $0x944] sm:$0xf0]  ;;  %v3145_v48 = vor.u32 %v4101_v26, %v3144_v25  ;;  %v3349_v25 = vor.u32 %v4146_v13, %v3346_v16  ;;  %v4133_v26 = vld [vmem:[%s6428_s0 + $0x434] sm:$0xf]  ;;  %v4140_v16 = vld [vmem:[%s6428_s0 + $0x468] sm:$0xf0] }
  0xde   :  { %2477 = vmatpush.bf16.msra.mxu1 %v3761_v32  ;;  %2502 = vmatpush.bf16.msrb.mxu2 %v2985_v44  ;;  %v3921_v31 = vor.u32 %v4289_v21, %v3918_v22  ;;  %v4185_v32 = vld [vmem:[%s6428_s0 + $0x5d4] sm:$0xf]  ;;  %v2774_v44 = vld [vmem:[%s6428_s0 + $0x54] sm:$0xf0]  ;;  %v3710_v22 = vld [vmem:[%s6428_s0 + $0x7a4] sm:$0xf0] }
  0xdf   :  { %3994 = vmatmul.msk.bf16.vlgmr.msra.gmra.mxu2 %vm1987_vm1, %v4455_v47  ;;  %v3505_v41 = vor.u32 %v4185_v32, %v3502_v33  ;;  %v4237_v21 = vld [vmem:[%s6428_s0 + $0x774] sm:$0xf]  ;;  %v3404_v32 = vld [vmem:[%s6428_s0 + $0x508] sm:$0xf]  ;;  %v4166_v33 = vld [vmem:[%s6428_s0 + $0x538] sm:$0xf0] }
  0xe0   :  { %2465 = vmatpush.bf16.msra.mxu0 %v3293_v39  ;;  %v2158_v39 = vadd.f32 %v5760_v50, %v5750_v45  ;;  %v3869_v45 = vor.u32 %v4276_v52, %v3866_v35  ;;  %v2170_v50 = vpop.f32.mrf.mxu0  ;;  %v4224_v52 = vld [vmem:[%s6428_s0 + $0x70c] sm:$0xf]  ;;  %v3658_v35 = vld [vmem:[%s6428_s0 + $0x73c] sm:$0xf0] }
  0xe1   :  { %2451 = vmatpush.bf16.msra.mxu3 %v2929_v36  ;;  %v2829_v36 = vor.u32 %v4016_v29, %v2826_v30  ;;  %v3713_v30 = vor.u32 %v4237_v21, %v3710_v22  ;;  %v3924_v22 = vld [vmem:[%s6428_s0 + $0x918] sm:$0xf] }
  0xe2   :  { %2478 = vmatpush.bf16.msra.mxu1 %v3709_v46  ;;  %2503 = vmatpush.bf16.msrb.mxu2 %v2933_v1  ;;  %v3450_v46 = vld [vmem:[%s6428_s0 + $0x59c] sm:$0xf0]  ;;  %v2171_v57 = vadd.f32 %v2170_v50, %v2158_v39 }
  0xe3   :  { %v3453_v62 = vor.u32 %v4172_v42, %v3450_v46  ;;  %v3661_v46 = vor.u32 %v4224_v52, %v3658_v35  ;;  %v3352_v50 = vld [vmem:[%s6428_s0 + $0x4a0] sm:$0xf] }
  0xe4   :  { %2466 = vmatpush.bf16.msra.mxu0 %v3241_v58  ;;  %v2777_v58 = vor.u32 %v4003_v43, %v2774_v44  ;;  %v2184_v1 = vadd.f32 %v5802_v10, %v2171_v57  ;;  %v4062_v10 = vld [vmem:[%s6428_s0 + $0x1f8] sm:$0xf0]  ;;  %v4120_v43 = vld [vmem:[%s6428_s0 + $0x3cc] sm:$0xf]  ;;  %v3405_v44 = vor.u32 %v4166_v33, %v3404_v32  ;;  %v3606_v57 = vld [vmem:[%s6428_s0 + $0x6d4] sm:$0xf0] }
  0xe5   :  { %2452 = vmatpush.bf16.msra.mxu3 %v2877_v51  ;;  %v4263_v51 = vld [vmem:[%s6428_s0 + $0x844] sm:$0xf]  ;;  %v4186_v33 = vld [vmem:[%s6428_s0 + $0x5dc] sm:$0xf] }
  0xe6   :  { %2479 = vmatpush.bf16.msra.mxu1 %v3657_v9  ;;  %2504 = vmatpush.bf16.msrb.mxu2 %v2881_v18  ;;  %v3817_v2 = vor.u32 %v4263_v51, %v3814_v54  ;;  %v3398_v9 = vld [vmem:[%s6428_s0 + $0x534] sm:$0xf0]  ;;  %4315 = vtanh.f32 %v2184_v1  ;;  %v2209_v14 = vpop.f32.mrf.mxu1  ;;  %v4179_v18 = vld [vmem:[%s6428_s0 + $0x5a0] sm:$0xf0]  ;;  %v2885_v51 = vor.u32 %v4036_v38, %v2884_v37  ;;  %v3872_v37 = vld [vmem:[%s6428_s0 + $0x8b0] sm:$0xf] }
  0xe7   :  { %v4211_v54 = vld [vmem:[%s6428_s0 + $0x6a4] sm:$0xf]  ;;  %v3190_v1 = vld [vmem:[%s6428_s0 + $0x394] sm:$0xf0] }
  0xe8   :  { %2467 = vmatpush.bf16.msra.mxu0 %v3189_v12  ;;  %v3401_v12 = vor.u32 %v4159_v63, %v3398_v9  ;;  %v2172_v19 = vpop.f32.mrf.mxu0  ;;  %v3609_v9 = vor.u32 %v4211_v54, %v3606_v57  ;;  %v4283_v38 = vld [vmem:[%s6428_s0 + $0x8e0] sm:$0xf0]  ;;  %v3820_v54 = vld [vmem:[%s6428_s0 + $0x848] sm:$0xf] }
  0xe9   :  { %2453 = vmatpush.bf16.msra.mxu3 %v2825_v5  ;;  %v4250_v5 = vld [vmem:[%s6428_s0 + $0x7dc] sm:$0xf]  ;;  %v3562_v19 = vld [vmem:[%s6428_s0 + $0x674] sm:$0xf0] }
  0xea   :  { %2480 = vmatpush.bf16.msra.mxu1 %v3605_v20  ;;  %2505 = vmatpush.bf16.msrb.mxu2 %v2829_v36  ;;  %v2989_v20 = vor.u32 %v4062_v10, %v2988_v8  ;;  %v4010_v8 = vld [vmem:[%s6428_s0 + $0x58] sm:$0xf0]  ;;  %v4095_v10 = vld [vmem:[%s6428_s0 + $0x304] sm:$0xf] }
  0xeb   :  { %2468 = vmatmul.bf16.vlgmr.msra.gmra.mxu0 %v4600_v60 }
  0xec   :  { %2525 = vmatpush.bf16.msrb.mxu0 %v3973_v15  ;;  %v3765_v15 = vor.u32 %v4250_v5, %v3762_v6  ;;  %v4316_v29 = vpop.eup %4315  ;;  %v2780_v5 = vld [vmem:[%s6428_s0 + $0x28] sm:$0xf] }
  0xed   :  { %2454 = vmatpush.bf16.msra.mxu3 %v2773_v24  ;;  %2481 = vmatmul.bf16.vlgmr.msra.gmra.mxu1 %v4589_v55  ;;  %v4049_v24 = vld [vmem:[%s6428_s0 + $0x190] sm:$0xf0]  ;;  %2722 = vst [vmem:[%s6430_s2 + $0x10] sm:$0xff] %v4316_v29 }
  0xee   :  { %2545 = vmatpush.bf16.msrb.mxu1 %v2020_v28  ;;  %2506 = vmatpush.bf16.msrb.mxu2 %v2777_v58  ;;  %v5946_v28 = vld [vmem:[%s6428_s0 + $0x9e8] sm:$0xff]  ;;  %v2222_v39 = vpop.f32.mrf.mxu2  ;;  %v2832_v58 = vld [vmem:[%s6428_s0 + $0x90] sm:$0xf] }
  0xef   :  { %v2196_v36 = vpop.f32.mrf.mxu3  ;;  %v2833_v6 = vor.u32 %v4023_v59, %v2832_v58  ;;  %v4270_v58 = vld [vmem:[%s6428_s0 + $0x878] sm:$0xf0]  ;;  %v4056_v59 = vld [vmem:[%s6428_s0 + $0x1cc] sm:$0xf] }
  0xf0   :  { %2526 = vmatpush.bf16.msrb.mxu0 %v3921_v31  ;;  %2455 = vmatmul.bf16.vlgmr.msra.gmra.mxu3 %v4587_v53  ;;  %v3294_v31 = vld [vmem:[%s6428_s0 + $0x464] sm:$0xf0]  ;;  %v2210_v40 = vadd.f32 %v2209_v14, %v2196_v36  ;;  %v2235_v63 = vpop.f32.mrf.mxu0 }
  0xf1   :  { %2512 = vmatpush.bf16.msrb.mxu3 %v3557_v27  ;;  %2507 = vmatmul.bf16.vlgmr.msrb.gmra.mxu2 %v4587_v53  ;;  %v3457_v27 = vor.u32 %v4179_v18, %v3456_v17  ;;  %v3297_v42 = vor.u32 %v4133_v26, %v3294_v31  ;;  %v4199_v18 = vld [vmem:[%s6428_s0 + $0x644] sm:$0xf]  ;;  %v4082_v26 = vld [vmem:[%s6428_s0 + $0x29c] sm:$0xf] }
  0xf2   :  { %2551 = vmatpush.bf16.msra.mxu1 %v3145_v48  ;;  %2564 = vmatpush.bf16.msra.mxu2 %v3561_v0  ;;  %v2937_v48 = vor.u32 %v4049_v24, %v2936_v23  ;;  %v2223_v11 = vadd.f32 %v2222_v39, %v2210_v40  ;;  %v4107_v0 = vld [vmem:[%s6428_s0 + $0x364] sm:$0xf]  ;;  %v2781_v23 = vor.u32 %v4010_v8, %v2780_v5  ;;  %v4069_v40 = vld [vmem:[%s6428_s0 + $0x234] sm:$0xf]  ;;  %v3768_v5 = vld [vmem:[%s6428_s0 + $0x7e0] sm:$0xf] }
  0xf3   :  { %v3193_v17 = vor.u32 %v4107_v0, %v3190_v1  ;;  %v3565_v29 = vor.u32 %v4199_v18, %v3562_v19  ;;  %v4127_v31 = vld [vmem:[%s6428_s0 + $0x400] sm:$0xf0]  ;;  %v4160_v0 = vld [vmem:[%s6428_s0 + $0x50c] sm:$0xf]  ;;  %v4257_v8 = vld [vmem:[%s6428_s0 + $0x810] sm:$0xf0] }
  0xf4   :  { %2527 = vmatpush.bf16.msrb.mxu0 %v3869_v45  ;;  %v2211_v45 = vpop.f32.mrf.mxu1  ;;  %v2236_v7 = vadd.f32 %v2235_v63, %v2223_v11  ;;  %v4303_v11 = vld [vmem:[%s6428_s0 + $0x984] sm:$0xf]  ;;  %v3874_v18 = vld [vmem:[%s6428_s0 + $0x8e4] sm:$0xf0]  ;;  %v3769_v19 = vor.u32 %v4257_v8, %v3768_v5 }
  0xf5   :  { %2513 = vmatpush.bf16.msrb.mxu3 %v3505_v41  ;;  %v1347_v41 = vunpack.c.l.b16 %v5946_v28  ;;  %v4173_v45 = vld [vmem:[%s6428_s0 + $0x574] sm:$0xf]  ;;  %v3984_v8 = vld [vmem:[%s6428_s0 + $0x988] sm:$0xf] }
  0xf6   :  { %2552 = vmatpush.bf16.msra.mxu1 %v3093_v34  ;;  %2565 = vmatpush.bf16.msra.mxu2 %v3509_v56  ;;  %v4153_v34 = vld [vmem:[%s6428_s0 + $0x4d0] sm:$0xf0]  ;;  %4317 = vtanh.f32 %v2236_v7  ;;  %v2224_v14 = vpop.f32.mrf.mxu2  ;;  %v3926_v7 = vld [vmem:[%s6428_s0 + $0x94c] sm:$0xf0] }
  0xf7   :  { %v1672_v61 = vpack.c.b16 %v1347_v41, %v1347_v41  ;;  %v2198_v13 = vpop.f32.mrf.mxu3  ;;  %v3042_v41 = vld [vmem:[%s6428_s0 + $0x264] sm:$0xf0]  ;;  %v4147_v14 = vld [vmem:[%s6428_s0 + $0x4a4] sm:$0xf] }
  0xf8   :  { %2528 = vmatpush.bf16.msrb.mxu0 %v3817_v2  ;;  %v3353_v2 = vor.u32 %v4153_v34, %v3352_v50  ;;  %v2237_v32 = vpop.f32.mrf.mxu0  ;;  %v3978_v50 = vld [vmem:[%s6428_s0 + $0x9b4] sm:$0xf0]  ;;  %v3873_v34 = vor.u32 %v4283_v38, %v3872_v37  ;;  %v4231_v38 = vld [vmem:[%s6428_s0 + $0x740] sm:$0xf0] }
  0xf9   :  { %2514 = vmatpush.bf16.msrb.mxu3 %v3453_v62  ;;  %v3245_v62 = vor.u32 %v4120_v43, %v3242_v49  ;;  %v2023_v56 = vsel %vm1991_vm0, %v1672_v61, 0  ;;  %v3196_v43 = vld [vmem:[%s6428_s0 + $0x368] sm:$0xf]  ;;  %v2990_v61 = vld [vmem:[%s6428_s0 + $0x1fc] sm:$0xf0]  ;;  %v3981_v63 = vor.u32 %v4303_v11, %v3978_v50 }
  0xfa   :  { %2553 = vmatpush.bf16.msra.mxu1 %v3041_v4  ;;  %2566 = vmatpush.bf16.msra.mxu2 %v3457_v27  ;;  %v4309_v4 = vld [vmem:[%s6428_s0 + $0x9b0] sm:$0xf0]  ;;  %v3094_v27 = vld [vmem:[%s6428_s0 + $0x2cc] sm:$0xf0]  ;;  %v3458_v49 = vld [vmem:[%s6428_s0 + $0x5a4] sm:$0xf0] }
  0xfb   :  { %v3097_v36 = vor.u32 %v4082_v26, %v3094_v27  ;;  %v3302_v32 = vld [vmem:[%s6428_s0 + $0x46c] sm:$0xf0]  ;;  %v3250_v11 = vld [vmem:[%s6428_s0 + $0x404] sm:$0xf0]  ;;  %v4251_v50 = vld [vmem:[%s6428_s0 + $0x7e4] sm:$0xf] }
  0xfc   :  { %2529 = vmatpush.bf16.msrb.mxu0 %v3765_v15  ;;  %v3300_v15 = vld [vmem:[%s6428_s0 + $0x438] sm:$0xf]  ;;  %v4318_v52 = vpop.eup %4317 }
  0xfd   :  { %2515 = vmatpush.bf16.msrb.mxu3 %v3401_v12  ;;  %3995 = vmatmul.msk.bf16.vlgmr.msrb.gmra.mxu1 %vm1987_vm1, %v4455_v47  ;;  %v3146_v12 = vld [vmem:[%s6428_s0 + $0x334] sm:$0xf0]  ;;  %v3301_v24 = vor.u32 %v4140_v16, %v3300_v15  ;;  %2723 = vst [vmem:[%s6430_s2 + $0x18] sm:$0xff] %v4318_v52 }
  0xfe   :  { %2554 = vmatpush.bf16.msra.mxu1 %v2989_v20  ;;  %2567 = vmatpush.bf16.msra.mxu2 %v3405_v44  ;;  %v3977_v20 = vor.u32 %v4309_v4, %v3976_v3  ;;  %v3149_v21 = vor.u32 %v4095_v10, %v3146_v12  ;;  %v4114_v44 = vld [vmem:[%s6428_s0 + $0x398] sm:$0xf0]  ;;  %v3821_v3 = vor.u32 %v4270_v58, %v3820_v54  ;;  %v4043_v10 = vld [vmem:[%s6428_s0 + $0x164] sm:$0xf]  ;;  %v2938_v12 = vld [vmem:[%s6428_s0 + $0x194] sm:$0xf0] }
  0xff   :  { %v3197_v57 = vor.u32 %v4114_v44, %v3196_v43  ;;  %v2993_v4 = vor.u32 %v4056_v59, %v2990_v61  ;;  %v3354_v16 = vld [vmem:[%s6428_s0 + $0x4d4] sm:$0xf0]  ;;  %v4121_v44 = vld [vmem:[%s6428_s0 + $0x3d4] sm:$0xf]  ;;  %v4004_v58 = vld [vmem:[%s6428_s0 + $0x2c] sm:$0xf] }
 0x100   :  { %2530 = vmatpush.bf16.msrb.mxu0 %v3713_v30  ;;  %v3248_v30 = vld [vmem:[%s6428_s0 + $0x3d0] sm:$0xf]  ;;  %v3357_v26 = vor.u32 %v4147_v14, %v3354_v16  ;;  %v2782_v59 = vld [vmem:[%s6428_s0 + $0x5c] sm:$0xf0]  ;;  %v3253_v61 = vor.u32 %v4121_v44, %v3250_v11  ;;  %v3048_v44 = vld [vmem:[%s6428_s0 + $0x238] sm:$0xf] }
 0x101   :  { %2516 = vmatpush.bf16.msrb.mxu3 %v3349_v25  ;;  %v4296_v25 = vld [vmem:[%s6428_s0 + $0x948] sm:$0xf0]  ;;  %v3249_v39 = vor.u32 %v4127_v31, %v3248_v30 }
 0x102   :  { %2555 = vmatpush.bf16.msra.mxu1 %v2937_v48  ;;  %2568 = vmatpush.bf16.msra.mxu2 %v3353_v2  ;;  %v3510_v48 = vld [vmem:[%s6428_s0 + $0x60c] sm:$0xf0]  ;;  %v3925_v35 = vor.u32 %v4296_v25, %v3924_v22  ;;  %v3406_v2 = vld [vmem:[%s6428_s0 + $0x53c] sm:$0xf0]  ;;  %v4244_v22 = vld [vmem:[%s6428_s0 + $0x7a8] sm:$0xf0] }
 0x103   :  { %v3409_v13 = vor.u32 %v4160_v0, %v3406_v2  ;;  %v4206_v2 = vld [vmem:[%s6428_s0 + $0x678] sm:$0xf0] }
 0x104   :  { %2531 = vmatpush.bf16.msrb.mxu0 %v3661_v46  ;;  %v6086_v46 = vpop.f32.mrf.mxu2 }
 0x105   :  { %2517 = vmatpush.bf16.msrb.mxu3 %v3297_v42  ;;  %v3513_v42 = vor.u32 %v4186_v33, %v3510_v48  ;;  %v4264_v33 = vld [vmem:[%s6428_s0 + $0x84c] sm:$0xf]  ;;  %v3822_v48 = vld [vmem:[%s6428_s0 + $0x87c] sm:$0xf0] }
 0x106   :  { %2556 = vmatpush.bf16.msra.mxu1 %v2885_v51  ;;  %2569 = vmatpush.bf16.msra.mxu2 %v3301_v24  ;;  %v3045_v51 = vor.u32 %v4069_v40, %v3042_v41  ;;  %v2274_v1 = vpop.f32.mrf.mxu1  ;;  %v2886_v24 = vld [vmem:[%s6428_s0 + $0x12c] sm:$0xf0]  ;;  %v2834_v40 = vld [vmem:[%s6428_s0 + $0xc4] sm:$0xf0]  ;;  %v3825_v43 = vor.u32 %v4264_v33, %v3822_v48  ;;  %v4089_v33 = vld [vmem:[%s6428_s0 + $0x2d0] sm:$0xf0] }
 0x108   :  { %2532 = vmatpush.bf16.msrb.mxu0 %v3609_v9  ;;  %v4290_v9 = vld [vmem:[%s6428_s0 + $0x91c] sm:$0xf] }
 0x109   :  { %2518 = vmatpush.bf16.msrb.mxu3 %v3245_v62  ;;  %v3461_v62 = vor.u32 %v4173_v45, %v3458_v49  ;;  %v1348_v45 = vunpack.c.h.b16 %v5946_v28 }
 0x10a   :  { %2557 = vmatpush.bf16.msra.mxu1 %v2833_v6  ;;  %2570 = vmatpush.bf16.msra.mxu2 %v3249_v39  ;;  %v2261_v6 = vpop.f32.mrf.mxu0  ;;  %v4017_v39 = vld [vmem:[%s6428_s0 + $0x94] sm:$0xf] }
 0x10b   :  { %2533 = vmatmul.bf16.vlgmr.msrb.gmra.mxu0 %v4589_v55  ;;  %v2837_v28 = vor.u32 %v4017_v39, %v2834_v40  ;;  %v1673_v0 = vpack.c.b16 %v1348_v45, %v1348_v45  ;;  %v3880_v40 = vld [vmem:[%s6428_s0 + $0x8b8] sm:$0xf]  ;;  %v4076_v45 = vld [vmem:[%s6428_s0 + $0x268] sm:$0xf0] }
 0x10c   :  { %2597 = vmatpush.bf16.msra.mxu0 %v2023_v56  ;;  %v3929_v56 = vor.u32 %v4290_v9, %v3926_v7  ;;  %v2289_v15 = vpop.f32.mrf.mxu2  ;;  %v3198_v7 = vld [vmem:[%s6428_s0 + $0x39c] sm:$0xf0] }
 0x10d   :  { %2519 = vmatpush.bf16.msrb.mxu3 %v3193_v17  ;;  %v4277_v17 = vld [vmem:[%s6428_s0 + $0x8b4] sm:$0xf]  ;;  %v356_v15 = vld [vmem:[%s6428_s0 + $0x9f0] sm:$0xf] }
 0x10e   :  { %2558 = vmatpush.bf16.msra.mxu1 %v2781_v23  ;;  %2571 = vmatpush.bf16.msra.mxu2 %v3197_v57  ;;  %v4030_v23 = vld [vmem:[%s6428_s0 + $0xfc] sm:$0xf]  ;;  %v3877_v27 = vor.u32 %v4277_v17, %v3874_v18  ;;  %v2276_v31 = vpop.f32.mrf.mxu1  ;;  %v2026_v17 = vsel %vm1991_vm0, %v1673_v0, 0  ;;  %v3360_v0 = vld [vmem:[%s6428_s0 + $0x4a8] sm:$0xf] }
 0x10f   :  { %v2248_v25 = vpop.f32.mrf.mxu3  ;;  %v4218_v57 = vld [vmem:[%s6428_s0 + $0x6d8] sm:$0xf0] }
 0x110   :  { %2603 = vmatpush.bf16.msrb.mxu0 %v3149_v21  ;;  %2520 = vmatmul.bf16.vlgmr.msrb.gmra.mxu3 %v4600_v60  ;;  %v3716_v21 = vld [vmem:[%s6428_s0 + $0x778] sm:$0xf]  ;;  %v2262_v30 = vadd.f32 %v2261_v6, %v2248_v25  ;;  %v2785_v6 = vor.u32 %v4004_v58, %v2782_v59  ;;  %v4271_v58 = vld [vmem:[%s6428_s0 + $0x880] sm:$0xf0] }
 0x111   :  { %2577 = vmatpush.bf16.msra.mxu3 %v3977_v20  ;;  %2559 = vmatmul.bf16.vlgmr.msra.gmra.mxu1 %v4587_v53  ;;  %v2941_v20 = vor.u32 %v4043_v10, %v2938_v12  ;;  %v3717_v52 = vor.u32 %v4244_v22, %v3716_v21  ;;  %v4310_v10 = vld [vmem:[%s6428_s0 + $0x9b8] sm:$0xf0] }
 0x112   :  { %2616 = vmatpush.bf16.msrb.mxu1 %v3565_v29  ;;  %2629 = vmatpush.bf16.msrb.mxu2 %v3981_v63  ;;  %v4134_v29 = vld [vmem:[%s6428_s0 + $0x43c] sm:$0xf]  ;;  %v2275_v37 = vadd.f32 %v2274_v1, %v2262_v30  ;;  %v2263_v41 = vpop.f32.mrf.mxu0  ;;  %v4108_v63 = vld [vmem:[%s6428_s0 + $0x36c] sm:$0xf]  ;;  %v3568_v1 = vld [vmem:[%s6428_s0 + $0x648] sm:$0xf]  ;;  %v3985_v22 = vor.u32 %v4310_v10, %v3984_v8  ;;  %v1349_v30 = vunpack.c.l.b16 %v356_v15 }
 0x113   :  { %2572 = vmatmul.bf16.vlgmr.msra.gmra.mxu2 %v4600_v60  ;;  %v3569_v12 = vor.u32 %v4206_v2, %v3568_v1  ;;  %v3201_v16 = vor.u32 %v4108_v63, %v3198_v7  ;;  %v4284_v41 = vld [vmem:[%s6428_s0 + $0x8e8] sm:$0xf0]  ;;  %v4063_v63 = vld [vmem:[%s6428_s0 + $0x200] sm:$0xf0]  ;;  %v4154_v1 = vld [vmem:[%s6428_s0 + $0x4d8] sm:$0xf0] }
 0x114   :  { %2604 = vmatpush.bf16.msrb.mxu0 %v3097_v36  ;;  %v3664_v36 = vld [vmem:[%s6428_s0 + $0x710] sm:$0xf]  ;;  %v2288_v49 = vadd.f32 %v6086_v46, %v2275_v37  ;;  %v3612_v46 = vld [vmem:[%s6428_s0 + $0x6a8] sm:$0xf]  ;;  %v4212_v37 = vld [vmem:[%s6428_s0 + $0x6ac] sm:$0xf] }
 0x115   :  { %2578 = vmatpush.bf16.msra.mxu3 %v3925_v35  ;;  %v2889_v35 = vor.u32 %v4030_v23, %v2886_v24  ;;  %v3665_v54 = vor.u32 %v4231_v38, %v3664_v36  ;;  %v3613_v5 = vor.u32 %v4218_v57, %v3612_v46  ;;  %v4225_v23 = vld [vmem:[%s6428_s0 + $0x714] sm:$0xf]  ;;  %v3666_v24 = vld [vmem:[%s6428_s0 + $0x744] sm:$0xf0]  ;;  %v3614_v38 = vld [vmem:[%s6428_s0 + $0x6dc] sm:$0xf0]  ;;  %v3049_v46 = vor.u32 %v4076_v45, %v3048_v44 }
 0x116   :  { %2617 = vmatpush.bf16.msrb.mxu1 %v3513_v42  ;;  %2630 = vmatpush.bf16.msrb.mxu2 %v3929_v56  ;;  %v3305_v42 = vor.u32 %v4134_v29, %v3302_v32  ;;  %4319 = vtanh.f32 %v2288_v49  ;;  %v4102_v56 = vld [vmem:[%s6428_s0 + $0x338] sm:$0xf0]  ;;  %v6243_v14 = vpop.f32.mrf.mxu1  ;;  %v4297_v29 = vld [vmem:[%s6428_s0 + $0x950] sm:$0xf0]  ;;  %v3100_v32 = vld [vmem:[%s6428_s0 + $0x2a0] sm:$0xf]  ;;  %v3669_v48 = vor.u32 %v4225_v23, %v3666_v24 }
 0x117   :  { %v2250_v9 = vpop.f32.mrf.mxu3  ;;  %v3101_v39 = vor.u32 %v4089_v33, %v3100_v32  ;;  %v3828_v57 = vld [vmem:[%s6428_s0 + $0x850] sm:$0xf]  ;;  %v3776_v7 = vld [vmem:[%s6428_s0 + $0x7e8] sm:$0xf]  ;;  %v3308_v10 = vld [vmem:[%s6428_s0 + $0x440] sm:$0xf] }
 0x118   :  { %2605 = vmatpush.bf16.msrb.mxu0 %v3045_v51  ;;  %v6199_v51 = vpop.f32.mrf.mxu2  ;;  %v3829_v2 = vor.u32 %v4271_v58, %v3828_v57  ;;  %v3256_v23 = vld [vmem:[%s6428_s0 + $0x3d8] sm:$0xf]  ;;  %v4128_v24 = vld [vmem:[%s6428_s0 + $0x408] sm:$0xf0]  ;;  %v3204_v33 = vld [vmem:[%s6428_s0 + $0x370] sm:$0xf] }
 0x119   :  { %2579 = vmatpush.bf16.msra.mxu3 %v3873_v34  ;;  %v3770_v34 = vld [vmem:[%s6428_s0 + $0x814] sm:$0xf0]  ;;  %v4011_v44 = vld [vmem:[%s6428_s0 + $0x60] sm:$0xf0] }
 0x11a   :  { %2618 = vmatpush.bf16.msrb.mxu1 %v3461_v62  ;;  %2631 = vmatpush.bf16.msrb.mxu2 %v3877_v27  ;;  %v3773_v62 = vor.u32 %v4251_v50, %v3770_v34  ;;  %v3932_v27 = vld [vmem:[%s6428_s0 + $0x920] sm:$0xf]  ;;  %v3617_v50 = vor.u32 %v4212_v37, %v3614_v38  ;;  %v3412_v34 = vld [vmem:[%s6428_s0 + $0x510] sm:$0xf]  ;;  %v2840_v32 = vld [vmem:[%s6428_s0 + $0x98] sm:$0xf] }
 0x11b   :  { %3996 = vmatmul.msk.bf16.vlgmr.msra.gmra.mxu0 %vm1987_vm1, %v4455_v47  ;;  %v3933_v36 = vor.u32 %v4297_v29, %v3932_v27  ;;  %v3672_v29 = vld [vmem:[%s6428_s0 + $0x718] sm:$0xf] }
 0x11c   :  { %2606 = vmatpush.bf16.msrb.mxu0 %v2993_v4  ;;  %v3718_v4 = vld [vmem:[%s6428_s0 + $0x7ac] sm:$0xf0]  ;;  %v4320_v21 = vpop.eup %4319 }
 0x11d   :  { %2580 = vmatpush.bf16.msra.mxu3 %v3821_v3  ;;  %v4238_v3 = vld [vmem:[%s6428_s0 + $0x77c] sm:$0xf]  ;;  %2724 = vst [vmem:[%s6430_s2 + $0x20] sm:$0xff] %v4320_v21  ;;  %v2892_v21 = vld [vmem:[%s6428_s0 + $0x100] sm:$0xf] }
 0x11e   :  { %2619 = vmatpush.bf16.msrb.mxu1 %v3409_v13  ;;  %2632 = vmatpush.bf16.msrb.mxu2 %v3825_v43  ;;  %v3152_v13 = vld [vmem:[%s6428_s0 + $0x308] sm:$0xf]  ;;  %v3721_v18 = vor.u32 %v4238_v3, %v3718_v4  ;;  %v2341_v49 = vpop.f32.mrf.mxu1  ;;  %v4258_v3 = vld [vmem:[%s6428_s0 + $0x818] sm:$0xf0]  ;;  %v3361_v4 = vor.u32 %v4154_v1, %v3360_v0 }
 0x11f   :  { %v3777_v15 = vor.u32 %v4258_v3, %v3776_v7 }
 0x120   :  { %2607 = vmatpush.bf16.msrb.mxu0 %v2941_v20  ;;  %v4193_v20 = vld [vmem:[%s6428_s0 + $0x610] sm:$0xf0]  ;;  %v2302_v25 = vpop.f32.mrf.mxu2 }
 0x121   :  { %2581 = vmatpush.bf16.msra.mxu3 %v3769_v19  ;;  %v3516_v19 = vld [vmem:[%s6428_s0 + $0x5e0] sm:$0xf] }
 0x122   :  { %2620 = vmatpush.bf16.msrb.mxu1 %v3357_v26  ;;  %2633 = vmatpush.bf16.msrb.mxu2 %v3773_v62  ;;  %v3153_v26 = vor.u32 %v4102_v56, %v3152_v13  ;;  %v3517_v31 = vor.u32 %v4193_v20, %v3516_v19  ;;  %v2996_v62 = vld [vmem:[%s6428_s0 + $0x1d0] sm:$0xf]  ;;  %v4245_v19 = vld [vmem:[%s6428_s0 + $0x7b0] sm:$0xf0] }
 0x123   :  { %v2997_v9 = vor.u32 %v4063_v63, %v2996_v62 }
 0x124   :  { %2608 = vmatpush.bf16.msrb.mxu0 %v2889_v35  ;;  %v4180_v35 = vld [vmem:[%s6428_s0 + $0x5a8] sm:$0xf0]  ;;  %v2326_v11 = vpop.f32.mrf.mxu0 }
 0x125   :  { %2582 = vmatpush.bf16.msra.mxu3 %v3717_v52  ;;  %v3464_v52 = vld [vmem:[%s6428_s0 + $0x578] sm:$0xf] }
 0x126   :  { %2621 = vmatpush.bf16.msrb.mxu1 %v3305_v42  ;;  %2634 = vmatpush.bf16.msrb.mxu2 %v3721_v18  ;;  %v1674_v42 = vpack.c.b16 %v1349_v30, %v1349_v30  ;;  %v3465_v43 = vor.u32 %v4180_v35, %v3464_v52  ;;  %v3724_v18 = vld [vmem:[%s6428_s0 + $0x780] sm:$0xf]  ;;  %v4232_v30 = vld [vmem:[%s6428_s0 + $0x748] sm:$0xf0] }
 0x127   :  { %v3725_v25 = vor.u32 %v4245_v19, %v3724_v18 }
 0x128   :  { %2609 = vmatpush.bf16.msrb.mxu0 %v2837_v28  ;;  %v3881_v28 = vor.u32 %v4284_v41, %v3880_v40  ;;  %v2029_v59 = vsel %vm1991_vm0, %v1674_v42, 0  ;;  %v3620_v40 = vld [vmem:[%s6428_s0 + $0x6b0] sm:$0xf]  ;;  %v4219_v41 = vld [vmem:[%s6428_s0 + $0x6e0] sm:$0xf0] }
 0x129   :  { %2583 = vmatpush.bf16.msra.mxu3 %v3665_v54  ;;  %v4167_v54 = vld [vmem:[%s6428_s0 + $0x540] sm:$0xf0]  ;;  %v3621_v45 = vor.u32 %v4219_v41, %v3620_v40 }
 0x12a   :  { %2622 = vmatpush.bf16.msrb.mxu1 %v3253_v61  ;;  %2635 = vmatpush.bf16.msrb.mxu2 %v3669_v48  ;;  %v3413_v61 = vor.u32 %v4167_v54, %v3412_v34  ;;  %v2352_v13 = vpop.f32.mrf.mxu1  ;;  %v4115_v48 = vld [vmem:[%s6428_s0 + $0x3a0] sm:$0xf0] }
 0x12b   :  { %v3205_v42 = vor.u32 %v4115_v48, %v3204_v33 }
 0x12c   :  { %2610 = vmatpush.bf16.msrb.mxu0 %v2785_v6  ;;  %v4050_v6 = vld [vmem:[%s6428_s0 + $0x198] sm:$0xf0]  ;;  %v2328_v8 = vpop.f32.mrf.mxu0 }
 0x12d   :  { %2584 = vmatpush.bf16.msra.mxu3 %v3613_v5  ;;  %v2944_v5 = vld [vmem:[%s6428_s0 + $0x168] sm:$0xf] }
 0x12e   :  { %2623 = vmatpush.bf16.msrb.mxu1 %v3201_v16  ;;  %2636 = vmatpush.bf16.msrb.mxu2 %v3617_v50 }
 0x12f   :  { %2611 = vmatmul.bf16.vlgmr.msrb.gmra.mxu0 %v4587_v53  ;;  %v2313_v56 = vpop.f32.mrf.mxu3 }
 0x130   :  { %2668 = vmatpush.bf16.msra.mxu0 %v3569_v12  ;;  %2585 = vmatmul.bf16.vlgmr.msra.gmra.mxu3 %v4589_v55  ;;  %v4141_v12 = vld [vmem:[%s6428_s0 + $0x470] sm:$0xf0]  ;;  %v2314_v16 = vadd.f32 %v2313_v56, %v6199_v51 }
 0x131   :  { %2649 = vmatpush.bf16.msrb.mxu3 %v2026_v17  ;;  %2624 = vmatmul.bf16.vlgmr.msrb.gmra.mxu1 %v4600_v60  ;;  %v2945_v17 = vor.u32 %v4050_v6, %v2944_v5  ;;  %v3309_v20 = vor.u32 %v4141_v12, %v3308_v10  ;;  %v4037_v51 = vld [vmem:[%s6428_s0 + $0x130] sm:$0xf0] }
 0x132   :  { %2681 = vmatpush.bf16.msra.mxu1 %v3985_v22  ;;  %2701 = vmatpush.bf16.msra.mxu2 %v2029_v59  ;;  %v2327_v22 = vadd.f32 %v2326_v11, %v2314_v16  ;;  %v2893_v27 = vor.u32 %v4037_v51, %v2892_v21  ;;  %v2365_v35 = vpop.f32.mrf.mxu2  ;;  %v2354_v38 = vpop.f32.mrf.mxu1 }
 0x133   :  { %2637 = vmatmul.bf16.vlgmr.msrb.gmra.mxu2 %v4589_v55 }
 0x134   :  { %2669 = vmatpush.bf16.msra.mxu0 %v3517_v31  ;;  %v3257_v31 = vor.u32 %v4128_v24, %v3256_v23  ;;  %v2391_v52 = vpop.f32.mrf.mxu0 }
 0x135   :  { %2655 = vmatpush.bf16.msra.mxu3 %v3153_v26  ;;  %v2340_v26 = vadd.f32 %v6243_v14, %v2327_v22  ;;  %v4024_v14 = vld [vmem:[%s6428_s0 + $0xc8] sm:$0xf0] }
 0x136   :  { %2682 = vmatpush.bf16.msra.mxu1 %v3933_v36  ;;  %v3673_v36 = vor.u32 %v4232_v30, %v3672_v29 }
 0x137   :  { %4321 = vtanh.f32 %v2340_v26  ;;  %v2315_v37 = vpop.f32.mrf.mxu3 }
 0x138   :  { %2670 = vmatpush.bf16.msra.mxu0 %v3465_v43  ;;  %v2788_v43 = vld [vmem:[%s6428_s0 + $0x30] sm:$0xf] }
 0x139   :  { %2656 = vmatpush.bf16.msra.mxu3 %v3101_v39  ;;  %v2841_v39 = vor.u32 %v4024_v14, %v2840_v32  ;;  %v2789_v11 = vor.u32 %v4011_v44, %v2788_v43 }
 0x13a   :  { %2683 = vmatpush.bf16.msra.mxu1 %v3881_v28  ;;  %v2367_v34 = vpop.f32.mrf.mxu2 }
 0x13c   :  { %2671 = vmatpush.bf16.msra.mxu0 %v3413_v61  ;;  %v2393_v50 = vpop.f32.mrf.mxu0 }
 0x13d   :  { %2657 = vmatpush.bf16.msra.mxu3 %v3049_v46  ;;  %v4322_v49 = vpop.eup %4321  ;;  %v2366_v46 = vadd.f32 %v2365_v35, %v2352_v13 }
 0x13e   :  { %2684 = vmatpush.bf16.msra.mxu1 %v3829_v2  ;;  %2725 = vst [vmem:[%s6430_s2 + $0x28] sm:$0xff] %v4322_v49 }
 0x140   :  { %2672 = vmatpush.bf16.msra.mxu0 %v3361_v4  ;;  %3997 = vmatmul.msk.bf16.vlgmr.msrb.gmra.mxu3 %vm1987_vm1, %v4455_v47 }
 0x141   :  { %2658 = vmatpush.bf16.msra.mxu3 %v2997_v9 }
 0x142   :  { %2685 = vmatpush.bf16.msra.mxu1 %v3777_v15 }
 0x143   :  { %3998 = vmatmul.msk.bf16.vlgmr.msra.gmra.mxu2 %vm1987_vm1, %v4455_v47 }
 0x144   :  { %2673 = vmatpush.bf16.msra.mxu0 %v3309_v20 }
 0x145   :  { %2659 = vmatpush.bf16.msra.mxu3 %v2945_v17 }
 0x146   :  { %2686 = vmatpush.bf16.msra.mxu1 %v3725_v25 }
 0x148   :  { %2674 = vmatpush.bf16.msra.mxu0 %v3257_v31  ;;  %v2404_v54 = vpop.f32.mrf.mxu0 }
 0x149   :  { %2660 = vmatpush.bf16.msra.mxu3 %v2893_v27 }
 0x14a   :  { %2687 = vmatpush.bf16.msra.mxu1 %v3673_v36  ;;  %v2417_v28 = vpop.f32.mrf.mxu1 }
 0x14b   :  { %v2418_v0 = vadd.f32 %v2417_v28, %v2404_v54 }
 0x14c   :  { %2675 = vmatpush.bf16.msra.mxu0 %v3205_v42 }
 0x14d   :  { %2661 = vmatpush.bf16.msra.mxu3 %v2841_v39 }
 0x14e   :  { %2688 = vmatpush.bf16.msra.mxu1 %v3621_v45 }
 0x14f   :  { %2676 = vmatmul.bf16.vlgmr.msra.gmra.mxu0 %v4600_v60  ;;  %v2378_v57 = vpop.f32.mrf.mxu3 }
 0x150   :  { %v2379_v58 = vadd.f32 %v2378_v57, %v2366_v46  ;;  %v2406_v61 = vpop.f32.mrf.mxu0 }
 0x151   :  { %2662 = vmatpush.bf16.msra.mxu3 %v2789_v11  ;;  %2689 = vmatmul.bf16.vlgmr.msra.gmra.mxu1 %v4589_v55 }
 0x152   :  { %v2392_v59 = vadd.f32 %v2391_v52, %v2379_v58  ;;  %v2419_v62 = vpop.f32.mrf.mxu1  ;;  %v2430_v47 = vpop.f32.mrf.mxu2 }
 0x153   :  { %v2431_v55 = vadd.f32 %v2430_v47, %v2418_v0 }
 0x154   :  { %2663 = vmatmul.bf16.vlgmr.msra.gmra.mxu3 %v4587_v53  ;;  %4323 = vtanh.f32 %v2392_v59 }
 0x157   :  { %v2380_v63 = vpop.f32.mrf.mxu3 }
 0x15a   :  { %v4324_v1 = vpop.eup %4323  ;;  %v2432_v60 = vpop.f32.mrf.mxu2 }
 0x15b   :  { %2726 = vst [vmem:[%s6430_s2 + $0x30] sm:$0xff] %v4324_v1 }
 0x15f   :  { %v2443_v53 = vpop.f32.mrf.mxu3 }
 0x160   :  { %v2444_v2 = vadd.f32 %v2443_v53, %v2431_v55 }
 0x162   :  { %4325 = vtanh.f32 %v2444_v2  ;;  %v2495_v9 = vpop.f32.mrf.mxu2 }
 0x167   :  { %v2445_v7 = vpop.f32.mrf.mxu3 }
 0x168   :  { %v2469_v3 = vpop.f32.mrf.mxu0  ;;  %v4326_v4 = vpop.eup %4325 }
 0x169   :  { %2727 = vst [vmem:[%s6430_s2 + $0x38] sm:$0xff] %v4326_v4 }
 0x16a   :  { %v2482_v5 = vpop.f32.mrf.mxu1  ;;  %v2497_v6 = vpop.f32.mrf.mxu2 }
 0x170   :  { %v2471_v10 = vpop.f32.mrf.mxu0 }
 0x172   :  { %v2484_v13 = vpop.f32.mrf.mxu1 }
 0x173   :  { %v2456_v8 = vpop.f32.mrf.mxu3 }
 0x174   :  { %v2470_v12 = vadd.f32 %v2469_v3, %v2456_v8  ;;  %v2508_v17 = vpop.f32.mrf.mxu2 }
 0x176   :  { %v2483_v56 = vadd.f32 %v2482_v5, %v2470_v12 }
 0x178   :  { %v2496_v15 = vadd.f32 %v2495_v9, %v2483_v56 }
 0x17a   :  { %4327 = vtanh.f32 %v2496_v15  ;;  %v2547_v18 = vpop.f32.mrf.mxu1 }
 0x17b   :  { %v2458_v16 = vpop.f32.mrf.mxu3 }
 0x17c   :  { %v2510_v20 = vpop.f32.mrf.mxu2 }
 0x180   :  { %v4328_v19 = vpop.eup %4327 }
 0x181   :  { %2728 = vst [vmem:[%s6430_s2 + $0x40] sm:$0xff] %v4328_v19 }
 0x182   :  { %v2549_v21 = vpop.f32.mrf.mxu1 }
 0x188   :  { %v2534_v51 = vpop.f32.mrf.mxu0 }
 0x18e   :  { %v2560_v22 = vpop.f32.mrf.mxu1 }
 0x190   :  { %v2536_v23 = vpop.f32.mrf.mxu0 }
 0x193   :  { %v2521_v24 = vpop.f32.mrf.mxu3 }
 0x194   :  { %v2522_v25 = vadd.f32 %v2521_v24, %v2508_v17 }
 0x196   :  { %v2535_v26 = vadd.f32 %v2534_v51, %v2522_v25  ;;  %v2562_v29 = vpop.f32.mrf.mxu1  ;;  %v2573_v32 = vpop.f32.mrf.mxu2 }
 0x197   :  { %v2574_v36 = vadd.f32 %v2573_v32, %v2560_v22 }
 0x198   :  { %v2548_v27 = vadd.f32 %v2547_v18, %v2535_v26  ;;  %v2599_v30 = vpop.f32.mrf.mxu0 }
 0x19a   :  { %4329 = vtanh.f32 %v2548_v27 }
 0x19b   :  { %v2523_v31 = vpop.f32.mrf.mxu3 }
 0x19e   :  { %v2575_v48 = vpop.f32.mrf.mxu2 }
 0x1a0   :  { %v4330_v14 = vpop.eup %4329  ;;  %v2601_v33 = vpop.f32.mrf.mxu0 }
 0x1a1   :  { %2729 = vst [vmem:[%s6430_s2 + $0x48] sm:$0xff] %v4330_v14 }
 0x1ac   :  { %v2612_v52 = vpop.f32.mrf.mxu0 }
 0x1ae   :  { %v2625_v35 = vpop.f32.mrf.mxu1 }
 0x1af   :  { %v2626_v43 = vadd.f32 %v2625_v35, %v2612_v52 }
 0x1b3   :  { %v2586_v37 = vpop.f32.mrf.mxu3 }
 0x1b4   :  { %v2587_v38 = vadd.f32 %v2586_v37, %v2574_v36  ;;  %v2614_v40 = vpop.f32.mrf.mxu0 }
 0x1b6   :  { %v2600_v39 = vadd.f32 %v2599_v30, %v2587_v38  ;;  %v2627_v41 = vpop.f32.mrf.mxu1  ;;  %v2638_v44 = vpop.f32.mrf.mxu2 }
 0x1b7   :  { %v2639_v49 = vadd.f32 %v2638_v44, %v2626_v43 }
 0x1b8   :  { %4331 = vtanh.f32 %v2600_v39 }
 0x1bb   :  { %v2588_v42 = vpop.f32.mrf.mxu3 }
 0x1be   :  { %v4332_v45 = vpop.eup %4331  ;;  %v2640_v34 = vpop.f32.mrf.mxu2 }
 0x1bf   :  { %2730 = vst [vmem:[%s6430_s2 + $0x50] sm:$0xff] %v4332_v45 }
 0x1c3   :  { %v2651_v11 = vpop.f32.mrf.mxu3 }
 0x1c4   :  { %v2652_v50 = vadd.f32 %v2651_v11, %v2639_v49 }
 0x1c6   :  { %4333 = vtanh.f32 %v2652_v50  ;;  %v2703_v58 = vpop.f32.mrf.mxu2 }
 0x1cb   :  { %v2653_v28 = vpop.f32.mrf.mxu3 }
 0x1cc   :  { %v2677_v54 = vpop.f32.mrf.mxu0  ;;  %v4334_v46 = vpop.eup %4333 }
 0x1cd   :  { %2731 = vst [vmem:[%s6430_s2 + $0x58] sm:$0xff] %v4334_v46 }
 0x1ce   :  { %v2690_v57 = vpop.f32.mrf.mxu1  ;;  %v2705_v63 = vpop.f32.mrf.mxu2 }
 0x1d4   :  { %v2679_v59 = vpop.f32.mrf.mxu0 }
 0x1d6   :  { %v2692_v47 = vpop.f32.mrf.mxu1 }
 0x1d7   :  { %v2664_v61 = vpop.f32.mrf.mxu3 }
 0x1d8   :  { %v2678_v62 = vadd.f32 %v2677_v54, %v2664_v61 }
 0x1da   :  { %v2691_v0 = vadd.f32 %v2690_v57, %v2678_v62 }
 0x1dc   :  { %v2704_v1 = vadd.f32 %v2703_v58, %v2691_v0 }
 0x1de   :  { %4335 = vtanh.f32 %v2704_v1 }
 0x1df   :  { %v2666_v55 = vpop.f32.mrf.mxu3 }
 0x1e4   :  { %v4336_v60 = vpop.eup %4335 }
 0x1e5   :  { %2733 = vst.msk [vmem:[%s6430_s2 + $0x60] sm:$0xff] %vm2732_vm2, %v4336_v60 }

</bundles_post_ra>
